<compile_context>
chip_gen: v7x
topology: tpu7x:2x2x1
jax: 0.10.0
libtpu: 0.0.40
codegen_flags: <defaults>
</compile_context>

<pallas_src>
import jax
import jax.numpy as jnp
from jax.experimental import pallas as pl
from jax.experimental.pallas import tpu as pltpu

BN_EPS = 1e-5
MXU_DTYPE = jnp.bfloat16        # MXU operand dtype; accumulation is always f32.

H0 = W0 = 16                    # input spatial size implied by the module head


# -----------------------------------------------------------------------------
# In-kernel helpers (traced inside the fused kernel).
# -----------------------------------------------------------------------------
def _relu_bn(acc, pack):
    """acc: (M, C) f32 conv output.  pack: (3, C) = [conv bias; bn scale; bn shift]."""
    b, scale, shift = pack[0:1], pack[1:2], pack[2:3]
    return jnp.maximum(acc + b, 0.0) * scale + shift


def _maxpool2x2(a, h, w, c):
    """2x2 / stride-2 max pool, fully in registers.  a: (h*w, c) row-major."""
    a = a.reshape(h * w // 2, 2, c)
    a = jnp.maximum(a[:, 0, :], a[:, 1, :])     # pool adjacent W positions
    a = a.reshape(h // 2, 2, w // 2, c)
    return jnp.maximum(a[:, 0], a[:, 1])        # pool adjacent H rows -> (h/2, w/2, c)


def _im2col(pad_ref, h, w, cin):
    """Gather the 9 shifted (h*w, cin) patches and concatenate along lanes."""
    cols = []
    for dy in range(3):
        for dx in range(3):
            cols.append(pad_ref[pl.ds(dy, h), pl.ds(dx, w), :].reshape(h * w, cin))
    return jnp.concatenate(cols, axis=1)        # (h*w, 9*cin)


# -----------------------------------------------------------------------------
# Fused kernel: one image per grid step, everything resident in VMEM.
# -----------------------------------------------------------------------------
def cnn_fused_kernel(x_ref, w1_ref, p1_ref, w2_ref, p2_ref, w3_ref, p3_ref,
                     w4_ref, p4_ref, fw1_ref, fb1_ref, fw2_ref, fb2_ref,
                     fw3_ref, fb3_ref, o_ref, pad1, pad2, pad3, pad4):
    f32 = jnp.float32

    # ---- Block 1: conv 1->32 on the VPU (Cin == 1), ReLU, BN, maxpool. ------
    pad1[...] = jnp.zeros_like(pad1)
    pad1[pl.ds(1, H0), pl.ds(1, W0), :] = x_ref[0]          # in-kernel halo pad
    w1 = w1_ref[...]                                        # (9, 32) f32
    acc = jnp.zeros((H0 * W0, 32), f32)
    for dy in range(3):
        for dx in range(3):
            col = pad1[pl.ds(dy, H0), pl.ds(dx, W0), :].reshape(H0 * W0, 1)
            t = dy * 3 + dx
            acc = acc + col * w1[t:t + 1, :]                # broadcast MAC on VPU
    a = _maxpool2x2(_relu_bn(acc, p1_ref[...]), H0, W0, 32)         # (8, 8, 32)

    # ---- Block 2: conv 32->64 as one im2col matmul, ReLU, BN, maxpool. ------
    pad2[...] = jnp.zeros_like(pad2)
    pad2[pl.ds(1, 8), pl.ds(1, 8), :] = a
    patches = _im2col(pad2, 8, 8, 32)                               # (64, 288)
    acc = jnp.dot(patches.astype(MXU_DTYPE), w2_ref[...],
                  preferred_element_type=f32)
    a = _maxpool2x2(_relu_bn(acc, p2_ref[...]), 8, 8, 64)           # (4, 4, 64)

    # ---- Block 3: conv 64->128, ReLU, BN, maxpool. --------------------------
    pad3[...] = jnp.zeros_like(pad3)
    pad3[pl.ds(1, 4), pl.ds(1, 4), :] = a
    patches = _im2col(pad3, 4, 4, 64)                               # (16, 576)
    acc = jnp.dot(patches.astype(MXU_DTYPE), w3_ref[...],
                  preferred_element_type=f32)
    a = _maxpool2x2(_relu_bn(acc, p3_ref[...]), 4, 4, 128)          # (2, 2, 128)

    # ---- Block 4: conv 128->256, ReLU, BN, global average pool. -------------
    pad4[...] = jnp.zeros_like(pad4)
    pad4[pl.ds(1, 2), pl.ds(1, 2), :] = a
    patches = _im2col(pad4, 2, 2, 128)                              # (4, 1152)
    acc = jnp.dot(patches.astype(MXU_DTYPE), w4_ref[...],
                  preferred_element_type=f32)
    feat = jnp.mean(_relu_bn(acc, p4_ref[...]), axis=0, keepdims=True)  # (1, 256)

    # ---- FC head: 256 -> 128 -> 64 -> 2 (Dropout is identity in eval). ------
    h = jnp.dot(feat.astype(MXU_DTYPE), fw1_ref[...],
                preferred_element_type=f32) + fb1_ref[...]
    h = jnp.maximum(h, 0.0)
    h = jnp.dot(h.astype(MXU_DTYPE), fw2_ref[...],
                preferred_element_type=f32) + fb2_ref[...]
    h = jnp.maximum(h, 0.0)
    z = jnp.dot(h.astype(MXU_DTYPE), fw3_ref[...],
                preferred_element_type=f32) + fb3_ref[...]
    o_ref[0] = jax.nn.sigmoid(z)                                    # (1, 2)


# -----------------------------------------------------------------------------
# One-time parameter preparation (layout glue hoisted out of the call path).
# -----------------------------------------------------------------------------
def prepare_params(params):
    prep = {}
    conv_ws, packs = [], []
    for cp, bp in zip(params["conv"], params["bn"]):
        w = cp["w"]                                    # (Cout, Cin, 3, 3) torch layout
        cout, cin = w.shape[0], w.shape[1]
        # row index = (kh*3 + kw)*Cin + cin  -> matches in-kernel im2col order.
        w_flat = jnp.transpose(w, (2, 3, 1, 0)).reshape(9 * cin, cout)
        scale = bp["gamma"] * jax.lax.rsqrt(bp["var"] + BN_EPS)
        shift = bp["beta"] - bp["mean"] * scale
        packs.append(jnp.stack([cp["b"], scale, shift], 0).astype(jnp.float32))
        conv_ws.append(w_flat)
    prep["w1"] = conv_ws[0].astype(jnp.float32)        # (9, 32)   VPU path stays f32
    prep["w2"] = conv_ws[1].astype(MXU_DTYPE)          # (288, 64)
    prep["w3"] = conv_ws[2].astype(MXU_DTYPE)          # (576, 128)
    prep["w4"] = conv_ws[3].astype(MXU_DTYPE)          # (1152, 256)
    prep["p1"], prep["p2"], prep["p3"], prep["p4"] = packs
    fws = [fp["w"].T.astype(MXU_DTYPE) for fp in params["fc"]]
    fbs = [fp["b"].reshape(1, -1).astype(jnp.float32) for fp in params["fc"]]
    prep["fw1"], prep["fw2"], prep["fw3"] = fws
    prep["fb1"], prep["fb2"], prep["fb3"] = fbs
    return prep


def cnn_forward(x_nchw, prep):
    n = x_nchw.shape[0]
    # layout: PyTorch NCHW -> NHWC (C == 1, so this is effectively a reshape).
    x = jnp.transpose(x_nchw, (0, 2, 3, 1)).astype(jnp.float32)     # (N, 16, 16, 1)

    def full_spec(shape):
        ndim = len(shape)
        return pl.BlockSpec(shape, lambda i, _n=ndim: (0,) * _n)

    out = pl.pallas_call(
        cnn_fused_kernel,
        out_shape=jax.ShapeDtypeStruct((n, 1, 2), jnp.float32),
        grid=(n,),
        in_specs=[
            pl.BlockSpec((1, H0, W0, 1), lambda i: (i, 0, 0, 0)),
            full_spec(prep["w1"].shape), full_spec(prep["p1"].shape),
            full_spec(prep["w2"].shape), full_spec(prep["p2"].shape),
            full_spec(prep["w3"].shape), full_spec(prep["p3"].shape),
            full_spec(prep["w4"].shape), full_spec(prep["p4"].shape),
            full_spec(prep["fw1"].shape), full_spec(prep["fb1"].shape),
            full_spec(prep["fw2"].shape), full_spec(prep["fb2"].shape),
            full_spec(prep["fw3"].shape), full_spec(prep["fb3"].shape),
        ],
        out_specs=pl.BlockSpec((1, 1, 2), lambda i: (i, 0, 0)),
        scratch_shapes=[
            pltpu.VMEM((H0 + 2, W0 + 2, 1), jnp.float32),   # padded input
            pltpu.VMEM((10, 10, 32), jnp.float32),          # padded act1
            pltpu.VMEM((6, 6, 64), jnp.float32),            # padded act2
            pltpu.VMEM((4, 4, 128), jnp.float32),           # padded act3
        ],
        compiler_params=pltpu.CompilerParams(
            dimension_semantics=("parallel",)),
    )(x, prep["w1"], prep["p1"], prep["w2"], prep["p2"], prep["w3"], prep["p3"],
      prep["w4"], prep["p4"], prep["fw1"], prep["fb1"], prep["fw2"], prep["fb2"],
      prep["fw3"], prep["fb3"])
    return out.reshape(n, 2)


# -----------------------------------------------------------------------------
# Deterministic PyTorch-shaped parameter init.
# -----------------------------------------------------------------------------
def init_params(key):
    ks = jax.random.split(key, 14)

    def conv_w(k, cout, cin):
        return jax.random.normal(k, (cout, cin, 3, 3), jnp.float32) / jnp.sqrt(
            cin * 9.0)

    def lin_w(k, cout, cin):
        return jax.random.normal(k, (cout, cin), jnp.float32) / jnp.sqrt(float(cin))

    def bn(c):
        return dict(gamma=jnp.ones((c,), jnp.float32),
                    beta=jnp.zeros((c,), jnp.float32),
                    mean=jnp.zeros((c,), jnp.float32),
                    var=jnp.ones((c,), jnp.float32))

    chans = [(1, 32), (32, 64), (64, 128), (128, 256)]
    params = {"conv": [], "bn": []}
    for i, (cin, cout) in enumerate(chans):
        params["conv"].append(
            dict(w=conv_w(ks[2 * i], cout, cin),
                 b=0.01 * jax.random.normal(ks[2 * i + 1], (cout,), jnp.float32)))
        params["bn"].append(bn(cout))
    params["fc"] = [
        dict(w=lin_w(ks[8], 128, 256),
             b=0.01 * jax.random.normal(ks[9], (128,), jnp.float32)),
        dict(w=lin_w(ks[10], 64, 128),
             b=0.01 * jax.random.normal(ks[11], (64,), jnp.float32)),
        dict(w=lin_w(ks[12], 2, 64),
             b=0.01 * jax.random.normal(ks[13], (2,), jnp.float32)),
    ]
    return params


if __name__ == "__main__":
    key = jax.random.PRNGKey(0)
    k_params, k_x = jax.random.split(key)
    params = init_params(k_params)
    prep = prepare_params(params)                 # one-time weight layout prep
    # Input consistent with the module: NCHW (2, 1, 16, 16).
    x = jax.random.normal(k_x, (2, 1, 16, 16), jnp.float32)
    fwd = jax.jit(cnn_forward)
    out = fwd(x, prep)
    jax.block_until_ready(out)
    assert out.shape == (2, 2) and out.dtype == jnp.float32
    print("KERNEL_OK")
</pallas_src>

<mosaic_0001>
module attributes {stable_mosaic.version = 11 : i64} {
  func.func @cnn_fused_kernel(%arg0: i32, %arg1: memref<1x16x16x1xf32, #tpu.memory_space<vmem>>, %arg2: memref<9x32xf32, #tpu.memory_space<vmem>>, %arg3: memref<3x32xf32, #tpu.memory_space<vmem>>, %arg4: memref<288x64xbf16, #tpu.memory_space<vmem>>, %arg5: memref<3x64xf32, #tpu.memory_space<vmem>>, %arg6: memref<576x128xbf16, #tpu.memory_space<vmem>>, %arg7: memref<3x128xf32, #tpu.memory_space<vmem>>, %arg8: memref<1152x256xbf16, #tpu.memory_space<vmem>>, %arg9: memref<3x256xf32, #tpu.memory_space<vmem>>, %arg10: memref<256x128xbf16, #tpu.memory_space<vmem>>, %arg11: memref<1x128xf32, #tpu.memory_space<vmem>>, %arg12: memref<128x64xbf16, #tpu.memory_space<vmem>>, %arg13: memref<1x64xf32, #tpu.memory_space<vmem>>, %arg14: memref<64x2xbf16, #tpu.memory_space<vmem>>, %arg15: memref<1x2xf32, #tpu.memory_space<vmem>>, %arg16: memref<1x1x2xf32, #tpu.memory_space<vmem>>, %arg17: memref<18x18x1xf32, #tpu.memory_space<vmem>>, %arg18: memref<10x10x32xf32, #tpu.memory_space<vmem>>, %arg19: memref<6x6x64xf32, #tpu.memory_space<vmem>>, %arg20: memref<4x4x128xf32, #tpu.memory_space<vmem>>) attributes {dimension_semantics = [#tpu.dimension_semantics<parallel>], iteration_bounds = array<i64: 2>, scalar_prefetch = 0 : i64, scratch_operands = 4 : i64, tpu.core_type = #tpu.core_type<tc>, window_params = [{transform_indices = @transform_0, window_bounds = array<i64: 1, 16, 16, 1>}, {pipeline_mode = #tpu.pipeline_mode<synchronous>, transform_indices = @transform_1, window_bounds = array<i64: 9, 32>}, {pipeline_mode = #tpu.pipeline_mode<synchronous>, transform_indices = @transform_2, window_bounds = array<i64: 3, 32>}, {pipeline_mode = #tpu.pipeline_mode<synchronous>, transform_indices = @transform_3, window_bounds = array<i64: 288, 64>}, {pipeline_mode = #tpu.pipeline_mode<synchronous>, transform_indices = @transform_4, window_bounds = array<i64: 3, 64>}, {pipeline_mode = #tpu.pipeline_mode<synchronous>, transform_indices = @transform_5, window_bounds = array<i64: 576, 128>}, {pipeline_mode = #tpu.pipeline_mode<synchronous>, transform_indices = @transform_6, window_bounds = array<i64: 3, 128>}, {pipeline_mode = #tpu.pipeline_mode<synchronous>, transform_indices = @transform_7, window_bounds = array<i64: 1152, 256>}, {pipeline_mode = #tpu.pipeline_mode<synchronous>, transform_indices = @transform_8, window_bounds = array<i64: 3, 256>}, {pipeline_mode = #tpu.pipeline_mode<synchronous>, transform_indices = @transform_9, window_bounds = array<i64: 256, 128>}, {pipeline_mode = #tpu.pipeline_mode<synchronous>, transform_indices = @transform_10, window_bounds = array<i64: 1, 128>}, {pipeline_mode = #tpu.pipeline_mode<synchronous>, transform_indices = @transform_11, window_bounds = array<i64: 128, 64>}, {pipeline_mode = #tpu.pipeline_mode<synchronous>, transform_indices = @transform_12, window_bounds = array<i64: 1, 64>}, {pipeline_mode = #tpu.pipeline_mode<synchronous>, transform_indices = @transform_13, window_bounds = array<i64: 64, 2>}, {pipeline_mode = #tpu.pipeline_mode<synchronous>, transform_indices = @transform_14, window_bounds = array<i64: 1, 2>}, {transform_indices = @transform_15, window_bounds = array<i64: 1, 1, 2>}]} {
    %cst = arith.constant 0.000000e+00 : f32
    %0 = vector.broadcast %cst : f32 to vector<18x18x1xf32>
    %c0 = arith.constant 0 : index
    %c0_0 = arith.constant 0 : index
    %c0_1 = arith.constant 0 : index
    %1 = vector.load %arg17[%c0, %c0_0, %c0_1] : memref<18x18x1xf32, #tpu.memory_space<vmem>>, vector<18x18x1xf32>
    tpu.vector_store %arg17[%c0, %c0_0, %c0_1], %0 {strides = array<i32>} : memref<18x18x1xf32, #tpu.memory_space<vmem>>, vector<18x18x1xf32>,
    %c0_2 = arith.constant 0 : index
    %c0_3 = arith.constant 0 : index
    %c0_4 = arith.constant 0 : index
    %c0_5 = arith.constant 0 : index
    %2 = vector.load %arg1[%c0_2, %c0_3, %c0_4, %c0_5] : memref<1x16x16x1xf32, #tpu.memory_space<vmem>>, vector<1x16x16x1xf32>
    %3 = vector.shape_cast %2 : vector<1x16x16x1xf32> to vector<16x16x1xf32>
    %c1 = arith.constant 1 : index
    %c1_6 = arith.constant 1 : index
    %c0_7 = arith.constant 0 : index
    %4 = vector.load %arg17[%c1, %c1_6, %c0_7] : memref<18x18x1xf32, #tpu.memory_space<vmem>>, vector<16x16x1xf32>
    tpu.vector_store %arg17[%c1, %c1_6, %c0_7], %3 {strides = array<i32>} : memref<18x18x1xf32, #tpu.memory_space<vmem>>, vector<16x16x1xf32>,
    %c0_8 = arith.constant 0 : index
    %c0_9 = arith.constant 0 : index
    %5 = vector.load %arg2[%c0_8, %c0_9] : memref<9x32xf32, #tpu.memory_space<vmem>>, vector<9x32xf32>
    %cst_10 = arith.constant 0.000000e+00 : f32
    %6 = vector.broadcast %cst_10 : f32 to vector<256x32xf32>
    %c0_11 = arith.constant 0 : index
    %c0_12 = arith.constant 0 : index
    %c0_13 = arith.constant 0 : index
    %7 = vector.load %arg17[%c0_11, %c0_12, %c0_13] : memref<18x18x1xf32, #tpu.memory_space<vmem>>, vector<16x16x1xf32>
    %8 = vector.shape_cast %7 : vector<16x16x1xf32> to vector<256x1xf32>
    %9 = vector.extract_strided_slice %5 {offsets = [0, 0], sizes = [1, 32], strides = [1, 1]} : vector<9x32xf32> to vector<1x32xf32>
    %10 = vector.broadcast %8 : vector<256x1xf32> to vector<256x32xf32>
    %11 = vector.broadcast %9 : vector<1x32xf32> to vector<256x32xf32>
    %12 = arith.mulf %10, %11 : vector<256x32xf32>
    %13 = arith.addf %6, %12 : vector<256x32xf32>
    %c0_14 = arith.constant 0 : index
    %c1_15 = arith.constant 1 : index
    %c0_16 = arith.constant 0 : index
    %14 = vector.load %arg17[%c0_14, %c1_15, %c0_16] : memref<18x18x1xf32, #tpu.memory_space<vmem>>, vector<16x16x1xf32>
    %15 = vector.shape_cast %14 : vector<16x16x1xf32> to vector<256x1xf32>
    %16 = vector.extract_strided_slice %5 {offsets = [1, 0], sizes = [1, 32], strides = [1, 1]} : vector<9x32xf32> to vector<1x32xf32>
    %17 = vector.broadcast %15 : vector<256x1xf32> to vector<256x32xf32>
    %18 = vector.broadcast %16 : vector<1x32xf32> to vector<256x32xf32>
    %19 = arith.mulf %17, %18 : vector<256x32xf32>
    %20 = arith.addf %13, %19 : vector<256x32xf32>
    %c0_17 = arith.constant 0 : index
    %c2 = arith.constant 2 : index
    %c0_18 = arith.constant 0 : index
    %21 = vector.load %arg17[%c0_17, %c2, %c0_18] : memref<18x18x1xf32, #tpu.memory_space<vmem>>, vector<16x16x1xf32>
    %22 = vector.shape_cast %21 : vector<16x16x1xf32> to vector<256x1xf32>
    %23 = vector.extract_strided_slice %5 {offsets = [2, 0], sizes = [1, 32], strides = [1, 1]} : vector<9x32xf32> to vector<1x32xf32>
    %24 = vector.broadcast %22 : vector<256x1xf32> to vector<256x32xf32>
    %25 = vector.broadcast %23 : vector<1x32xf32> to vector<256x32xf32>
    %26 = arith.mulf %24, %25 : vector<256x32xf32>
    %27 = arith.addf %20, %26 : vector<256x32xf32>
    %c1_19 = arith.constant 1 : index
    %c0_20 = arith.constant 0 : index
    %c0_21 = arith.constant 0 : index
    %28 = vector.load %arg17[%c1_19, %c0_20, %c0_21] : memref<18x18x1xf32, #tpu.memory_space<vmem>>, vector<16x16x1xf32>
    %29 = vector.shape_cast %28 : vector<16x16x1xf32> to vector<256x1xf32>
    %30 = vector.extract_strided_slice %5 {offsets = [3, 0], sizes = [1, 32], strides = [1, 1]} : vector<9x32xf32> to vector<1x32xf32>
    %31 = vector.broadcast %29 : vector<256x1xf32> to vector<256x32xf32>
    %32 = vector.broadcast %30 : vector<1x32xf32> to vector<256x32xf32>
    %33 = arith.mulf %31, %32 : vector<256x32xf32>
    %34 = arith.addf %27, %33 : vector<256x32xf32>
    %c1_22 = arith.constant 1 : index
    %c1_23 = arith.constant 1 : index
    %c0_24 = arith.constant 0 : index
    %35 = vector.load %arg17[%c1_22, %c1_23, %c0_24] : memref<18x18x1xf32, #tpu.memory_space<vmem>>, vector<16x16x1xf32>
    %36 = vector.shape_cast %35 : vector<16x16x1xf32> to vector<256x1xf32>
    %37 = vector.extract_strided_slice %5 {offsets = [4, 0], sizes = [1, 32], strides = [1, 1]} : vector<9x32xf32> to vector<1x32xf32>
    %38 = vector.broadcast %36 : vector<256x1xf32> to vector<256x32xf32>
    %39 = vector.broadcast %37 : vector<1x32xf32> to vector<256x32xf32>
    %40 = arith.mulf %38, %39 : vector<256x32xf32>
    %41 = arith.addf %34, %40 : vector<256x32xf32>
    %c1_25 = arith.constant 1 : index
    %c2_26 = arith.constant 2 : index
    %c0_27 = arith.constant 0 : index
    %42 = vector.load %arg17[%c1_25, %c2_26, %c0_27] : memref<18x18x1xf32, #tpu.memory_space<vmem>>, vector<16x16x1xf32>
    %43 = vector.shape_cast %42 : vector<16x16x1xf32> to vector<256x1xf32>
    %44 = vector.extract_strided_slice %5 {offsets = [5, 0], sizes = [1, 32], strides = [1, 1]} : vector<9x32xf32> to vector<1x32xf32>
    %45 = vector.broadcast %43 : vector<256x1xf32> to vector<256x32xf32>
    %46 = vector.broadcast %44 : vector<1x32xf32> to vector<256x32xf32>
    %47 = arith.mulf %45, %46 : vector<256x32xf32>
    %48 = arith.addf %41, %47 : vector<256x32xf32>
    %c2_28 = arith.constant 2 : index
    %c0_29 = arith.constant 0 : index
    %c0_30 = arith.constant 0 : index
    %49 = vector.load %arg17[%c2_28, %c0_29, %c0_30] : memref<18x18x1xf32, #tpu.memory_space<vmem>>, vector<16x16x1xf32>
    %50 = vector.shape_cast %49 : vector<16x16x1xf32> to vector<256x1xf32>
    %51 = vector.extract_strided_slice %5 {offsets = [6, 0], sizes = [1, 32], strides = [1, 1]} : vector<9x32xf32> to vector<1x32xf32>
    %52 = vector.broadcast %50 : vector<256x1xf32> to vector<256x32xf32>
    %53 = vector.broadcast %51 : vector<1x32xf32> to vector<256x32xf32>
    %54 = arith.mulf %52, %53 : vector<256x32xf32>
    %55 = arith.addf %48, %54 : vector<256x32xf32>
    %c2_31 = arith.constant 2 : index
    %c1_32 = arith.constant 1 : index
    %c0_33 = arith.constant 0 : index
    %56 = vector.load %arg17[%c2_31, %c1_32, %c0_33] : memref<18x18x1xf32, #tpu.memory_space<vmem>>, vector<16x16x1xf32>
    %57 = vector.shape_cast %56 : vector<16x16x1xf32> to vector<256x1xf32>
    %58 = vector.extract_strided_slice %5 {offsets = [7, 0], sizes = [1, 32], strides = [1, 1]} : vector<9x32xf32> to vector<1x32xf32>
    %59 = vector.broadcast %57 : vector<256x1xf32> to vector<256x32xf32>
    %60 = vector.broadcast %58 : vector<1x32xf32> to vector<256x32xf32>
    %61 = arith.mulf %59, %60 : vector<256x32xf32>
    %62 = arith.addf %55, %61 : vector<256x32xf32>
    %c2_34 = arith.constant 2 : index
    %c2_35 = arith.constant 2 : index
    %c0_36 = arith.constant 0 : index
    %63 = vector.load %arg17[%c2_34, %c2_35, %c0_36] : memref<18x18x1xf32, #tpu.memory_space<vmem>>, vector<16x16x1xf32>
    %64 = vector.shape_cast %63 : vector<16x16x1xf32> to vector<256x1xf32>
    %65 = vector.extract_strided_slice %5 {offsets = [8, 0], sizes = [1, 32], strides = [1, 1]} : vector<9x32xf32> to vector<1x32xf32>
    %66 = vector.broadcast %64 : vector<256x1xf32> to vector<256x32xf32>
    %67 = vector.broadcast %65 : vector<1x32xf32> to vector<256x32xf32>
    %68 = arith.mulf %66, %67 : vector<256x32xf32>
    %69 = arith.addf %62, %68 : vector<256x32xf32>
    %c0_37 = arith.constant 0 : index
    %c0_38 = arith.constant 0 : index
    %70 = vector.load %arg3[%c0_37, %c0_38] : memref<3x32xf32, #tpu.memory_space<vmem>>, vector<3x32xf32>
    %71 = vector.extract_strided_slice %70 {offsets = [0, 0], sizes = [1, 32], strides = [1, 1]} : vector<3x32xf32> to vector<1x32xf32>
    %72 = vector.extract_strided_slice %70 {offsets = [1, 0], sizes = [1, 32], strides = [1, 1]} : vector<3x32xf32> to vector<1x32xf32>
    %73 = vector.extract_strided_slice %70 {offsets = [2, 0], sizes = [1, 32], strides = [1, 1]} : vector<3x32xf32> to vector<1x32xf32>
    %74 = vector.broadcast %71 : vector<1x32xf32> to vector<256x32xf32>
    %75 = arith.addf %69, %74 : vector<256x32xf32>
    %cst_39 = arith.constant 0.000000e+00 : f32
    %76 = vector.broadcast %cst_39 : f32 to vector<256x32xf32>
    %77 = arith.maximumf %75, %76 : vector<256x32xf32>
    %78 = vector.broadcast %72 : vector<1x32xf32> to vector<256x32xf32>
    %79 = arith.mulf %77, %78 : vector<256x32xf32>
    %80 = vector.broadcast %73 : vector<1x32xf32> to vector<256x32xf32>
    %81 = arith.addf %79, %80 : vector<256x32xf32>
    %82 = vector.shape_cast %81 : vector<256x32xf32> to vector<128x2x32xf32>
    %83 = vector.extract_strided_slice %82 {offsets = [0, 0, 0], sizes = [128, 1, 32], strides = [1, 1, 1]} : vector<128x2x32xf32> to vector<128x1x32xf32>
    %84 = vector.shape_cast %83 : vector<128x1x32xf32> to vector<128x32xf32>
    %85 = vector.extract_strided_slice %82 {offsets = [0, 1, 0], sizes = [128, 1, 32], strides = [1, 1, 1]} : vector<128x2x32xf32> to vector<128x1x32xf32>
    %86 = vector.shape_cast %85 : vector<128x1x32xf32> to vector<128x32xf32>
    %87 = arith.maximumf %84, %86 : vector<128x32xf32>
    %88 = vector.shape_cast %87 : vector<128x32xf32> to vector<8x2x8x32xf32>
    %89 = vector.extract_strided_slice %88 {offsets = [0, 0, 0, 0], sizes = [8, 1, 8, 32], strides = [1, 1, 1, 1]} : vector<8x2x8x32xf32> to vector<8x1x8x32xf32>
    %90 = vector.shape_cast %89 : vector<8x1x8x32xf32> to vector<8x8x32xf32>
    %91 = vector.extract_strided_slice %88 {offsets = [0, 1, 0, 0], sizes = [8, 1, 8, 32], strides = [1, 1, 1, 1]} : vector<8x2x8x32xf32> to vector<8x1x8x32xf32>
    %92 = vector.shape_cast %91 : vector<8x1x8x32xf32> to vector<8x8x32xf32>
    %93 = arith.maximumf %90, %92 : vector<8x8x32xf32>
    %cst_40 = arith.constant 0.000000e+00 : f32
    %94 = vector.broadcast %cst_40 : f32 to vector<10x10x32xf32>
    %c0_41 = arith.constant 0 : index
    %c0_42 = arith.constant 0 : index
    %c0_43 = arith.constant 0 : index
    %95 = vector.load %arg18[%c0_41, %c0_42, %c0_43] : memref<10x10x32xf32, #tpu.memory_space<vmem>>, vector<10x10x32xf32>
    tpu.vector_store %arg18[%c0_41, %c0_42, %c0_43], %94 {strides = array<i32>} : memref<10x10x32xf32, #tpu.memory_space<vmem>>, vector<10x10x32xf32>,
    %c1_44 = arith.constant 1 : index
    %c1_45 = arith.constant 1 : index
    %c0_46 = arith.constant 0 : index
    %96 = vector.load %arg18[%c1_44, %c1_45, %c0_46] : memref<10x10x32xf32, #tpu.memory_space<vmem>>, vector<8x8x32xf32>
    tpu.vector_store %arg18[%c1_44, %c1_45, %c0_46], %93 {strides = array<i32>} : memref<10x10x32xf32, #tpu.memory_space<vmem>>, vector<8x8x32xf32>,
    %c0_47 = arith.constant 0 : index
    %c0_48 = arith.constant 0 : index
    %c0_49 = arith.constant 0 : index
    %97 = vector.load %arg18[%c0_47, %c0_48, %c0_49] : memref<10x10x32xf32, #tpu.memory_space<vmem>>, vector<8x8x32xf32>
    %98 = vector.shape_cast %97 : vector<8x8x32xf32> to vector<64x32xf32>
    %c0_50 = arith.constant 0 : index
    %c1_51 = arith.constant 1 : index
    %c0_52 = arith.constant 0 : index
    %99 = vector.load %arg18[%c0_50, %c1_51, %c0_52] : memref<10x10x32xf32, #tpu.memory_space<vmem>>, vector<8x8x32xf32>
    %100 = vector.shape_cast %99 : vector<8x8x32xf32> to vector<64x32xf32>
    %c0_53 = arith.constant 0 : index
    %c2_54 = arith.constant 2 : index
    %c0_55 = arith.constant 0 : index
    %101 = vector.load %arg18[%c0_53, %c2_54, %c0_55] : memref<10x10x32xf32, #tpu.memory_space<vmem>>, vector<8x8x32xf32>
    %102 = vector.shape_cast %101 : vector<8x8x32xf32> to vector<64x32xf32>
    %c1_56 = arith.constant 1 : index
    %c0_57 = arith.constant 0 : index
    %c0_58 = arith.constant 0 : index
    %103 = vector.load %arg18[%c1_56, %c0_57, %c0_58] : memref<10x10x32xf32, #tpu.memory_space<vmem>>, vector<8x8x32xf32>
    %104 = vector.shape_cast %103 : vector<8x8x32xf32> to vector<64x32xf32>
    %c1_59 = arith.constant 1 : index
    %c1_60 = arith.constant 1 : index
    %c0_61 = arith.constant 0 : index
    %105 = vector.load %arg18[%c1_59, %c1_60, %c0_61] : memref<10x10x32xf32, #tpu.memory_space<vmem>>, vector<8x8x32xf32>
    %106 = vector.shape_cast %105 : vector<8x8x32xf32> to vector<64x32xf32>
    %c1_62 = arith.constant 1 : index
    %c2_63 = arith.constant 2 : index
    %c0_64 = arith.constant 0 : index
    %107 = vector.load %arg18[%c1_62, %c2_63, %c0_64] : memref<10x10x32xf32, #tpu.memory_space<vmem>>, vector<8x8x32xf32>
    %108 = vector.shape_cast %107 : vector<8x8x32xf32> to vector<64x32xf32>
    %c2_65 = arith.constant 2 : index
    %c0_66 = arith.constant 0 : index
    %c0_67 = arith.constant 0 : index
    %109 = vector.load %arg18[%c2_65, %c0_66, %c0_67] : memref<10x10x32xf32, #tpu.memory_space<vmem>>, vector<8x8x32xf32>
    %110 = vector.shape_cast %109 : vector<8x8x32xf32> to vector<64x32xf32>
    %c2_68 = arith.constant 2 : index
    %c1_69 = arith.constant 1 : index
    %c0_70 = arith.constant 0 : index
    %111 = vector.load %arg18[%c2_68, %c1_69, %c0_70] : memref<10x10x32xf32, #tpu.memory_space<vmem>>, vector<8x8x32xf32>
    %112 = vector.shape_cast %111 : vector<8x8x32xf32> to vector<64x32xf32>
    %c2_71 = arith.constant 2 : index
    %c2_72 = arith.constant 2 : index
    %c0_73 = arith.constant 0 : index
    %113 = vector.load %arg18[%c2_71, %c2_72, %c0_73] : memref<10x10x32xf32, #tpu.memory_space<vmem>>, vector<8x8x32xf32>
    %114 = vector.shape_cast %113 : vector<8x8x32xf32> to vector<64x32xf32>
    %115 = tpu.concatenate %98, %100, %102, %104, %106, %108, %110, %112, %114 in 1 : vector<64x32xf32>, vector<64x32xf32>, vector<64x32xf32>, vector<64x32xf32>, vector<64x32xf32>, vector<64x32xf32>, vector<64x32xf32>, vector<64x32xf32>, vector<64x32xf32> -> vector<64x288xf32>
    %116 = arith.truncf %115 : vector<64x288xf32> to vector<64x288xbf16>
    %c0_74 = arith.constant 0 : index
    %c0_75 = arith.constant 0 : index
    %117 = vector.load %arg4[%c0_74, %c0_75] : memref<288x64xbf16, #tpu.memory_space<vmem>>, vector<288x64xbf16>
    %cst_76 = arith.constant dense<0.000000e+00> : vector<64x64xf32>
    %118 = tpu.matmul %116, %117, %cst_76 {dimension_numbers = #tpu.dot_dimension_numbers<[1], [0], [0], [1], [0, 0, 1, 1], [], []>} : vector<64x288xbf16>, vector<288x64xbf16>, vector<64x64xf32> -> vector<64x64xf32>
    %c0_77 = arith.constant 0 : index
    %c0_78 = arith.constant 0 : index
    %119 = vector.load %arg5[%c0_77, %c0_78] : memref<3x64xf32, #tpu.memory_space<vmem>>, vector<3x64xf32>
    %120 = vector.extract_strided_slice %119 {offsets = [0, 0], sizes = [1, 64], strides = [1, 1]} : vector<3x64xf32> to vector<1x64xf32>
    %121 = vector.extract_strided_slice %119 {offsets = [1, 0], sizes = [1, 64], strides = [1, 1]} : vector<3x64xf32> to vector<1x64xf32>
    %122 = vector.extract_strided_slice %119 {offsets = [2, 0], sizes = [1, 64], strides = [1, 1]} : vector<3x64xf32> to vector<1x64xf32>
    %123 = vector.broadcast %120 : vector<1x64xf32> to vector<64x64xf32>
    %124 = arith.addf %118, %123 : vector<64x64xf32>
    %cst_79 = arith.constant 0.000000e+00 : f32
    %125 = vector.broadcast %cst_79 : f32 to vector<64x64xf32>
    %126 = arith.maximumf %124, %125 : vector<64x64xf32>
    %127 = vector.broadcast %121 : vector<1x64xf32> to vector<64x64xf32>
    %128 = arith.mulf %126, %127 : vector<64x64xf32>
    %129 = vector.broadcast %122 : vector<1x64xf32> to vector<64x64xf32>
    %130 = arith.addf %128, %129 : vector<64x64xf32>
    %131 = vector.shape_cast %130 : vector<64x64xf32> to vector<32x2x64xf32>
    %132 = vector.extract_strided_slice %131 {offsets = [0, 0, 0], sizes = [32, 1, 64], strides = [1, 1, 1]} : vector<32x2x64xf32> to vector<32x1x64xf32>
    %133 = vector.shape_cast %132 : vector<32x1x64xf32> to vector<32x64xf32>
    %134 = vector.extract_strided_slice %131 {offsets = [0, 1, 0], sizes = [32, 1, 64], strides = [1, 1, 1]} : vector<32x2x64xf32> to vector<32x1x64xf32>
    %135 = vector.shape_cast %134 : vector<32x1x64xf32> to vector<32x64xf32>
    %136 = arith.maximumf %133, %135 : vector<32x64xf32>
    %137 = vector.shape_cast %136 : vector<32x64xf32> to vector<4x2x4x64xf32>
    %138 = vector.extract_strided_slice %137 {offsets = [0, 0, 0, 0], sizes = [4, 1, 4, 64], strides = [1, 1, 1, 1]} : vector<4x2x4x64xf32> to vector<4x1x4x64xf32>
    %139 = vector.shape_cast %138 : vector<4x1x4x64xf32> to vector<4x4x64xf32>
    %140 = vector.extract_strided_slice %137 {offsets = [0, 1, 0, 0], sizes = [4, 1, 4, 64], strides = [1, 1, 1, 1]} : vector<4x2x4x64xf32> to vector<4x1x4x64xf32>
    %141 = vector.shape_cast %140 : vector<4x1x4x64xf32> to vector<4x4x64xf32>
    %142 = arith.maximumf %139, %141 : vector<4x4x64xf32>
    %cst_80 = arith.constant 0.000000e+00 : f32
    %143 = vector.broadcast %cst_80 : f32 to vector<6x6x64xf32>
    %c0_81 = arith.constant 0 : index
    %c0_82 = arith.constant 0 : index
    %c0_83 = arith.constant 0 : index
    %144 = vector.load %arg19[%c0_81, %c0_82, %c0_83] : memref<6x6x64xf32, #tpu.memory_space<vmem>>, vector<6x6x64xf32>
    tpu.vector_store %arg19[%c0_81, %c0_82, %c0_83], %143 {strides = array<i32>} : memref<6x6x64xf32, #tpu.memory_space<vmem>>, vector<6x6x64xf32>,
    %c1_84 = arith.constant 1 : index
    %c1_85 = arith.constant 1 : index
    %c0_86 = arith.constant 0 : index
    %145 = vector.load %arg19[%c1_84, %c1_85, %c0_86] : memref<6x6x64xf32, #tpu.memory_space<vmem>>, vector<4x4x64xf32>
    tpu.vector_store %arg19[%c1_84, %c1_85, %c0_86], %142 {strides = array<i32>} : memref<6x6x64xf32, #tpu.memory_space<vmem>>, vector<4x4x64xf32>,
    %c0_87 = arith.constant 0 : index
    %c0_88 = arith.constant 0 : index
    %c0_89 = arith.constant 0 : index
    %146 = vector.load %arg19[%c0_87, %c0_88, %c0_89] : memref<6x6x64xf32, #tpu.memory_space<vmem>>, vector<4x4x64xf32>
    %147 = vector.shape_cast %146 : vector<4x4x64xf32> to vector<16x64xf32>
    %c0_90 = arith.constant 0 : index
    %c1_91 = arith.constant 1 : index
    %c0_92 = arith.constant 0 : index
    %148 = vector.load %arg19[%c0_90, %c1_91, %c0_92] : memref<6x6x64xf32, #tpu.memory_space<vmem>>, vector<4x4x64xf32>
    %149 = vector.shape_cast %148 : vector<4x4x64xf32> to vector<16x64xf32>
    %c0_93 = arith.constant 0 : index
    %c2_94 = arith.constant 2 : index
    %c0_95 = arith.constant 0 : index
    %150 = vector.load %arg19[%c0_93, %c2_94, %c0_95] : memref<6x6x64xf32, #tpu.memory_space<vmem>>, vector<4x4x64xf32>
    %151 = vector.shape_cast %150 : vector<4x4x64xf32> to vector<16x64xf32>
    %c1_96 = arith.constant 1 : index
    %c0_97 = arith.constant 0 : index
    %c0_98 = arith.constant 0 : index
    %152 = vector.load %arg19[%c1_96, %c0_97, %c0_98] : memref<6x6x64xf32, #tpu.memory_space<vmem>>, vector<4x4x64xf32>
    %153 = vector.shape_cast %152 : vector<4x4x64xf32> to vector<16x64xf32>
    %c1_99 = arith.constant 1 : index
    %c1_100 = arith.constant 1 : index
    %c0_101 = arith.constant 0 : index
    %154 = vector.load %arg19[%c1_99, %c1_100, %c0_101] : memref<6x6x64xf32, #tpu.memory_space<vmem>>, vector<4x4x64xf32>
    %155 = vector.shape_cast %154 : vector<4x4x64xf32> to vector<16x64xf32>
    %c1_102 = arith.constant 1 : index
    %c2_103 = arith.constant 2 : index
    %c0_104 = arith.constant 0 : index
    %156 = vector.load %arg19[%c1_102, %c2_103, %c0_104] : memref<6x6x64xf32, #tpu.memory_space<vmem>>, vector<4x4x64xf32>
    %157 = vector.shape_cast %156 : vector<4x4x64xf32> to vector<16x64xf32>
    %c2_105 = arith.constant 2 : index
    %c0_106 = arith.constant 0 : index
    %c0_107 = arith.constant 0 : index
    %158 = vector.load %arg19[%c2_105, %c0_106, %c0_107] : memref<6x6x64xf32, #tpu.memory_space<vmem>>, vector<4x4x64xf32>
    %159 = vector.shape_cast %158 : vector<4x4x64xf32> to vector<16x64xf32>
    %c2_108 = arith.constant 2 : index
    %c1_109 = arith.constant 1 : index
    %c0_110 = arith.constant 0 : index
    %160 = vector.load %arg19[%c2_108, %c1_109, %c0_110] : memref<6x6x64xf32, #tpu.memory_space<vmem>>, vector<4x4x64xf32>
    %161 = vector.shape_cast %160 : vector<4x4x64xf32> to vector<16x64xf32>
    %c2_111 = arith.constant 2 : index
    %c2_112 = arith.constant 2 : index
    %c0_113 = arith.constant 0 : index
    %162 = vector.load %arg19[%c2_111, %c2_112, %c0_113] : memref<6x6x64xf32, #tpu.memory_space<vmem>>, vector<4x4x64xf32>
    %163 = vector.shape_cast %162 : vector<4x4x64xf32> to vector<16x64xf32>
    %164 = tpu.concatenate %147, %149, %151, %153, %155, %157, %159, %161, %163 in 1 : vector<16x64xf32>, vector<16x64xf32>, vector<16x64xf32>, vector<16x64xf32>, vector<16x64xf32>, vector<16x64xf32>, vector<16x64xf32>, vector<16x64xf32>, vector<16x64xf32> -> vector<16x576xf32>
    %165 = arith.truncf %164 : vector<16x576xf32> to vector<16x576xbf16>
    %c0_114 = arith.constant 0 : index
    %c0_115 = arith.constant 0 : index
    %166 = vector.load %arg6[%c0_114, %c0_115] : memref<576x128xbf16, #tpu.memory_space<vmem>>, vector<576x128xbf16>
    %cst_116 = arith.constant dense<0.000000e+00> : vector<16x128xf32>
    %167 = tpu.matmul %165, %166, %cst_116 {dimension_numbers = #tpu.dot_dimension_numbers<[1], [0], [0], [1], [0, 0, 1, 1], [], []>} : vector<16x576xbf16>, vector<576x128xbf16>, vector<16x128xf32> -> vector<16x128xf32>
    %c0_117 = arith.constant 0 : index
    %c0_118 = arith.constant 0 : index
    %168 = vector.load %arg7[%c0_117, %c0_118] : memref<3x128xf32, #tpu.memory_space<vmem>>, vector<3x128xf32>
    %169 = vector.extract_strided_slice %168 {offsets = [0, 0], sizes = [1, 128], strides = [1, 1]} : vector<3x128xf32> to vector<1x128xf32>
    %170 = vector.extract_strided_slice %168 {offsets = [1, 0], sizes = [1, 128], strides = [1, 1]} : vector<3x128xf32> to vector<1x128xf32>
    %171 = vector.extract_strided_slice %168 {offsets = [2, 0], sizes = [1, 128], strides = [1, 1]} : vector<3x128xf32> to vector<1x128xf32>
    %172 = vector.broadcast %169 : vector<1x128xf32> to vector<16x128xf32>
    %173 = arith.addf %167, %172 : vector<16x128xf32>
    %cst_119 = arith.constant 0.000000e+00 : f32
    %174 = vector.broadcast %cst_119 : f32 to vector<16x128xf32>
    %175 = arith.maximumf %173, %174 : vector<16x128xf32>
    %176 = vector.broadcast %170 : vector<1x128xf32> to vector<16x128xf32>
    %177 = arith.mulf %175, %176 : vector<16x128xf32>
    %178 = vector.broadcast %171 : vector<1x128xf32> to vector<16x128xf32>
    %179 = arith.addf %177, %178 : vector<16x128xf32>
    %180 = vector.shape_cast %179 : vector<16x128xf32> to vector<8x2x128xf32>
    %181 = vector.extract_strided_slice %180 {offsets = [0, 0, 0], sizes = [8, 1, 128], strides = [1, 1, 1]} : vector<8x2x128xf32> to vector<8x1x128xf32>
    %182 = vector.shape_cast %181 : vector<8x1x128xf32> to vector<8x128xf32>
    %183 = vector.extract_strided_slice %180 {offsets = [0, 1, 0], sizes = [8, 1, 128], strides = [1, 1, 1]} : vector<8x2x128xf32> to vector<8x1x128xf32>
    %184 = vector.shape_cast %183 : vector<8x1x128xf32> to vector<8x128xf32>
    %185 = arith.maximumf %182, %184 : vector<8x128xf32>
    %186 = vector.shape_cast %185 : vector<8x128xf32> to vector<2x2x2x128xf32>
    %187 = vector.extract_strided_slice %186 {offsets = [0, 0, 0, 0], sizes = [2, 1, 2, 128], strides = [1, 1, 1, 1]} : vector<2x2x2x128xf32> to vector<2x1x2x128xf32>
    %188 = vector.shape_cast %187 : vector<2x1x2x128xf32> to vector<2x2x128xf32>
    %189 = vector.extract_strided_slice %186 {offsets = [0, 1, 0, 0], sizes = [2, 1, 2, 128], strides = [1, 1, 1, 1]} : vector<2x2x2x128xf32> to vector<2x1x2x128xf32>
    %190 = vector.shape_cast %189 : vector<2x1x2x128xf32> to vector<2x2x128xf32>
    %191 = arith.maximumf %188, %190 : vector<2x2x128xf32>
    %cst_120 = arith.constant 0.000000e+00 : f32
    %192 = vector.broadcast %cst_120 : f32 to vector<4x4x128xf32>
    %c0_121 = arith.constant 0 : index
    %c0_122 = arith.constant 0 : index
    %c0_123 = arith.constant 0 : index
    %193 = vector.load %arg20[%c0_121, %c0_122, %c0_123] : memref<4x4x128xf32, #tpu.memory_space<vmem>>, vector<4x4x128xf32>
    tpu.vector_store %arg20[%c0_121, %c0_122, %c0_123], %192 {strides = array<i32>} : memref<4x4x128xf32, #tpu.memory_space<vmem>>, vector<4x4x128xf32>,
    %c1_124 = arith.constant 1 : index
    %c1_125 = arith.constant 1 : index
    %c0_126 = arith.constant 0 : index
    %194 = vector.load %arg20[%c1_124, %c1_125, %c0_126] : memref<4x4x128xf32, #tpu.memory_space<vmem>>, vector<2x2x128xf32>
    tpu.vector_store %arg20[%c1_124, %c1_125, %c0_126], %191 {strides = array<i32>} : memref<4x4x128xf32, #tpu.memory_space<vmem>>, vector<2x2x128xf32>,
    %c0_127 = arith.constant 0 : index
    %c0_128 = arith.constant 0 : index
    %c0_129 = arith.constant 0 : index
    %195 = vector.load %arg20[%c0_127, %c0_128, %c0_129] : memref<4x4x128xf32, #tpu.memory_space<vmem>>, vector<2x2x128xf32>
    %196 = vector.shape_cast %195 : vector<2x2x128xf32> to vector<4x128xf32>
    %c0_130 = arith.constant 0 : index
    %c1_131 = arith.constant 1 : index
    %c0_132 = arith.constant 0 : index
    %197 = vector.load %arg20[%c0_130, %c1_131, %c0_132] : memref<4x4x128xf32, #tpu.memory_space<vmem>>, vector<2x2x128xf32>
    %198 = vector.shape_cast %197 : vector<2x2x128xf32> to vector<4x128xf32>
    %c0_133 = arith.constant 0 : index
    %c2_134 = arith.constant 2 : index
    %c0_135 = arith.constant 0 : index
    %199 = vector.load %arg20[%c0_133, %c2_134, %c0_135] : memref<4x4x128xf32, #tpu.memory_space<vmem>>, vector<2x2x128xf32>
    %200 = vector.shape_cast %199 : vector<2x2x128xf32> to vector<4x128xf32>
    %c1_136 = arith.constant 1 : index
    %c0_137 = arith.constant 0 : index
    %c0_138 = arith.constant 0 : index
    %201 = vector.load %arg20[%c1_136, %c0_137, %c0_138] : memref<4x4x128xf32, #tpu.memory_space<vmem>>, vector<2x2x128xf32>
    %202 = vector.shape_cast %201 : vector<2x2x128xf32> to vector<4x128xf32>
    %c1_139 = arith.constant 1 : index
    %c1_140 = arith.constant 1 : index
    %c0_141 = arith.constant 0 : index
    %203 = vector.load %arg20[%c1_139, %c1_140, %c0_141] : memref<4x4x128xf32, #tpu.memory_space<vmem>>, vector<2x2x128xf32>
    %204 = vector.shape_cast %203 : vector<2x2x128xf32> to vector<4x128xf32>
    %c1_142 = arith.constant 1 : index
    %c2_143 = arith.constant 2 : index
    %c0_144 = arith.constant 0 : index
    %205 = vector.load %arg20[%c1_142, %c2_143, %c0_144] : memref<4x4x128xf32, #tpu.memory_space<vmem>>, vector<2x2x128xf32>
    %206 = vector.shape_cast %205 : vector<2x2x128xf32> to vector<4x128xf32>
    %c2_145 = arith.constant 2 : index
    %c0_146 = arith.constant 0 : index
    %c0_147 = arith.constant 0 : index
    %207 = vector.load %arg20[%c2_145, %c0_146, %c0_147] : memref<4x4x128xf32, #tpu.memory_space<vmem>>, vector<2x2x128xf32>
    %208 = vector.shape_cast %207 : vector<2x2x128xf32> to vector<4x128xf32>
    %c2_148 = arith.constant 2 : index
    %c1_149 = arith.constant 1 : index
    %c0_150 = arith.constant 0 : index
    %209 = vector.load %arg20[%c2_148, %c1_149, %c0_150] : memref<4x4x128xf32, #tpu.memory_space<vmem>>, vector<2x2x128xf32>
    %210 = vector.shape_cast %209 : vector<2x2x128xf32> to vector<4x128xf32>
    %c2_151 = arith.constant 2 : index
    %c2_152 = arith.constant 2 : index
    %c0_153 = arith.constant 0 : index
    %211 = vector.load %arg20[%c2_151, %c2_152, %c0_153] : memref<4x4x128xf32, #tpu.memory_space<vmem>>, vector<2x2x128xf32>
    %212 = vector.shape_cast %211 : vector<2x2x128xf32> to vector<4x128xf32>
    %213 = tpu.concatenate %196, %198, %200, %202, %204, %206, %208, %210, %212 in 1 : vector<4x128xf32>, vector<4x128xf32>, vector<4x128xf32>, vector<4x128xf32>, vector<4x128xf32>, vector<4x128xf32>, vector<4x128xf32>, vector<4x128xf32>, vector<4x128xf32> -> vector<4x1152xf32>
    %214 = arith.truncf %213 : vector<4x1152xf32> to vector<4x1152xbf16>
    %c0_154 = arith.constant 0 : index
    %c0_155 = arith.constant 0 : index
    %215 = vector.load %arg8[%c0_154, %c0_155] : memref<1152x256xbf16, #tpu.memory_space<vmem>>, vector<1152x256xbf16>
    %cst_156 = arith.constant dense<0.000000e+00> : vector<4x256xf32>
    %216 = tpu.matmul %214, %215, %cst_156 {dimension_numbers = #tpu.dot_dimension_numbers<[1], [0], [0], [1], [0, 0, 1, 1], [], []>} : vector<4x1152xbf16>, vector<1152x256xbf16>, vector<4x256xf32> -> vector<4x256xf32>
    %c0_157 = arith.constant 0 : index
    %c0_158 = arith.constant 0 : index
    %217 = vector.load %arg9[%c0_157, %c0_158] : memref<3x256xf32, #tpu.memory_space<vmem>>, vector<3x256xf32>
    %218 = vector.extract_strided_slice %217 {offsets = [0, 0], sizes = [1, 256], strides = [1, 1]} : vector<3x256xf32> to vector<1x256xf32>
    %219 = vector.extract_strided_slice %217 {offsets = [1, 0], sizes = [1, 256], strides = [1, 1]} : vector<3x256xf32> to vector<1x256xf32>
    %220 = vector.extract_strided_slice %217 {offsets = [2, 0], sizes = [1, 256], strides = [1, 1]} : vector<3x256xf32> to vector<1x256xf32>
    %221 = vector.broadcast %218 : vector<1x256xf32> to vector<4x256xf32>
    %222 = arith.addf %216, %221 : vector<4x256xf32>
    %cst_159 = arith.constant 0.000000e+00 : f32
    %223 = vector.broadcast %cst_159 : f32 to vector<4x256xf32>
    %224 = arith.maximumf %222, %223 : vector<4x256xf32>
    %225 = vector.broadcast %219 : vector<1x256xf32> to vector<4x256xf32>
    %226 = arith.mulf %224, %225 : vector<4x256xf32>
    %227 = vector.broadcast %220 : vector<1x256xf32> to vector<4x256xf32>
    %228 = arith.addf %226, %227 : vector<4x256xf32>
    %cst_160 = arith.constant dense<0.000000e+00> : vector<256xf32>
    %229 = vector.multi_reduction <add>, %228, %cst_160 [0] : vector<4x256xf32> to vector<256xf32>
    %230 = vector.shape_cast %229 : vector<256xf32> to vector<1x256xf32>
    %cst_161 = arith.constant 4.000000e+00 : f32
    %231 = vector.broadcast %cst_161 : f32 to vector<1x256xf32>
    %232 = arith.divf %230, %231 : vector<1x256xf32>
    %233 = arith.truncf %232 : vector<1x256xf32> to vector<1x256xbf16>
    %c0_162 = arith.constant 0 : index
    %c0_163 = arith.constant 0 : index
    %234 = vector.load %arg10[%c0_162, %c0_163] : memref<256x128xbf16, #tpu.memory_space<vmem>>, vector<256x128xbf16>
    %cst_164 = arith.constant dense<0.000000e+00> : vector<1x128xf32>
    %235 = tpu.matmul %233, %234, %cst_164 {dimension_numbers = #tpu.dot_dimension_numbers<[1], [0], [0], [1], [0, 0, 1, 1], [], []>} : vector<1x256xbf16>, vector<256x128xbf16>, vector<1x128xf32> -> vector<1x128xf32>
    %c0_165 = arith.constant 0 : index
    %c0_166 = arith.constant 0 : index
    %236 = vector.load %arg11[%c0_165, %c0_166] : memref<1x128xf32, #tpu.memory_space<vmem>>, vector<1x128xf32>
    %237 = arith.addf %235, %236 : vector<1x128xf32>
    %cst_167 = arith.constant 0.000000e+00 : f32
    %238 = vector.broadcast %cst_167 : f32 to vector<1x128xf32>
    %239 = arith.maximumf %237, %238 : vector<1x128xf32>
    %240 = arith.truncf %239 : vector<1x128xf32> to vector<1x128xbf16>
    %c0_168 = arith.constant 0 : index
    %c0_169 = arith.constant 0 : index
    %241 = vector.load %arg12[%c0_168, %c0_169] : memref<128x64xbf16, #tpu.memory_space<vmem>>, vector<128x64xbf16>
    %cst_170 = arith.constant dense<0.000000e+00> : vector<1x64xf32>
    %242 = tpu.matmul %240, %241, %cst_170 {dimension_numbers = #tpu.dot_dimension_numbers<[1], [0], [0], [1], [0, 0, 1, 1], [], []>} : vector<1x128xbf16>, vector<128x64xbf16>, vector<1x64xf32> -> vector<1x64xf32>
    %c0_171 = arith.constant 0 : index
    %c0_172 = arith.constant 0 : index
    %243 = vector.load %arg13[%c0_171, %c0_172] : memref<1x64xf32, #tpu.memory_space<vmem>>, vector<1x64xf32>
    %244 = arith.addf %242, %243 : vector<1x64xf32>
    %cst_173 = arith.constant 0.000000e+00 : f32
    %245 = vector.broadcast %cst_173 : f32 to vector<1x64xf32>
    %246 = arith.maximumf %244, %245 : vector<1x64xf32>
    %247 = arith.truncf %246 : vector<1x64xf32> to vector<1x64xbf16>
    %c0_174 = arith.constant 0 : index
    %c0_175 = arith.constant 0 : index
    %248 = vector.load %arg14[%c0_174, %c0_175] : memref<64x2xbf16, #tpu.memory_space<vmem>>, vector<64x2xbf16>
    %cst_176 = arith.constant dense<0.000000e+00> : vector<1x2xf32>
    %249 = tpu.matmul %247, %248, %cst_176 {dimension_numbers = #tpu.dot_dimension_numbers<[1], [0], [0], [1], [0, 0, 1, 1], [], []>} : vector<1x64xbf16>, vector<64x2xbf16>, vector<1x2xf32> -> vector<1x2xf32>
    %c0_177 = arith.constant 0 : index
    %c0_178 = arith.constant 0 : index
    %250 = vector.load %arg15[%c0_177, %c0_178] : memref<1x2xf32, #tpu.memory_space<vmem>>, vector<1x2xf32>
    %251 = arith.addf %249, %250 : vector<1x2xf32>
    %252 = arith.negf %251 : vector<1x2xf32>
    %253 = math.exp %252 : vector<1x2xf32>
    %cst_179 = arith.constant 1.000000e+00 : f32
    %254 = vector.broadcast %cst_179 : f32 to vector<1x2xf32>
    %255 = arith.addf %254, %253 : vector<1x2xf32>
    %256 = arith.divf %254, %255 : vector<1x2xf32>
    %c0_180 = arith.constant 0 : index
    %c0_181 = arith.constant 0 : index
    %c0_182 = arith.constant 0 : index
    %257 = vector.load %arg16[%c0_180, %c0_181, %c0_182] : memref<1x1x2xf32, #tpu.memory_space<vmem>>, vector<1x1x2xf32>
    %258 = vector.shape_cast %257 : vector<1x1x2xf32> to vector<1x2xf32>
    %259 = vector.shape_cast %256 : vector<1x2xf32> to vector<1x1x2xf32>
    tpu.vector_store %arg16[%c0_180, %c0_181, %c0_182], %259 {strides = array<i32>} : memref<1x1x2xf32, #tpu.memory_space<vmem>>, vector<1x1x2xf32>,
    return
  }
  func.func @transform_0(%arg0: i32) -> (i32, i32, i32, i32) {
    %c0_i32 = arith.constant 0 : i32
    %c0_i32_0 = arith.constant 0 : i32
    %c0_i32_1 = arith.constant 0 : i32
    %c0_i32_2 = arith.constant 0 : i32
    return %arg0, %c0_i32, %c0_i32_0, %c0_i32_1 : i32, i32, i32, i32
  }
  func.func @transform_1(%arg0: i32) -> (i32, i32) {
    %c0_i32 = arith.constant 0 : i32
    %c0_i32_0 = arith.constant 0 : i32
    %c0_i32_1 = arith.constant 0 : i32
    return %c0_i32, %c0_i32_0 : i32, i32
  }
  func.func @transform_2(%arg0: i32) -> (i32, i32) {
    %c0_i32 = arith.constant 0 : i32
    %c0_i32_0 = arith.constant 0 : i32
    %c0_i32_1 = arith.constant 0 : i32
    return %c0_i32, %c0_i32_0 : i32, i32
  }
  func.func @transform_3(%arg0: i32) -> (i32, i32) {
    %c0_i32 = arith.constant 0 : i32
    %c0_i32_0 = arith.constant 0 : i32
    %c0_i32_1 = arith.constant 0 : i32
    return %c0_i32, %c0_i32_0 : i32, i32
  }
  func.func @transform_4(%arg0: i32) -> (i32, i32) {
    %c0_i32 = arith.constant 0 : i32
    %c0_i32_0 = arith.constant 0 : i32
    %c0_i32_1 = arith.constant 0 : i32
    return %c0_i32, %c0_i32_0 : i32, i32
  }
  func.func @transform_5(%arg0: i32) -> (i32, i32) {
    %c0_i32 = arith.constant 0 : i32
    %c0_i32_0 = arith.constant 0 : i32
    %c0_i32_1 = arith.constant 0 : i32
    return %c0_i32, %c0_i32_0 : i32, i32
  }
  func.func @transform_6(%arg0: i32) -> (i32, i32) {
    %c0_i32 = arith.constant 0 : i32
    %c0_i32_0 = arith.constant 0 : i32
    %c0_i32_1 = arith.constant 0 : i32
    return %c0_i32, %c0_i32_0 : i32, i32
  }
  func.func @transform_7(%arg0: i32) -> (i32, i32) {
    %c0_i32 = arith.constant 0 : i32
    %c0_i32_0 = arith.constant 0 : i32
    %c0_i32_1 = arith.constant 0 : i32
    return %c0_i32, %c0_i32_0 : i32, i32
  }
  func.func @transform_8(%arg0: i32) -> (i32, i32) {
    %c0_i32 = arith.constant 0 : i32
    %c0_i32_0 = arith.constant 0 : i32
    %c0_i32_1 = arith.constant 0 : i32
    return %c0_i32, %c0_i32_0 : i32, i32
  }
  func.func @transform_9(%arg0: i32) -> (i32, i32) {
    %c0_i32 = arith.constant 0 : i32
    %c0_i32_0 = arith.constant 0 : i32
    %c0_i32_1 = arith.constant 0 : i32
    return %c0_i32, %c0_i32_0 : i32, i32
  }
  func.func @transform_10(%arg0: i32) -> (i32, i32) {
    %c0_i32 = arith.constant 0 : i32
    %c0_i32_0 = arith.constant 0 : i32
    %c0_i32_1 = arith.constant 0 : i32
    return %c0_i32, %c0_i32_0 : i32, i32
  }
  func.func @transform_11(%arg0: i32) -> (i32, i32) {
    %c0_i32 = arith.constant 0 : i32
    %c0_i32_0 = arith.constant 0 : i32
    %c0_i32_1 = arith.constant 0 : i32
    return %c0_i32, %c0_i32_0 : i32, i32
  }
  func.func @transform_12(%arg0: i32) -> (i32, i32) {
    %c0_i32 = arith.constant 0 : i32
    %c0_i32_0 = arith.constant 0 : i32
    %c0_i32_1 = arith.constant 0 : i32
    return %c0_i32, %c0_i32_0 : i32, i32
  }
  func.func @transform_13(%arg0: i32) -> (i32, i32) {
    %c0_i32 = arith.constant 0 : i32
    %c0_i32_0 = arith.constant 0 : i32
    %c0_i32_1 = arith.constant 0 : i32
    return %c0_i32, %c0_i32_0 : i32, i32
  }
  func.func @transform_14(%arg0: i32) -> (i32, i32) {
    %c0_i32 = arith.constant 0 : i32
    %c0_i32_0 = arith.constant 0 : i32
    %c0_i32_1 = arith.constant 0 : i32
    return %c0_i32, %c0_i32_0 : i32, i32
  }
  func.func @transform_15(%arg0: i32) -> (i32, i32, i32) {
    %c0_i32 = arith.constant 0 : i32
    %c0_i32_0 = arith.constant 0 : i32
    %c0_i32_1 = arith.constant 0 : i32
    return %arg0, %c0_i32, %c0_i32_0 : i32, i32, i32
  }
}

</mosaic_0001>

<bundles_post_ra>
// kernel: cnn_forward.1
= control target key start
LH: loop header
LB: loop body
LE: loop exit
PB: predicated region body
PF: predicated region fallthrough
CT: control target
= control target key end

     0   :  { %20 = vsyncpa [#allocation7], 0  ;;  %s12715_s0 = inlined_call_operand.vmem [shape: f32[2,16,16,1], index: 0, kind: input, shape index: {}]   ;;  %s12716_s1 = inlined_call_operand.vmem [shape: f32[9,32], index: 1, kind: input, shape index: {}]   ;;  %s12717_s2 = inlined_call_operand.vmem [shape: f32[3,32], index: 2, kind: input, shape index: {}]   ;;  %s12718_s3 = inlined_call_operand.vmem [shape: bf16[288,64], index: 3, kind: input, shape index: {}]   ;;  %s12719_s4 = inlined_call_operand.vmem [shape: f32[3,64], index: 4, kind: input, shape index: {}]   ;;  %s12720_s5 = inlined_call_operand.vmem [shape: bf16[576,128], index: 5, kind: input, shape index: {}]   ;;  %s12721_s6 = inlined_call_operand.vmem [shape: f32[3,128], index: 6, kind: input, shape index: {}]   ;;  %s12722_s7 = inlined_call_operand.hbm [shape: bf16[1152,256], index: 7, kind: input, shape index: {}]   ;;  %s12723_s8 = inlined_call_operand.vmem [shape: f32[3,256], index: 8, kind: input, shape index: {}]   ;;  %s12724_s9 = inlined_call_operand.vmem [shape: bf16[256,128], index: 9, kind: input, shape index: {}]   ;;  %s12725_s10 = inlined_call_operand.vmem [shape: f32[1,128], index: 10, kind: input, shape index: {}]   ;;  %s12726_s11 = inlined_call_operand.vmem [shape: bf16[128,64], index: 11, kind: input, shape index: {}]   ;;  %s12727_s12 = inlined_call_operand.vmem [shape: f32[1,64], index: 12, kind: input, shape index: {}]   ;;  %s12728_s13 = inlined_call_operand.vmem [shape: bf16[64,2], index: 13, kind: input, shape index: {}]   ;;  %s12729_s14 = inlined_call_operand.vmem [shape: f32[1,2], index: 14, kind: input, shape index: {}]   ;;  %s12730_s15 = inlined_call_operand.hbm [shape: f32[2,1,2], index: 15, kind: output, shape index: {}]  }
   0x1   :  { %21 = vsyncpa [#allocation8], 0 }
   0x2   :  { %23 = vsyncpa [#allocation8 + $0x1], 0  ;;  %s9645_s18 = smov 0   ;;  %s9647_s19 = smov 0  }
   0x3   :  { %s9649_s20 = smov 0   ;;  %s9651_s21 = smov 0  }
   0x4 LB: > { %12786 = sst [smem:[#allocation12_spill]] %s9540_s18  ;;  %s9666_s22 = sadd.s32 4294967295, %s9552_s21   ;;  %s9552_s21 = sphi %s9651_s21, %s13172_s21   ;;  %s9548_s20 = sphi %s9649_s20, %s13174_s20   ;;  %s9544_s19 = sphi %s9647_s19, %s13176_s19   ;;  %s9540_s18 = sphi %s9645_s18, %s13175_s18  }
   0x5   : > { %12787 = sst [smem:[#allocation13_spill]] %s9548_s20  ;;  %s8296_s23 = sadd.s32 4294967294, %s9552_s21  }
   0x6   : > { %s9670_s24 = sadd.s32 1, %s9552_s21   ;;  %s356_s25 = sadd.s32 1, %s9548_s20 }
   0x7   : > { %12788 = sst [smem:[#allocation14_spill]] %s9670_s24  ;;  %s353_s26 = ssub.s32 %s9552_s21, %s9670_s24 }
   0x8   : > { %p366_p0 = scmp.ne.s32.totalorder %s9548_s20, %s9544_s19  ;;  %p354_p1 = scmp.eq.s32.totalorder %s353_s26, 0 }
   0x9   : > { %p367_p2 = scmp.eq.s32.totalorder %s9666_s22, 1  ;;  %p372_p3 = scmp.ne.s32.totalorder %s9544_s19, %s9540_s18 }
   0xa   : > { %p373_p4 = scmp.eq.s32.totalorder %s8296_s23, 1  ;;  %p8297_p7 = scmp.ge.s32.totalorder %s9552_s21, 1 }
   0xb   : > { %s9681_s27 = scalar_select %p354_p1, %s9548_s20, %s356_s25  }
   0xc   : > { %p9683_p5 = por %p367_p2, %p366_p0  ;;  %p9687_p6 = por %p373_p4, %p372_p3 }
   0xd   : > { %12789 = sst [smem:[#allocation15_spill]] %s9681_s27  ;;  %p380_p8 = scmp.lt.s32.totalorder %s9552_s21, 3 }
   0xe   : > { %s12790_s28 = scalar_select %p9683_p5, 1, 0 }
   0xf   : > { %s12791_s29 = scalar_select %p9687_p6, 1, 0 }
  0x10   : > { %p12736_p9 = scmp.eq.s32.totalorder %s9666_s22, 0  ;;  %p9694_p10 = pnand %p8297_p7, %p380_p8 }
  0x11   : > { %12792 = sst [smem:[#allocation16_spill]] %s12791_s29  ;;  %s9554_s16 = smov [#allocation6]  }
  0x12   : > { %s12793_s30 = scalar_select %p9694_p10, 1, 0 }
  0x13   : > { %s410_s17 = sshll.u32 %s9554_s16, 4  ;;  %p8919_p11 = pneg %p9694_p10  ;;  %s411_s17 = int_to_ptr.vmem [resolvable:$true] %s410_s17 }
  0x14   : > { %s9458_s27 = scalar_lea.hbm %s12722_s7, 18432 }
  0x15   : > { %p9702_p12 = pnand %p12736_p9, %p8919_p11  ;;  %p9459_p13 = scmp.ne.s32.totalorder %s12722_s7, %s9458_s27 }
  0x16   : > { %p9465_p3 = scmp.lt.u32.totalorder %s9458_s27, %s12722_s7 }
  0x17   : > { %p9460_p0 = pneg %p9702_p12 }
  0x19   : > { %p9461_p1 = pnand %p9460_p0, %p9459_p13 }
  0x1b   : > { %p9462_p2 = pneg %p9461_p1 }
  0x1d   : > { %p9467_p4 = pnand %p9465_p3, %p9462_p2 }
  0x1f   : > { %9470 = shalt.err (!%p9467_p4)
}
  0x20   : > { %s9471_s18 = scalar_lea.vmem %s411_s17, 18432  ;;  %p9479_p9 = scmp.lt.s32.totalorder %s411_s17, %s411_s17 }
  0x21   : > { %p9472_p7 = scmp.ne.s32.totalorder %s411_s17, %s9471_s18  ;;  %p9480_p6 = scmp.lt.s32.totalorder %s9471_s18, %s9471_s18 }
  0x23   : > { %p9474_p8 = pnand %p9472_p7, %p9460_p0  ;;  %p9481_p5 = por %p9480_p6, %p9479_p9 }
  0x25   : > { %p9475_p11 = pneg %p9474_p8 }
  0x27   : > { %p9482_p10 = pnand %p9481_p5, %p9475_p11 }
  0x29   : > { %9485 = shalt.err (!%p9482_p10)
}
  0x2a   : > { %s9555_s20 = smov 128   ;;  %s9556_s24 = smov 8  }
  0x2b   : > { %8922 = dma.hbm_to_vmem [thread:$0]  (!%p9702_p12), %s12722_s7, 18432, %s411_s17, [#allocation7], %s9555_s20, %s9555_s20, %s9556_s24  }
  0x2c   : > { %p12795_p13 = scmp.ne.s32.totalorder %s12793_s30, 0 }
  0x2e   : > { %455 = sbr.rel (%p12795_p13) target bundleno = 2726 (0xaa6), region = 80 }
  0x35   : > { %p12796_p1 = scmp.eq.s32.totalorder %s9666_s22, 0 }
  0x37   : > { %9531 = dma.done.wait (%p12796_p1), [#allocation7], 18432   ;;  %p12797_p0 = pmov %p12796_p1 }
  0x38   : > { %vm508_vm0 = vcmask 7168   ;;  %p502_p5 = scmp.lt.s32.totalorder %s9666_s22, 1  ;;  %v12739_v0 = vmov 0   ;;  %v12740_v1 = vmov 0.0   ;;  %vm511_vm1 = vcmask 1024   ;;  %s9560_s26 = smov 32  }
  0x39   : > { %9533 = vsyncadd (%p12797_p0), [#allocation7], 4294948864  ;;  %8972 = vset.pattern.permute.xlu0 %v12739_v0  ;;  %509 = vst.msk [vmem:[#allocation2] sm:$0xff] %vm508_vm0, %v12740_v1  ;;  %8973 = vset.pattern.permute.xlu1 %v12739_v0  ;;  %vm4393_vm2 = vcmask 261120   ;;  %vm4395_vm3 = vcmask 254976   ;;  %vm4735_vm4 = vcmask 1041409  }
  0x3a   : > { %510 = vst.msk [vmem:[#allocation2 + $0x8] sm:$0xff] %vm508_vm0, %v12740_v1  ;;  %513 = vst.msk [vmem:[#allocation2 + $0x18] sm:$0xff] %vm508_vm0, %v12740_v1  ;;  %s503_s18 = scalar_select %p502_p5, %s9666_s22, 1  ;;  %vm4737_vm5 = vcmask 1042434   ;;  %vm4739_vm6 = vcmask 1043459   ;;  %vm4741_vm7 = vcmask 1044484  }
  0x3b   : > { %514 = vst.msk [vmem:[#allocation2 + $0x20] sm:$0xff] %vm508_vm0, %v12740_v1  ;;  %516 = vst.msk [vmem:[#allocation2 + $0x30] sm:$0xff] %vm508_vm0, %v12740_v1  ;;  %vm4743_vm8 = vcmask 1045509   ;;  %vm4745_vm9 = vcmask 1046534   ;;  %vm4747_vm10 = vcmask 1047559   ;;  %s9562_s25 = smov 96  }
  0x3c   : > { %517 = vst.msk [vmem:[#allocation2 + $0x38] sm:$0xff] %vm508_vm0, %v12740_v1  ;;  %519 = vst.msk [vmem:[#allocation2 + $0x48] sm:$0xff] %vm508_vm0, %v12740_v1  ;;  %s8709_s27 = sshll.u32 %s503_s18, 8  ;;  %vm5088_vm11 = vcmask 523264   ;;  %vm5097_vm12 = vcmask 785408   ;;  %vm5785_vm13 = vcmask 521216  }
  0x3d   : > { %520 = vst.msk [vmem:[#allocation2 + $0x50] sm:$0xff] %vm508_vm0, %v12740_v1  ;;  %522 = vst.msk [vmem:[#allocation2 + $0x60] sm:$0xff] %vm508_vm0, %v12740_v1  ;;  %s9849_s17 = scalar_lea.vmem %s12715_s0, %s8709_s27  ;;  %vm5889_vm14 = vcmask 519168   ;;  %vm9563_vm15 = vmmov 0   ;;  %s8706_s20 = sshll.u32 %s9666_s22, 4 }
  0x3e   : > { %523 = vst.msk [vmem:[#allocation2 + $0x68] sm:$0xff] %vm508_vm0, %v12740_v1  ;;  %525 = vst.msk [vmem:[#allocation2 + $0x78] sm:$0xff] %vm508_vm0, %v12740_v1  ;;  %v566_v2 = vld [vmem:[%s9849_s17 + $0x10] sm:$0xff]  ;;  %v564_v3 = vld [vmem:[%s9849_s17] sm:$0xff]  ;;  %s12673_s29 = scalar_lea.hbm %s12730_s15, %s8706_s20  ;;  %p13168_p9 = scmp.ne.s32.totalorder %s12790_s28, 0 }
  0x3f   : > { %526 = vst.msk [vmem:[#allocation2 + $0x80] sm:$0xff] %vm508_vm0, %v12740_v1  ;;  %528 = vst.msk [vmem:[#allocation2 + $0x90] sm:$0xff] %vm508_vm0, %v12740_v1  ;;  %v568_v4 = vld [vmem:[%s9849_s17 + $0x20] sm:$0xff]  ;;  %v570_v6 = vld [vmem:[%s9849_s17 + $0x30] sm:$0xff]  ;;  %s9564_s22 = smov [#allocation9]  }
  0x40   : > { %529 = vst.msk [vmem:[#allocation2 + $0x98] sm:$0xff] %vm508_vm0, %v12740_v1  ;;  %531 = vst.msk [vmem:[#allocation2 + $0xa8] sm:$0xff] %vm508_vm0, %v12740_v1  ;;  %v631_v5 = vld [vmem:[#allocation2] sm:$0xff]  ;;  %v567_v9 = vld [vmem:[%s9849_s17 + $0x18] sm:$0xff]  ;;  %s9490_s16 = sshll.u32 %s9564_s22, 4  ;;  %s9491_s16 = int_to_ptr.vmem [resolvable:$false] %s9490_s16 }
  0x41   : > { %532 = vst.msk [vmem:[#allocation2 + $0xb0] sm:$0xff] %vm508_vm0, %v12740_v1  ;;  %534 = vst.msk [vmem:[#allocation2 + $0xc0] sm:$0xff] %vm508_vm0, %v12740_v1  ;;  %665 = vperm.xlu0 %8972, %v631_v5   ;;  %v891_v7 = vld [vmem:[#allocation2 + $0x1] sm:$0xff]  ;;  %v571_v11 = vld [vmem:[%s9849_s17 + $0x38] sm:$0xff] }
  0x42   : > { %535 = vst.msk [vmem:[#allocation2 + $0xc8] sm:$0xff] %vm508_vm0, %v12740_v1  ;;  %537 = vst.msk [vmem:[#allocation2 + $0xd8] sm:$0xff] %vm508_vm0, %v12740_v1  ;;  %v572_v8 = vld [vmem:[%s9849_s17 + $0x40] sm:$0xff]  ;;  %v565_v10 = vld [vmem:[%s9849_s17 + $0x8] sm:$0xff] }
  0x43   : > { %538 = vst.msk [vmem:[#allocation2 + $0xe0] sm:$0xff] %vm508_vm0, %v12740_v1  ;;  %540 = vst.msk [vmem:[#allocation2 + $0xf0] sm:$0xff] %vm508_vm0, %v12740_v1  ;;  %v569_v12 = vld [vmem:[%s9849_s17 + $0x28] sm:$0xff]  ;;  %v574_v14 = vld [vmem:[%s9849_s17 + $0x50] sm:$0xff] }
  0x44   : > { %541 = vst.msk [vmem:[#allocation2 + $0xf8] sm:$0xff] %vm508_vm0, %v12740_v1  ;;  %543 = vst.msk [vmem:[#allocation2 + $0x108] sm:$0xff] %vm508_vm0, %v12740_v1  ;;  %v573_v13 = vld [vmem:[%s9849_s17 + $0x48] sm:$0xff]  ;;  %v576_v15 = vld [vmem:[%s9849_s17 + $0x60] sm:$0xff] }
  0x45   : > { %544 = vst.msk [vmem:[#allocation2 + $0x110] sm:$0xff] %vm508_vm0, %v12740_v1  ;;  %546 = vst.msk [vmem:[#allocation2 + $0x120] sm:$0xff] %vm508_vm0, %v12740_v1  ;;  %925 = vperm.xlu0 %8972, %v891_v7   ;;  %v578_v16 = vld [vmem:[%s9849_s17 + $0x70] sm:$0xff]  ;;  %v580_v17 = vld [vmem:[%s9849_s17 + $0x80] sm:$0xff] }
  0x46   : > { %547 = vst.msk [vmem:[#allocation2 + $0x128] sm:$0xff] %vm508_vm0, %v12740_v1  ;;  %549 = vst.msk [vmem:[#allocation2 + $0x138] sm:$0xff] %vm508_vm0, %v12740_v1  ;;  %v575_v18 = vld [vmem:[%s9849_s17 + $0x58] sm:$0xff]  ;;  %v1151_v28 = vld [vmem:[#allocation2 + $0x2] sm:$0xff] }
  0x47   : > { %550 = vst.msk [vmem:[#allocation2 + $0x140] sm:$0xff] %vm508_vm0, %v12740_v1  ;;  %552 = vst.msk [vmem:[#allocation2 + $0x150] sm:$0xff] %vm508_vm0, %v12740_v1  ;;  %v577_v29 = vld [vmem:[%s9849_s17 + $0x68] sm:$0xff]  ;;  %v579_v30 = vld [vmem:[%s9849_s17 + $0x78] sm:$0xff] }
  0x48   : > { %553 = vst.msk [vmem:[#allocation2 + $0x158] sm:$0xff] %vm508_vm0, %v12740_v1  ;;  %555 = vst.msk [vmem:[#allocation2 + $0x168] sm:$0xff] %vm508_vm0, %v12740_v1  ;;  %v581_v33 = vld [vmem:[%s9849_s17 + $0x88] sm:$0xff]  ;;  %v582_v54 = vld [vmem:[%s9849_s17 + $0x90] sm:$0xff] }
  0x49   : > { %556 = vst.msk [vmem:[#allocation2 + $0x170] sm:$0xff] %vm508_vm0, %v12740_v1  ;;  %558 = vst.msk [vmem:[#allocation2 + $0x180] sm:$0xff] %vm508_vm0, %v12740_v1  ;;  %v632_v37 = vld [vmem:[#allocation2 + $0x8] sm:$0xff] }
  0x4a   : > { %559 = vst.msk [vmem:[#allocation2 + $0x188] sm:$0xff] %vm508_vm0, %v12740_v1  ;;  %561 = vst.msk [vmem:[#allocation2 + $0x198] sm:$0xff] %vm508_vm0, %v12740_v1 }
  0x4b   : > { %562 = vst.msk [vmem:[#allocation2 + $0x1a0] sm:$0xff] %vm508_vm0, %v12740_v1  ;;  %6545 = vst [vmem:[#allocation5] sm:$0xf] %v12740_v1 }
  0x4c   : > { %6546 = vst [vmem:[#allocation5 + $0x4] sm:$0xf] %v12740_v1  ;;  %6547 = vst [vmem:[#allocation5 + $0x8] sm:$0xf] %v12740_v1 }
  0x4d   : > { %6548 = vst [vmem:[#allocation5 + $0xc] sm:$0xf] %v12740_v1  ;;  %518 = vst.msk [vmem:[#allocation2 + $0x40] sm:$0x3] %vm511_vm1, %v12740_v1 }
  0x4e   : > { %512 = vst.msk [vmem:[#allocation2 + $0x10] sm:$0x3] %vm511_vm1, %v12740_v1  ;;  %515 = vst.msk [vmem:[#allocation2 + $0x28] sm:$0x3] %vm511_vm1, %v12740_v1 }
  0x4f   : > { %521 = vst.msk [vmem:[#allocation2 + $0x58] sm:$0x3] %vm511_vm1, %v12740_v1  ;;  %524 = vst.msk [vmem:[#allocation2 + $0x70] sm:$0x3] %vm511_vm1, %v12740_v1 }
  0x50   : > { %527 = vst.msk [vmem:[#allocation2 + $0x88] sm:$0x3] %vm511_vm1, %v12740_v1  ;;  %530 = vst.msk [vmem:[#allocation2 + $0xa0] sm:$0x3] %vm511_vm1, %v12740_v1 }
  0x51   : > { %533 = vst.msk [vmem:[#allocation2 + $0xb8] sm:$0x3] %vm511_vm1, %v12740_v1  ;;  %536 = vst.msk [vmem:[#allocation2 + $0xd0] sm:$0x3] %vm511_vm1, %v12740_v1 }
  0x52   : > { %539 = vst.msk [vmem:[#allocation2 + $0xe8] sm:$0x3] %vm511_vm1, %v12740_v1  ;;  %542 = vst.msk [vmem:[#allocation2 + $0x100] sm:$0x3] %vm511_vm1, %v12740_v1 }
  0x53   : > { %545 = vst.msk [vmem:[#allocation2 + $0x118] sm:$0x3] %vm511_vm1, %v12740_v1  ;;  %548 = vst.msk [vmem:[#allocation2 + $0x130] sm:$0x3] %vm511_vm1, %v12740_v1 }
  0x54   : > { %551 = vst.msk [vmem:[#allocation2 + $0x148] sm:$0x3] %vm511_vm1, %v12740_v1  ;;  %554 = vst.msk [vmem:[#allocation2 + $0x160] sm:$0x3] %vm511_vm1, %v12740_v1 }
  0x55   : > { %557 = vst.msk [vmem:[#allocation2 + $0x178] sm:$0x3] %vm511_vm1, %v12740_v1  ;;  %560 = vst.msk [vmem:[#allocation2 + $0x190] sm:$0x3] %vm511_vm1, %v12740_v1  ;;  %v892_v41 = vld [vmem:[#allocation2 + $0x9] sm:$0xff] }
  0x56   : > { %563 = vst.msk [vmem:[#allocation2 + $0x1a8] sm:$0x3] %vm511_vm1, %v12740_v1  ;;  %v1152_v50 = vld [vmem:[#allocation2 + $0xa] sm:$0xff]  ;;  %v587_v1 = vld [vmem:[%s9849_s17 + $0xb8] sm:$0xff]  ;;  %vm8214_vm1 = vcmask 8192  }
  0x57   : > { %599 = vst.msk [vmem:[#allocation2 + $0x31] sm:$0xff] %vm508_vm0, %v566_v2  ;;  %597 = vst.msk [vmem:[#allocation2 + $0x19] sm:$0xff] %vm508_vm0, %v564_v3  ;;  %v584_v3 = vld [vmem:[%s9849_s17 + $0xa0] sm:$0xff] }
  0x58   : > { %601 = vst.msk [vmem:[#allocation2 + $0x49] sm:$0xff] %vm508_vm0, %v568_v4  ;;  %603 = vst.msk [vmem:[#allocation2 + $0x61] sm:$0xff] %vm508_vm0, %v570_v6 }
  0x59   : > { %605 = vst.msk [vmem:[#allocation2 + $0x79] sm:$0xff] %vm508_vm0, %v572_v8  ;;  %600 = vst.msk [vmem:[#allocation2 + $0x39] sm:$0xff] %vm508_vm0, %v567_v9 }
  0x5a   : > { %598 = vst.msk [vmem:[#allocation2 + $0x21] sm:$0xff] %vm508_vm0, %v565_v10  ;;  %604 = vst.msk [vmem:[#allocation2 + $0x69] sm:$0xff] %vm508_vm0, %v571_v11 }
  0x5b   : > { %602 = vst.msk [vmem:[#allocation2 + $0x51] sm:$0xff] %vm508_vm0, %v569_v12  ;;  %606 = vst.msk [vmem:[#allocation2 + $0x81] sm:$0xff] %vm508_vm0, %v573_v13 }
  0x5c   : > { %607 = vst.msk [vmem:[#allocation2 + $0x91] sm:$0xff] %vm508_vm0, %v574_v14  ;;  %609 = vst.msk [vmem:[#allocation2 + $0xa9] sm:$0xff] %vm508_vm0, %v576_v15  ;;  %v586_v15 = vld [vmem:[%s9849_s17 + $0xb0] sm:$0xff] }
  0x5d   : > { %611 = vst.msk [vmem:[#allocation2 + $0xc1] sm:$0xff] %vm508_vm0, %v578_v16  ;;  %613 = vst.msk [vmem:[#allocation2 + $0xd9] sm:$0xff] %vm508_vm0, %v580_v17 }
  0x5e   : > { %v9880_v19 = vld [vmem:[#allocation2 + $0x30] sm:$0xff]  ;;  %v633_v20 = vld [vmem:[#allocation2 + $0x18] sm:$0xff]  ;;  %608 = vst.msk [vmem:[#allocation2 + $0x99] sm:$0xff] %vm508_vm0, %v575_v18  ;;  %610 = vst.msk [vmem:[#allocation2 + $0xb1] sm:$0xff] %vm508_vm0, %v577_v29 }
  0x5f   : > { %685 = vperm.xlu1 %8973, %v9880_v19   ;;  %675 = vperm.xlu0 %8972, %v633_v20   ;;  %v9884_v21 = vld [vmem:[#allocation2 + $0x48] sm:$0xff]  ;;  %v9886_v22 = vld [vmem:[#allocation2 + $0x31] sm:$0xff]  ;;  %v9890_v23 = vld [vmem:[#allocation2 + $0x19] sm:$0xff]  ;;  %612 = vst.msk [vmem:[#allocation2 + $0xc9] sm:$0xff] %vm508_vm0, %v579_v30 }
  0x60   : > { %v9892_v24 = vld [vmem:[#allocation2 + $0x60] sm:$0xff]  ;;  %v9896_v25 = vld [vmem:[#allocation2 + $0x49] sm:$0xff]  ;;  %v9901_v27 = vld [vmem:[#allocation2 + $0x78] sm:$0xff]  ;;  %614 = vst.msk [vmem:[#allocation2 + $0xe1] sm:$0xff] %vm508_vm0, %v581_v33 }
  0x61   : > { %v9898_v26 = vld [vmem:[#allocation2 + $0x61] sm:$0xff]  ;;  %v9908_v31 = vld [vmem:[#allocation2 + $0x79] sm:$0xff]  ;;  %v9948_v47 = vld [vmem:[#allocation2 + $0x69] sm:$0xff]  ;;  %615 = vst.msk [vmem:[#allocation2 + $0xf1] sm:$0xff] %vm508_vm0, %v582_v54 }
  0x62   : > { %v9911_v32 = vld [vmem:[#allocation2 + $0x32] sm:$0xff]  ;;  %v9915_v34 = vld [vmem:[#allocation2 + $0x1a] sm:$0xff]  ;;  %v9917_v35 = vld [vmem:[#allocation2 + $0x62] sm:$0xff]  ;;  %617 = vst.msk [vmem:[#allocation2 + $0x109] sm:$0xff] %vm508_vm0, %v584_v3 }
  0x63   : > { %695 = vperm.xlu1 %8973, %v9884_v21   ;;  %945 = vperm.xlu0 %8972, %v9886_v22   ;;  %v9921_v36 = vld [vmem:[#allocation2 + $0x4a] sm:$0xff]  ;;  %v9925_v38 = vld [vmem:[#allocation2 + $0x7a] sm:$0xff]  ;;  %v9964_v53 = vld [vmem:[#allocation2 + $0x22] sm:$0xff]  ;;  %619 = vst.msk [vmem:[#allocation2 + $0x121] sm:$0xff] %vm508_vm0, %v586_v15 }
  0x64   : > { %v9928_v39 = vld [vmem:[#allocation2 + $0x38] sm:$0xff]  ;;  %v634_v40 = vld [vmem:[#allocation2 + $0x20] sm:$0xff]  ;;  %v9932_v42 = vld [vmem:[#allocation2 + $0x50] sm:$0xff]  ;;  %620 = vst.msk [vmem:[#allocation2 + $0x129] sm:$0xff] %vm508_vm0, %v587_v1 }
  0x65   : > { %v9934_v43 = vld [vmem:[#allocation2 + $0x39] sm:$0xff]  ;;  %v9936_v44 = vld [vmem:[#allocation2 + $0x21] sm:$0xff]  ;;  %v9940_v45 = vld [vmem:[#allocation2 + $0x51] sm:$0xff] }
  0x66   : > { %v9944_v46 = vld [vmem:[#allocation2 + $0x68] sm:$0xff]  ;;  %v9951_v48 = vld [vmem:[#allocation2 + $0x80] sm:$0xff]  ;;  %v9959_v51 = vld [vmem:[#allocation2 + $0x90] sm:$0xff] }
  0x67   : > { %935 = vperm.xlu1 %8973, %v9890_v23   ;;  %705 = vperm.xlu0 %8972, %v9892_v24   ;;  %v9956_v49 = vld [vmem:[#allocation2 + $0x81] sm:$0xff]  ;;  %v9970_v55 = vld [vmem:[#allocation2 + $0x52] sm:$0xff]  ;;  %v9975_v56 = vld [vmem:[#allocation2 + $0x6a] sm:$0xff] }
  0x68   : > { %v9962_v52 = vld [vmem:[#allocation2 + $0x3a] sm:$0xff]  ;;  %v9980_v57 = vld [vmem:[#allocation2 + $0x82] sm:$0xff]  ;;  %v9984_v58 = vld [vmem:[#allocation2 + $0x91] sm:$0xff] }
  0x69   : > { %v9988_v59 = vld [vmem:[#allocation2 + $0xa8] sm:$0xff]  ;;  %v10000_v61 = vld [vmem:[#allocation2 + $0xc0] sm:$0xff]  ;;  %v10007_v63 = vld [vmem:[#allocation2 + $0xd8] sm:$0xff] }
  0x6a   : > { %v9992_v60 = vld [vmem:[#allocation2 + $0xa9] sm:$0xff]  ;;  %v10004_v62 = vld [vmem:[#allocation2 + $0xc1] sm:$0xff]  ;;  %v10011_v2 = vld [vmem:[#allocation2 + $0xd9] sm:$0xff] }
  0x6b   : > { %955 = vperm.xlu1 %8973, %v9896_v25   ;;  %965 = vperm.xlu0 %8972, %v9898_v26   ;;  %v10023_v6 = vld [vmem:[#allocation2 + $0x98] sm:$0xff]  ;;  %v10039_v12 = vld [vmem:[#allocation2 + $0xaa] sm:$0xff] }
  0x6c   : > { %v10025_v7 = vld [vmem:[#allocation2 + $0x92] sm:$0xff]  ;;  %v10141_v1 = vld [vmem:[#allocation2 + $0xc8] sm:$0xff] }
  0x6d   : > { %v10111_v15 = vld [vmem:[#allocation2 + $0xb1] sm:$0xff] }
  0x6f   : > { %715 = vperm.xlu1 %8973, %v9901_v27   ;;  %1185 = vperm.xlu0 %8972, %v1151_v28   ;;  %v10063_v28 = vld [vmem:[#allocation2 + $0xc2] sm:$0xff] }
  0x73   : > { %975 = vperm.xlu1 %8973, %v9908_v31   ;;  %1205 = vperm.xlu0 %8972, %v9911_v32  }
  0x77   : > { %1195 = vperm.xlu1 %8973, %v9915_v34   ;;  %1225 = vperm.xlu0 %8972, %v9917_v35  }
  0x7b   : > { %1215 = vperm.xlu1 %8973, %v9921_v36   ;;  %670 = vperm.xlu0 %8972, %v632_v37   ;;  %v10087_v37 = vld [vmem:[#allocation2 + $0x99] sm:$0xff] }
  0x7f   : > { %1235 = vperm.xlu1 %8973, %v9925_v38   ;;  %690 = vperm.xlu0 %8972, %v9928_v39  }
  0x83   : > { %680 = vperm.xlu1 %8973, %v634_v40   ;;  %930 = vperm.xlu0 %8972, %v892_v41  }
  0x87   : > { %700 = vperm.xlu1 %8973, %v9932_v42   ;;  %950 = vperm.xlu0 %8972, %v9934_v43  }
  0x8b   : > { %940 = vperm.xlu1 %8973, %v9936_v44   ;;  %1445 = vperm.xlu0 %8972, %v633_v20   ;;  %v588_v20 = vld [vmem:[%s9849_s17 + $0xc0] sm:$0xff] }
  0x8c   : > { %621 = vst.msk [vmem:[#allocation2 + $0x139] sm:$0xff] %vm508_vm0, %v588_v20 }
  0x8f   : > { %960 = vperm.xlu1 %8973, %v9940_v45   ;;  %1465 = vperm.xlu0 %8972, %v9884_v21  }
  0x93   : > { %1455 = vperm.xlu1 %8973, %v9880_v19   ;;  %710 = vperm.xlu0 %8972, %v9944_v46  }
  0x97   : > { %1475 = vperm.xlu1 %8973, %v9892_v24   ;;  %970 = vperm.xlu0 %8972, %v9948_v47  }
  0x9b   : > { %720 = vperm.xlu1 %8973, %v9951_v48   ;;  %1485 = vperm.xlu0 %8972, %v9901_v27  }
  0x9f   : > { %980 = vperm.xlu1 %8973, %v9956_v49   ;;  %1190 = vperm.xlu0 %8972, %v1152_v50  }
  0xa3   : > { %1495 = vperm.xlu1 %8973, %v9959_v51   ;;  %1210 = vperm.xlu0 %8972, %v9962_v52  }
  0xa7   : > { %1200 = vperm.xlu1 %8973, %v9964_v53   ;;  %1705 = vperm.xlu0 %8972, %v9890_v23  }
  0xab   : > { %1220 = vperm.xlu1 %8973, %v9970_v55   ;;  %1725 = vperm.xlu0 %8972, %v9896_v25  }
  0xaf   : > { %1715 = vperm.xlu1 %8973, %v9886_v22   ;;  %1230 = vperm.xlu0 %8972, %v9975_v56  }
  0xb3   : > { %1735 = vperm.xlu1 %8973, %v9898_v26   ;;  %1745 = vperm.xlu0 %8972, %v9908_v31  }
  0xb7   : > { %1240 = vperm.xlu1 %8973, %v9980_v57   ;;  %725 = vperm.xlu0 %8972, %v9959_v51  }
  0xbb   : > { %1755 = vperm.xlu1 %8973, %v9984_v58   ;;  %985 = vperm.xlu0 %8972, %v9984_v58  }
  0xbf   : > { %735 = vperm.xlu1 %8973, %v9988_v59   ;;  %1450 = vperm.xlu0 %8972, %v634_v40  }
  0xc0   : > { %v10015_v4 = vpop.permute.xlu0 %665 }
  0xc3   : > { %995 = vperm.xlu1 %8973, %v9992_v60   ;;  %1470 = vperm.xlu0 %8972, %v9932_v42  }
  0xc4   : > { %v10020_v5 = vpop.permute.xlu0 %925 }
  0xc7   : > { %1460 = vperm.xlu1 %8973, %v9928_v39   ;;  %1965 = vperm.xlu0 %8972, %v9915_v34  }
  0xcb   : > { %1480 = vperm.xlu1 %8973, %v9944_v46   ;;  %1985 = vperm.xlu0 %8972, %v9921_v36  }
  0xcf   : > { %1975 = vperm.xlu1 %8973, %v9911_v32   ;;  %745 = vperm.xlu0 %8972, %v10000_v61   ;;  %v583_v32 = vld [vmem:[%s9849_s17 + $0x98] sm:$0xff] }
  0xd0   : > { %616 = vst.msk [vmem:[#allocation2 + $0xf9] sm:$0xff] %vm508_vm0, %v583_v32 }
  0xd3   : > { %1995 = vperm.xlu1 %8973, %v9917_v35   ;;  %1005 = vperm.xlu0 %8972, %v10004_v62  }
  0xd7   : > { %755 = vperm.xlu1 %8973, %v10007_v63   ;;  %1490 = vperm.xlu0 %8972, %v9951_v48  }
  0xdb   : > { %1015 = vperm.xlu1 %8973, %v10011_v2   ;;  %2005 = vperm.xlu0 %8972, %v9925_v38  }
  0xde   : > { %v10027_v8 = vpop.permute.xlu1 %685  ;;  %v10030_v9 = vpop.permute.xlu0 %675 }
  0xdf   : > { %1500 = vperm.xlu1 %8973, %v10023_v6   ;;  %1245 = vperm.xlu0 %8972, %v10025_v7  }
  0xe2   : > { %v10033_v10 = vpop.permute.xlu1 %695  ;;  %v10036_v11 = vpop.permute.xlu0 %945 }
  0xe3   : > { %2015 = vperm.xlu1 %8973, %v10025_v7   ;;  %1710 = vperm.xlu0 %8972, %v9936_v44   ;;  %v585_v44 = vld [vmem:[%s9849_s17 + $0xa8] sm:$0xff] }
  0xe4   : > { %618 = vst.msk [vmem:[#allocation2 + $0x111] sm:$0xff] %vm508_vm0, %v585_v44 }
  0xe6   : > { %v10041_v13 = vpop.permute.xlu1 %935  ;;  %v10044_v14 = vpop.permute.xlu0 %705 }
  0xe7   : > { %1255 = vperm.xlu1 %8973, %v10039_v12   ;;  %1730 = vperm.xlu0 %8972, %v9940_v45  }
  0xea   : > { %v10049_v16 = vpop.permute.xlu1 %955  ;;  %v10052_v17 = vpop.permute.xlu0 %965 }
  0xeb   : > { %1720 = vperm.xlu1 %8973, %v9934_v43   ;;  %2226 = vperm.xlu0 %8972, %v9880_v19  }
  0xee   : > { %v10055_v18 = vpop.permute.xlu1 %715  ;;  %v10059_v23 = vpop.permute.xlu0 %1185 }
  0xef   : > { %1740 = vperm.xlu1 %8973, %v9948_v47   ;;  %2246 = vperm.xlu0 %8972, %v9892_v24   ;;  %v10079_v24 = vld [vmem:[#allocation2 + $0xda] sm:$0xff] }
  0xf2   : > { %v10065_v29 = vpop.permute.xlu1 %975  ;;  %v10068_v30 = vpop.permute.xlu0 %1205 }
  0xf3   : > { %2236 = vperm.xlu1 %8973, %v9884_v21   ;;  %1265 = vperm.xlu0 %8972, %v10063_v28  }
  0xf6   : > { %v10071_v19 = vpop.permute.xlu1 %1195  ;;  %v10075_v33 = vpop.permute.xlu0 %1225 }
  0xf7   : > { %2256 = vperm.xlu1 %8973, %v9901_v27   ;;  %1750 = vperm.xlu0 %8972, %v9956_v49  }
  0xfa   : > { %v10081_v34 = vpop.permute.xlu1 %1215  ;;  %v10084_v21 = vpop.permute.xlu0 %670 }
  0xfb   : > { %1275 = vperm.xlu1 %8973, %v10079_v24   ;;  %2266 = vperm.xlu0 %8972, %v9959_v51   ;;  %v10103_v51 = vld [vmem:[#allocation2 + $0xb0] sm:$0xff] }
  0xfe   : > { %v10089_v40 = vpop.permute.xlu1 %1235  ;;  %v10092_v27 = vpop.permute.xlu0 %690 }
  0xff   : > { %1760 = vperm.xlu1 %8973, %v10087_v37   ;;  %730 = vperm.xlu0 %8972, %v10023_v6  }
 0x102   : > { %v10095_v41 = vpop.permute.xlu1 %680  ;;  %v10099_v50 = vpop.permute.xlu0 %930 }
 0x103   : > { %12798 = vst [vmem:[#allocation17_spill] sm:$0xff] %v10095_v41  ;;  %2276 = vperm.xlu1 %8973, %v9988_v59   ;;  %990 = vperm.xlu0 %8972, %v10087_v37   ;;  %v589_v41 = vld [vmem:[%s9849_s17 + $0xc8] sm:$0xff] }
 0x104   : > { %622 = vst.msk [vmem:[#allocation2 + $0x141] sm:$0xff] %vm508_vm0, %v589_v41 }
 0x106   : > { %v10105_v54 = vpop.permute.xlu1 %700  ;;  %v10108_v3 = vpop.permute.xlu0 %950 }
 0x107   : > { %12799 = vst [vmem:[#allocation18_spill] sm:$0xff] %v10105_v54  ;;  %740 = vperm.xlu1 %8973, %v10103_v51   ;;  %1505 = vperm.xlu0 %8972, %v9988_v59  }
 0x10a   : > { %v10113_v20 = vpop.permute.xlu1 %940  ;;  %v10116_v32 = vpop.permute.xlu0 %1445 }
 0x10b   : > { %1000 = vperm.xlu1 %8973, %v10111_v15   ;;  %1970 = vperm.xlu0 %8972, %v9964_v53  }
 0x10e   : > { %v10119_v44 = vpop.permute.xlu1 %960  ;;  %v10122_v0 = vpop.permute.xlu0 %1465 }
 0x10f   : > { %12800 = vst [vmem:[#allocation19_spill] sm:$0xff] %v10119_v44  ;;  %1515 = vperm.xlu1 %8973, %v10000_v61   ;;  %1990 = vperm.xlu0 %8972, %v9970_v55  }
 0x112   : > { %v10127_v59 = vpop.permute.xlu1 %1455  ;;  %v10130_v54 = vpop.permute.xlu0 %710 }
 0x113   : > { %1980 = vperm.xlu1 %8973, %v9962_v52   ;;  %12801 = vst [vmem:[#allocation20_spill] sm:$0xff] %v10130_v54  ;;  %2486 = vperm.xlu0 %8972, %v9886_v22   ;;  %v10149_v22 = vld [vmem:[#allocation2 + $0xc9] sm:$0xff] }
 0x116   : > { %v10133_v53 = vpop.permute.xlu1 %1475  ;;  %v10137_v44 = vpop.permute.xlu0 %970 }
 0x117   : > { %2000 = vperm.xlu1 %8973, %v9975_v56   ;;  %12802 = vst [vmem:[#allocation21_spill] sm:$0xff] %v10137_v44  ;;  %2506 = vperm.xlu0 %8972, %v9898_v26   ;;  %v10157_v26 = vld [vmem:[#allocation2 + $0xe0] sm:$0xff] }
 0x11a   : > { %v10143_v55 = vpop.permute.xlu1 %720  ;;  %v10146_v52 = vpop.permute.xlu0 %1485 }
 0x11b   : > { %12803 = vst [vmem:[#allocation22_spill] sm:$0xff] %v10143_v55  ;;  %2496 = vperm.xlu1 %8973, %v9896_v25   ;;  %12804 = vst [vmem:[#allocation23_spill] sm:$0xff] %v10146_v52  ;;  %750 = vperm.xlu0 %8972, %v10141_v1   ;;  %v10165_v55 = vld [vmem:[#allocation2 + $0xe1] sm:$0xff] }
 0x11e   : > { %v10151_v54 = vpop.permute.xlu1 %980  ;;  %v10154_v56 = vpop.permute.xlu0 %1190 }
 0x11f   : > { %12805 = vst [vmem:[#allocation24_spill] sm:$0xff] %v10151_v54  ;;  %2516 = vperm.xlu1 %8973, %v9908_v31   ;;  %12806 = vst [vmem:[#allocation25_spill] sm:$0xff] %v10154_v56  ;;  %1010 = vperm.xlu0 %8972, %v10149_v22   ;;  %v10173_v56 = vld [vmem:[#allocation2 + $0xf0] sm:$0xff] }
 0x122   : > { %v10159_v41 = vpop.permute.xlu1 %1495  ;;  %v10162_v25 = vpop.permute.xlu0 %1210 }
 0x123   : > { %12807 = vst [vmem:[#allocation26_spill] sm:$0xff] %v10159_v41  ;;  %760 = vperm.xlu1 %8973, %v10157_v26   ;;  %12808 = vst [vmem:[#allocation27_spill] sm:$0xff] %v10162_v25  ;;  %1525 = vperm.xlu0 %8972, %v10007_v63   ;;  %v10181_v25 = vld [vmem:[#allocation2 + $0x9a] sm:$0xff] }
 0x126   : > { %v10167_v52 = vpop.permute.xlu1 %1200  ;;  %v10170_v31 = vpop.permute.xlu0 %1705 }
 0x127   : > { %12809 = vst [vmem:[#allocation28_spill] sm:$0xff] %v10167_v52  ;;  %1020 = vperm.xlu1 %8973, %v10165_v55   ;;  %2010 = vperm.xlu0 %8972, %v9980_v57  }
 0x12a   : > { %v10175_v54 = vpop.permute.xlu1 %1220  ;;  %v10178_v41 = vpop.permute.xlu0 %1725 }
 0x12b   : > { %12810 = vst [vmem:[#allocation29_spill] sm:$0xff] %v10175_v54  ;;  %1535 = vperm.xlu1 %8973, %v10173_v56   ;;  %12811 = vst [vmem:[#allocation30_spill] sm:$0xff] %v10178_v41  ;;  %2526 = vperm.xlu0 %8972, %v9984_v58   ;;  %v10195_v41 = vld [vmem:[#allocation2 + $0xb2] sm:$0xff] }
 0x12e   : > { %v10183_v44 = vpop.permute.xlu1 %1715  ;;  %v10186_v52 = vpop.permute.xlu0 %1230 }
 0x12f   : > { %12812 = vst [vmem:[#allocation31_spill] sm:$0xff] %v10183_v44  ;;  %2020 = vperm.xlu1 %8973, %v10181_v25   ;;  %12813 = vst [vmem:[#allocation32_spill] sm:$0xff] %v10186_v52  ;;  %1250 = vperm.xlu0 %8972, %v10181_v25  }
 0x132   : > { %v10189_v57 = vpop.permute.xlu1 %1735  ;;  %v10192_v54 = vpop.permute.xlu0 %1745 }
 0x133   : > { %12814 = vst [vmem:[#allocation33_spill] sm:$0xff] %v10189_v57  ;;  %2536 = vperm.xlu1 %8973, %v9992_v60   ;;  %12815 = vst [vmem:[#allocation34_spill] sm:$0xff] %v10192_v54  ;;  %1765 = vperm.xlu0 %8972, %v9992_v60   ;;  %v9443_v54 = vld [vmem:[#allocation2 + $0x32] sm:$0xff] }
 0x136   : > { %v10197_v58 = vpop.permute.xlu1 %1240  ;;  %v10200_v44 = vpop.permute.xlu0 %725 }
 0x137   : > { %12816 = vst [vmem:[#allocation35_spill] sm:$0xff] %v10197_v58  ;;  %1260 = vperm.xlu1 %8973, %v10195_v41   ;;  %12817 = vst [vmem:[#allocation36_spill] sm:$0xff] %v10200_v44  ;;  %2231 = vperm.xlu0 %8972, %v9928_v39  }
 0x13a   : > { %v10203_v52 = vpop.permute.xlu1 %1755  ;;  %v10206_v57 = vpop.permute.xlu0 %985 }
 0x13b   : > { %12818 = vst [vmem:[#allocation37_spill] sm:$0xff] %v10203_v52  ;;  %1775 = vperm.xlu1 %8973, %v10004_v62   ;;  %12819 = vst [vmem:[#allocation38_spill] sm:$0xff] %v10206_v57  ;;  %2251 = vperm.xlu0 %8972, %v9944_v46   ;;  %v10220_v62 = vld [vmem:[#allocation2 + $0xca] sm:$0xff] }
 0x13c   : > { %v590_v57 = vld [vmem:[%s9849_s17 + $0xd0] sm:$0xff] }
 0x13d   : > { %623 = vst.msk [vmem:[#allocation2 + $0x151] sm:$0xff] %vm508_vm0, %v590_v57 }
 0x13e   : > { %v10209_v60 = vpop.permute.xlu1 %735  ;;  %v10212_v58 = vpop.permute.xlu0 %1450 }
 0x13f   : > { %12820 = vst [vmem:[#allocation39_spill] sm:$0xff] %v10209_v60  ;;  %2241 = vperm.xlu1 %8973, %v9932_v42   ;;  %12821 = vst [vmem:[#allocation40_spill] sm:$0xff] %v10212_v58  ;;  %2746 = vperm.xlu0 %8972, %v9443_v54  }
 0x142   : > { %v10214_v44 = vpop.permute.xlu1 %995  ;;  %v10217_v39 = vpop.permute.xlu0 %1470 }
 0x143   : > { %12822 = vst [vmem:[#allocation41_spill] sm:$0xff] %v10214_v44  ;;  %2261 = vperm.xlu1 %8973, %v9951_v48   ;;  %12823 = vst [vmem:[#allocation42_spill] sm:$0xff] %v10217_v39  ;;  %2766 = vperm.xlu0 %8972, %v9917_v35   ;;  %v10236_v35 = vld [vmem:[#allocation2 + $0xe2] sm:$0xff] }
 0x146   : > { %v10223_v46 = vpop.permute.xlu1 %1460  ;;  %v10227_v42 = vpop.permute.xlu0 %1965 }
 0x147   : > { %12824 = vst [vmem:[#allocation43_spill] sm:$0xff] %v10223_v46  ;;  %2756 = vperm.xlu1 %8973, %v9921_v36   ;;  %1270 = vperm.xlu0 %8972, %v10220_v62   ;;  %v10244_v36 = vld [vmem:[#allocation2 + $0xf1] sm:$0xff]  ;;  %v10264_v46 = vld [vmem:[#allocation2 + $0x108] sm:$0xff] }
 0x14a   : > { %v10230_v54 = vpop.permute.xlu1 %1480  ;;  %v10233_v48 = vpop.permute.xlu0 %1985 }
 0x14b   : > { %12825 = vst [vmem:[#allocation44_spill] sm:$0xff] %v10230_v54  ;;  %2776 = vperm.xlu1 %8973, %v9925_v38   ;;  %1785 = vperm.xlu0 %8972, %v10011_v2  }
 0x14e   : > { %v10238_v60 = vpop.permute.xlu1 %1975  ;;  %v10241_v57 = vpop.permute.xlu0 %745 }
 0x14f   : > { %1280 = vperm.xlu1 %8973, %v10236_v35   ;;  %12826 = vst [vmem:[#allocation45_spill] sm:$0xff] %v10241_v57  ;;  %2271 = vperm.xlu0 %8972, %v10023_v6  }
 0x152   : > { %v10246_v44 = vpop.permute.xlu1 %1995  ;;  %v10249_v38 = vpop.permute.xlu0 %1005 }
 0x153   : > { %1795 = vperm.xlu1 %8973, %v10244_v36   ;;  %12827 = vst [vmem:[#allocation46_spill] sm:$0xff] %v10249_v38  ;;  %2786 = vperm.xlu0 %8972, %v10025_v7  }
 0x156   : > { %v10252_v2 = vpop.permute.xlu1 %755  ;;  %v10255_v54 = vpop.permute.xlu0 %1490 }
 0x157   : > { %12828 = vst [vmem:[#allocation47_spill] sm:$0xff] %v10252_v2  ;;  %2281 = vperm.xlu1 %8973, %v10103_v51   ;;  %12829 = vst [vmem:[#allocation48_spill] sm:$0xff] %v10255_v54  ;;  %765 = vperm.xlu0 %8972, %v10173_v56   ;;  %v10272_v2 = vld [vmem:[#allocation2 + $0x109] sm:$0xff] }
 0x15a   : > { %v10258_v57 = vpop.permute.xlu1 %1015  ;;  %v10261_v6 = vpop.permute.xlu0 %2005 }
 0x15b   : > { %12830 = vst [vmem:[#allocation49_spill] sm:$0xff] %v10258_v57  ;;  %2796 = vperm.xlu1 %8973, %v10039_v12   ;;  %12831 = vst [vmem:[#allocation50_spill] sm:$0xff] %v10261_v6  ;;  %1025 = vperm.xlu0 %8972, %v10244_v36  }
 0x15e   : > { %v10266_v38 = vpop.permute.xlu1 %1500  ;;  %v10269_v7 = vpop.permute.xlu0 %1245 }
 0x15f   : > { %12832 = vst [vmem:[#allocation51_spill] sm:$0xff] %v10266_v38  ;;  %775 = vperm.xlu1 %8973, %v10264_v46   ;;  %12833 = vst [vmem:[#allocation52_spill] sm:$0xff] %v10269_v7  ;;  %1510 = vperm.xlu0 %8972, %v10103_v51  }
 0x162   : > { %v10274_v54 = vpop.permute.xlu1 %2015  ;;  %v10277_v57 = vpop.permute.xlu0 %1710 }
 0x163   : > { %12834 = vst [vmem:[#allocation53_spill] sm:$0xff] %v10274_v54  ;;  %1035 = vperm.xlu1 %8973, %v10272_v2   ;;  %12835 = vst [vmem:[#allocation54_spill] sm:$0xff] %v10277_v57  ;;  %2025 = vperm.xlu0 %8972, %v10039_v12   ;;  %v10292_v54 = vld [vmem:[#allocation2 + $0x120] sm:$0xff]  ;;  %v10326_v57 = vld [vmem:[#allocation2 + $0xf8] sm:$0xff] }
 0x164   : > { %12844 = vst [vmem:[#allocation63_spill] sm:$0xff] %v10326_v57 }
 0x166   : > { %v10280_v6 = vpop.permute.xlu1 %1255  ;;  %v10283_v38 = vpop.permute.xlu0 %1730 }
 0x167   : > { %12836 = vst [vmem:[#allocation55_spill] sm:$0xff] %v10280_v6  ;;  %1520 = vperm.xlu1 %8973, %v10141_v1   ;;  %12837 = vst [vmem:[#allocation56_spill] sm:$0xff] %v10283_v38  ;;  %2491 = vperm.xlu0 %8972, %v9934_v43   ;;  %v10300_v43 = vld [vmem:[#allocation2 + $0x121] sm:$0xff] }
 0x168   : > { %v592_v38 = vld [vmem:[%s9849_s17 + $0xe0] sm:$0xff] }
 0x169   : > { %625 = vst.msk [vmem:[#allocation2 + $0x169] sm:$0xff] %vm508_vm0, %v592_v38  ;;  %v10334_v38 = vld [vmem:[#allocation2 + $0xf2] sm:$0xff] }
 0x16a   : > { %v10286_v7 = vpop.permute.xlu1 %1720  ;;  %v10289_v51 = vpop.permute.xlu0 %2226  ;;  %12847 = vst [vmem:[#allocation66_spill] sm:$0xff] %v10334_v38 }
 0x16b   : > { %12838 = vst [vmem:[#allocation57_spill] sm:$0xff] %v10286_v7  ;;  %2035 = vperm.xlu1 %8973, %v10063_v28   ;;  %2511 = vperm.xlu0 %8972, %v9948_v47   ;;  %v10308_v47 = vld [vmem:[#allocation2 + $0x138] sm:$0xff] }
 0x16e   : > { %v10294_v12 = vpop.permute.xlu1 %1740  ;;  %v10297_v1 = vpop.permute.xlu0 %2246 }
 0x16f   : > { %12839 = vst [vmem:[#allocation58_spill] sm:$0xff] %v10294_v12  ;;  %2501 = vperm.xlu1 %8973, %v9940_v45   ;;  %785 = vperm.xlu0 %8972, %v10292_v54   ;;  %v10316_v12 = vld [vmem:[#allocation2 + $0x139] sm:$0xff] }
 0x172   : > { %v10302_v6 = vpop.permute.xlu1 %2236  ;;  %v10305_v28 = vpop.permute.xlu0 %1265 }
 0x173   : > { %2521 = vperm.xlu1 %8973, %v9956_v49   ;;  %12840 = vst [vmem:[#allocation59_spill] sm:$0xff] %v10305_v28  ;;  %1045 = vperm.xlu0 %8972, %v10300_v43  }
 0x176   : > { %v10310_v7 = vpop.permute.xlu1 %2256  ;;  %v10313_v45 = vpop.permute.xlu0 %1750 }
 0x177   : > { %795 = vperm.xlu1 %8973, %v10308_v47   ;;  %12841 = vst [vmem:[#allocation60_spill] sm:$0xff] %v10313_v45  ;;  %1530 = vperm.xlu0 %8972, %v10157_v26   ;;  %v2713_v45 = vld [vmem:[#allocation2 + $0x3a] sm:$0xff] }
 0x17a   : > { %v10320_v49 = vpop.permute.xlu1 %1275  ;;  %v10323_v28 = vpop.permute.xlu0 %2266 }
 0x17b   : > { %12842 = vst [vmem:[#allocation61_spill] sm:$0xff] %v10320_v49  ;;  %1055 = vperm.xlu1 %8973, %v10316_v12   ;;  %12843 = vst [vmem:[#allocation62_spill] sm:$0xff] %v10323_v28  ;;  %2045 = vperm.xlu0 %8972, %v10079_v24  }
 0x17e   : > { %v10328_v39 = vpop.permute.xlu1 %1760  ;;  %v10331_v26 = vpop.permute.xlu0 %730 }
 0x17f   : > { %12845 = vst [vmem:[#allocation64_spill] sm:$0xff] %v10328_v39  ;;  %1540 = vperm.xlu1 %8973, %v10326_v57   ;;  %12846 = vst [vmem:[#allocation65_spill] sm:$0xff] %v10331_v26  ;;  %2531 = vperm.xlu0 %8972, %v10087_v37   ;;  %v10348_v26 = vld [vmem:[#allocation2 + $0x10a] sm:$0xff] }
 0x180   : > { %12852 = vst [vmem:[#allocation71_spill] sm:$0xff] %v10348_v26 }
 0x182   : > { %v10336_v49 = vpop.permute.xlu1 %2276  ;;  %v10339_v28 = vpop.permute.xlu0 %990 }
 0x183   : > { %12848 = vst [vmem:[#allocation67_spill] sm:$0xff] %v10336_v49  ;;  %2055 = vperm.xlu1 %8973, %v10334_v38   ;;  %12849 = vst [vmem:[#allocation68_spill] sm:$0xff] %v10339_v28  ;;  %1285 = vperm.xlu0 %8972, %v10334_v38   ;;  %v591_v28 = vld [vmem:[%s9849_s17 + $0xd8] sm:$0xff] }
 0x184   : > { %624 = vst.msk [vmem:[#allocation2 + $0x159] sm:$0xff] %vm508_vm0, %v591_v28 }
 0x186   : > { %v10342_v24 = vpop.permute.xlu1 %740  ;;  %v10345_v39 = vpop.permute.xlu0 %1505 }
 0x187   : > { %12850 = vst [vmem:[#allocation69_spill] sm:$0xff] %v10342_v24  ;;  %2541 = vperm.xlu1 %8973, %v10111_v15   ;;  %12851 = vst [vmem:[#allocation70_spill] sm:$0xff] %v10345_v39  ;;  %1770 = vperm.xlu0 %8972, %v10111_v15   ;;  %v2717_v39 = vld [vmem:[#allocation2 + $0x6a] sm:$0xff] }
 0x18a   : > { %v10350_v37 = vpop.permute.xlu1 %1000  ;;  %v10353_v49 = vpop.permute.xlu0 %1970 }
 0x18b   : > { %12853 = vst [vmem:[#allocation72_spill] sm:$0xff] %v10350_v37  ;;  %1295 = vperm.xlu1 %8973, %v10348_v26   ;;  %12854 = vst [vmem:[#allocation73_spill] sm:$0xff] %v10353_v49  ;;  %2286 = vperm.xlu0 %8972, %v10000_v61   ;;  %v2715_v61 = vld [vmem:[#allocation2 + $0x52] sm:$0xff]  ;;  %v10368_v26 = vld [vmem:[#allocation2 + $0x122] sm:$0xff] }
 0x18c   : > { %12858 = vst [vmem:[#allocation77_spill] sm:$0xff] %v10368_v26 }
 0x18e   : > { %v10358_v24 = vpop.permute.xlu1 %1515  ;;  %v10361_v15 = vpop.permute.xlu0 %1990 }
 0x18f   : > { %12855 = vst [vmem:[#allocation74_spill] sm:$0xff] %v10358_v24  ;;  %1780 = vperm.xlu1 %8973, %v10149_v22   ;;  %12856 = vst [vmem:[#allocation75_spill] sm:$0xff] %v10361_v15  ;;  %2751 = vperm.xlu0 %8972, %v2713_v45   ;;  %v2719_v22 = vld [vmem:[#allocation2 + $0x82] sm:$0xff] }
 0x190   : > { %v593_v45 = vld [vmem:[%s9849_s17 + $0xe8] sm:$0xff] }
 0x191   : > { %626 = vst.msk [vmem:[#allocation2 + $0x171] sm:$0xff] %vm508_vm0, %v593_v45 }
 0x192   : > { %v10363_v37 = vpop.permute.xlu1 %1980  ;;  %v10366_v49 = vpop.permute.xlu0 %2486 }
 0x193   : > { %12857 = vst [vmem:[#allocation76_spill] sm:$0xff] %v10363_v37  ;;  %2296 = vperm.xlu1 %8973, %v10007_v63   ;;  %2771 = vperm.xlu0 %8972, %v2717_v39   ;;  %v10382_v39 = vld [vmem:[#allocation2 + $0x13a] sm:$0xff] }
 0x194   : > { %12862 = vst [vmem:[#allocation81_spill] sm:$0xff] %v10382_v39 }
 0x196   : > { %v10370_v28 = vpop.permute.xlu1 %2000  ;;  %v10372_v24 = vpop.permute.xlu0 %2506 }
 0x197   : > { %12859 = vst [vmem:[#allocation78_spill] sm:$0xff] %v10370_v28  ;;  %2761 = vperm.xlu1 %8973, %v2715_v61   ;;  %12860 = vst [vmem:[#allocation79_spill] sm:$0xff] %v10372_v24  ;;  %1305 = vperm.xlu0 %8972, %v10368_v26   ;;  %v10390_v26 = vld [vmem:[#allocation2 + $0xf9] sm:$0xff] }
 0x198   : > { %12864 = vst [vmem:[#allocation83_spill] sm:$0xff] %v10390_v26 }
 0x19a   : > { %v10377_v37 = vpop.permute.xlu1 %2496  ;;  %v10379_v63 = vpop.permute.xlu0 %750 }
 0x19b   : > { %2781 = vperm.xlu1 %8973, %v2719_v22   ;;  %12861 = vst [vmem:[#allocation80_spill] sm:$0xff] %v10379_v63  ;;  %1790 = vperm.xlu0 %8972, %v10165_v55  }
 0x19e   : > { %v10384_v15 = vpop.permute.xlu1 %2516  ;;  %v10387_v61 = vpop.permute.xlu0 %1010 }
 0x19f   : > { %1315 = vperm.xlu1 %8973, %v10382_v39   ;;  %12863 = vst [vmem:[#allocation82_spill] sm:$0xff] %v10387_v61  ;;  %2306 = vperm.xlu0 %8972, %v10173_v56   ;;  %v12870_v61 = vmov 0.0  }
 0x1a0   : > { %4397 = vst.msk [vmem:[#allocation3 + $0x10] sm:$0xff] %vm4393_vm2, %v12870_v61  ;;  %4394 = vst.msk [vmem:[#allocation3] sm:$0xff] %vm4393_vm2, %v12870_v61 }
 0x1a1   : > { %4398 = vst.msk [vmem:[#allocation3 + $0x18] sm:$0x3] %vm4395_vm3, %v12870_v61  ;;  %4396 = vst.msk [vmem:[#allocation3 + $0x8] sm:$0x3] %vm4395_vm3, %v12870_v61 }
 0x1a2   : > { %v10392_v45 = vpop.permute.xlu1 %760  ;;  %v10395_v22 = vpop.permute.xlu0 %1525  ;;  %4399 = vst.msk [vmem:[#allocation3 + $0x20] sm:$0xff] %vm4393_vm2, %v12870_v61  ;;  %4401 = vst.msk [vmem:[#allocation3 + $0x30] sm:$0xff] %vm4393_vm2, %v12870_v61 }
 0x1a3   : > { %12865 = vst [vmem:[#allocation84_spill] sm:$0xff] %v10392_v45  ;;  %1800 = vperm.xlu1 %8973, %v10390_v26   ;;  %12866 = vst [vmem:[#allocation85_spill] sm:$0xff] %v10395_v22  ;;  %2791 = vperm.xlu0 %8972, %v10181_v25   ;;  %v10450_v45 = vld [vmem:[#allocation2 + $0x110] sm:$0xff] }
 0x1a4   : > { %4400 = vst.msk [vmem:[#allocation3 + $0x28] sm:$0x3] %vm4395_vm3, %v12870_v61  ;;  %4402 = vst.msk [vmem:[#allocation3 + $0x38] sm:$0x3] %vm4395_vm3, %v12870_v61  ;;  %v10458_v22 = vld [vmem:[#allocation2 + $0x111] sm:$0xff] }
 0x1a5   : > { %4403 = vst.msk [vmem:[#allocation3 + $0x40] sm:$0xff] %vm4393_vm2, %v12870_v61  ;;  %4405 = vst.msk [vmem:[#allocation3 + $0x50] sm:$0xff] %vm4393_vm2, %v12870_v61 }
 0x1a6   : > { %v10398_v55 = vpop.permute.xlu1 %1020  ;;  %v10401_v63 = vpop.permute.xlu0 %2010  ;;  %4404 = vst.msk [vmem:[#allocation3 + $0x48] sm:$0x3] %vm4395_vm3, %v12870_v61  ;;  %4406 = vst.msk [vmem:[#allocation3 + $0x58] sm:$0x3] %vm4395_vm3, %v12870_v61 }
 0x1a7   : > { %12867 = vst [vmem:[#allocation86_spill] sm:$0xff] %v10398_v55  ;;  %2316 = vperm.xlu1 %8973, %v10264_v46   ;;  %12868 = vst [vmem:[#allocation87_spill] sm:$0xff] %v10401_v63  ;;  %770 = vperm.xlu0 %8972, %v10326_v57   ;;  %v10543_v63 = vld [vmem:[#allocation2 + $0xfa] sm:$0xff] }
 0x1a8   : > { %4407 = vst.msk [vmem:[#allocation3 + $0x60] sm:$0xff] %vm4393_vm2, %v12870_v61  ;;  %4409 = vst.msk [vmem:[#allocation3 + $0x70] sm:$0xff] %vm4393_vm2, %v12870_v61 }
 0x1a9   : > { %4408 = vst.msk [vmem:[#allocation3 + $0x68] sm:$0x3] %vm4395_vm3, %v12870_v61  ;;  %4410 = vst.msk [vmem:[#allocation3 + $0x78] sm:$0x3] %vm4395_vm3, %v12870_v61 }
 0x1aa   : > { %v10404_v56 = vpop.permute.xlu1 %1535  ;;  %4411 = vst.msk [vmem:[#allocation3 + $0x80] sm:$0xff] %vm4393_vm2, %v12870_v61  ;;  %4413 = vst.msk [vmem:[#allocation3 + $0x90] sm:$0xff] %vm4393_vm2, %v12870_v61  ;;  %v10447_v25 = vpop.permute.xlu0 %2526 }
 0x1ab   : > { %12869 = vst [vmem:[#allocation88_spill] sm:$0xff] %v10404_v56  ;;  %4412 = vst.msk [vmem:[#allocation3 + $0x88] sm:$0x3] %vm4395_vm3, %v12870_v61  ;;  %2801 = vperm.xlu1 %8973, %v10195_v41   ;;  %1030 = vperm.xlu0 %8972, %v10390_v26   ;;  %v2464_v26 = vld [vmem:[#allocation2 + $0xc1] sm:$0xff] }
 0x1ac   : > { %4414 = vst.msk [vmem:[#allocation3 + $0x98] sm:$0x3] %vm4395_vm3, %v12870_v61  ;;  %12871 = vst [vmem:[#allocation89_spill] sm:$0xff] %v10447_v25 }
 0x1ad   : > { %12872 = vst [vmem:[#allocation90_spill] sm:$0xff] %v10450_v45  ;;  %12875 = vst [vmem:[#allocation93_spill] sm:$0xff] %v10458_v22 }
 0x1ae   : > { %v10452_v56 = vpop.permute.xlu1 %2020  ;;  %v10455_v55 = vpop.permute.xlu0 %1250  ;;  %12900 = vst [vmem:[#allocation118_spill] sm:$0xff] %v10543_v63 }
 0x1af   : > { %12873 = vst [vmem:[#allocation91_spill] sm:$0xff] %v10452_v56  ;;  %780 = vperm.xlu1 %8973, %v10450_v45   ;;  %12874 = vst [vmem:[#allocation92_spill] sm:$0xff] %v10455_v55  ;;  %1545 = vperm.xlu0 %8972, %v10264_v46   ;;  %v10471_v46 = vld [vmem:[#allocation2 + $0x128] sm:$0xff] }
 0x1b0   : > { %12880 = vst [vmem:[#allocation98_spill] sm:$0xff] %v10471_v46 }
 0x1b2   : > { %v10460_v39 = vpop.permute.xlu1 %2536  ;;  %v10463_v61 = vpop.permute.xlu0 %1765 }
 0x1b3   : > { %12876 = vst [vmem:[#allocation94_spill] sm:$0xff] %v10460_v39  ;;  %1040 = vperm.xlu1 %8973, %v10458_v22   ;;  %12877 = vst [vmem:[#allocation95_spill] sm:$0xff] %v10463_v61  ;;  %2030 = vperm.xlu0 %8972, %v10195_v41   ;;  %v2466_v61 = vld [vmem:[#allocation2 + $0xd9] sm:$0xff]  ;;  %v10479_v41 = vld [vmem:[#allocation2 + $0x129] sm:$0xff]  ;;  %v823_v39 = vlaneseq }
 0x1b4   : > { %12883 = vst [vmem:[#allocation101_spill] sm:$0xff] %v10479_v41 }
 0x1b6   : > { %v10466_v25 = vpop.permute.xlu1 %1260  ;;  %v10469_v56 = vpop.permute.xlu0 %2231 }
 0x1b7   : > { %12878 = vst [vmem:[#allocation96_spill] sm:$0xff] %v10466_v25  ;;  %1555 = vperm.xlu1 %8973, %v10292_v54   ;;  %12879 = vst [vmem:[#allocation97_spill] sm:$0xff] %v10469_v56  ;;  %2546 = vperm.xlu0 %8972, %v2464_v26   ;;  %v594_v54 = vld [vmem:[%s9849_s17 + $0xf0] sm:$0xff]  ;;  %v10488_v26 = vld [vmem:[#allocation2 + $0x140] sm:$0xff] }
 0x1b8   : > { %627 = vst.msk [vmem:[#allocation2 + $0x181] sm:$0xff] %vm508_vm0, %v594_v54  ;;  %12885 = vst [vmem:[#allocation103_spill] sm:$0xff] %v10488_v26 }
 0x1ba   : > { %v10473_v55 = vpop.permute.xlu1 %1775  ;;  %v10476_v22 = vpop.permute.xlu0 %2251 }
 0x1bb   : > { %12881 = vst [vmem:[#allocation99_spill] sm:$0xff] %v10473_v55  ;;  %2040 = vperm.xlu1 %8973, %v10220_v62   ;;  %12882 = vst [vmem:[#allocation100_spill] sm:$0xff] %v10476_v22  ;;  %790 = vperm.xlu0 %8972, %v10471_v46   ;;  %v10490_v62 = vshrl.u32 %v823_v39, 7  ;;  %v10511_v39 = vld [vmem:[%s12716_s1] sm:$0xff] }
 0x1bd   : > { %12886 = vst [vmem:[#allocation104_spill] sm:$0xff] %v10490_v62  ;;  %v10504_v54 = vsub.s32 1, %v10490_v62  ;;  %v1605_v22 = vsub.s32 3, %v10490_v62 }
 0x1be   : > { %v10481_v25 = vpop.permute.xlu1 %2241  ;;  %v10484_v56 = vpop.permute.xlu0 %2746 }
 0x1bf   : > { %12884 = vst [vmem:[#allocation102_spill] sm:$0xff] %v10481_v25  ;;  %2556 = vperm.xlu1 %8973, %v2466_v61   ;;  %1050 = vperm.xlu0 %8972, %v10479_v41   ;;  %v10498_v25 = vld [vmem:[#allocation2 + $0x141] sm:$0xff]  ;;  %v10501_v61 = vsub.s32 0, %v10490_v62  ;;  %12891 = vst [vmem:[#allocation109_spill] sm:$0xff] %v10504_v54  ;;  %v10546_v58 = vrot.slane %v10511_v39, %v1605_v22 }
 0x1c0   : > { %12889 = vst [vmem:[#allocation107_spill] sm:$0xff] %v10498_v25 }
 0x1c1   : > { %12890 = vst [vmem:[#allocation108_spill] sm:$0xff] %v10501_v61  ;;  %v10526_v28 = vrot.slane %v10511_v39, %v10501_v61  ;;  %12901 = vst [vmem:[#allocation119_spill] sm:$0xff] %v10546_v58 }
 0x1c2   : > { %v10492_v55 = vpop.permute.xlu1 %2261  ;;  %v10495_v46 = vpop.permute.xlu0 %2766 }
 0x1c3   : > { %12887 = vst [vmem:[#allocation105_spill] sm:$0xff] %v10492_v55  ;;  %800 = vperm.xlu1 %8973, %v10488_v26   ;;  %12888 = vst [vmem:[#allocation106_spill] sm:$0xff] %v10495_v46  ;;  %1565 = vperm.xlu0 %8972, %v10308_v47   ;;  %v10517_v47 = vsub.s32 2, %v10490_v62  ;;  %v10520_v55 = vld [vmem:[#allocation2 + $0x150] sm:$0xff] }
 0x1c4   : > { %12894 = vst [vmem:[#allocation112_spill] sm:$0xff] %v10520_v55  ;;  %12895 = vst [vmem:[#allocation113_spill] sm:$0xff] %v10526_v28 }
 0x1c5   : > { %12893 = vst [vmem:[#allocation111_spill] sm:$0xff] %v10517_v47  ;;  %v10540_v38 = vrot.slane %v10511_v39, %v10517_v47 }
 0x1c6   : > { %v10506_v41 = vpop.permute.xlu1 %2756  ;;  %v10514_v26 = vpop.permute.xlu0 %1270 }
 0x1c7   : > { %1060 = vperm.xlu1 %8973, %v10498_v25   ;;  %12892 = vst [vmem:[#allocation110_spill] sm:$0xff] %v10514_v26  ;;  %2050 = vperm.xlu0 %8972, %v10236_v35   ;;  %v10530_v25 = vrot.slane %v10511_v39, %v10504_v54  ;;  %12899 = vst [vmem:[#allocation117_spill] sm:$0xff] %v10540_v38  ;;  %v12902_v54 = vsub.s32 4, %v10490_v62 }
 0x1c9   : > { %12896 = vst [vmem:[#allocation114_spill] sm:$0xff] %v10530_v25  ;;  %v10551_v26 = vrot.slane %v10511_v39, %v12902_v54  ;;  %v1091_v47 = vmul.f32 %v10530_v25, %v10036_v11  ;;  %v1089_v54 = vmul.f32 %v10530_v25, %v10041_v13  ;;  %v1093_v57 = vmul.f32 %v10530_v25, %v10049_v16 }
 0x1ca   : > { %v10533_v45 = vpop.permute.xlu1 %2776  ;;  %v10536_v35 = vpop.permute.xlu0 %1785  ;;  %v1347_v13 = vmul.f32 %v10540_v38, %v10059_v23  ;;  %v1097_v16 = vmul.f32 %v10530_v25, %v10065_v29  ;;  %v837_v23 = vmul.f32 %v10526_v28, %v10055_v18  ;;  %v1355_v29 = vmul.f32 %v10540_v38, %v10075_v33 }
 0x1cb   : > { %12897 = vst [vmem:[#allocation115_spill] sm:$0xff] %v10533_v45  ;;  %1575 = vperm.xlu1 %8973, %v10520_v55   ;;  %12898 = vst [vmem:[#allocation116_spill] sm:$0xff] %v10536_v35  ;;  %2566 = vperm.xlu0 %8972, %v10244_v36   ;;  %v827_v55 = vmul.f32 %v10526_v28, %v10015_v4  ;;  %v1087_v35 = vmul.f32 %v10530_v25, %v10020_v5  ;;  %v12904_v36 = vsub.s32 5, %v10490_v62 }
 0x1cc   : > { %12903 = vst [vmem:[#allocation120_spill] sm:$0xff] %v10551_v26  ;;  %v1095_v4 = vmul.f32 %v10530_v25, %v10052_v17  ;;  %v833_v17 = vmul.f32 %v10526_v28, %v10033_v10  ;;  %v835_v5 = vmul.f32 %v10526_v28, %v10044_v14  ;;  %v12909_v14 = vsub.s32 6, %v10490_v62 }
 0x1cd   : > { %v10562_v52 = vrot.slane %v10511_v39, %v12904_v36  ;;  %v831_v36 = vmul.f32 %v10526_v28, %v10027_v8  ;;  %v1351_v8 = vmul.f32 %v10540_v38, %v10068_v30  ;;  %v1353_v18 = vmul.f32 %v10540_v38, %v10081_v34 }
 0x1ce   : > { %v10564_v22 = vpop.permute.xlu1 %1280  ;;  %v10574_v11 = vpop.permute.xlu0 %2271  ;;  %v1125_v45 = vadd.f32 %v1093_v57, %v833_v17  ;;  %v1127_v24 = vadd.f32 %v1095_v4, %v835_v5  ;;  %v10602_v30 = vrot.slane %v10511_v39, %v12909_v14  ;;  %v1357_v33 = vmul.f32 %v10540_v38, %v10089_v40  ;;  %v10612_v57 = vld [vmem:[#allocation2 + $0x112] sm:$0xff]  ;;  %v2205_v5 = vld [vmem:[#allocation2 + $0xc8] sm:$0xff] }
 0x1cf   : > { %12905 = vst [vmem:[#allocation121_spill] sm:$0xff] %v10562_v52  ;;  %12906 = vst [vmem:[#allocation122_spill] sm:$0xff] %v10564_v22  ;;  %2060 = vperm.xlu1 %8973, %v10543_v63   ;;  %v829_v22 = vmul.f32 %v10526_v28, %v10030_v9  ;;  %1290 = vperm.xlu0 %8972, %v10543_v63   ;;  %v1349_v9 = vmul.f32 %v10540_v38, %v10071_v19  ;;  %v12912_v17 = vld [vmem:[#allocation17_spill] sm:$0xff] }
 0x1d0   : > { %12907 = vst [vmem:[#allocation123_spill] sm:$0xff] %v10574_v11  ;;  %v1119_v11 = vadd.f32 %v1087_v35, %v827_v55  ;;  %v1123_v46 = vadd.f32 %v1091_v47, %v831_v36  ;;  %v1129_v47 = vadd.f32 %v1097_v16, %v837_v23  ;;  %v1092_v4 = vmul.f32 %v10530_v25, %v10108_v3 }
 0x1d1   : > { %v1121_v10 = vadd.f32 %v1089_v54, %v829_v22  ;;  %v1088_v54 = vmul.f32 %v10530_v25, %v10099_v50  ;;  %v828_v34 = vmul.f32 %v10526_v28, %v10084_v21  ;;  %v1607_v40 = vmul.f32 %v10546_v58, %v10116_v32 }
 0x1d2   : > { %v10597_v63 = vpop.permute.xlu1 %1795  ;;  %v10605_v19 = vpop.permute.xlu0 %2786  ;;  %v1379_v55 = vadd.f32 %v1347_v13, %v1119_v11  ;;  %v1383_v35 = vadd.f32 %v1351_v8, %v1123_v46  ;;  %v1387_v11 = vadd.f32 %v1355_v29, %v1127_v24  ;;  %v832_v46 = vmul.f32 %v10526_v28, %v10092_v27  ;;  %v12910_v13 = vld [vmem:[#allocation19_spill] sm:$0xff] }
 0x1d3   : > { %12908 = vst [vmem:[#allocation124_spill] sm:$0xff] %v10597_v63  ;;  %2576 = vperm.xlu1 %8973, %v10272_v2   ;;  %1805 = vperm.xlu0 %8972, %v10272_v2   ;;  %v1381_v22 = vadd.f32 %v1349_v9, %v1121_v10  ;;  %v2646_v2 = vsub.s32 7, %v10490_v62  ;;  %v1090_v50 = vmul.f32 %v10530_v25, %v10113_v20  ;;  %v12913_v9 = vld [vmem:[#allocation18_spill] sm:$0xff]  ;;  %v2724_v10 = vld [vmem:[#allocation2 + $0xc2] sm:$0xff] }
 0x1d4   : > { %v1094_v3 = vmul.f32 %v10530_v25, %v12910_v13  ;;  %v1611_v24 = vmul.f32 %v10546_v58, %v10122_v0  ;;  %v1385_v32 = vadd.f32 %v1353_v18, %v1125_v45  ;;  %v10636_v16 = vadd.f32 %v1357_v33, %v1129_v47  ;;  %v12967_v63 = vld [vmem:[#allocation67_spill] sm:$0xff] }
 0x1d5   : > { %v830_v8 = vmul.f32 %v10526_v28, %v12912_v17  ;;  %v1867_v27 = vmul.f32 %v10551_v26, %v10170_v31  ;;  %v1120_v20 = vadd.f32 %v1088_v54, %v828_v34  ;;  %v834_v23 = vmul.f32 %v10526_v28, %v12913_v9 }
 0x1d6   : > { %v10623_v36 = vpop.permute.xlu1 %2281  ;;  %v10634_v21 = vpop.permute.xlu0 %765  ;;  %v10644_v29 = vadd.f32 %v1092_v4, %v832_v46  ;;  %v1609_v0 = vmul.f32 %v10546_v58, %v10127_v59  ;;  %v1639_v45 = vadd.f32 %v1607_v40, %v1379_v55  ;;  %v1613_v14 = vmul.f32 %v10546_v58, %v10133_v53  ;;  %v12916_v53 = vld [vmem:[#allocation20_spill] sm:$0xff]  ;;  %v2207_v46 = vld [vmem:[#allocation2 + $0xe0] sm:$0xff] }
 0x1d7   : > { %1300 = vperm.xlu1 %8973, %v10612_v57   ;;  %12911 = vst [vmem:[#allocation19_spill] sm:$0xff] %v10634_v21  ;;  %2291 = vperm.xlu0 %8972, %v2205_v5   ;;  %v2127_v47 = vmul.f32 %v10562_v52, %v10227_v42  ;;  %v10653_v31 = vrot.slane %v10511_v39, %v2646_v2  ;;  %v12914_v5 = vld [vmem:[#allocation21_spill] sm:$0xff]  ;;  %v12917_v39 = vld [vmem:[#allocation31_spill] sm:$0xff] }
 0x1d8   : > { %v10657_v33 = vadd.f32 %v1090_v50, %v830_v8  ;;  %v10659_v54 = vadd.f32 %v1094_v3, %v834_v23  ;;  %v1643_v4 = vadd.f32 %v1611_v24, %v1383_v35  ;;  %v1096_v59 = vmul.f32 %v10530_v25, %v12914_v5  ;;  %v12918_v50 = vld [vmem:[#allocation23_spill] sm:$0xff]  ;;  %v12919_v3 = vld [vmem:[#allocation24_spill] sm:$0xff]  ;;  %v12920_v24 = vld [vmem:[#allocation25_spill] sm:$0xff] }
 0x1d9   : > { %v836_v42 = vmul.f32 %v10526_v28, %v12916_v53  ;;  %v1899_v34 = vadd.f32 %v1867_v27, %v1639_v45  ;;  %v1869_v40 = vmul.f32 %v10551_v26, %v12917_v39  ;;  %v2388_v2 = vmul.f32 %v10602_v30, %v10289_v51  ;;  %v10681_v8 = vld [vmem:[%s12716_s1 + $0x8] ss:$0 sm:$0xff]  ;;  %v1176_v27 = vld [vmem:[#allocation2 + $0x12a] sm:$0xff]  ;;  %v12922_v45 = vld [vmem:[#allocation22_spill] sm:$0xff] }
 0x1da   : > { %v10655_v18 = vpop.permute.xlu1 %2796  ;;  %v10664_v55 = vpop.permute.xlu0 %1025  ;;  %v1641_v35 = vadd.f32 %v1609_v0, %v1381_v22  ;;  %v1615_v13 = vmul.f32 %v10546_v58, %v12918_v50  ;;  %v1348_v17 = vmul.f32 %v10540_v38, %v12920_v24  ;;  %v1645_v9 = vadd.f32 %v1613_v14, %v1385_v32  ;;  %v12923_v53 = vld [vmem:[#allocation30_spill] sm:$0xff]  ;;  %v12924_v50 = vld [vmem:[#allocation33_spill] sm:$0xff] }
 0x1db   : > { %1815 = vperm.xlu1 %8973, %v10300_v43   ;;  %12915 = vst [vmem:[#allocation17_spill] sm:$0xff] %v10664_v55  ;;  %2806 = vperm.xlu0 %8972, %v2724_v10   ;;  %v1098_v43 = vmul.f32 %v10530_v25, %v12919_v3  ;;  %v2159_v51 = vadd.f32 %v2127_v47, %v1899_v34  ;;  %v2726_v34 = vld [vmem:[#allocation2 + $0xda] sm:$0xff] }
 0x1dc   : > { %v2129_v22 = vmul.f32 %v10562_v52, %v10238_v60  ;;  %v2648_v23 = vmul.f32 %v10653_v31, %v10366_v49  ;;  %v10689_v10 = vadd.f32 %v1096_v59, %v836_v42  ;;  %v838_v5 = vmul.f32 %v10526_v28, %v12922_v45  ;;  %v10704_v59 = vld [vmem:[%s12717_s2] sm:$0x7] }
 0x1dd   : > { %v1871_v39 = vmul.f32 %v10551_v26, %v12923_v53  ;;  %v1873_v32 = vmul.f32 %v10551_v26, %v12924_v50  ;;  %v1901_v60 = vadd.f32 %v1869_v40, %v1641_v35  ;;  %v2420_v47 = vadd.f32 %v2388_v2, %v2159_v51  ;;  %v12931_v50 = vld [vmem:[#allocation79_spill] sm:$0xff] }
 0x1de   : > { %v10687_v0 = vpop.permute.xlu1 %775  ;;  %v10697_v14 = vpop.permute.xlu0 %1510  ;;  %v2390_v49 = vmul.f32 %v10602_v30, %v10302_v6  ;;  %v2908_v42 = vmul.f32 %v10681_v8, %v10484_v56  ;;  %v10708_v3 = vadd.f32 %v1615_v13, %v1387_v11  ;;  %v10712_v24 = vadd.f32 %v1348_v17, %v1120_v20 }
 0x1df   : > { %12921 = vst [vmem:[#allocation18_spill] sm:$0xff] %v10687_v0  ;;  %2301 = vperm.xlu1 %8973, %v2207_v46   ;;  %12925 = vst [vmem:[#allocation21_spill] sm:$0xff] %v10697_v14  ;;  %1310 = vperm.xlu0 %8972, %v1176_v27   ;;  %v10710_v46 = vadd.f32 %v1098_v43, %v838_v5  ;;  %v2133_v40 = vmul.f32 %v10562_v52, %v10246_v44 }
 0x1e0   : > { %v2131_v6 = vmul.f32 %v10562_v52, %v10233_v48  ;;  %v2161_v2 = vadd.f32 %v2129_v22, %v1901_v60  ;;  %v2680_v35 = vadd.f32 %v2648_v23, %v2420_v47  ;;  %v2650_v51 = vmul.f32 %v10653_v31, %v10377_v37  ;;  %v12929_v22 = vld [vmem:[#allocation27_spill] sm:$0xff]  ;;  %v12933_v60 = vld [vmem:[#allocation29_spill] sm:$0xff] }
 0x1e1   : > { %v1903_v27 = vadd.f32 %v1871_v39, %v1643_v4  ;;  %v1905_v11 = vadd.f32 %v1873_v32, %v1645_v9  ;;  %v2394_v13 = vmul.f32 %v10602_v30, %v10310_v7  ;;  %v10726_v20 = vrot.slane %v10704_v59, %v10501_v61  ;;  %v10735_v4 = vld [vmem:[#allocation2 + $0x142] sm:$0xff]  ;;  %v12928_v7 = vld [vmem:[#allocation26_spill] sm:$0xff] }
 0x1e2   : > { %v10720_v56 = vpop.permute.xlu1 %1035  ;;  %v10728_v44 = vpop.permute.xlu0 %2025  ;;  %v2392_v48 = vmul.f32 %v10602_v30, %v10297_v1  ;;  %v2422_v43 = vadd.f32 %v2390_v49, %v2161_v2  ;;  %v2940_v17 = vadd.f32 %v2908_v42, %v2680_v35  ;;  %v2910_v37 = vmul.f32 %v10681_v8, %v10506_v41  ;;  %v12930_v1 = vld [vmem:[#allocation28_spill] sm:$0xff]  ;;  %v12934_v42 = vld [vmem:[#allocation115_spill] sm:$0xff]  ;;  %v12935_v2 = vld [vmem:[#allocation106_spill] sm:$0xff] }
 0x1e3   : > { %12926 = vst [vmem:[#allocation20_spill] sm:$0xff] %v10720_v56  ;;  %2816 = vperm.xlu1 %8973, %v2726_v34   ;;  %12927 = vst [vmem:[#allocation31_spill] sm:$0xff] %v10728_v44  ;;  %1825 = vperm.xlu0 %8972, %v10316_v12   ;;  %v1617_v9 = vmul.f32 %v10546_v58, %v12928_v7  ;;  %v1352_v23 = vmul.f32 %v10540_v38, %v12929_v22  ;;  %v12939_v7 = vld [vmem:[#allocation34_spill] sm:$0xff] }
 0x1e4   : > { %v2165_v45 = vadd.f32 %v2133_v40, %v1905_v11  ;;  %v2654_v5 = vmul.f32 %v10653_v31, %v10384_v15  ;;  %v1350_v53 = vmul.f32 %v10540_v38, %v12930_v1  ;;  %v2163_v39 = vadd.f32 %v2131_v6, %v1903_v27  ;;  %v12936_v27 = vld [vmem:[#allocation63_spill] sm:$0xff]  ;;  %v10760_v11 = vld [vmem:[#allocation2 + $0x151] sm:$0xff] }
 0x1e5   : > { %v2652_v41 = vmul.f32 %v10653_v31, %v12931_v50  ;;  %v2682_v12 = vadd.f32 %v2650_v51, %v2422_v43  ;;  %v1354_v47 = vmul.f32 %v10540_v38, %v12933_v60  ;;  %v2914_v34 = vmul.f32 %v10681_v8, %v12934_v42  ;;  %12937 = vst [vmem:[#allocation24_spill] sm:$0xff] %v10760_v11  ;;  %v12942_v50 = vld [vmem:[#allocation40_spill] sm:$0xff] }
 0x1e6   : > { %v10747_v32 = vpop.permute.xlu1 %1520  ;;  %v2426_v49 = vadd.f32 %v2394_v13, %v2165_v45  ;;  %v10754_v15 = vpop.permute.xlu0 %2491  ;;  %v2424_v40 = vadd.f32 %v2392_v48, %v2163_v39  ;;  %v2977_v6 = vadd.f32 %v10726_v20, %v2940_v17  ;;  %v2912_v35 = vmul.f32 %v10681_v8, %v12935_v2  ;;  %v12938_v13 = vld [vmem:[#allocation32_spill] sm:$0xff]  ;;  %v12940_v45 = vld [vmem:[#allocation35_spill] sm:$0xff]  ;;  %v12941_v39 = vld [vmem:[#allocation37_spill] sm:$0xff] }
 0x1e7   : > { %12932 = vst [vmem:[#allocation23_spill] sm:$0xff] %v10747_v32  ;;  %1320 = vperm.xlu1 %8973, %v10735_v4   ;;  %v2942_v51 = vadd.f32 %v2910_v37, %v2682_v12  ;;  %2311 = vperm.xlu0 %8972, %v12936_v27   ;;  %v1356_v43 = vmul.f32 %v10540_v38, %v12938_v13  ;;  %v9559_v60 = vmov 1983009808   ;;  %v595_v27 = vld [vmem:[%s9849_s17 + $0xf8] sm:$0xff]  ;;  %v12961_v32 = vld [vmem:[#allocation71_spill] sm:$0xff]  ;;  %s9561_s17 = smov 64  }
 0x1e8   : > { %v1875_v22 = vmul.f32 %v10551_v26, %v12939_v7  ;;  %v1358_v48 = vmul.f32 %v10540_v38, %v12940_v45  ;;  %v2686_v1 = vadd.f32 %v2654_v5, %v2426_v49  ;;  %v1877_v17 = vmul.f32 %v10551_v26, %v12941_v39  ;;  %628 = vst.msk [vmem:[#allocation2 + $0x189] sm:$0xff] %vm508_vm0, %v595_v27  ;;  %v12944_v49 = vld [vmem:[#allocation109_spill] sm:$0xff]  ;;  %v12948_v27 = vld [vmem:[#allocation44_spill] sm:$0xff] }
 0x1e9   : > { %v1608_v37 = vmul.f32 %v10546_v58, %v12942_v50  ;;  %v2684_v12 = vadd.f32 %v2652_v41, %v2424_v40  ;;  %v3147_v42 = vunpack.c.l.s4 %v9559_v60  ;;  %v1649_v13 = vadd.f32 %v1617_v9, %v10636_v16  ;;  %v12945_v16 = vld [vmem:[#allocation66_spill] sm:$0xff] }
 0x1ea   : > { %v10772_v2 = vpop.permute.xlu1 %2035  ;;  %v1384_v7 = vadd.f32 %v1352_v23, %v10644_v29  ;;  %v1382_v0 = vadd.f32 %v1350_v53, %v10657_v33  ;;  %v2946_v45 = vadd.f32 %v2914_v34, %v2686_v1  ;;  %v10779_v5 = vpop.permute.xlu0 %2511  ;;  %v10784_v41 = vrot.slane %v10704_v59, %v12944_v49  ;;  %v12946_v23 = vld [vmem:[#allocation42_spill] sm:$0xff]  ;;  %v12958_v49 = vld [vmem:[#allocation56_spill] sm:$0xff] }
 0x1eb   : > { %12943 = vst [vmem:[#allocation25_spill] sm:$0xff] %v10772_v2  ;;  %1835 = vperm.xlu1 %8973, %v10760_v11   ;;  %v3009_v40 = vmax.f32 %v2977_v6, 0.0  ;;  %v2944_v39 = vadd.f32 %v2912_v35, %v2684_v12  ;;  %v2979_v50 = vadd.f32 %v10726_v20, %v2942_v51  ;;  %2826 = vperm.xlu0 %8972, %v12945_v16   ;;  %v3148_v6 = vunpack.c.0.s8 %v3147_v42  ;;  %v12947_v51 = vld [vmem:[#allocation43_spill] sm:$0xff]  ;;  %v12953_v42 = vld [vmem:[#allocation112_spill] sm:$0xff]  ;;  %v12954_v16 = vld [vmem:[#allocation50_spill] sm:$0xff] }
 0x1ec   : > { %v1386_v29 = vadd.f32 %v1354_v47, %v10659_v54  ;;  %v1388_v33 = vadd.f32 %v1356_v43, %v10689_v10  ;;  %v1907_v9 = vadd.f32 %v1875_v22, %v10708_v3  ;;  %v1612_v53 = vmul.f32 %v10546_v58, %v12946_v23  ;;  %v12949_v10 = vld [vmem:[#allocation111_spill] sm:$0xff]  ;;  %v12950_v43 = vld [vmem:[#allocation90_spill] sm:$0xff] }
 0x1ed   : > { %v1390_v34 = vadd.f32 %v1358_v48, %v10710_v46  ;;  %v1909_v1 = vadd.f32 %v1877_v17, %v1649_v13  ;;  %v1640_v60 = vadd.f32 %v1608_v37, %v10712_v24  ;;  %v1610_v12 = vmul.f32 %v10546_v58, %v12947_v51  ;;  %v12952_v24 = vld [vmem:[#allocation48_spill] sm:$0xff]  ;;  %v12955_v23 = vld [vmem:[#allocation51_spill] sm:$0xff]  ;;  %v12956_v51 = vld [vmem:[#allocation53_spill] sm:$0xff] }
 0x1ee   : > { %v10795_v35 = vpop.permute.xlu1 %2501  ;;  %v1614_v54 = vmul.f32 %v10546_v58, %v12948_v27  ;;  %v10803_v3 = vrot.slane %v10704_v59, %v12949_v10  ;;  %v2983_v47 = vadd.f32 %v10726_v20, %v2946_v45  ;;  %v10807_v46 = vpop.permute.xlu0 %785  ;;  %v1616_v22 = vmul.f32 %v10546_v58, %v12952_v24  ;;  %v12957_v10 = vld [vmem:[#allocation54_spill] sm:$0xff] }
 0x1ef   : > { %2321 = vperm.xlu1 %8973, %v12950_v43   ;;  %12951 = vst [vmem:[#allocation22_spill] sm:$0xff] %v10807_v46  ;;  %v3045_v48 = vmul.f32 %v10784_v41, %v3009_v40  ;;  %v2981_v17 = vadd.f32 %v10726_v20, %v2944_v39  ;;  %v3011_v37 = vmax.f32 %v2979_v50, 0.0  ;;  %805 = vperm.xlu0 %8972, %v12953_v42   ;;  %v12959_v39 = vld [vmem:[#allocation57_spill] sm:$0xff]  ;;  %vm7834_vm0 = vcmask 1043456  }
 0x1f0   : > { %v1644_v13 = vadd.f32 %v1612_v53, %v1384_v7  ;;  %v2135_v59 = vmul.f32 %v10562_v52, %v12954_v16  ;;  %v1618_v45 = vmul.f32 %v10546_v58, %v12955_v23  ;;  %v2137_v27 = vmul.f32 %v10562_v52, %v12956_v51  ;;  %v12960_v23 = vld [vmem:[#allocation58_spill] sm:$0xff] }
 0x1f1   : > { %v1868_v24 = vmul.f32 %v10551_v26, %v12957_v10  ;;  %v1872_v40 = vmul.f32 %v10551_v26, %v12958_v49  ;;  %v1870_v50 = vmul.f32 %v10551_v26, %v12959_v39  ;;  %v10827_v7 = vsub.s32 %v3148_v6, %v10490_v62  ;;  %v10839_v6 = vld [vmem:[#allocation2 + $0x168] sm:$0xff] }
 0x1f2   : > { %v10829_v53 = vpop.permute.xlu1 %2521  ;;  %v1642_v16 = vadd.f32 %v1610_v12, %v1382_v0  ;;  %v1646_v46 = vadd.f32 %v1614_v54, %v1386_v29  ;;  %v1874_v21 = vmul.f32 %v10551_v26, %v12960_v23  ;;  %v3015_v51 = vmax.f32 %v2983_v47, 0.0  ;;  %v10834_v10 = vpop.permute.xlu0 %1045  ;;  %v12963_v54 = vld [vmem:[#allocation60_spill] sm:$0xff] }
 0x1f3   : > { %2836 = vperm.xlu1 %8973, %v12961_v32   ;;  %12962 = vst [vmem:[#allocation30_spill] sm:$0xff] %v10834_v10  ;;  %v1648_v56 = vadd.f32 %v1616_v22, %v1388_v33  ;;  %v3081_v49 = vadd.f32 %v10803_v3, %v3045_v48  ;;  %v3013_v14 = vmax.f32 %v2981_v17, 0.0  ;;  %v3047_v39 = vmul.f32 %v10784_v41, %v3011_v37  ;;  %v12964_v10 = vld [vmem:[#allocation62_spill] sm:$0xff]  ;;  %v12966_v17 = vld [vmem:[#allocation64_spill] sm:$0xff] }
 0x1f4   : > { %1065 = vperm.xlu0 %8972, %v10760_v11   ;;  %v2167_v0 = vadd.f32 %v2135_v59, %v1907_v9  ;;  %v1650_v29 = vadd.f32 %v1618_v45, %v1390_v34  ;;  %v2169_v12 = vadd.f32 %v2137_v27, %v1909_v1  ;;  %v1876_v47 = vmul.f32 %v10551_v26, %v12963_v54  ;;  %v12974_v54 = vld [vmem:[#allocation87_spill] sm:$0xff] }
 0x1f5   : > { %v1900_v23 = vadd.f32 %v1868_v24, %v1640_v60  ;;  %v1904_v62 = vadd.f32 %v1872_v40, %v1644_v13  ;;  %v1902_v55 = vadd.f32 %v1870_v50, %v1642_v16  ;;  %v2396_v33 = vmul.f32 %v10602_v30, %v12964_v10  ;;  %v12969_v60 = vld [vmem:[#allocation73_spill] sm:$0xff]  ;;  %v12972_v40 = vld [vmem:[#allocation76_spill] sm:$0xff]  ;;  %v12973_v16 = vld [vmem:[#allocation78_spill] sm:$0xff] }
 0x1f6   : > { %v10845_v22 = vpop.permute.xlu1 %795  ;;  %v1906_v48 = vadd.f32 %v1874_v21, %v1646_v46  ;;  %v1878_v37 = vmul.f32 %v10551_v26, %v12966_v17  ;;  %v2398_v9 = vmul.f32 %v10602_v30, %v12967_v63  ;;  %v3051_v34 = vmul.f32 %v10784_v41, %v3015_v51  ;;  %v10853_v1 = vpop.permute.xlu0 %1530  ;;  %v10860_v46 = vld [vmem:[#allocation2 + $0x169] sm:$0xff]  ;;  %v12975_v17 = vld [vmem:[#allocation89_spill] sm:$0xff] }
 0x1f7   : > { %12965 = vst [vmem:[#allocation33_spill] sm:$0xff] %v10845_v22  ;;  %815 = vperm.xlu1 %8973, %v10839_v6   ;;  %12968 = vst [vmem:[#allocation26_spill] sm:$0xff] %v10853_v1  ;;  %v2128_v13 = vmul.f32 %v10562_v52, %v12969_v60  ;;  %v3145_v59 = vcombine.high %v3081_v49, %v3081_v49  ;;  %v3049_v45 = vmul.f32 %v10784_v41, %v3013_v14  ;;  %v12971_v63 = vld [vmem:[#allocation75_spill] sm:$0xff] }
 0x1f8   : > { %v3083_v21 = vadd.f32 %v10803_v3, %v3047_v39  ;;  %1550 = vperm.xlu0 %8972, %v12950_v43   ;;  %12970 = vst [vmem:[#allocation27_spill] sm:$0xff] %v10860_v46  ;;  %v1908_v27 = vadd.f32 %v1876_v47, %v1648_v56  ;;  %v2132_v24 = vmul.f32 %v10562_v52, %v12971_v63  ;;  %v12977_v63 = vld [vmem:[#allocation91_spill] sm:$0xff] }
 0x1f9   : > { %v2130_v50 = vmul.f32 %v10562_v52, %v12972_v40  ;;  %v2134_v51 = vmul.f32 %v10562_v52, %v12973_v16  ;;  %v2428_v10 = vadd.f32 %v2396_v33, %v2167_v0  ;;  %v2136_v14 = vmul.f32 %v10562_v52, %v12974_v54 }
 0x1fa   : > { %v2656_v39 = vmul.f32 %v10653_v31, %v12975_v17  ;;  %v3152_v43 = vrot.slane %v3081_v49, %v10827_v7  ;;  %v10873_v60 = vpop.permute.xlu1 %1055  ;;  %v1910_v56 = vadd.f32 %v1878_v37, %v1650_v29  ;;  %v2430_v47 = vadd.f32 %v2398_v9, %v2169_v12  ;;  %v10879_v0 = vpop.permute.xlu0 %2045  ;;  %v12979_v9 = vld [vmem:[#allocation94_spill] sm:$0xff]  ;;  %v2465_v17 = vld [vmem:[#allocation2 + $0xc9] sm:$0xff] }
 0x1fb   : > { %12976 = vst [vmem:[#allocation28_spill] sm:$0xff] %v10873_v60  ;;  %v2138_v22 = vmul.f32 %v10562_v52, %v12977_v63  ;;  %v3087_v40 = vadd.f32 %v10803_v3, %v3051_v34  ;;  %1075 = vperm.xlu1 %8973, %v10860_v46   ;;  %12978 = vst [vmem:[#allocation79_spill] sm:$0xff] %v10879_v0  ;;  %v2160_v33 = vadd.f32 %v2128_v13, %v1900_v23  ;;  %v12980_v23 = vld [vmem:[#allocation97_spill] sm:$0xff]  ;;  %v12982_v0 = vld [vmem:[#allocation100_spill] sm:$0xff] }
 0x1fc   : > { %v3159_v16 = vrot.slane %v3145_v59, %v10827_v7  ;;  %v3085_v54 = vadd.f32 %v10803_v3, %v3049_v45  ;;  %v10884_v49 = vrot.slane %v3083_v21, %v10827_v7  ;;  %2065 = vperm.xlu0 %8972, %v12961_v32   ;;  %v2164_v29 = vadd.f32 %v2132_v24, %v1904_v62  ;;  %v12984_v24 = vld [vmem:[#allocation102_spill] sm:$0xff] }
 0x1fd   : > { %v2162_v12 = vadd.f32 %v2130_v50, %v1902_v55  ;;  %v2166_v37 = vadd.f32 %v2134_v51, %v1906_v48  ;;  %v2658_v34 = vmul.f32 %v10653_v31, %v12979_v9  ;;  %v10889_v63 = vadd.f32 %v2136_v14, %v1908_v27  ;;  %v12983_v48 = vld [vmem:[#allocation98_spill] sm:$0xff] }
 0x1fe   : > { %v2688_v60 = vadd.f32 %v2656_v39, %v2428_v10  ;;  %v2389_v13 = vmul.f32 %v10602_v30, %v12980_v23  ;;  %v3160_v59 = vcombine.high %v3152_v43, %v3152_v43  ;;  %v10893_v45 = vpop.permute.xlu1 %1540  ;;  %v10895_v1 = vadd.f32 %v2138_v22, %v1910_v56  ;;  %v10903_v27 = vpop.permute.xlu0 %2531  ;;  %v12985_v39 = vld [vmem:[#allocation105_spill] sm:$0xff] }
 0x1ff   : > { %12981 = vst [vmem:[#allocation29_spill] sm:$0xff] %v10893_v45  ;;  %v2393_v62 = vmul.f32 %v10602_v30, %v12982_v0  ;;  %v3179_v55 = vcombine.high %v3083_v21, %v3083_v21  ;;  %v10900_v32 = vrot.slane %v3087_v40, %v10827_v7  ;;  %1560 = vperm.xlu1 %8973, %v12983_v48   ;;  %v8305_v23 = vrot.slane %v3152_v43, 9 }
 0x200   : > { %v2391_v50 = vmul.f32 %v10602_v30, %v12984_v24  ;;  %v3161_v51 = vcombine.high %v3159_v16, %v3159_v16  ;;  %v3213_v10 = vcombine.high %v3085_v54, %v3085_v54  ;;  %v3194_v22 = vcombine.high %v10884_v49, %v10884_v49  ;;  %2551 = vperm.xlu0 %8972, %v2465_v17   ;;  %v12987_v17 = vld [vmem:[#allocation77_spill] sm:$0xff] }
 0x201   : > { %v2690_v14 = vadd.f32 %v2658_v34, %v2430_v47  ;;  %v2395_v21 = vmul.f32 %v10602_v30, %v12985_v39  ;;  %v3220_v56 = vrot.slane %v3085_v54, %v10827_v7  ;;  %v3247_v0 = vcombine.high %v3087_v40, %v3087_v40  ;;  %v12989_v39 = vld [vmem:[#allocation103_spill] sm:$0xff] }
 0x202   : > { %v10912_v9 = vadd.f32 %v2389_v13, %v2160_v33  ;;  %v8306_v48 = vrot.slane %v3160_v59, 9  ;;  %v2916_v24 = vmul.f32 %v10681_v8, %v10605_v19  ;;  %v10916_v45 = vpop.permute.xlu1 %2055  ;;  %v10918_v44 = vadd.f32 %v2393_v62, %v2164_v29  ;;  %v10924_v40 = vpop.permute.xlu0 %1285  ;;  %v2467_v29 = vld [vmem:[#allocation2 + $0xe1] sm:$0xff] }
 0x203   : > { %12986 = vst [vmem:[#allocation115_spill] sm:$0xff] %v10916_v45  ;;  %v8307_v52 = vrot.slane %v3159_v16, 9  ;;  %v3193_v47 = vrot.slane %v3179_v55, %v10827_v7  ;;  %v3262_v34 = vcombine.high %v10900_v32, %v10900_v32  ;;  %2075 = vperm.xlu1 %8973, %v12987_v17   ;;  %12988 = vst [vmem:[#allocation106_spill] sm:$0xff] %v10924_v40  ;;  %v8308_v54 = vrot.slane %v3161_v51, 9 }
 0x204   : > { %v10926_v33 = vadd.f32 %v2391_v50, %v2162_v12  ;;  %v3227_v13 = vrot.slane %v3213_v10, %v10827_v7  ;;  %v8314_v19 = vrot.slane %v3194_v22, 9  ;;  %1570 = vperm.xlu0 %8972, %v12989_v39   ;;  %v10930_v62 = vadd.f32 %v2395_v21, %v2166_v37 }
 0x205   : > { %v3228_v45 = vcombine.high %v3220_v56, %v3220_v56  ;;  %v3261_v55 = vrot.slane %v3247_v0, %v10827_v7  ;;  %v2918_v2 = vmul.f32 %v10681_v8, %v10655_v18  ;;  %v10935_v17 = vmax.f32 %v3152_v43, %v8305_v23  ;;  %v12991_v23 = vld [vmem:[#allocation81_spill] sm:$0xff] }
 0x206   : > { %v4202_v40 = vmax.f32 %v3160_v59, %v8306_v48  ;;  %v8313_v12 = vrot.slane %v10884_v49, 9  ;;  %v2948_v50 = vadd.f32 %v2916_v24, %v2688_v60  ;;  %v10938_v26 = vpop.permute.xlu1 %2541  ;;  %v10940_v10 = vmax.f32 %v3159_v16, %v8307_v52  ;;  %v10942_v21 = vpop.permute.xlu0 %1770  ;;  %v10947_v59 = vld [vmem:[#allocation2 + $0x158] sm:$0xff] }
 0x207   : > { %v3195_v39 = vcombine.high %v3193_v47, %v3193_v47  ;;  %v8315_v58 = vrot.slane %v3193_v47, 9  ;;  %v8330_v37 = vrot.slane %v3262_v34, 9  ;;  %2561 = vperm.xlu1 %8973, %v2467_v29   ;;  %12990 = vst [vmem:[#allocation63_spill] sm:$0xff] %v10942_v21  ;;  %v10944_v0 = vmax.f32 %v3161_v51, %v8308_v54 }
 0x208   : > { %v3229_v38 = vcombine.high %v3227_v13, %v3227_v13  ;;  %v8321_v18 = vrot.slane %v3220_v56, 9  ;;  %v4210_v43 = vmax.f32 %v3194_v22, %v8314_v19  ;;  %2085 = vperm.xlu0 %8972, %v12991_v23   ;;  %v8322_v60 = vrot.slane %v3228_v45, 9  ;;  %v12993_v23 = vld [vmem:[#allocation123_spill] sm:$0xff] }
 0x209   : > { %v3263_v48 = vcombine.high %v3261_v55, %v3261_v55  ;;  %v8329_v52 = vrot.slane %v10900_v32, 9  ;;  %v2950_v16 = vadd.f32 %v2918_v2, %v2690_v14  ;;  %v8323_v24 = vrot.slane %v3227_v13, 9 }
 0x20a   : > { %v4209_v29 = vmax.f32 %v10884_v49, %v8313_v12  ;;  %v8331_v28 = vrot.slane %v3261_v55, 9  ;;  %v2985_v51 = vadd.f32 %v10726_v20, %v2948_v50  ;;  %v10952_v54 = vpop.permute.xlu1 %1295  ;;  %v8316_v21 = vrot.slane %v3195_v39, 9  ;;  %v10957_v46 = vpop.permute.xlu0 %2286  ;;  %v12995_v12 = vld [vmem:[#allocation83_spill] sm:$0xff]  ;;  %v10962_v50 = vld [vmem:[#allocation2 + $0x152] sm:$0xff] }
 0x20b   : > { %12992 = vst [vmem:[#allocation32_spill] sm:$0xff] %v10952_v54  ;;  %v4211_v22 = vmax.f32 %v3193_v47, %v8315_v58  ;;  %v4226_v19 = vmax.f32 %v3262_v34, %v8330_v37  ;;  %v2397_v25 = vmul.f32 %v10602_v30, %v12993_v23  ;;  %1580 = vperm.xlu1 %8973, %v10947_v59   ;;  %12994 = vst [vmem:[#allocation34_spill] sm:$0xff] %v10957_v46 }
 0x20c   : > { %v8324_v11 = vrot.slane %v3229_v38, 9  ;;  %v4217_v2 = vmax.f32 %v3220_v56, %v8321_v18  ;;  %v4330_v14 = vmax.f32 %v4202_v40, %v4210_v43  ;;  %v2649_v49 = vmul.f32 %v10653_v31, %v10754_v15  ;;  %2571 = vperm.xlu0 %8972, %v12995_v12  }
 0x20d   : > { %v4218_v54 = vmax.f32 %v3228_v45, %v8322_v60  ;;  %v8332_v58 = vrot.slane %v3263_v48, 9  ;;  %v4225_v47 = vmax.f32 %v10900_v32, %v8329_v52  ;;  %v2987_v34 = vadd.f32 %v10726_v20, %v2950_v16 }
 0x20e   : > { %v4219_v37 = vmax.f32 %v3227_v13, %v8323_v24  ;;  %v4329_v23 = vmax.f32 %v10935_v17, %v4209_v29  ;;  %v4227_v46 = vmax.f32 %v3261_v55, %v8331_v28  ;;  %v3017_v56 = vmax.f32 %v2985_v51, 0.0  ;;  %v10967_v40 = vpop.permute.xlu1 %1780  ;;  %v2752_v45 = vpop.permute.xlu0 %2751 }
 0x20f   : > { %v4212_v18 = vmax.f32 %v3195_v39, %v8316_v21  ;;  %v4331_v15 = vmax.f32 %v10940_v10, %v4211_v22  ;;  %v4338_v43 = vmax.f32 %v4218_v54, %v4226_v19  ;;  %v10971_v12 = vadd.f32 %v2397_v25, %v10889_v63  ;;  %2095 = vperm.xlu1 %8973, %v10962_v50  }
 0x210   : > { %v4486_v32 = vrot.slane %v4330_v14, %v10501_v61  ;;  %v2681_v13 = vadd.f32 %v2649_v49, %v10912_v9  ;;  %v2653_v28 = vmul.f32 %v10653_v31, %v10779_v5  ;;  %v2909_v55 = vmul.f32 %v10681_v8, %v2752_v45  ;;  %1325 = vperm.xlu0 %8972, %v10962_v50   ;;  %v2212_v14 = vld [vmem:[#allocation2 + $0x120] sm:$0xff] }
 0x211   : > { %v4220_v17 = vmax.f32 %v3229_v38, %v8324_v11  ;;  %v4228_v10 = vmax.f32 %v3263_v48, %v8332_v58  ;;  %v4337_v39 = vmax.f32 %v4217_v2, %v4225_v47  ;;  %v3019_v21 = vmax.f32 %v2987_v34, 0.0  ;;  %v12996_v11 = vld [vmem:[#allocation93_spill] sm:$0xff] }
 0x212   : > { %v4482_v25 = vrot.slane %v4329_v23, %v10501_v61  ;;  %v4339_v63 = vmax.f32 %v4219_v37, %v4227_v46  ;;  %v3053_v60 = vmul.f32 %v10784_v41, %v3017_v56  ;;  %v2941_v52 = vadd.f32 %v2909_v55, %v2681_v13  ;;  %v10982_v16 = vpop.permute.xlu1 %2296  ;;  %v2772_v48 = vpop.permute.xlu0 %2771  ;;  %v2725_v55 = vld [vmem:[#allocation2 + $0xca] sm:$0xff] }
 0x213   : > { %v4332_v9 = vmax.f32 %v10944_v0, %v4212_v18  ;;  %v4490_v5 = vrot.slane %v4331_v15, %v10501_v61  ;;  %v4518_v24 = vrot.slane %v4338_v43, %v10501_v61  ;;  %v2651_v38 = vmul.f32 %v10653_v31, %v10795_v35  ;;  %2581 = vperm.xlu1 %8973, %v12996_v11   ;;  %v10995_v0 = vld [vmem:[#allocation2 + $0x16a] sm:$0xff] }
 0x214   : > { %v4736_v29 = vsel %vm4735_vm4, %v4486_v32, %v4482_v25  ;;  %v2685_v46 = vadd.f32 %v2653_v28, %v10918_v44  ;;  %v2978_v51 = vadd.f32 %v10726_v20, %v2941_v52  ;;  %v2913_v54 = vmul.f32 %v10681_v8, %v2772_v48  ;;  %1810 = vperm.xlu0 %8972, %v12996_v11  }
 0x215   : > { %v4340_v22 = vmax.f32 %v4220_v17, %v4228_v10  ;;  %v4514_v19 = vrot.slane %v4337_v39, %v10501_v61  ;;  %v2399_v35 = vmul.f32 %v10602_v30, %v10623_v36  ;;  %v3055_v2 = vmul.f32 %v10784_v41, %v3019_v21 }
 0x216   : > { %v4522_v49 = vrot.slane %v4339_v63, %v10501_v61  ;;  %v3089_v44 = vadd.f32 %v10803_v3, %v3053_v60  ;;  %v3010_v58 = vmax.f32 %v2978_v51, 0.0  ;;  %v2945_v47 = vadd.f32 %v2913_v54, %v2685_v46  ;;  %v2762_v34 = vpop.permute.xlu1 %2761  ;;  %v11009_v36 = vpop.permute.xlu0 %1305 }
 0x217   : > { %v4749_v37 = vsel %vm4735_vm4, %v4518_v24, %v4514_v19  ;;  %v2683_v23 = vadd.f32 %v2651_v38, %v10926_v33  ;;  %v2655_v56 = vmul.f32 %v10653_v31, %v10829_v53  ;;  %v2911_v18 = vmul.f32 %v10681_v8, %v2762_v34  ;;  %1335 = vperm.xlu1 %8973, %v10995_v0  }
 0x218   : > { %12997 = vst [vmem:[#allocation35_spill] sm:$0xff] %v11009_v36  ;;  %v4494_v15 = vrot.slane %v4332_v9, %v10501_v61  ;;  %v4738_v43 = vsel %vm4737_vm5, %v4490_v5, %v4736_v29  ;;  %v3046_v45 = vmul.f32 %v10784_v41, %v3010_v58  ;;  %v2982_v32 = vadd.f32 %v10726_v20, %v2945_v47  ;;  %v12998_v9 = vld [vmem:[#allocation101_spill] sm:$0xff] }
 0x219   : > { %2326 = vperm.xlu0 %8972, %v2212_v14   ;;  %v4526_v33 = vrot.slane %v4340_v22, %v10501_v61  ;;  %v11017_v13 = vadd.f32 %v2399_v35, %v10895_v1  ;;  %v3091_v53 = vadd.f32 %v10803_v3, %v3055_v2  ;;  %v2943_v28 = vadd.f32 %v2911_v18, %v2683_v23  ;;  %v2214_v29 = vld [vmem:[#allocation2 + $0x138] sm:$0xff] }
 0x21a   : > { %v4750_v17 = vsel %vm4737_vm5, %v4522_v49, %v4749_v37  ;;  %v3281_v10 = vcombine.high %v3089_v44, %v3089_v44  ;;  %v3082_v39 = vadd.f32 %v10803_v3, %v3046_v45  ;;  %v3014_v21 = vmax.f32 %v2982_v32, 0.0  ;;  %v2782_v25 = vpop.permute.xlu1 %2781  ;;  %v11029_v5 = vpop.permute.xlu0 %1790 }
 0x21b   : > { %v11023_v63 = vrot.slane %v3089_v44, %v10827_v7  ;;  %v2687_v60 = vadd.f32 %v2655_v56, %v10930_v62  ;;  %v2980_v52 = vadd.f32 %v10726_v20, %v2943_v28  ;;  %v2915_v1 = vmul.f32 %v10681_v8, %v2782_v25  ;;  %1820 = vperm.xlu1 %8973, %v12998_v9  }
 0x21c   : > { %12999 = vst [vmem:[#allocation37_spill] sm:$0xff] %v11029_v5  ;;  %v3162_v24 = vcombine.high %v3082_v39, %v3082_v39  ;;  %v3169_v38 = vrot.slane %v3082_v39, %v10827_v7  ;;  %v3050_v11 = vmul.f32 %v10784_v41, %v3014_v21  ;;  %v11034_v48 = vsel %vm4739_vm6, %v4494_v15, %v4738_v43  ;;  %v13001_v15 = vld [vmem:[#allocation107_spill] sm:$0xff] }
 0x21d   : > { %2811 = vperm.xlu0 %8972, %v2725_v55   ;;  %v3315_v46 = vcombine.high %v3091_v53, %v3091_v53  ;;  %v3012_v62 = vmax.f32 %v2980_v52, 0.0  ;;  %v2947_v51 = vadd.f32 %v2915_v1, %v2687_v60  ;;  %v11037_v54 = vsel %vm4739_vm6, %v4526_v33, %v4750_v17  ;;  %v2727_v43 = vld [vmem:[#allocation2 + $0xe2] sm:$0xff] }
 0x21e   : > { %v11040_v22 = vrot.slane %v3091_v53, %v10827_v7  ;;  %v3176_v19 = vrot.slane %v3162_v24, %v10827_v7  ;;  %v3177_v35 = vcombine.high %v3169_v38, %v3169_v38  ;;  %v3086_v2 = vadd.f32 %v10803_v3, %v3050_v11  ;;  %v11044_v14 = vpop.permute.xlu1 %1315  ;;  %v11055_v34 = vpop.permute.xlu0 %2306 }
 0x21f   : > { %13000 = vst [vmem:[#allocation40_spill] sm:$0xff] %v11044_v14  ;;  %v11047_v49 = vrot.slane %v3281_v10, %v10827_v7  ;;  %v11051_v44 = vcombine.high %v11023_v63, %v11023_v63  ;;  %v3048_v58 = vmul.f32 %v10784_v41, %v3012_v62  ;;  %v2984_v47 = vadd.f32 %v10726_v20, %v2947_v51 }
 0x220   : > { %2336 = vperm.xlu1 %8973, %v2214_v29   ;;  %v2657_v37 = vmul.f32 %v10653_v31, %v10903_v27  ;;  %v3178_v23 = vcombine.high %v3176_v19, %v3176_v19  ;;  %v8309_v56 = vrot.slane %v3169_v38, 9  ;;  %v8310_v18 = vrot.slane %v3177_v35, 9  ;;  %v11084_v29 = vld [vmem:[#allocation2 + $0x159] sm:$0xff] }
 0x221   : > { %1830 = vperm.xlu0 %8972, %v13001_v15   ;;  %v3230_v45 = vcombine.high %v3086_v2, %v3086_v2  ;;  %v3237_v32 = vrot.slane %v3086_v2, %v10827_v7  ;;  %v3084_v33 = vadd.f32 %v10803_v3, %v3048_v58  ;;  %v3016_v53 = vmax.f32 %v2984_v47, 0.0 }
 0x222   : > { %v11063_v28 = vrot.slane %v3315_v46, %v10827_v7  ;;  %v11067_v55 = vcombine.high %v11040_v22, %v11040_v22  ;;  %v8311_v27 = vrot.slane %v3176_v19, 9  ;;  %v8312_v17 = vrot.slane %v3178_v23, 9  ;;  %v11069_v10 = vpop.permute.xlu1 %1800  ;;  %v11072_v52 = vpop.permute.xlu0 %2791 }
 0x223   : > { %13002 = vst [vmem:[#allocation66_spill] sm:$0xff] %v11069_v10  ;;  %v3244_v39 = vrot.slane %v3230_v45, %v10827_v7  ;;  %v3245_v21 = vcombine.high %v3237_v32, %v3237_v32  ;;  %v8325_v25 = vrot.slane %v3237_v32, 9  ;;  %v3196_v60 = vcombine.high %v3084_v33, %v3084_v33 }
 0x224   : > { %2821 = vperm.xlu1 %8973, %v2727_v43   ;;  %v11075_v1 = vadd.f32 %v2657_v37, %v10971_v12  ;;  %v11079_v9 = vmul.f32 %v10653_v31, %v10938_v26  ;;  %v3203_v24 = vrot.slane %v3084_v33, %v10827_v7  ;;  %v3052_v11 = vmul.f32 %v10784_v41, %v3016_v53  ;;  %v13004_v53 = vld [vmem:[#allocation118_spill] sm:$0xff] }
 0x225   : > { %2346 = vperm.xlu0 %8972, %v12953_v42   ;;  %v4205_v46 = vmax.f32 %v3169_v38, %v8309_v56  ;;  %v4206_v62 = vmax.f32 %v3177_v35, %v8310_v18  ;;  %v3246_v51 = vcombine.high %v3244_v39, %v3244_v39  ;;  %v8326_v2 = vrot.slane %v3245_v21, 9 }
 0x226   : > { %v3210_v12 = vrot.slane %v3196_v60, %v10827_v7  ;;  %v3211_v58 = vcombine.high %v3203_v24, %v3203_v24  ;;  %v8317_v47 = vrot.slane %v3203_v24, 9  ;;  %v3088_v26 = vadd.f32 %v10803_v3, %v3052_v11  ;;  %v11088_v37 = vpop.permute.xlu1 %2316  ;;  %v11091_v38 = vpop.permute.xlu0 %770 }
 0x227   : > { %v4207_v15 = vmax.f32 %v3176_v19, %v8311_v27  ;;  %v4208_v43 = vmax.f32 %v3178_v23, %v8312_v17  ;;  %v8327_v45 = vrot.slane %v3244_v39, 9  ;;  %v4221_v42 = vmax.f32 %v3237_v32, %v8325_v25  ;;  %13003 = vst [vmem:[#allocation42_spill] sm:$0xff] %v11091_v38 }
 0x228   : > { %1840 = vperm.xlu1 %8973, %v11084_v29   ;;  %v3212_v35 = vcombine.high %v3210_v12, %v3210_v12  ;;  %v8318_v56 = vrot.slane %v3211_v58, 9  ;;  %v8319_v18 = vrot.slane %v3210_v12, 9  ;;  %v4213_v33 = vmax.f32 %v3203_v24, %v8317_v47 }
 0x229   : > { %2831 = vperm.xlu0 %8972, %v13004_v53   ;;  %v8328_v60 = vrot.slane %v3246_v51, 9  ;;  %v4222_v14 = vmax.f32 %v3245_v21, %v8326_v2  ;;  %v3264_v11 = vcombine.high %v3088_v26, %v3088_v26  ;;  %v3271_v10 = vrot.slane %v3088_v26, %v10827_v7 }
 0x22a   : > { %v8320_v19 = vrot.slane %v3212_v35, 9  ;;  %v4214_v23 = vmax.f32 %v3211_v58, %v8318_v56  ;;  %v4215_v27 = vmax.f32 %v3210_v12, %v8319_v18  ;;  %v4333_v32 = vmax.f32 %v4205_v46, %v4213_v33  ;;  %v2802_v17 = vpop.permute.xlu1 %2801  ;;  %v11097_v24 = vpop.permute.xlu0 %1030 }
 0x22b   : > { %v4223_v25 = vmax.f32 %v3244_v39, %v8327_v45  ;;  %v3278_v5 = vrot.slane %v3264_v11, %v10827_v7  ;;  %v3279_v38 = vcombine.high %v3271_v10, %v3271_v10  ;;  %v8333_v36 = vrot.slane %v3271_v10, 9  ;;  %13005 = vst [vmem:[#allocation43_spill] sm:$0xff] %v11097_v24  ;;  %v13072_v24 = vld [vmem:[#allocation116_spill] sm:$0xff] }
 0x22c   : > { %2356 = vperm.xlu1 %8973, %v10839_v6   ;;  %v4216_v47 = vmax.f32 %v3212_v35, %v8320_v19  ;;  %v4334_v53 = vmax.f32 %v4206_v62, %v4214_v23  ;;  %v4335_v21 = vmax.f32 %v4207_v15, %v4215_v27  ;;  %v4498_v2 = vrot.slane %v4333_v32, %v10501_v61 }
 0x22d   : > { %810 = vperm.xlu0 %8972, %v10947_v59   ;;  %v3280_v58 = vcombine.high %v3278_v5, %v3278_v5  ;;  %v8334_v12 = vrot.slane %v3279_v38, 9  ;;  %v8335_v46 = vrot.slane %v3278_v5, 9  ;;  %v4229_v26 = vmax.f32 %v3271_v10, %v8333_v36 }
 0x22e   : > { %v4336_v39 = vmax.f32 %v4208_v43, %v4216_v47  ;;  %v4502_v45 = vrot.slane %v4334_v53, %v10501_v61  ;;  %v4506_v56 = vrot.slane %v4335_v21, %v10501_v61  ;;  %v4742_v18 = vsel %vm4741_vm7, %v4498_v2, %v11034_v48  ;;  %v11105_v33 = vpop.permute.xlu1 %780  ;;  %v11108_v19 = vpop.permute.xlu0 %1545  ;;  %v11115_v48 = vld [vmem:[#allocation2 + $0x170] sm:$0xff] }
 0x22f   : > { %13006 = vst [vmem:[#allocation44_spill] sm:$0xff] %v11105_v33  ;;  %v8336_v62 = vrot.slane %v3280_v58, 9  ;;  %v4230_v15 = vmax.f32 %v3279_v38, %v8334_v12  ;;  %v4231_v35 = vmax.f32 %v3278_v5, %v8335_v46  ;;  %v4341_v11 = vmax.f32 %v4221_v42, %v4229_v26  ;;  %13007 = vst [vmem:[#allocation90_spill] sm:$0xff] %v11108_v19  ;;  %v11138_v46 = vld [vmem:[#allocation2 + $0x171] sm:$0xff] }
 0x230   : > { %2841 = vperm.xlu1 %8973, %v10612_v57   ;;  %v4224_v23 = vmax.f32 %v3246_v51, %v8328_v60  ;;  %v4510_v36 = vrot.slane %v4336_v39, %v10501_v61  ;;  %v4744_v10 = vsel %vm4743_vm8, %v4502_v45, %v4742_v18  ;;  %v2917_v43 = vmul.f32 %v10681_v8, %v11072_v52  ;;  %v13069_v19 = vld [vmem:[#allocation92_spill] sm:$0xff] }
 0x231   : > { %1070 = vperm.xlu0 %8972, %v11084_v29   ;;  %v4746_v38 = vsel %vm4745_vm9, %v4506_v56, %v4744_v10  ;;  %v4232_v5 = vmax.f32 %v3280_v58, %v8336_v62  ;;  %v4342_v42 = vmax.f32 %v4222_v14, %v4230_v15  ;;  %v4343_v27 = vmax.f32 %v4223_v25, %v4231_v35  ;;  %v9444_v10 = vld [vmem:[#allocation2 + $0x112] sm:$0xff] }
 0x232   : > { %v8338_v57 = vrot.slane %v11051_v44, 9  ;;  %v4748_v51 = vsel %vm4747_vm10, %v4510_v36, %v4746_v38  ;;  %v4530_v60 = vrot.slane %v4341_v11, %v10501_v61  ;;  %v2949_v32 = vadd.f32 %v2917_v43, %v11075_v1  ;;  %v11122_v47 = vpop.permute.xlu1 %1040  ;;  %v11129_v25 = vpop.permute.xlu0 %2030  ;;  %v11161_v43 = vld [vmem:[#allocation2 + $0x180] sm:$0xff] }
 0x233   : > { %13008 = vst [vmem:[#allocation48_spill] sm:$0xff] %v11122_v47  ;;  %v8346_v52 = vrot.slane %v11067_v55, 9  ;;  %4807 = vst.msk [vmem:[#allocation3 + $0x11] sm:$0xff] %vm4393_vm2, %v4748_v51  ;;  %v4344_v53 = vmax.f32 %v4224_v23, %v4232_v5  ;;  %v4534_v21 = vrot.slane %v4342_v42, %v10501_v61  ;;  %v4538_v14 = vrot.slane %v4343_v27, %v10501_v61  ;;  %v2472_v42 = vld [vmem:[#allocation2 + $0x121] sm:$0xff]  ;;  %v13061_v47 = vld [vmem:[#allocation65_spill] sm:$0xff] }
 0x234   : > { %820 = vperm.xlu1 %8973, %v11115_v48   ;;  %v2691_v2 = vadd.f32 %v11079_v9, %v11017_v13  ;;  %v4752_v1 = vsel %vm4741_vm7, %v4530_v60, %v11037_v54  ;;  %v2986_v58 = vadd.f32 %v10726_v20, %v2949_v32  ;;  %v2919_v12 = vmul.f32 %v10681_v8, %v2802_v17 }
 0x235   : > { %1585 = vperm.xlu0 %8972, %v10839_v6   ;;  %v3331_v26 = vcombine.high %v11063_v28, %v11063_v28  ;;  %v8345_v39 = vrot.slane %v11040_v22, 9  ;;  %v4542_v45 = vrot.slane %v4344_v53, %v10501_v61  ;;  %v4753_v13 = vsel %vm4743_vm8, %v4534_v21, %v4752_v1 }
 0x236   : > { %v8347_v9 = vrot.slane %v11063_v28, 9  ;;  %v4754_v54 = vsel %vm4745_vm9, %v4538_v14, %v4753_v13  ;;  %v3018_v56 = vmax.f32 %v2986_v58, 0.0  ;;  %v2951_v18 = vadd.f32 %v2919_v12, %v2691_v2  ;;  %v11147_v8 = vpop.permute.xlu1 %1555  ;;  %v11155_v35 = vpop.permute.xlu0 %2546 }
 0x237   : > { %13009 = vst [vmem:[#allocation112_spill] sm:$0xff] %v11147_v8  ;;  %v3297_v6 = vcombine.high %v11047_v49, %v11047_v49  ;;  %v8337_v17 = vrot.slane %v11023_v63, 9  ;;  %v4242_v62 = vmax.f32 %v11067_v55, %v8346_v52  ;;  %v4755_v15 = vsel %vm4747_vm10, %v4542_v45, %v4754_v54 }
 0x238   : > { %1080 = vperm.xlu1 %8973, %v11138_v46   ;;  %v8339_v11 = vrot.slane %v11047_v49, 9  ;;  %4808 = vst.msk [vmem:[#allocation3 + $0x21] sm:$0xff] %vm4393_vm2, %v4755_v15  ;;  %v3054_v23 = vmul.f32 %v10784_v41, %v3018_v56  ;;  %v2988_v36 = vadd.f32 %v10726_v20, %v2951_v18  ;;  %v4234_v55 = vmax.f32 %v11051_v44, %v8338_v57 }
 0x239   : > { %2070 = vperm.xlu0 %8972, %v9444_v10   ;;  %v8348_v38 = vrot.slane %v3331_v26, 9  ;;  %v4241_v5 = vmax.f32 %v11040_v22, %v8345_v39  ;;  %v4243_v27 = vmax.f32 %v11063_v28, %v8347_v9  ;;  %v8340_v52 = vrot.slane %v3297_v6, 9  ;;  %v9445_v9 = vld [vmem:[#allocation2 + $0x12a] sm:$0xff] }
 0x23a   : > { %v3090_v51 = vadd.f32 %v10803_v3, %v3054_v23  ;;  %v3020_v60 = vmax.f32 %v2988_v36, 0.0  ;;  %v11167_v32 = vpop.permute.xlu1 %2040  ;;  %v4233_v53 = vmax.f32 %v11023_v63, %v8337_v17  ;;  %v4346_v21 = vmax.f32 %v4234_v55, %v4242_v62  ;;  %v11171_v14 = vpop.permute.xlu0 %790 }
 0x23b   : > { %13010 = vst [vmem:[#allocation50_spill] sm:$0xff] %v11171_v14  ;;  %v4235_v44 = vmax.f32 %v11047_v49, %v8339_v11  ;;  %v4244_v2 = vmax.f32 %v3331_v26, %v8348_v38  ;;  %v4236_v54 = vmax.f32 %v3297_v6, %v8340_v52  ;;  %v2474_v26 = vld [vmem:[#allocation2 + $0x139] sm:$0xff]  ;;  %v2402_v14 = vmul.f32 %v10602_v30, %v10982_v16 }
 0x23c   : > { %1595 = vperm.xlu1 %8973, %v11161_v43   ;;  %v3298_v57 = vcombine.high %v3090_v51, %v3090_v51  ;;  %v3305_v22 = vrot.slane %v3090_v51, %v10827_v7  ;;  %v3056_v28 = vmul.f32 %v10784_v41, %v3020_v60  ;;  %v4345_v1 = vmax.f32 %v4233_v53, %v4241_v5  ;;  %v13014_v60 = vld [vmem:[#allocation24_spill] sm:$0xff]  ;;  %v11194_v52 = vld [vmem:[#allocation2 + $0x15a] sm:$0xff] }
 0x23d   : > { %2586 = vperm.xlu0 %8972, %v2472_v42   ;;  %v4347_v58 = vmax.f32 %v4235_v44, %v4243_v27  ;;  %v4550_v13 = vrot.slane %v4346_v21, %v10501_v61  ;;  %v4348_v11 = vmax.f32 %v4236_v54, %v4244_v2  ;;  %v2660_v16 = vmul.f32 %v10653_v31, %v11155_v35 }
 0x23e   : > { %v3312_v12 = vrot.slane %v3298_v57, %v10827_v7  ;;  %v3313_v39 = vcombine.high %v3305_v22, %v3305_v22  ;;  %v3092_v63 = vadd.f32 %v10803_v3, %v3056_v28  ;;  %v11178_v45 = vpop.permute.xlu1 %2556  ;;  %v11181_v49 = vpop.permute.xlu0 %1050  ;;  %v8341_v18 = vrot.slane %v3305_v22, 9 }
 0x23f   : > { %13011 = vst [vmem:[#allocation51_spill] sm:$0xff] %v11181_v49  ;;  %v4546_v17 = vrot.slane %v4345_v1, %v10501_v61  ;;  %v4554_v23 = vrot.slane %v4347_v58, %v10501_v61  ;;  %v4558_v28 = vrot.slane %v4348_v11, %v10501_v61  ;;  %v13045_v49 = vld [vmem:[#allocation25_spill] sm:$0xff] }
 0x240   : > { %2080 = vperm.xlu1 %8973, %v9445_v9   ;;  %v3314_v56 = vcombine.high %v3312_v12, %v3312_v12  ;;  %v3332_v62 = vcombine.high %v3092_v63, %v3092_v63  ;;  %v3339_v15 = vrot.slane %v3092_v63, %v10827_v7  ;;  %v8342_v36 = vrot.slane %v3313_v39, 9 }
 0x241   : > { %2090 = vperm.xlu0 %8972, %v10735_v4   ;;  %v8343_v10 = vrot.slane %v3312_v12, 9  ;;  %v4756_v38 = vsel %vm4735_vm4, %v4550_v13, %v4546_v17  ;;  %v4237_v51 = vmax.f32 %v3305_v22, %v8341_v18 }
 0x242   : > { %v11187_v55 = vpop.permute.xlu1 %800  ;;  %v3346_v6 = vrot.slane %v3332_v62, %v10827_v7  ;;  %v3347_v5 = vcombine.high %v3339_v15, %v3339_v15  ;;  %v8349_v42 = vrot.slane %v3339_v15, 9  ;;  %v11191_v4 = vpop.permute.xlu0 %1565  ;;  %v8344_v27 = vrot.slane %v3314_v56, 9 }
 0x243   : > { %13012 = vst [vmem:[#allocation53_spill] sm:$0xff] %v11187_v55  ;;  %13013 = vst [vmem:[#allocation54_spill] sm:$0xff] %v11191_v4  ;;  %v4757_v2 = vsel %vm4737_vm5, %v4554_v23, %v4756_v38  ;;  %v4238_v1 = vmax.f32 %v3313_v39, %v8342_v36  ;;  %v4239_v58 = vmax.f32 %v3312_v12, %v8343_v10  ;;  %v13041_v4 = vld [vmem:[#allocation120_spill] sm:$0xff] }
 0x244   : > { %2596 = vperm.xlu1 %8973, %v2474_v26   ;;  %v3348_v53 = vcombine.high %v3346_v6, %v3346_v6  ;;  %v8350_v21 = vrot.slane %v3347_v5, 9  ;;  %v8351_v44 = vrot.slane %v3346_v6, 9  ;;  %v4245_v57 = vmax.f32 %v3339_v15, %v8349_v42 }
 0x245   : > { %2606 = vperm.xlu0 %8972, %v13014_v60   ;;  %v4240_v26 = vmax.f32 %v3314_v56, %v8344_v27  ;;  %v4758_v12 = vsel %vm4739_vm6, %v4558_v28, %v4757_v2  ;;  %v11230_v28 = vld [vmem:[#allocation2 + $0x181] sm:$0xff] }
 0x246   : > { %v11198_v63 = vpop.permute.xlu1 %1060  ;;  %v8352_v13 = vrot.slane %v3348_v53, 9  ;;  %v4246_v9 = vmax.f32 %v3347_v5, %v8350_v21  ;;  %v4247_v54 = vmax.f32 %v3346_v6, %v8351_v44  ;;  %v4349_v22 = vmax.f32 %v4237_v51, %v4245_v57  ;;  %v11201_v18 = vpop.permute.xlu0 %2050  ;;  %v13017_v6 = vld [vmem:[#allocation27_spill] sm:$0xff]  ;;  %v11215_v5 = vld [vmem:[#allocation2 + $0x172] sm:$0xff] }
 0x247   : > { %13015 = vst [vmem:[#allocation56_spill] sm:$0xff] %v11198_v63  ;;  %v2213_v51 = vld [vmem:[#allocation2 + $0x128] sm:$0xff]  ;;  %v9114_v21 = vld [vmem:[%s12718_s3 + $0x80] sm:$0xff]  }
 0x248   : > { %2100 = vperm.xlu1 %8973, %v11194_v52   ;;  %v4248_v17 = vmax.f32 %v3348_v53, %v8352_v13  ;;  %v4350_v62 = vmax.f32 %v4238_v1, %v4246_v9  ;;  %v4351_v15 = vmax.f32 %v4239_v58, %v4247_v54  ;;  %v4562_v11 = vrot.slane %v4349_v22, %v10501_v61  ;;  %v2732_v2 = vld [vmem:[#allocation2 + $0x122] sm:$0xff] }
 0x249   : > { %1330 = vperm.xlu0 %8972, %v11194_v52   ;;  %8841 = vmatprep.subr.bf16.mxu1 %v9114_v21  ;;  %v9115_v58 = vld [vmem:[%s12718_s3 + $0x88] sm:$0xff]   ;;  %v2215_v9 = vld [vmem:[#allocation2 + $0x140] sm:$0xff]  ;;  %v13021_v22 = vmov 0.0  }
 0x24a   : > { %v11206_v39 = vpop.permute.xlu1 %1575  ;;  %v4352_v23 = vmax.f32 %v4240_v26, %v4248_v17  ;;  %v4566_v36 = vrot.slane %v4350_v62, %v10501_v61  ;;  %v4570_v10 = vrot.slane %v4351_v15, %v10501_v61  ;;  %v4759_v38 = vsel %vm4741_vm7, %v4562_v11, %v4758_v12  ;;  %v11212_v56 = vpop.permute.xlu0 %2566  ;;  %8842 = vmatpush3.bf16.msra.mxu1 %v9114_v21  ;;  %v11243_v26 = vld [vmem:[#allocation3 + $0x22] sm:$0xff]  ;;  %v2734_v11 = vld [vmem:[#allocation2 + $0x13a] sm:$0xff]  ;;  %v13040_v63 = vld [vmem:[#allocation99_spill] sm:$0xff] }
 0x24b   : > { %13016 = vst [vmem:[#allocation57_spill] sm:$0xff] %v11206_v39  ;;  %8843 = vmatprep.subr.bf16.mxu1 %v9115_v58  ;;  %v13039_v39 = vld [vmem:[#allocation70_spill] sm:$0xff] }
 0x24c   : > { %2616 = vperm.xlu1 %8973, %v13017_v6   ;;  %v4574_v42 = vrot.slane %v4352_v23, %v10501_v61  ;;  %v4760_v27 = vsel %vm4743_vm8, %v4566_v36, %v4759_v38  ;;  %v13027_v38 = vld [vmem:[#allocation41_spill] sm:$0xff] }
 0x24d   : > { %1845 = vperm.xlu0 %8972, %v13017_v6   ;;  %v4761_v60 = vsel %vm4745_vm9, %v4570_v10, %v4760_v27  ;;  %v13028_v6 = vld [vmem:[#allocation114_spill] sm:$0xff] }
 0x24e   : > { %v11220_v53 = vpop.permute.xlu1 %2060  ;;  %v4762_v44 = vsel %vm4747_vm10, %v4574_v42, %v4761_v60  ;;  %v11227_v57 = vpop.permute.xlu0 %1290  ;;  %8844 = vmatpush3.bf16.msra.mxu1 %v9115_v58  ;;  %v1101_v42 = vmul.f32 %v13028_v6, %v13027_v38  ;;  %v13031_v60 = vld [vmem:[#allocation113_spill] sm:$0xff] }
 0x24f   : > { %13018 = vst [vmem:[#allocation58_spill] sm:$0xff] %v11227_v57  ;;  %4809 = vst.msk [vmem:[#allocation3 + $0x31] sm:$0xff] %vm4393_vm2, %v4762_v44  ;;  %8853 = vmatprep.subr.bf16.mxu1 %v13021_v22  ;;  %v13032_v44 = vld [vmem:[#allocation55_spill] sm:$0xff]  ;;  %v13036_v22 = vld [vmem:[#allocation52_spill] sm:$0xff] }
 0x250   : > { %1340 = vperm.xlu1 %8973, %v11215_v5  }
 0x251   : > { %2331 = vperm.xlu0 %8972, %v2213_v51   ;;  %v13030_v51 = vld [vmem:[#allocation39_spill] sm:$0xff] }
 0x252   : > { %v11232_v1 = vpop.permute.xlu1 %2576  ;;  %v11238_v13 = vpop.permute.xlu0 %1805  ;;  %v841_v21 = vmul.f32 %v13031_v60, %v13030_v51  ;;  %v11280_v51 = vld [vmem:[#allocation2 + $0x188] sm:$0xff] }
 0x253   : > { %13019 = vst [vmem:[#allocation71_spill] sm:$0xff] %v11238_v13 }
 0x254   : > { %1855 = vperm.xlu1 %8973, %v11230_v28   ;;  %v1133_v38 = vadd.f32 %v1101_v42, %v841_v21 }
 0x255   : > { %2846 = vperm.xlu0 %8972, %v2732_v2   ;;  %v13033_v2 = vld [vmem:[#allocation117_spill] sm:$0xff] }
 0x256   : > { %v11240_v54 = vpop.permute.xlu1 %1300  ;;  %v11245_v17 = vld [vmem:[#allocation3 + $0x32] sm:$0xff]  ;;  %v11247_v62 = vpop.permute.xlu0 %2291 }
 0x257   : > { %13020 = vst [vmem:[#allocation60_spill] sm:$0xff] %v11240_v54  ;;  %13022 = vst [vmem:[#allocation62_spill] sm:$0xff] %v11245_v17  ;;  %v5132_v15 = vpack.c.bf16 %v11245_v17, %v11243_v26 }
 0x258   : > { %2341 = vperm.xlu1 %8973, %v2215_v9   ;;  %13023 = vst [vmem:[#allocation64_spill] sm:$0xff] %v11247_v62 }
 0x259   : > { %2351 = vperm.xlu0 %8972, %v10947_v59   ;;  %8845 = vmatprep.mubr.msk.bf16.mxu1 %vm4393_vm2, %v5132_v15  ;;  %v13029_v59 = vld [vmem:[#allocation38_spill] sm:$0xff]  ;;  %v13035_v15 = vld [vmem:[#allocation36_spill] sm:$0xff] }
 0x25a   : > { %v11253_v12 = vpop.permute.xlu1 %1815  ;;  %v2807_v23 = vpop.permute.xlu0 %2806  ;;  %v1099_v27 = vmul.f32 %v13028_v6, %v13029_v59  ;;  %v13038_v59 = vld [vmem:[#allocation119_spill] sm:$0xff] }
 0x25b   : > { %13024 = vst [vmem:[#allocation67_spill] sm:$0xff] %v11253_v12 }
 0x25c   : > { %2856 = vperm.xlu1 %8973, %v2734_v11   ;;  %v839_v11 = vmul.f32 %v13031_v60, %v13035_v15  ;;  %v1881_v15 = vmul.f32 %v13041_v4, %v13040_v63  ;;  %v13047_v63 = vld [vmem:[#allocation31_spill] sm:$0xff] }
 0x25d   : > { %2866 = vperm.xlu0 %8972, %v10962_v50   ;;  %v1361_v50 = vmul.f32 %v13033_v2, %v13032_v44  ;;  %v2473_v44 = vld [vmem:[#allocation2 + $0x129] sm:$0xff] }
 0x25e   : > { %v11256_v36 = vpop.permute.xlu1 %2301  ;;  %v11259_v10 = vpop.permute.xlu0 %1310  ;;  %v1131_v54 = vadd.f32 %v1099_v27, %v839_v11  ;;  %v13046_v27 = vld [vmem:[#allocation121_spill] sm:$0xff]  ;;  %v11295_v11 = vld [vmem:[#allocation2 + $0x182] sm:$0xff] }
 0x25f   : > { %13025 = vst [vmem:[#allocation73_spill] sm:$0xff] %v11256_v36  ;;  %13026 = vst [vmem:[#allocation75_spill] sm:$0xff] %v11259_v10  ;;  %v13037_v10 = vld [vmem:[#allocation74_spill] sm:$0xff]  ;;  %v1393_v57 = vadd.f32 %v1361_v50, %v1133_v38  ;;  %v2141_v50 = vmul.f32 %v13046_v27, %v13045_v49  ;;  %v13079_v36 = vld [vmem:[#allocation115_spill] sm:$0xff] }
 0x260   : > { %2361 = vperm.xlu1 %8973, %v11115_v48   ;;  %v1621_v12 = vmul.f32 %v13038_v59, %v13037_v10  ;;  %v13049_v49 = vld [vmem:[#allocation34_spill] sm:$0xff] }
 0x261   : > { %1590 = vperm.xlu0 %8972, %v11115_v48   ;;  %v1359_v48 = vmul.f32 %v13033_v2, %v13036_v22 }
 0x262   : > { %v2817_v58 = vpop.permute.xlu1 %2816  ;;  %v11271_v9 = vpop.permute.xlu0 %1825  ;;  %v1653_v21 = vadd.f32 %v1621_v12, %v1393_v57 }
 0x263   : > { %13034 = vst [vmem:[#allocation76_spill] sm:$0xff] %v11271_v9  ;;  %v1619_v9 = vmul.f32 %v13038_v59, %v13039_v39  ;;  %v1391_v10 = vadd.f32 %v1359_v48, %v1131_v54  ;;  %v2400_v48 = vmul.f32 %v10602_v30, %v13049_v49 }
 0x264   : > { %2876 = vperm.xlu1 %8973, %v10995_v0   ;;  %v1913_v38 = vadd.f32 %v1881_v15, %v1653_v21  ;;  %v11316_v21 = vld [vmem:[%s12716_s1 + $0x8] ss:$0 sm:$0xff] }
 0x265   : > { %2105 = vperm.xlu0 %8972, %v10995_v0   ;;  %v13044_v0 = vld [vmem:[#allocation95_spill] sm:$0xff]  ;;  %v1651_v39 = vadd.f32 %v1619_v9, %v1391_v10  ;;  %v2662_v9 = vmul.f32 %v10653_v31, %v11178_v45 }
 0x266   : > { %v11286_v42 = vpop.permute.xlu1 %1320  ;;  %v11289_v22 = vpop.permute.xlu0 %2311  ;;  %v1879_v55 = vmul.f32 %v13041_v4, %v13044_v0  ;;  %v2173_v12 = vadd.f32 %v2141_v50, %v1913_v38 }
 0x267   : > { %13042 = vst [vmem:[#allocation78_spill] sm:$0xff] %v11286_v42  ;;  %13043 = vst [vmem:[#allocation87_spill] sm:$0xff] %v11289_v22  ;;  %v2139_v42 = vmul.f32 %v13046_v27, %v13047_v63 }
 0x268   : > { %1600 = vperm.xlu1 %8973, %v11280_v51   ;;  %v1911_v54 = vadd.f32 %v1879_v55, %v1651_v39  ;;  %v2434_v10 = vadd.f32 %v2402_v14, %v2173_v12  ;;  %v2922_v55 = vmul.f32 %v11316_v21, %v2817_v58  ;;  %v13052_v14 = vld [vmem:[#allocation46_spill] sm:$0xff]  ;;  %v13053_v39 = vld [vmem:[#allocation49_spill] sm:$0xff] }
 0x269   : > { %2591 = vperm.xlu0 %8972, %v2473_v44   ;;  %v2475_v44 = vld [vmem:[#allocation2 + $0x141] sm:$0xff]  ;;  %v1103_v35 = vmul.f32 %v13028_v6, %v13052_v14  ;;  %v1105_v38 = vmul.f32 %v13028_v6, %v13053_v39  ;;  %v13054_v12 = vld [vmem:[#allocation45_spill] sm:$0xff] }
 0x26a   : > { %v11301_v8 = vpop.permute.xlu1 %1835  ;;  %v11304_v57 = vpop.permute.xlu0 %2826  ;;  %v2171_v15 = vadd.f32 %v2139_v42, %v1911_v54  ;;  %v2920_v42 = vmul.f32 %v11316_v21, %v2807_v23  ;;  %v843_v49 = vmul.f32 %v13031_v60, %v13054_v12 }
 0x26b   : > { %13048 = vst [vmem:[#allocation89_spill] sm:$0xff] %v11301_v8  ;;  %v2733_v8 = vld [vmem:[#allocation2 + $0x12a] sm:$0xff] }
 0x26c   : > { %2115 = vperm.xlu1 %8973, %v11295_v11   ;;  %v2432_v45 = vadd.f32 %v2400_v48, %v2171_v15  ;;  %v13057_v15 = vld [vmem:[#allocation61_spill] sm:$0xff]  ;;  %v1135_v39 = vadd.f32 %v1103_v35, %v843_v49 }
 0x26d   : > { %2611 = vperm.xlu0 %8972, %v11084_v29   ;;  %v2694_v29 = vadd.f32 %v2662_v9, %v2434_v10  ;;  %v13056_v9 = vld [vmem:[#allocation59_spill] sm:$0xff]  ;;  %v1365_v10 = vmul.f32 %v13033_v2, %v13057_v15  ;;  %v840_v15 = vmul.f32 %v13031_v60, %v13061_v47 }
 0x26e   : > { %v11319_v0 = vpop.permute.xlu1 %2321  ;;  %v11321_v50 = vpop.permute.xlu0 %805  ;;  %v2692_v63 = vadd.f32 %v2660_v16, %v2432_v45  ;;  %v1363_v23 = vmul.f32 %v13033_v2, %v13056_v9  ;;  %v13059_v16 = vld [vmem:[#allocation68_spill] sm:$0xff] }
 0x26f   : > { %13050 = vst [vmem:[#allocation91_spill] sm:$0xff] %v11319_v0  ;;  %13051 = vst [vmem:[#allocation94_spill] sm:$0xff] %v11321_v50  ;;  %v2954_v54 = vadd.f32 %v2922_v55, %v2694_v29  ;;  %v1100_v55 = vmul.f32 %v13028_v6, %v13059_v16  ;;  %v11345_v29 = vld [vmem:[#allocation2 + $0x189] sm:$0xff] }
 0x270   : > { %2601 = vperm.xlu1 %8973, %v2475_v44   ;;  %v13055_v44 = vld [vmem:[#allocation47_spill] sm:$0xff]  ;;  %v2952_v45 = vadd.f32 %v2920_v42, %v2692_v63  ;;  %v1395_v33 = vadd.f32 %v1363_v23, %v1135_v39  ;;  %v13063_v42 = vld [vmem:[#allocation69_spill] sm:$0xff]  ;;  %v13065_v63 = vld [vmem:[#allocation82_spill] sm:$0xff] }
 0x271   : > { %1850 = vperm.xlu0 %8972, %v11138_v46   ;;  %v845_v48 = vmul.f32 %v13031_v60, %v13055_v44  ;;  %v13060_v44 = vld [vmem:[#allocation72_spill] sm:$0xff]  ;;  %v1104_v49 = vmul.f32 %v13028_v6, %v13065_v63 }
 0x272   : > { %v11329_v58 = vpop.permute.xlu1 %2836  ;;  %v1102_v9 = vmul.f32 %v13028_v6, %v13060_v44  ;;  %v2222_v44 = vld [vmem:[#allocation2 + $0x198] sm:$0xff]  ;;  %v13077_v50 = vld [vmem:[#allocation124_spill] sm:$0xff] }
 0x273   : > { %v11340_v14 = vpop.permute.xlu0 %1065  ;;  %v1137_v12 = vadd.f32 %v1105_v38, %v845_v48  ;;  %v1132_v38 = vadd.f32 %v1100_v55, %v840_v15  ;;  %v13066_v48 = vld [vmem:[#allocation85_spill] sm:$0xff]  ;;  %v1360_v55 = vmul.f32 %v13033_v2, %v13069_v19  ;;  %v13070_v15 = vld [vmem:[#allocation80_spill] sm:$0xff] }
 0x274   : > { %2621 = vperm.xlu1 %8973, %v11138_v46   ;;  %13058 = vst [vmem:[#allocation97_spill] sm:$0xff] %v11340_v14  ;;  %v2991_v46 = vadd.f32 %v10726_v20, %v2954_v54  ;;  %v1623_v47 = vmul.f32 %v13038_v59, %v13066_v48  ;;  %v2989_v54 = vadd.f32 %v10726_v20, %v2952_v45  ;;  %v13076_v14 = vld [vmem:[#allocation122_spill] sm:$0xff] }
 0x275   : > { %2366 = vperm.xlu0 %8972, %v11161_v43   ;;  %v1397_v16 = vadd.f32 %v1365_v10, %v1137_v12  ;;  %v842_v43 = vmul.f32 %v13031_v60, %v13063_v42  ;;  %v13067_v10 = vld [vmem:[#allocation86_spill] sm:$0xff]  ;;  %v13068_v12 = vld [vmem:[#allocation88_spill] sm:$0xff]  ;;  %v844_v63 = vmul.f32 %v13031_v60, %v13070_v15  ;;  %v1366_v19 = vmul.f32 %v13033_v2, %v13076_v14 }
 0x276   : > { %v11352_v13 = vpop.permute.xlu1 %815  ;;  %v1106_v39 = vmul.f32 %v13028_v6, %v13067_v10  ;;  %v1625_v42 = vmul.f32 %v13038_v59, %v13068_v12  ;;  %v3023_v45 = vmax.f32 %v2991_v46, 0.0  ;;  %v1885_v15 = vmul.f32 %v13041_v4, %v13077_v50  ;;  %v13078_v46 = vld [vmem:[#allocation79_spill] sm:$0xff] }
 0x277   : > { %13062 = vst [vmem:[#allocation100_spill] sm:$0xff] %v11352_v13  ;;  %v11357_v35 = vpop.permute.xlu0 %1550  ;;  %v1134_v23 = vadd.f32 %v1102_v9, %v842_v43  ;;  %v13074_v43 = vld [vmem:[#allocation84_spill] sm:$0xff]  ;;  %v13075_v13 = vld [vmem:[#allocation110_spill] sm:$0xff]  ;;  %v1136_v0 = vadd.f32 %v1104_v49, %v844_v63  ;;  %v3021_v17 = vmax.f32 %v2989_v54, 0.0  ;;  %v1392_v22 = vadd.f32 %v1360_v55, %v1132_v38 }
 0x278   : > { %1860 = vperm.xlu1 %8973, %v11345_v29   ;;  %13064 = vst [vmem:[#allocation98_spill] sm:$0xff] %v11357_v35  ;;  %v13071_v35 = vld [vmem:[#allocation96_spill] sm:$0xff]  ;;  %v846_v10 = vmul.f32 %v13031_v60, %v13074_v43  ;;  %v1364_v12 = vmul.f32 %v13033_v2, %v13075_v13  ;;  %v2735_v43 = vld [vmem:[#allocation2 + $0x142] sm:$0xff]  ;;  %v1657_v13 = vadd.f32 %v1625_v42, %v1397_v16 }
 0x279   : > { %2851 = vperm.xlu0 %8972, %v2733_v8   ;;  %v1362_v48 = vmul.f32 %v13033_v2, %v13071_v35  ;;  %v1883_v8 = vmul.f32 %v13041_v4, %v13072_v24  ;;  %v1655_v24 = vadd.f32 %v1623_v47, %v1395_v33  ;;  %v2145_v14 = vmul.f32 %v13046_v27, %v13079_v36  ;;  %v13081_v36 = vld [vmem:[#allocation17_spill] sm:$0xff]  ;;  %v13083_v55 = vld [vmem:[#allocation20_spill] sm:$0xff] }
 0x27a   : > { %v11376_v9 = vpop.permute.xlu1 %1075  ;;  %v1138_v61 = vadd.f32 %v1106_v39, %v846_v10  ;;  %v3059_v33 = vmul.f32 %v10784_v41, %v3023_v45  ;;  %v1396_v47 = vadd.f32 %v1364_v12, %v1136_v0  ;;  %v2406_v16 = vmul.f32 %v10602_v30, %v11088_v37  ;;  %v13086_v12 = vld [vmem:[#allocation19_spill] sm:$0xff] }
 0x27b   : > { %13073 = vst [vmem:[#allocation102_spill] sm:$0xff] %v11376_v9  ;;  %v11386_v35 = vpop.permute.xlu0 %2065  ;;  %v2143_v9 = vmul.f32 %v13046_v27, %v13078_v46  ;;  %v1394_v62 = vadd.f32 %v1362_v48, %v1134_v23  ;;  %v1915_v50 = vadd.f32 %v1883_v8, %v1655_v24  ;;  %v1107_v23 = vmul.f32 %v13028_v6, %v13081_v36  ;;  %v13084_v8 = vld [vmem:[#allocation23_spill] sm:$0xff] }
 0x27c   : > { %2376 = vperm.xlu1 %8973, %v2222_v44   ;;  %v2404_v44 = vmul.f32 %v10602_v30, %v11055_v34  ;;  %v11398_v54 = vadd.f32 %v1366_v19, %v1138_v61  ;;  %v2664_v34 = vmul.f32 %v10653_v31, %v11212_v56  ;;  %v3057_v42 = vmul.f32 %v10784_v41, %v3021_v17  ;;  %v13082_v61 = vld [vmem:[#allocation21_spill] sm:$0xff] }
 0x27d   : > { %2871 = vperm.xlu0 %8972, %v11194_v52   ;;  %v1917_v52 = vadd.f32 %v1885_v15, %v1657_v13  ;;  %v2175_v39 = vadd.f32 %v2143_v9, %v1915_v50  ;;  %v1620_v0 = vmul.f32 %v13038_v59, %v13082_v61  ;;  %v1109_v37 = vmul.f32 %v13028_v6, %v13083_v55  ;;  %v13087_v15 = vld [vmem:[#allocation30_spill] sm:$0xff] }
 0x27e   : > { %v11396_v49 = vpop.permute.xlu1 %1560  ;;  %v2666_v48 = vmul.f32 %v10653_v31, %v11232_v1  ;;  %v1622_v45 = vmul.f32 %v13038_v59, %v13084_v8  ;;  %v3095_v56 = vadd.f32 %v10803_v3, %v3059_v33  ;;  %v2924_v17 = vmul.f32 %v11316_v21, %v11304_v57  ;;  %v13089_v13 = vld [vmem:[#allocation18_spill] sm:$0xff] }
 0x27f   : > { %13080 = vst [vmem:[#allocation105_spill] sm:$0xff] %v11396_v49  ;;  %v11402_v38 = vpop.permute.xlu0 %2551  ;;  %v2177_v63 = vadd.f32 %v2145_v14, %v1917_v52  ;;  %v2436_v9 = vadd.f32 %v2404_v44, %v2175_v39  ;;  %v847_v19 = vmul.f32 %v13031_v60, %v13086_v12  ;;  %v1111_v24 = vmul.f32 %v13028_v6, %v13087_v15  ;;  %v13090_v57 = vld [vmem:[#allocation26_spill] sm:$0xff]  ;;  %v11438_v52 = vld [vmem:[#allocation2 + $0x18a] sm:$0xff] }
 0x280   : > { %2861 = vperm.xlu1 %8973, %v2735_v43   ;;  %v2926_v1 = vmul.f32 %v11316_v21, %v11329_v58  ;;  %v849_v14 = vmul.f32 %v13031_v60, %v13089_v13  ;;  %v1624_v50 = vmul.f32 %v13038_v59, %v13090_v57  ;;  %v3093_v33 = vadd.f32 %v10803_v3, %v3057_v42  ;;  %v13091_v58 = vld [vmem:[#allocation22_spill] sm:$0xff]  ;;  %v13092_v42 = vld [vmem:[#allocation33_spill] sm:$0xff]  ;;  %v13099_v57 = vld [vmem:[#allocation35_spill] sm:$0xff] }
 0x281   : > { %2110 = vperm.xlu0 %8972, %v11215_v5   ;;  %v2438_v46 = vadd.f32 %v2406_v16, %v2177_v63  ;;  %v2696_v44 = vadd.f32 %v2664_v34, %v2436_v9  ;;  %v1139_v16 = vadd.f32 %v1107_v23, %v847_v19  ;;  %v1652_v36 = vadd.f32 %v1620_v0, %v1392_v22  ;;  %v13093_v9 = vld [vmem:[#allocation28_spill] sm:$0xff]  ;;  %v2482_v15 = vld [vmem:[#allocation2 + $0x199] sm:$0xff] }
 0x282   : > { %v11421_v10 = vpop.permute.xlu1 %2075  ;;  %v1141_v61 = vadd.f32 %v1109_v37, %v849_v14  ;;  %v1654_v55 = vadd.f32 %v1622_v45, %v1394_v62  ;;  %v11443_v63 = vrot.slane %v3095_v56, %v10827_v7  ;;  %v1113_v23 = vmul.f32 %v13028_v6, %v13093_v9  ;;  %v13095_v62 = vld [vmem:[#allocation29_spill] sm:$0xff]  ;;  %v13096_v45 = vld [vmem:[#allocation106_spill] sm:$0xff] }
 0x283   : > { %13085 = vst [vmem:[#allocation77_spill] sm:$0xff] %v11421_v10  ;;  %v11430_v43 = vpop.permute.xlu0 %1570  ;;  %v2698_v39 = vadd.f32 %v2666_v48, %v2438_v46  ;;  %v2956_v8 = vadd.f32 %v2924_v17, %v2696_v44  ;;  %v1656_v37 = vadd.f32 %v1624_v50, %v1396_v47  ;;  %v1626_v48 = vmul.f32 %v13038_v59, %v13095_v62  ;;  %v13100_v44 = vld [vmem:[#allocation37_spill] sm:$0xff]  ;;  %v13102_v9 = vld [vmem:[#allocation66_spill] sm:$0xff] }
 0x284   : > { %2881 = vperm.xlu1 %8973, %v11215_v5   ;;  %13088 = vst [vmem:[#allocation103_spill] sm:$0xff] %v11430_v43  ;;  %v851_v5 = vmul.f32 %v13031_v60, %v13091_v58  ;;  %v1367_v17 = vmul.f32 %v13033_v2, %v13096_v45  ;;  %v11459_v19 = vrot.slane %v3093_v33, %v10827_v7  ;;  %v11531_v43 = vld [vmem:[#allocation3 + $0x10] sm:$0xff] }
 0x285   : > { %2626 = vperm.xlu0 %8972, %v11230_v28   ;;  %v853_v28 = vmul.f32 %v13031_v60, %v13092_v42  ;;  %v2958_v22 = vadd.f32 %v2926_v1, %v2698_v39  ;;  %v13098_v1 = vld [vmem:[#allocation32_spill] sm:$0xff]  ;;  %v1882_v47 = vmul.f32 %v13041_v4, %v10967_v40  ;;  %v3383_v14 = vcombine.high %v3095_v56, %v3095_v56  ;;  %v4873_v10 = vld [vmem:[#allocation3 + $0x31] sm:$0xff] }
 0x286   : > { %v11445_v12 = vpop.permute.xlu1 %2561  ;;  %v1143_v34 = vadd.f32 %v1111_v24, %v851_v5  ;;  %v13097_v24 = vld [vmem:[#allocation63_spill] sm:$0xff]  ;;  %v1369_v13 = vmul.f32 %v13033_v2, %v13098_v1  ;;  %v1371_v50 = vmul.f32 %v13033_v2, %v13099_v57  ;;  %v1884_v58 = vmul.f32 %v13041_v4, %v13100_v44  ;;  %v11495_v44 = vld [vmem:[#allocation3 + $0x1] sm:$0xff] }
 0x287   : > { %v11452_v0 = vpop.permute.xlu0 %2085  ;;  %v1880_v46 = vmul.f32 %v13041_v4, %v13097_v24  ;;  %v2993_v5 = vadd.f32 %v10726_v20, %v2956_v8  ;;  %v11477_v42 = vadd.f32 %v1113_v23, %v853_v28  ;;  %v1886_v62 = vmul.f32 %v13041_v4, %v13102_v9  ;;  %v2223_v23 = vld [vmem:[#allocation2 + $0x1a0] sm:$0xff] }
 0x288   : > { %2120 = vperm.xlu1 %8973, %v11438_v52   ;;  %13094 = vst [vmem:[#allocation81_spill] sm:$0xff] %v11452_v0  ;;  %v3349_v40 = vcombine.high %v3093_v33, %v3093_v33  ;;  %v2995_v56 = vadd.f32 %v10726_v20, %v2958_v22  ;;  %v1658_v24 = vadd.f32 %v1626_v48, %v11398_v54  ;;  %v11497_v54 = vld [vmem:[#allocation3 + $0x11] sm:$0xff] }
 0x289   : > { %2371 = vperm.xlu0 %8972, %v11280_v51   ;;  %v3398_v51 = vcombine.high %v11443_v63, %v11443_v63  ;;  %v11485_v1 = vadd.f32 %v1367_v17, %v1139_v16  ;;  %v2140_v8 = vmul.f32 %v13046_v27, %v11129_v25  ;;  %v3364_v28 = vcombine.high %v11459_v19, %v11459_v19  ;;  %v11539_v0 = vld [vmem:[#allocation3 + $0x30] sm:$0xff] }
 0x28a   : > { %v11475_v39 = vpop.permute.xlu1 %1580  ;;  %v1912_v57 = vadd.f32 %v1880_v46, %v1652_v36  ;;  %v11492_v33 = vadd.f32 %v1369_v13, %v1141_v61  ;;  %v1914_v22 = vadd.f32 %v1882_v47, %v1654_v55  ;;  %v11499_v16 = vadd.f32 %v1371_v50, %v1143_v34  ;;  %v11508_v46 = vld [vmem:[#allocation3 + $0x12] sm:$0xff]  ;;  %v11510_v13 = vld [vmem:[#allocation3 + $0x2] sm:$0xff] }
 0x28b   : > { %13101 = vst [vmem:[#allocation123_spill] sm:$0xff] %v11475_v39  ;;  %v11482_v45 = vpop.permute.xlu0 %2571  ;;  %v1916_v48 = vadd.f32 %v1884_v58, %v1656_v37  ;;  %v8362_v25 = vrot.slane %v3398_v51, 9  ;;  %v3025_v17 = vmax.f32 %v2993_v5, 0.0  ;;  %v1918_v39 = vadd.f32 %v1886_v62, %v1658_v24 }
 0x28c   : > { %2636 = vperm.xlu1 %8973, %v2482_v15   ;;  %13103 = vst [vmem:[#allocation83_spill] sm:$0xff] %v11492_v33  ;;  %v3397_v15 = vrot.slane %v3383_v14, %v10827_v7  ;;  %13104 = vst [vmem:[#allocation93_spill] sm:$0xff] %v11499_v16  ;;  %v3363_v36 = vrot.slane %v3349_v40, %v10827_v7  ;;  %v3027_v61 = vmax.f32 %v2995_v56, 0.0  ;;  %v8354_v37 = vrot.slane %v3364_v28, 9  ;;  %v2742_v14 = vld [vmem:[#allocation2 + $0x19a] sm:$0xff]  ;;  %v11520_v40 = vld [vmem:[#allocation3 + $0x20] sm:$0xff] }
 0x28d   : > { %2886 = vperm.xlu0 %8972, %v11295_v11   ;;  %v2142_v11 = vmul.f32 %v13046_v27, %v11167_v32  ;;  %v2172_v34 = vadd.f32 %v2140_v8, %v1912_v57  ;;  %v8361_v47 = vrot.slane %v11443_v63, 9  ;;  %v2144_v50 = vmul.f32 %v13046_v27, %v11201_v18 }
 0x28e   : > { %v11501_v9 = vpop.permute.xlu1 %2095  ;;  %v2146_v58 = vmul.f32 %v13046_v27, %v11220_v53  ;;  %v3399_v5 = vcombine.high %v3397_v15, %v3397_v15  ;;  %v8363_v62 = vrot.slane %v3397_v15, 9  ;;  %v8353_v56 = vrot.slane %v11459_v19, 9 }
 0x28f   : > { %13105 = vst [vmem:[#allocation101_spill] sm:$0xff] %v11501_v9  ;;  %v11506_v55 = vpop.permute.xlu0 %1325  ;;  %v4258_v24 = vmax.f32 %v3398_v51, %v8362_v25  ;;  %v3061_v8 = vmul.f32 %v10784_v41, %v3025_v17  ;;  %v2174_v57 = vadd.f32 %v2142_v11, %v1914_v22  ;;  %v3365_v32 = vcombine.high %v3363_v36, %v3363_v36  ;;  %v2483_v25 = vld [vmem:[#allocation2 + $0x1a1] sm:$0xff] }
 0x290   : > { %2381 = vperm.xlu1 %8973, %v2223_v23   ;;  %v8355_v18 = vrot.slane %v3363_v36, 9  ;;  %v3063_v9 = vmul.f32 %v10784_v41, %v3027_v61  ;;  %v4250_v49 = vmax.f32 %v3364_v28, %v8354_v37  ;;  %v4257_v51 = vmax.f32 %v11443_v63, %v8361_v47 }
 0x291   : > { %2631 = vperm.xlu0 %8972, %v11345_v29   ;;  %v8974_v17 = vpack.i.bf16 %v11243_v26, %v11508_v46  ;;  %v2176_v11 = vadd.f32 %v2144_v50, %v1916_v48  ;;  %v2178_v23 = vadd.f32 %v2146_v58, %v1918_v39  ;;  %v8364_v61 = vrot.slane %v3399_v5, 9  ;;  %v9116_v48 = vld [vmem:[%s12718_s3 + $0x40] sm:$0xff]  }
 0x292   : > { %v11524_v29 = vpop.permute.xlu1 %2581  ;;  %v4249_v63 = vmax.f32 %v11459_v19, %v8353_v56  ;;  %v4354_v37 = vmax.f32 %v4250_v49, %v4258_v24  ;;  %v8356_v39 = vrot.slane %v3365_v32, 9  ;;  %v4251_v50 = vmax.f32 %v3363_v36, %v8355_v18  ;;  %v9117_v49 = vld [vmem:[%s12718_s3] sm:$0xff]   ;;  %8710 = vmatprep.subr.bf16.mxu0 %v9116_v48 }
 0x293   : > { %v11529_v53 = vpop.permute.xlu0 %1810  ;;  %v2661_v56 = vmul.f32 %v10653_v31, %v11402_v38  ;;  %v2743_v36 = vld [vmem:[#allocation2 + $0x1a2] sm:$0xff]  ;;  %v8984_v24 = vpack.i.bf16 %v11539_v0, %v11520_v40  ;;  %8711 = vmatpush3.bf16.msra.mxu0 %v9117_v49 }
 0x294   : > { %2896 = vperm.xlu1 %8973, %v2742_v14   ;;  %13106 = vst [vmem:[#allocation107_spill] sm:$0xff] %v11529_v53  ;;  %v4259_v14 = vmax.f32 %v3397_v15, %v8363_v62  ;;  %v13107_v53 = vld [vmem:[#allocation64_spill] sm:$0xff]  ;;  %v13108_v15 = vld [vmem:[#allocation73_spill] sm:$0xff]  ;;  %v3099_v62 = vadd.f32 %v10803_v3, %v3063_v9  ;;  %v4353_v19 = vmax.f32 %v4249_v63, %v4257_v51  ;;  %v13113_v48 = vld [vmem:[#allocation91_spill] sm:$0xff] }
 0x295   : > { %2891 = vperm.xlu0 %8972, %v11438_v52   ;;  %v2401_v28 = vmul.f32 %v10602_v30, %v13107_v53  ;;  %v3097_v52 = vadd.f32 %v10803_v3, %v3061_v8  ;;  %v2403_v58 = vmul.f32 %v10602_v30, %v13108_v15  ;;  %v4872_v8 = vld [vmem:[#allocation3 + $0x21] sm:$0xff]  ;;  %v4260_v9 = vmax.f32 %v3399_v5, %v8364_v61  ;;  %v9118_v5 = vld [vmem:[%s12718_s3 + $0x48] sm:$0xff]  }
 0x296   : > { %v11545_v47 = vpop.permute.xlu1 %1335  ;;  %v4355_v18 = vmax.f32 %v4251_v50, %v4259_v14  ;;  %v11565_v22 = vpack.i.bf16 %v4873_v10, %v4872_v8  ;;  %v13111_v63 = vld [vmem:[#allocation108_spill] sm:$0xff]  ;;  %v4252_v61 = vmax.f32 %v3365_v32, %v8356_v39  ;;  %v2407_v10 = vmul.f32 %v10602_v30, %v13113_v48  ;;  %8712 = vmatprep.subr.bf16.mxu0 %v9118_v5 }
 0x297   : > { %v2433_v51 = vadd.f32 %v2401_v28, %v2172_v34  ;;  %v4582_v38 = vrot.slane %v4354_v37, %v13111_v63  ;;  %v3417_v16 = vcombine.high %v3097_v52, %v3097_v52  ;;  %v2435_v14 = vadd.f32 %v2403_v58, %v2174_v57  ;;  %v9119_v28 = vld [vmem:[%s12718_s3 + $0x8] sm:$0xff]  }
 0x298   : > { %2641 = vperm.xlu1 %8973, %v2483_v25   ;;  %v11553_v53 = vpop.permute.xlu0 %2326  ;;  %v13110_v25 = vld [vmem:[#allocation87_spill] sm:$0xff]  ;;  %v3451_v50 = vcombine.high %v3099_v62, %v3099_v62  ;;  %v4578_v37 = vrot.slane %v4353_v19, %v13111_v63  ;;  %v4356_v32 = vmax.f32 %v4252_v61, %v4260_v9  ;;  %v4586_v57 = vrot.slane %v4355_v18, %v13111_v63  ;;  %v13118_v61 = vld [vmem:[#allocation102_spill] sm:$0xff] }
 0x299   : > { %13109 = vst [vmem:[#allocation118_spill] sm:$0xff] %v11553_v53  ;;  %8975 = vrot.lane.b32.xlu0 %v8974_v17, %s9560_s26  ;;  %v2405_v15 = vmul.f32 %v10602_v30, %v13110_v25  ;;  %v13112_v17 = vld [vmem:[#allocation62_spill] sm:$0xff]  ;;  %v2693_v49 = vadd.f32 %v2661_v56, %v2433_v51  ;;  %v3458_v58 = vrot.slane %v3099_v62, %v10827_v7 }
 0x29a   : > { %v11568_v33 = vpop.permute.xlu1 %1820  ;;  %8713 = vmatpush3.bf16.msra.mxu0 %v9119_v28  ;;  %v3424_v25 = vrot.slane %v3097_v52, %v10827_v7  ;;  %v11590_v19 = vrot.slane %v3417_v16, %v10827_v7  ;;  %v11597_v9 = vadd.f32 %v2407_v10, %v2178_v23  ;;  %v3465_v18 = vrot.slane %v3451_v50, %v10827_v7  ;;  %v9121_v23 = vld [vmem:[%s12718_s3 + $0x10] sm:$0xff]  }
 0x29b   : > { %v11584_v39 = vadd.f32 %v2405_v15, %v2176_v11  ;;  %v13114_v11 = vld [vmem:[#allocation94_spill] sm:$0xff]  ;;  %v2663_v52 = vmul.f32 %v10653_v31, %v11445_v12  ;;  %v13115_v16 = vpack.i.bf16 %v11497_v54, %v11495_v44  ;;  %v1117_v48 = vmul.f32 %v13028_v6, %v13118_v61  ;;  %v13119_v50 = vld [vmem:[#allocation100_spill] sm:$0xff] }
 0x29c   : > { %2901 = vperm.xlu1 %8973, %v2743_v36   ;;  %v2812_v34 = vpop.permute.xlu0 %2811  ;;  %v4763_v36 = vsel %vm4735_vm4, %v4582_v38, %v4578_v37  ;;  %v855_v62 = vmul.f32 %v13031_v60, %v13114_v11  ;;  %v13117_v38 = vld [vmem:[#allocation97_spill] sm:$0xff]  ;;  %v4590_v12 = vrot.slane %v4356_v32, %v13111_v63  ;;  %v3466_v54 = vcombine.high %v3458_v58, %v3458_v58 }
 0x29d   : > { %v2921_v8 = vmul.f32 %v11316_v21, %v2812_v34  ;;  %8985 = vrot.lane.b32.xlu0 %v8984_v24, %s9561_s17  ;;  %v9120_v24 = vld [vmem:[%s12718_s3 + $0x50] sm:$0xff]   ;;  %v1115_v5 = vmul.f32 %v13028_v6, %v13117_v38  ;;  %v4764_v44 = vsel %vm4737_vm5, %v4586_v57, %v4763_v36  ;;  %v857_v34 = vmul.f32 %v13031_v60, %v13119_v50  ;;  %v9123_v38 = vld [vmem:[%s12718_s3 + $0x18] sm:$0xff]  }
 0x29e   : > { %8714 = vmatprep.subr.bf16.mxu0 %v9120_v24  ;;  %v3432_v28 = vcombine.high %v3424_v25, %v3424_v25  ;;  %v3433_v37 = vcombine.high %v11590_v19, %v11590_v19  ;;  %v9122_v24 = vld [vmem:[%s12718_s3 + $0x58] sm:$0xff]   ;;  %v3467_v11 = vcombine.high %v3465_v18, %v3465_v18  ;;  %v8377_v32 = vrot.slane %v3458_v58, 9 }
 0x29f   : > { %v2953_v56 = vadd.f32 %v2921_v8, %v2693_v49  ;;  %v11592_v51 = vpop.permute.xlu1 %2336  ;;  %8715 = vmatpush3.bf16.msra.mxu0 %v9121_v23  ;;  %v8369_v49 = vrot.slane %v3424_v25, 9  ;;  %v13120_v36 = vpack.i.bf16 %v11508_v46, %v11510_v13  ;;  %v1147_v61 = vadd.f32 %v1115_v5, %v855_v62 }
 0x2a0   : > { %8980 = vrot.lane.b32.xlu1 %v13115_v16, %s9560_s26  ;;  %v11608_v15 = vpop.permute.xlu0 %1830  ;;  %v2695_v16 = vadd.f32 %v2663_v52, %v2435_v14  ;;  %v2665_v50 = vmul.f32 %v10653_v31, %v11482_v45  ;;  %8716 = vmatprep.subr.bf16.mxu0 %v9122_v24  ;;  %v8378_v52 = vrot.slane %v3466_v54, 9  ;;  %v11645_v46 = vsel %vm4739_vm6, %v4590_v12, %v4764_v44  ;;  %v9124_v45 = vld [vmem:[%s12718_s3 + $0x60] sm:$0xff]  }
 0x2a1   : > { %13116 = vst [vmem:[#allocation24_spill] sm:$0xff] %v11608_v15  ;;  %v2990_v10 = vadd.f32 %v10726_v20, %v2953_v56  ;;  %8995 = vrot.lane.b32.xlu0 %v11565_v22, %s9562_s25  ;;  %v8370_v13 = vrot.slane %v3432_v28, 9  ;;  %v11648_v15 = vmax.f32 %v3424_v25, %v8369_v49  ;;  %v13122_v44 = vpack.i.bf16 %v11520_v40, %v11531_v43  ;;  %v9125_v49 = vld [vmem:[%s12718_s3 + $0x20] sm:$0xff]  }
 0x2a2   : > { %v2697_v24 = vadd.f32 %v2665_v50, %v11584_v39  ;;  %v1375_v43 = vmul.f32 %v13033_v2, %v11506_v55 }
 0x2a3   : > { %v3022_v8 = vmax.f32 %v2990_v10, 0.0  ;;  %v2822_v56 = vpop.permute.xlu1 %2821  ;;  %v11639_v10 = vadd.f32 %v1117_v48, %v857_v34  ;;  %8717 = vmatpush3.bf16.msra.mxu0 %v9123_v38  ;;  %v8372_v48 = vrot.slane %v3433_v37, 9  ;;  %v8380_v34 = vrot.slane %v3467_v11, 9 }
 0x2a4   : > { %v2923_v57 = vmul.f32 %v11316_v21, %v2822_v56  ;;  %8990 = vrot.lane.b32.xlu1 %v13120_v36, %s9561_s17  ;;  %v11634_v23 = vpop.permute.xlu0 %2346  ;;  %v8379_v56 = vrot.slane %v3465_v18, 9  ;;  %v8371_v36 = vrot.slane %v11590_v19, 9  ;;  %8718 = vmatprep.subr.bf16.mxu0 %v9124_v45  ;;  %v2667_v38 = vmul.f32 %v10653_v31, %v11524_v29  ;;  %v9127_v45 = vld [vmem:[%s12718_s3 + $0x28] sm:$0xff]  }
 0x2a5   : > { %v3058_v14 = vmul.f32 %v10784_v41, %v3022_v8  ;;  %v11656_v8 = vmax.f32 %v3458_v58, %v8377_v32  ;;  %v11669_v32 = vmax.f32 %v3466_v54, %v8378_v52  ;;  %v9126_v54 = vld [vmem:[%s12718_s3 + $0x68] sm:$0xff]   ;;  %v11688_v55 = vmax.f32 %v3433_v37, %v8372_v48 }
 0x2a6   : > { %v2955_v53 = vadd.f32 %v2923_v57, %v2695_v16  ;;  %v11686_v52 = vmax.f32 %v11590_v19, %v8371_v36 }
 0x2a7   : > { %v3094_v62 = vadd.f32 %v10803_v3, %v3058_v14  ;;  %v11651_v5 = vpop.permute.xlu1 %1840  ;;  %8719 = vmatpush3.bf16.msra.mxu0 %v9125_v49 }
 0x2a8   : > { %13121 = vst [vmem:[#allocation27_spill] sm:$0xff] %v11651_v5  ;;  %v2992_v12 = vadd.f32 %v10726_v20, %v2955_v53  ;;  %9000 = vrot.lane.b32.xlu1 %v13122_v44, %s9562_s25  ;;  %v2832_v25 = vpop.permute.xlu0 %2831  ;;  %v11671_v53 = vmax.f32 %v3465_v18, %v8379_v56  ;;  %v11683_v18 = vmax.f32 %v3432_v28, %v8370_v13 }
 0x2a9   : > { %v3366_v16 = vcombine.high %v3094_v62, %v3094_v62  ;;  %v3373_v57 = vrot.slane %v3094_v62, %v10827_v7  ;;  %v2925_v58 = vmul.f32 %v11316_v21, %v2832_v25  ;;  %v4361_v28 = vmax.f32 %v11648_v15, %v11656_v8  ;;  %8720 = vmatprep.subr.bf16.mxu0 %v9126_v54  ;;  %v9128_v8 = vld [vmem:[%s12718_s3 + $0x70] sm:$0xff]  }
 0x2aa   : > { %v3024_v40 = vmax.f32 %v2992_v12, 0.0  ;;  %v11696_v12 = vmax.f32 %v3467_v11, %v8380_v34  ;;  %v1407_v44 = vadd.f32 %v1375_v43, %v1147_v61  ;;  %v2699_v11 = vadd.f32 %v2667_v38, %v11597_v9  ;;  %v9129_v9 = vld [vmem:[%s12718_s3 + $0x30] sm:$0xff]  }
 0x2ab   : > { %v3380_v39 = vrot.slane %v3366_v16, %v10827_v7  ;;  %v3381_v50 = vcombine.high %v3373_v57, %v3373_v57  ;;  %v2957_v14 = vadd.f32 %v2925_v58, %v2697_v24  ;;  %v11678_v62 = vpop.permute.xlu1 %2356  ;;  %v8357_v19 = vrot.slane %v3373_v57, 9  ;;  %8721 = vmatpush3.bf16.msra.mxu0 %v9127_v45 }
 0x2ac   : > { %v3060_v56 = vmul.f32 %v10784_v41, %v3024_v40  ;;  %9010 = vrot.lane.b32.xlu1 %v11565_v22, %s9560_s26  ;;  %v811_v29 = vpop.permute.xlu0 %810  ;;  %v13123_v40 = vpack.i.bf16 %v13112_v17, %v11243_v26  ;;  %8722 = vmatprep.subr.bf16.mxu0 %v9128_v8 }
 0x2ad   : > { %v3382_v13 = vcombine.high %v3380_v39, %v3380_v39  ;;  %v2994_v48 = vadd.f32 %v10726_v20, %v2957_v14  ;;  %v8358_v34 = vrot.slane %v3381_v50, 9  ;;  %v8359_v25 = vrot.slane %v3380_v39, 9 }
 0x2ae   : > { %v3096_v22 = vadd.f32 %v10803_v3, %v3060_v56  ;;  %v4253_v38 = vmax.f32 %v3373_v57, %v8357_v19  ;;  %v856_v14 = vmul.f32 %v13031_v60, %v811_v29 }
 0x2af   : > { %v2842_v15 = vpop.permute.xlu1 %2841  ;;  %v3026_v16 = vmax.f32 %v2994_v48, 0.0  ;;  %v8360_v43 = vrot.slane %v3382_v13, 9  ;;  %8723 = vmatpush3.bf16.msra.mxu0 %v9129_v9  ;;  %v4254_v26 = vmax.f32 %v3381_v50, %v8358_v34  ;;  %v4255_v17 = vmax.f32 %v3380_v39, %v8359_v25 }
 0x2b0   : > { %v3400_v49 = vcombine.high %v3096_v22, %v3096_v22  ;;  %v3407_v24 = vrot.slane %v3096_v22, %v10827_v7  ;;  %v2927_v58 = vmul.f32 %v11316_v21, %v2842_v15  ;;  %9020 = vrot.lane.b32.xlu1 %v13123_v40, %s9561_s17  ;;  %v1071_v61 = vpop.permute.xlu0 %1070 }
 0x2b1   : > { %v1116_v54 = vmul.f32 %v13028_v6, %v1071_v61  ;;  %v3062_v22 = vmul.f32 %v10784_v41, %v3026_v16  ;;  %v4256_v61 = vmax.f32 %v3382_v13, %v8360_v43 }
 0x2b2   : > { %v3414_v56 = vrot.slane %v3400_v49, %v10827_v7  ;;  %v3415_v21 = vcombine.high %v3407_v24, %v3407_v24  ;;  %v8365_v45 = vrot.slane %v3407_v24, 9  ;;  %v2959_v48 = vadd.f32 %v2927_v58, %v2699_v11 }
 0x2b3   : > { %v11723_v15 = vadd.f32 %v1116_v54, %v856_v14  ;;  %v821_v40 = vpop.permute.xlu1 %820  ;;  %v3098_v8 = vadd.f32 %v10803_v3, %v3062_v22 }
 0x2b4   : > { %v3416_v36 = vcombine.high %v3414_v56, %v3414_v56  ;;  %v8366_v57 = vrot.slane %v3415_v21, 9  ;;  %v8367_v19 = vrot.slane %v3414_v56, 9  ;;  %v4261_v29 = vmax.f32 %v3407_v24, %v8365_v45  ;;  %v1586_v37 = vpop.permute.xlu0 %1585 }
 0x2b5   : > { %v2996_v49 = vadd.f32 %v10726_v20, %v2959_v48  ;;  %v1635_v5 = vmul.f32 %v13038_v59, %v1586_v37  ;;  %v3434_v11 = vcombine.high %v3098_v8, %v3098_v8  ;;  %v3441_v34 = vrot.slane %v3098_v8, %v10827_v7 }
 0x2b6   : > { %v8368_v16 = vrot.slane %v3416_v36, 9  ;;  %v4262_v9 = vmax.f32 %v3415_v21, %v8366_v57  ;;  %v4263_v50 = vmax.f32 %v3414_v56, %v8367_v19  ;;  %v4357_v39 = vmax.f32 %v4253_v38, %v4261_v29 }
 0x2b7   : > { %v3028_v25 = vmax.f32 %v2996_v49, 0.0  ;;  %v11729_v58 = vadd.f32 %v1635_v5, %v1407_v44  ;;  %v1081_v14 = vpop.permute.xlu1 %1080  ;;  %v4364_v37 = vmax.f32 %v11688_v55, %v11696_v12  ;;  %v4610_v56 = vrot.slane %v4361_v28, %v13111_v63 }
 0x2b8   : > { %v4264_v24 = vmax.f32 %v3416_v36, %v8368_v16  ;;  %v4358_v54 = vmax.f32 %v4254_v26, %v4262_v9  ;;  %v4359_v13 = vmax.f32 %v4255_v17, %v4263_v50  ;;  %v4594_v43 = vrot.slane %v4357_v39, %v13111_v63  ;;  %v11732_v45 = vpop.permute.xlu0 %2070 }
 0x2b9   : > { %v3448_v38 = vrot.slane %v3434_v11, %v10827_v7  ;;  %v3064_v21 = vmul.f32 %v10784_v41, %v3028_v25  ;;  %v13124_v26 = vmax.f32 %v11683_v18, %v11669_v32  ;;  %v1377_v55 = vmul.f32 %v13033_v2, %v11545_v47 }
 0x2ba   : > { %v4360_v22 = vmax.f32 %v4256_v61, %v4264_v24  ;;  %v4598_v5 = vrot.slane %v4358_v54, %v13111_v63  ;;  %v4602_v36 = vrot.slane %v4359_v13, %v13111_v63  ;;  %v4766_v44 = vsel %vm4741_vm7, %v4594_v43, %v11645_v46 }
 0x2bb   : > { %v4614_v17 = vrot.slane %v13124_v26, %v13111_v63  ;;  %v3449_v12 = vcombine.high %v3441_v34, %v3441_v34  ;;  %v858_v28 = vmul.f32 %v13031_v60, %v821_v40  ;;  %v1596_v48 = vpop.permute.xlu1 %1595  ;;  %v3100_v29 = vadd.f32 %v10803_v3, %v3064_v21  ;;  %v13126_v21 = vld [vmem:[#allocation40_spill] sm:$0xff] }
 0x2bc   : > { %v4606_v57 = vrot.slane %v4360_v22, %v13111_v63  ;;  %v4767_v19 = vsel %vm4743_vm8, %v4598_v5, %v4766_v44  ;;  %v1118_v46 = vmul.f32 %v13028_v6, %v1081_v14  ;;  %v11754_v61 = vpop.permute.xlu0 %2586  ;;  %v13125_v32 = vmax.f32 %v11686_v52, %v11671_v53 }
 0x2bd   : > { %v4768_v47 = vsel %vm4745_vm9, %v4602_v36, %v4767_v19  ;;  %v3450_v8 = vcombine.high %v3448_v38, %v3448_v38  ;;  %v8373_v40 = vrot.slane %v3441_v34, 9  ;;  %v3468_v16 = vcombine.high %v3100_v29, %v3100_v29 }
 0x2be   : > { %v4618_v18 = vrot.slane %v13125_v32, %v13111_v63  ;;  %v4769_v49 = vsel %vm4747_vm10, %v4606_v57, %v4768_v47  ;;  %v3475_v9 = vrot.slane %v3100_v29, %v10827_v7  ;;  %v11763_v50 = vadd.f32 %v1118_v46, %v858_v28 }
 0x2bf   : > { %v1409_v39 = vadd.f32 %v1377_v55, %v11639_v10  ;;  %4810 = vst.msk [vmem:[#allocation3 + $0x41] sm:$0xff] %vm4393_vm2, %v4769_v49  ;;  %v8374_v11 = vrot.slane %v3449_v12, 9  ;;  %v8375_v25 = vrot.slane %v3448_v38, 9  ;;  %v1637_v53 = vmul.f32 %v13038_v59, %v1596_v48  ;;  %v11768_v52 = vpop.permute.xlu1 %2080  ;;  %v9130_v10 = vld [vmem:[%s12718_s3 + $0x78] sm:$0xff]  }
 0x2c0   : > { %v4770_v14 = vsel %vm4735_vm4, %v4614_v17, %v4610_v56  ;;  %v3482_v24 = vrot.slane %v3468_v16, %v10827_v7  ;;  %v3483_v54 = vcombine.high %v3475_v9, %v3475_v9  ;;  %v8381_v13 = vrot.slane %v3475_v9, 9  ;;  %v11772_v43 = vpop.permute.xlu0 %2090  ;;  %v9131_v56 = vld [vmem:[%s12718_s3 + $0x38] sm:$0xff]   ;;  %8724 = vmatprep.subr.bf16.mxu0 %v9130_v10 }
 0x2c1   : > { %v1373_v22 = vmul.f32 %v13033_v2, %v13126_v21  ;;  %v8376_v5 = vrot.slane %v3450_v8, 9  ;;  %v4269_v36 = vmax.f32 %v3441_v34, %v8373_v40  ;;  %v11779_v44 = vadd.f32 %v1637_v53, %v1409_v39  ;;  %8725 = vmatpush3.bf16.msra.mxu0 %v9131_v56  ;;  %v9447_v21 = vld [vmem:[#allocation3 + $0x32] sm:$0xff] }
 0x2c2   : > { %v3484_v26 = vcombine.high %v3482_v24, %v3482_v24  ;;  %v8382_v17 = vrot.slane %v3483_v54, 9  ;;  %v8383_v55 = vrot.slane %v3482_v24, 9  ;;  %v4277_v28 = vmax.f32 %v3475_v9, %v8381_v13  ;;  %v13127_v9 = vld [vmem:[#allocation43_spill] sm:$0xff] }
 0x2c3   : > { %v4622_v48 = vrot.slane %v4364_v37, %v13111_v63  ;;  %v4771_v57 = vsel %vm4737_vm5, %v4618_v18, %v4770_v14  ;;  %v4270_v19 = vmax.f32 %v3449_v12, %v8374_v11  ;;  %v4271_v29 = vmax.f32 %v3448_v38, %v8375_v25  ;;  %v11786_v46 = vpop.permute.xlu1 %2596  ;;  %v13128_v37 = vld [vmem:[#allocation90_spill] sm:$0xff] }
 0x2c4   : > { %v8384_v34 = vrot.slane %v3484_v26, 9  ;;  %v4278_v32 = vmax.f32 %v3483_v54, %v8382_v17  ;;  %v4279_v47 = vmax.f32 %v3482_v24, %v8383_v55  ;;  %v4365_v40 = vmax.f32 %v4269_v36, %v4277_v28  ;;  %v11788_v49 = vpop.permute.xlu0 %2606  ;;  %v13129_v54 = vld [vmem:[#allocation42_spill] sm:$0xff]  ;;  %v13130_v28 = vld [vmem:[#allocation44_spill] sm:$0xff] }
 0x2c5   : > { %v11791_v16 = vadd.f32 %v1373_v22, %v11477_v42  ;;  %v1108_v39 = vmul.f32 %v13028_v6, %v13127_v9  ;;  %v1627_v18 = vmul.f32 %v13038_v59, %v13128_v37  ;;  %v4272_v12 = vmax.f32 %v3450_v8, %v8376_v5  ;;  %v13133_v9 = vld [vmem:[#allocation112_spill] sm:$0xff] }
 0x2c6   : > { %v4280_v38 = vmax.f32 %v3484_v26, %v8384_v34  ;;  %v4366_v11 = vmax.f32 %v4270_v19, %v4278_v32  ;;  %v4367_v25 = vmax.f32 %v4271_v29, %v4279_v47  ;;  %v4626_v53 = vrot.slane %v4365_v40, %v13111_v63  ;;  %v11798_v14 = vld [vmem:[#allocation3 + $0x42] sm:$0xff]  ;;  %v13131_v19 = vld [vmem:[#allocation71_spill] sm:$0xff]  ;;  %v13132_v47 = vld [vmem:[#allocation48_spill] sm:$0xff] }
 0x2c7   : > { %v11800_v24 = vld [vmem:[#allocation3 + $0x40] sm:$0xff]  ;;  %v848_v42 = vmul.f32 %v13031_v60, %v13129_v54  ;;  %v4772_v13 = vsel %vm4739_vm6, %v4622_v48, %v4771_v57  ;;  %v11805_v10 = vpop.permute.xlu1 %2100  ;;  %v9004_v22 = vpack.i.bf16 %v11798_v14, %v9447_v21  ;;  %v850_v48 = vmul.f32 %v13031_v60, %v13130_v28 }
 0x2c8   : > { %v9029_v8 = vpack.i.bf16 %v11800_v24, %v11539_v0  ;;  %v4368_v5 = vmax.f32 %v4272_v12, %v4280_v38  ;;  %v4630_v36 = vrot.slane %v4366_v11, %v13111_v63  ;;  %v4634_v56 = vrot.slane %v4367_v25, %v13111_v63  ;;  %v1331_v17 = vpop.permute.xlu0 %1330  ;;  %v13135_v11 = vld [vmem:[#allocation51_spill] sm:$0xff] }
 0x2c9   : > { %v4773_v26 = vsel %vm4741_vm7, %v4626_v53, %v4772_v13  ;;  %v1140_v55 = vadd.f32 %v1108_v39, %v848_v42  ;;  %v1376_v57 = vmul.f32 %v13033_v2, %v1331_v17  ;;  %9005 = vrot.lane.b32.xlu0 %v9004_v22, %s9560_s26  ;;  %v1659_v0 = vadd.f32 %v1627_v18, %v11485_v1  ;;  %v13134_v1 = vld [vmem:[#allocation50_spill] sm:$0xff]  ;;  %v13136_v13 = vld [vmem:[#allocation53_spill] sm:$0xff] }
 0x2ca   : > { %9030 = vrot.lane.b32.xlu1 %v9029_v8, %s9562_s25  ;;  %v1887_v29 = vmul.f32 %v13041_v4, %v13131_v19  ;;  %v4638_v34 = vrot.slane %v4368_v5, %v13111_v63  ;;  %v4774_v32 = vsel %vm4743_vm8, %v4630_v36, %v4773_v26  ;;  %v1110_v40 = vmul.f32 %v13028_v6, %v13132_v47  ;;  %v13137_v22 = vld [vmem:[#allocation54_spill] sm:$0xff]  ;;  %v13138_v8 = vld [vmem:[#allocation56_spill] sm:$0xff]  ;;  %v13144_v47 = vld [vmem:[#allocation75_spill] sm:$0xff] }
 0x2cb   : > { %v1629_v39 = vmul.f32 %v13038_v59, %v13133_v9  ;;  %v4775_v37 = vsel %vm4745_vm9, %v4634_v56, %v4774_v32  ;;  %v11829_v12 = vadd.f32 %v1376_v57, %v11723_v15  ;;  %v11831_v38 = vpop.permute.xlu1 %2616  ;;  %v852_v18 = vmul.f32 %v13031_v60, %v13134_v1  ;;  %v13139_v56 = vld [vmem:[#allocation57_spill] sm:$0xff]  ;;  %v13141_v57 = vld [vmem:[#allocation118_spill] sm:$0xff]  ;;  %v13142_v19 = vld [vmem:[#allocation60_spill] sm:$0xff] }
 0x2cc   : > { %v1112_v25 = vmul.f32 %v13028_v6, %v13135_v11  ;;  %v2147_v53 = vmul.f32 %v13046_v27, %v11386_v35  ;;  %v4776_v54 = vsel %vm4747_vm10, %v4638_v34, %v4775_v37  ;;  %v1846_v42 = vpop.permute.xlu0 %1845  ;;  %v854_v21 = vmul.f32 %v13031_v60, %v13136_v13  ;;  %v13140_v35 = vld [vmem:[#allocation58_spill] sm:$0xff]  ;;  %v13143_v32 = vld [vmem:[#allocation67_spill] sm:$0xff] }
 0x2cd   : > { %v1631_v15 = vmul.f32 %v13038_v59, %v13137_v22  ;;  %v1114_v5 = vmul.f32 %v13028_v6, %v13138_v8  ;;  %4811 = vst.msk [vmem:[#allocation3 + $0x51] sm:$0xff] %vm4393_vm2, %v4776_v54  ;;  %v1895_v36 = vmul.f32 %v13041_v4, %v1846_v42  ;;  %v1633_v26 = vmul.f32 %v13038_v59, %v13139_v56  ;;  %v13145_v13 = vld [vmem:[#allocation83_spill] sm:$0xff]  ;;  %v13146_v56 = vld [vmem:[#allocation93_spill] sm:$0xff] }
 0x2ce   : > { %v1368_v17 = vmul.f32 %v13033_v2, %v13140_v35  ;;  %v1919_v28 = vadd.f32 %v1887_v29, %v1659_v0  ;;  %v2408_v60 = vmul.f32 %v10602_v30, %v13141_v57  ;;  %v1370_v34 = vmul.f32 %v13033_v2, %v13142_v19 }
 0x2cf   : > { %v1889_v6 = vmul.f32 %v13041_v4, %v13143_v32  ;;  %v1372_v9 = vmul.f32 %v13033_v2, %v13144_v47  ;;  %v11861_v37 = vadd.f32 %v1895_v36, %v11729_v58  ;;  %v1341_v1 = vpop.permute.xlu1 %1340  ;;  %v1142_v11 = vadd.f32 %v1110_v40, %v850_v48  ;;  %v13147_v58 = vld [vmem:[#allocation76_spill] sm:$0xff] }
 0x2d0   : > { %v2179_v54 = vadd.f32 %v2147_v53, %v1919_v28  ;;  %v2668_v0 = vmul.f32 %v10653_v31, %v11754_v61  ;;  %v1378_v29 = vmul.f32 %v13033_v2, %v1341_v1  ;;  %v11866_v42 = vpop.permute.xlu0 %2331  ;;  %v1661_v22 = vadd.f32 %v1629_v39, %v13145_v13  ;;  %v4827_v1 = vld [vmem:[#allocation3 + $0x41] sm:$0xff] }
 0x2d1   : > { %v1144_v8 = vadd.f32 %v1112_v25, %v852_v18  ;;  %v1663_v35 = vadd.f32 %v1631_v15, %v13146_v56  ;;  %v1146_v57 = vadd.f32 %v1114_v5, %v854_v21  ;;  %v1665_v19 = vadd.f32 %v1633_v26, %v11791_v16  ;;  %v13148_v39 = vld [vmem:[#allocation77_spill] sm:$0xff] }
 0x2d2   : > { %v1891_v36 = vmul.f32 %v13041_v4, %v13147_v58  ;;  %v2440_v48 = vadd.f32 %v2408_v60, %v2179_v54  ;;  %v11874_v40 = vadd.f32 %v1378_v29, %v11763_v50  ;;  %v1400_v61 = vadd.f32 %v1368_v17, %v1140_v55  ;;  %v13149_v25 = vld [vmem:[#allocation81_spill] sm:$0xff]  ;;  %v11888_v17 = vld [vmem:[%s12716_s1 + $0x8] ss:$0 sm:$0xff]  ;;  %v13150_v54 = vld [vmem:[#allocation78_spill] sm:$0xff] }
 0x2d3   : > { %v1402_v53 = vadd.f32 %v1370_v34, %v1142_v11  ;;  %v1921_v28 = vadd.f32 %v1889_v6, %v1661_v22  ;;  %v1404_v32 = vadd.f32 %v1372_v9, %v1144_v8  ;;  %v1856_v47 = vpop.permute.xlu1 %1855  ;;  %v2149_v18 = vmul.f32 %v13046_v27, %v13148_v39  ;;  %v13151_v22 = vld [vmem:[#allocation89_spill] sm:$0xff] }
 0x2d4   : > { %v2151_v21 = vmul.f32 %v13046_v27, %v13149_v25  ;;  %v2700_v16 = vadd.f32 %v2668_v0, %v2440_v48  ;;  %v1897_v15 = vmul.f32 %v13041_v4, %v1856_v47  ;;  %v2847_v5 = vpop.permute.xlu0 %2846  ;;  %v11881_v26 = vld [vmem:[#allocation3 + $0x52] sm:$0xff]  ;;  %v1923_v11 = vadd.f32 %v1891_v36, %v1663_v35 }
 0x2d5   : > { %v11883_v50 = vld [vmem:[#allocation3 + $0x50] sm:$0xff]  ;;  %v2928_v60 = vmul.f32 %v11888_v17, %v2847_v5  ;;  %v5135_v34 = vpack.c.bf16 %v11881_v26, %v11798_v14  ;;  %v1374_v0 = vmul.f32 %v13033_v2, %v13150_v54  ;;  %v2410_v29 = vmul.f32 %v10602_v30, %v11592_v51  ;;  %v13153_v51 = vld [vmem:[#allocation105_spill] sm:$0xff] }
 0x2d6   : > { %v4828_v55 = vld [vmem:[#allocation3 + $0x51] sm:$0xff]  ;;  %v9014_v6 = vpack.i.bf16 %v11883_v50, %v11800_v24  ;;  %v11900_v13 = vadd.f32 %v1897_v15, %v11779_v44  ;;  %v1893_v8 = vmul.f32 %v13041_v4, %v13151_v22  ;;  %v2412_v56 = vmul.f32 %v10602_v30, %v11634_v23 }
 0x2d7   : > { %v9039_v9 = vpack.i.bf16 %v4828_v55, %v4827_v1  ;;  %v2960_v58 = vadd.f32 %v2928_v60, %v2700_v16  ;;  %8846 = vmatmul.mubr.msk.bf16.vlgmr.msra.gmra.mrb[0].mxu1 %vm4393_vm2, %v5135_v34  ;;  %v11908_v24 = vpop.permute.xlu1 %2341  ;;  %v13152_v2 = vld [vmem:[#allocation98_spill] sm:$0xff]  ;;  %v1630_v44 = vmul.f32 %v13038_v59, %v13153_v51  ;;  %v2181_v36 = vadd.f32 %v2149_v18, %v1921_v28  ;;  %v13154_v47 = vld [vmem:[#allocation103_spill] sm:$0xff]  ;;  %v13156_v60 = vld [vmem:[#allocation101_spill] sm:$0xff] }
 0x2d8   : > { %9015 = vrot.lane.b32.xlu0 %v9014_v6, %s9561_s17  ;;  %v1628_v35 = vmul.f32 %v13038_v59, %v13152_v2  ;;  %v2670_v48 = vmul.f32 %v10653_v31, %v11786_v46  ;;  %v11917_v23 = vpop.permute.xlu0 %2351  ;;  %v1632_v1 = vmul.f32 %v13038_v59, %v13154_v47  ;;  %v2183_v39 = vadd.f32 %v2151_v21, %v1923_v11  ;;  %v13155_v5 = vld [vmem:[#allocation123_spill] sm:$0xff] }
 0x2d9   : > { %9040 = vrot.lane.b32.xlu1 %v9039_v9, %s9560_s26  ;;  %v2672_v25 = vmul.f32 %v10653_v31, %v11788_v49  ;;  %v2997_v16 = vadd.f32 %v10726_v20, %v2960_v58  ;;  %v1406_v15 = vadd.f32 %v1374_v0, %v1146_v57  ;;  %v1634_v28 = vmul.f32 %v13038_v59, %v13155_v5  ;;  %v13159_v47 = vld [vmem:[#allocation27_spill] sm:$0xff] }
 0x2da   : > { %v2442_v18 = vadd.f32 %v2410_v29, %v2181_v36  ;;  %v9049_v46 = vpack.i.bf16 %v11881_v26, %v11798_v14  ;;  %v1925_v55 = vadd.f32 %v1893_v8, %v1665_v19  ;;  %v2153_v34 = vmul.f32 %v13046_v27, %v13156_v60  ;;  %v13158_v36 = vld [vmem:[#allocation24_spill] sm:$0xff] }
 0x2db   : > { %v2444_v6 = vadd.f32 %v2412_v56, %v2183_v39  ;;  %v3029_v54 = vmax.f32 %v2997_v16, 0.0  ;;  %v2857_v21 = vpop.permute.xlu1 %2856  ;;  %v1660_v49 = vadd.f32 %v1628_v35, %v1400_v61  ;;  %v1662_v11 = vadd.f32 %v1630_v44, %v1402_v53  ;;  %v13157_v56 = vld [vmem:[#allocation107_spill] sm:$0xff] }
 0x2dc   : > { %9025 = vrot.lane.b32.xlu0 %v9039_v9, %s9562_s25  ;;  %v2702_v22 = vadd.f32 %v2670_v48, %v2442_v18  ;;  %v2930_v57 = vmul.f32 %v11888_v17, %v2857_v21  ;;  %v2867_v0 = vpop.permute.xlu0 %2866  ;;  %v1664_v29 = vadd.f32 %v1632_v1, %v1404_v32  ;;  %v1666_v8 = vadd.f32 %v1634_v28, %v1406_v15 }
 0x2dd   : > { %9050 = vrot.lane.b32.xlu1 %v9049_v46, %s9561_s17  ;;  %v2704_v58 = vadd.f32 %v2672_v25, %v2444_v6  ;;  %v3065_v14 = vmul.f32 %v10784_v41, %v3029_v54  ;;  %v2932_v19 = vmul.f32 %v11888_v17, %v2867_v0  ;;  %v1888_v2 = vmul.f32 %v13041_v4, %v13157_v56 }
 0x2de   : > { %v2414_v61 = vmul.f32 %v10602_v30, %v11678_v62  ;;  %v2962_v53 = vadd.f32 %v2930_v57, %v2702_v22  ;;  %v2185_v9 = vadd.f32 %v2153_v34, %v1925_v55  ;;  %v1890_v35 = vmul.f32 %v13041_v4, %v11568_v33 }
 0x2df   : > { %v3101_v51 = vadd.f32 %v10803_v3, %v3065_v14  ;;  %v2964_v32 = vadd.f32 %v2932_v19, %v2704_v58  ;;  %v11942_v44 = vpop.permute.xlu1 %2361  ;;  %v1892_v48 = vmul.f32 %v13041_v4, %v13158_v36  ;;  %v1894_v1 = vmul.f32 %v13041_v4, %v13159_v47 }
 0x2e0   : > { %v2674_v39 = vmul.f32 %v10653_v31, %v11831_v38  ;;  %v2999_v62 = vadd.f32 %v10726_v20, %v2962_v53  ;;  %v11951_v25 = vpop.permute.xlu0 %1590  ;;  %v2148_v33 = vmul.f32 %v13046_v27, %v11732_v45  ;;  %v1920_v28 = vadd.f32 %v1888_v2, %v1660_v49 }
 0x2e1   : > { %v3485_v16 = vcombine.high %v3101_v51, %v3101_v51  ;;  %v3492_v15 = vrot.slane %v3101_v51, %v10827_v7  ;;  %v3001_v5 = vadd.f32 %v10726_v20, %v2964_v32  ;;  %v2446_v18 = vadd.f32 %v2414_v61, %v2185_v9 }
 0x2e2   : > { %v2150_v46 = vmul.f32 %v13046_v27, %v11768_v52  ;;  %v3031_v55 = vmax.f32 %v2999_v62, 0.0  ;;  %v2152_v38 = vmul.f32 %v13046_v27, %v11772_v43  ;;  %v2154_v60 = vmul.f32 %v13046_v27, %v11805_v10 }
 0x2e3   : > { %v3499_v34 = vrot.slane %v3485_v16, %v10827_v7  ;;  %v3033_v45 = vmax.f32 %v3001_v5, 0.0  ;;  %v2877_v6 = vpop.permute.xlu1 %2876  ;;  %v1922_v54 = vadd.f32 %v1890_v35, %v1662_v11  ;;  %v2706_v21 = vadd.f32 %v2674_v39, %v2446_v18 }
 0x2e4   : > { %v3067_v22 = vmul.f32 %v10784_v41, %v3031_v55  ;;  %v2934_v49 = vmul.f32 %v11888_v17, %v2877_v6  ;;  %v11966_v57 = vpop.permute.xlu0 %2105  ;;  %v1924_v52 = vadd.f32 %v1892_v48, %v1664_v29  ;;  %v1926_v0 = vadd.f32 %v1894_v1, %v1666_v8 }
 0x2e5   : > { %v2180_v58 = vadd.f32 %v2148_v33, %v1920_v28  ;;  %v3500_v14 = vcombine.high %v3492_v15, %v3492_v15  ;;  %v2182_v43 = vadd.f32 %v2150_v46, %v1922_v54  ;;  %v3069_v10 = vmul.f32 %v10784_v41, %v3033_v45 }
 0x2e6   : > { %v3103_v19 = vadd.f32 %v10803_v3, %v3067_v22  ;;  %v2966_v56 = vadd.f32 %v2934_v49, %v2706_v21  ;;  %v2184_v2 = vadd.f32 %v2152_v38, %v1924_v52  ;;  %v2186_v61 = vadd.f32 %v2154_v60, %v1926_v0 }
 0x2e7   : > { %v3501_v11 = vcombine.high %v3499_v34, %v3499_v34  ;;  %v8385_v53 = vrot.slane %v3492_v15, 9  ;;  %v11970_v9 = vpop.permute.xlu1 %1600  ;;  %v3105_v29 = vadd.f32 %v10803_v3, %v3069_v10  ;;  %v2409_v36 = vmul.f32 %v10602_v30, %v11866_v42 }
 0x2e8   : > { %v3519_v35 = vcombine.high %v3103_v19, %v3103_v19  ;;  %v3526_v51 = vrot.slane %v3103_v19, %v10827_v7  ;;  %v3003_v8 = vadd.f32 %v10726_v20, %v2966_v56  ;;  %v2592_v32 = vpop.permute.xlu0 %2591  ;;  %v8386_v48 = vrot.slane %v3500_v14, 9 }
 0x2e9   : > { %v8387_v47 = vrot.slane %v3499_v34, 9  ;;  %v2411_v1 = vmul.f32 %v10602_v30, %v11908_v24  ;;  %v3553_v16 = vcombine.high %v3105_v29, %v3105_v29  ;;  %v8388_v5 = vrot.slane %v3501_v11, 9 }
 0x2ea   : > { %v3533_v39 = vrot.slane %v3519_v35, %v10827_v7  ;;  %v3534_v62 = vcombine.high %v3526_v51, %v3526_v51  ;;  %v8393_v33 = vrot.slane %v3526_v51, 9  ;;  %v4281_v28 = vmax.f32 %v3492_v15, %v8385_v53 }
 0x2eb   : > { %v3560_v18 = vrot.slane %v3105_v29, %v10827_v7  ;;  %v3035_v46 = vmax.f32 %v3003_v8, 0.0  ;;  %v11981_v55 = vpop.permute.xlu1 %2115  ;;  %v4282_v54 = vmax.f32 %v3500_v14, %v8386_v48  ;;  %v4283_v21 = vmax.f32 %v3499_v34, %v8387_v47 }
 0x2ec   : > { %v3535_v38 = vcombine.high %v3533_v39, %v3533_v39  ;;  %v8394_v60 = vrot.slane %v3534_v62, 9  ;;  %v8395_v42 = vrot.slane %v3533_v39, 9  ;;  %v4289_v45 = vmax.f32 %v3526_v51, %v8393_v33  ;;  %v2612_v6 = vpop.permute.xlu0 %2611 }
 0x2ed   : > { %v3567_v24 = vrot.slane %v3553_v16, %v10827_v7  ;;  %v3071_v22 = vmul.f32 %v10784_v41, %v3035_v46  ;;  %v2441_v19 = vadd.f32 %v2409_v36, %v2180_v58  ;;  %v4284_v10 = vmax.f32 %v3501_v11, %v8388_v5 }
 0x2ee   : > { %v8396_v49 = vrot.slane %v3535_v38, 9  ;;  %v4290_v52 = vmax.f32 %v3534_v62, %v8394_v60  ;;  %v4291_v0 = vmax.f32 %v3533_v39, %v8395_v42  ;;  %v4369_v15 = vmax.f32 %v4281_v28, %v4289_v45 }
 0x2ef   : > { %v2413_v56 = vmul.f32 %v10602_v30, %v11917_v23  ;;  %v2415_v53 = vmul.f32 %v10602_v30, %v11942_v44  ;;  %v2602_v35 = vpop.permute.xlu1 %2601  ;;  %v3568_v29 = vcombine.high %v3560_v18, %v3560_v18  ;;  %v11991_v48 = vadd.f32 %v2411_v1, %v2182_v43 }
 0x2f0   : > { %v4292_v51 = vmax.f32 %v3535_v38, %v8396_v49  ;;  %v4370_v14 = vmax.f32 %v4282_v54, %v4290_v52  ;;  %v4371_v34 = vmax.f32 %v4283_v21, %v4291_v0  ;;  %v11989_v8 = vpop.permute.xlu0 %1850  ;;  %v3569_v47 = vcombine.high %v3567_v24, %v3567_v24 }
 0x2f1   : > { %v8401_v39 = vrot.slane %v3560_v18, 9  ;;  %v3107_v58 = vadd.f32 %v10803_v3, %v3071_v22  ;;  %v4642_v36 = vrot.slane %v4369_v15, %v13111_v63  ;;  %v2445_v62 = vadd.f32 %v2413_v56, %v2184_v2 }
 0x2f2   : > { %v4372_v11 = vmax.f32 %v4284_v10, %v4292_v51  ;;  %v4646_v23 = vrot.slane %v4370_v14, %v13111_v63  ;;  %v4650_v44 = vrot.slane %v4371_v34, %v13111_v63  ;;  %v1636_v33 = vmul.f32 %v13038_v59, %v11951_v25 }
 0x2f3   : > { %v3587_v16 = vcombine.high %v3107_v58, %v3107_v58  ;;  %v3594_v5 = vrot.slane %v3107_v58, %v10827_v7  ;;  %v2622_v43 = vpop.permute.xlu1 %2621  ;;  %v8402_v28 = vrot.slane %v3568_v29, 9  ;;  %v8403_v46 = vrot.slane %v3567_v24, 9 }
 0x2f4   : > { %v4777_v1 = vsel %vm4735_vm4, %v4646_v23, %v4642_v36  ;;  %v12001_v38 = vadd.f32 %v2415_v53, %v2186_v61  ;;  %v2367_v60 = vpop.permute.xlu0 %2366  ;;  %v4654_v21 = vrot.slane %v4372_v11, %v13111_v63  ;;  %v8404_v25 = vrot.slane %v3569_v47, 9 }
 0x2f5   : > { %v4778_v42 = vsel %vm4737_vm5, %v4650_v44, %v4777_v1  ;;  %v3601_v45 = vrot.slane %v3587_v16, %v10827_v7  ;;  %v3602_v54 = vcombine.high %v3594_v5, %v3594_v5  ;;  %v8409_v2 = vrot.slane %v3594_v5, 9 }
 0x2f6   : > { %v4297_v22 = vmax.f32 %v3560_v18, %v8401_v39  ;;  %v2669_v49 = vmul.f32 %v10653_v31, %v2592_v32  ;;  %v4298_v61 = vmax.f32 %v3568_v29, %v8402_v28  ;;  %v4299_v53 = vmax.f32 %v3567_v24, %v8403_v46 }
 0x2f7   : > { %v3603_v52 = vcombine.high %v3601_v45, %v3601_v45  ;;  %v8410_v0 = vrot.slane %v3602_v54, 9  ;;  %v8411_v15 = vrot.slane %v3601_v45, 9  ;;  %v4305_v10 = vmax.f32 %v3594_v5, %v8409_v2  ;;  %v1861_v56 = vpop.permute.xlu1 %1860 }
 0x2f8   : > { %v2155_v51 = vmul.f32 %v13046_v27, %v11966_v57  ;;  %v2673_v14 = vmul.f32 %v10653_v31, %v2612_v6  ;;  %v2852_v34 = vpop.permute.xlu0 %2851  ;;  %v4300_v18 = vmax.f32 %v3569_v47, %v8404_v25  ;;  %v2701_v39 = vadd.f32 %v2669_v49, %v2441_v19 }
 0x2f9   : > { %v8412_v58 = vrot.slane %v3603_v52, 9  ;;  %v4306_v36 = vmax.f32 %v3602_v54, %v8410_v0  ;;  %v4307_v11 = vmax.f32 %v3601_v45, %v8411_v15  ;;  %v4377_v23 = vmax.f32 %v4297_v22, %v4305_v10 }
 0x2fa   : > { %v2929_v32 = vmul.f32 %v11888_v17, %v2852_v34  ;;  %v12012_v44 = vsel %vm4739_vm6, %v4654_v21, %v4778_v42  ;;  %v2671_v5 = vmul.f32 %v10653_v31, %v2602_v35  ;;  %v1668_v6 = vadd.f32 %v1636_v33, %v11829_v12 }
 0x2fb   : > { %v4308_v16 = vmax.f32 %v3603_v52, %v8412_v58  ;;  %v4378_v29 = vmax.f32 %v4298_v61, %v4306_v36  ;;  %v4379_v24 = vmax.f32 %v4299_v53, %v4307_v11  ;;  %v2377_v57 = vpop.permute.xlu1 %2376  ;;  %v4674_v1 = vrot.slane %v4377_v23, %v13111_v63 }
 0x2fc   : > { %v2705_v28 = vadd.f32 %v2673_v14, %v2445_v62  ;;  %v2961_v46 = vadd.f32 %v2929_v32, %v2701_v39  ;;  %v2872_v45 = vpop.permute.xlu0 %2871  ;;  %v2187_v2 = vadd.f32 %v2155_v51, %v11861_v37  ;;  %v1638_v35 = vmul.f32 %v13038_v59, %v11970_v9 }
 0x2fd   : > { %v4380_v47 = vmax.f32 %v4300_v18, %v4308_v16  ;;  %v4678_v19 = vrot.slane %v4378_v29, %v13111_v63  ;;  %v4682_v54 = vrot.slane %v4379_v24, %v13111_v63  ;;  %v2933_v42 = vmul.f32 %v11888_v17, %v2872_v45 }
 0x2fe   : > { %v2157_v12 = vmul.f32 %v13046_v27, %v11981_v55  ;;  %v2998_v33 = vadd.f32 %v10726_v20, %v2961_v46  ;;  %v2703_v25 = vadd.f32 %v2671_v5, %v11991_v48  ;;  %v2675_v37 = vmul.f32 %v10653_v31, %v2622_v43 }
 0x2ff   : > { %v4686_v62 = vrot.slane %v4380_v47, %v13111_v63  ;;  %v4784_v21 = vsel %vm4735_vm4, %v4678_v19, %v4674_v1  ;;  %v2965_v22 = vadd.f32 %v2933_v42, %v2705_v28  ;;  %v2862_v49 = vpop.permute.xlu1 %2861  ;;  %v1896_v55 = vmul.f32 %v13041_v4, %v11989_v8 }
 0x300   : > { %v4785_v52 = vsel %vm4737_vm5, %v4682_v54, %v4784_v21  ;;  %v3030_v0 = vmax.f32 %v2998_v33, 0.0  ;;  %v2931_v59 = vmul.f32 %v11888_v17, %v2862_v49  ;;  %v2111_v9 = vpop.permute.xlu0 %2110  ;;  %v2416_v15 = vmul.f32 %v10602_v30, %v2367_v60 }
 0x301   : > { %v3002_v10 = vadd.f32 %v10726_v20, %v2965_v22  ;;  %v12037_v61 = vsel %vm4739_vm6, %v4686_v62, %v4785_v52  ;;  %v1670_v48 = vadd.f32 %v1638_v35, %v11874_v40  ;;  %v2189_v53 = vadd.f32 %v2157_v12, %v11900_v13 }
 0x302   : > { %v3066_v43 = vmul.f32 %v10784_v41, %v3030_v0  ;;  %v2963_v51 = vadd.f32 %v2931_v59, %v2703_v25  ;;  %v1898_v14 = vmul.f32 %v13041_v4, %v1861_v56  ;;  %v2418_v34 = vmul.f32 %v10602_v30, %v2377_v57 }
 0x303   : > { %v3034_v58 = vmax.f32 %v3002_v10, 0.0  ;;  %v2156_v8 = vmul.f32 %v13046_v27, %v2111_v9  ;;  %v2882_v60 = vpop.permute.xlu1 %2881  ;;  %v2707_v36 = vadd.f32 %v2675_v37, %v12001_v38  ;;  %v1928_v18 = vadd.f32 %v1896_v55, %v1668_v6 }
 0x304   : > { %v3102_v11 = vadd.f32 %v10803_v3, %v3066_v43  ;;  %v3000_v23 = vadd.f32 %v10726_v20, %v2963_v51  ;;  %v2935_v40 = vmul.f32 %v11888_v17, %v2882_v60  ;;  %v2627_v13 = vpop.permute.xlu0 %2626  ;;  %v2448_v39 = vadd.f32 %v2416_v15, %v2187_v2 }
 0x305   : > { %v3070_v32 = vmul.f32 %v10784_v41, %v3034_v58  ;;  %v2676_v4 = vmul.f32 %v10653_v31, %v2627_v13  ;;  %v1930_v5 = vadd.f32 %v1898_v14, %v1670_v48  ;;  %v12052_v38 = vadd.f32 %v2418_v34, %v2189_v53 }
 0x306   : > { %v3502_v56 = vcombine.high %v3102_v11, %v3102_v11  ;;  %v3509_v16 = vrot.slane %v3102_v11, %v10827_v7  ;;  %v3032_v29 = vmax.f32 %v3000_v23, 0.0  ;;  %v2967_v24 = vadd.f32 %v2935_v40, %v2707_v36 }
 0x307   : > { %v3106_v57 = vadd.f32 %v10803_v3, %v3070_v32  ;;  %v2188_v1 = vadd.f32 %v2156_v8, %v1928_v18  ;;  %v2121_v28 = vpop.permute.xlu1 %2120  ;;  %v2708_v35 = vadd.f32 %v2676_v4, %v2448_v39 }
 0x308   : > { %v3516_v46 = vrot.slane %v3502_v56, %v10827_v7  ;;  %v3517_v6 = vcombine.high %v3509_v16, %v3509_v16  ;;  %v8389_v45 = vrot.slane %v3509_v16, 9  ;;  %v3068_v47 = vmul.f32 %v10784_v41, %v3032_v29  ;;  %v2372_v19 = vpop.permute.xlu0 %2371 }
 0x309   : > { %v3570_v54 = vcombine.high %v3106_v57, %v3106_v57  ;;  %v3577_v42 = vrot.slane %v3106_v57, %v10827_v7  ;;  %v3004_v2 = vadd.f32 %v10726_v20, %v2967_v24  ;;  %v2158_v21 = vmul.f32 %v13046_v27, %v2121_v28 }
 0x30a   : > { %v3518_v12 = vcombine.high %v3516_v46, %v3516_v46  ;;  %v8390_v33 = vrot.slane %v3517_v6, 9  ;;  %v8391_v62 = vrot.slane %v3516_v46, 9  ;;  %v3104_v52 = vadd.f32 %v10803_v3, %v3068_v47 }
 0x30b   : > { %v3584_v25 = vrot.slane %v3570_v54, %v10827_v7  ;;  %v3585_v22 = vcombine.high %v3577_v42, %v3577_v42  ;;  %v8405_v49 = vrot.slane %v3577_v42, 9  ;;  %v2637_v37 = vpop.permute.xlu1 %2636  ;;  %v4285_v59 = vmax.f32 %v3509_v16, %v8389_v45 }
 0x30c   : > { %v8392_v0 = vrot.slane %v3518_v12, 9  ;;  %v4286_v9 = vmax.f32 %v3517_v6, %v8390_v33  ;;  %v3036_v55 = vmax.f32 %v3004_v2, 0.0  ;;  %v2887_v15 = vpop.permute.xlu0 %2886  ;;  %v4287_v10 = vmax.f32 %v3516_v46, %v8391_v62 }
 0x30d   : > { %v3586_v48 = vcombine.high %v3584_v25, %v3584_v25  ;;  %v8406_v53 = vrot.slane %v3585_v22, 9  ;;  %v8407_v43 = vrot.slane %v3584_v25, 9  ;;  %v12062_v51 = vmax.f32 %v3577_v42, %v8405_v49 }
 0x30e   : > { %v3536_v14 = vcombine.high %v3104_v52, %v3104_v52  ;;  %v3543_v27 = vrot.slane %v3104_v52, %v10827_v7  ;;  %v3072_v34 = vmul.f32 %v10784_v41, %v3036_v55  ;;  %v4288_v58 = vmax.f32 %v3518_v12, %v8392_v0 }
 0x30f   : > { %v8408_v8 = vrot.slane %v3586_v48, 9  ;;  %v12066_v60 = vmax.f32 %v3585_v22, %v8406_v53  ;;  %v12068_v36 = vmax.f32 %v3584_v25, %v8407_v43  ;;  %v2382_v11 = vpop.permute.xlu1 %2381  ;;  %v12074_v4 = vadd.f32 %v2158_v21, %v1930_v5 }
 0x310   : > { %v3550_v23 = vrot.slane %v3536_v14, %v10827_v7  ;;  %v3551_v40 = vcombine.high %v3543_v27, %v3543_v27  ;;  %v8397_v13 = vrot.slane %v3543_v27, 9  ;;  %v3108_v18 = vadd.f32 %v10803_v3, %v3072_v34  ;;  %v2632_v39 = vpop.permute.xlu0 %2631 }
 0x311   : > { %v12072_v32 = vmax.f32 %v3586_v48, %v8408_v8  ;;  %v2417_v56 = vmul.f32 %v10602_v30, %v2372_v19  ;;  %v2936_v16 = vmul.f32 %v11888_v17, %v2887_v15  ;;  %v2678_v47 = vmul.f32 %v10653_v31, %v2637_v37 }
 0x312   : > { %v3552_v29 = vcombine.high %v3550_v23, %v3550_v23  ;;  %v8398_v24 = vrot.slane %v3551_v40, 9  ;;  %v8399_v57 = vrot.slane %v3550_v23, 9  ;;  %v4293_v28 = vmax.f32 %v3543_v27, %v8397_v13 }
 0x313   : > { %v3604_v46 = vcombine.high %v3108_v18, %v3108_v18  ;;  %v3611_v6 = vrot.slane %v3108_v18, %v10827_v7  ;;  %v2449_v45 = vadd.f32 %v2417_v56, %v2188_v1  ;;  %v2897_v54 = vpop.permute.xlu1 %2896  ;;  %v2968_v21 = vadd.f32 %v2936_v16, %v2708_v35 }
 0x314   : > { %v8400_v42 = vrot.slane %v3552_v29, 9  ;;  %v4294_v2 = vmax.f32 %v3551_v40, %v8398_v24  ;;  %v4295_v12 = vmax.f32 %v3550_v23, %v8399_v57  ;;  %v4373_v5 = vmax.f32 %v4285_v59, %v4293_v28  ;;  %v2892_v25 = vpop.permute.xlu0 %2891 }
 0x315   : > { %v3618_v33 = vrot.slane %v3604_v46, %v10827_v7  ;;  %v3619_v19 = vcombine.high %v3611_v6, %v3611_v6  ;;  %v8413_v62 = vrot.slane %v3611_v6, 9  ;;  %v2710_v23 = vadd.f32 %v2678_v47, %v12052_v38 }
 0x316   : > { %v4296_v22 = vmax.f32 %v3552_v29, %v8400_v42  ;;  %v4374_v49 = vmax.f32 %v4286_v9, %v4294_v2  ;;  %v4375_v52 = vmax.f32 %v4287_v10, %v4295_v12  ;;  %v4658_v0 = vrot.slane %v4373_v5, %v13111_v63 }
 0x317   : > { %v3620_v55 = vcombine.high %v3618_v33, %v3618_v33  ;;  %v8414_v1 = vrot.slane %v3619_v19, 9  ;;  %v8415_v15 = vrot.slane %v3618_v33, 9  ;;  %v4309_v37 = vmax.f32 %v3611_v6, %v8413_v62  ;;  %v2642_v48 = vpop.permute.xlu1 %2641 }
 0x318   : > { %v4376_v53 = vmax.f32 %v4288_v58, %v4296_v22  ;;  %v4662_v43 = vrot.slane %v4374_v49, %v13111_v63  ;;  %v4666_v59 = vrot.slane %v4375_v52, %v13111_v63  ;;  %v4780_v14 = vsel %vm4741_vm7, %v4658_v0, %v12012_v44  ;;  %v12094_v56 = vpop.permute.xlu0 %8975 }
 0x319   : > { %v8416_v35 = vrot.slane %v3620_v55, 9  ;;  %v4310_v27 = vmax.f32 %v3619_v19, %v8414_v1  ;;  %v4311_v34 = vmax.f32 %v3618_v33, %v8415_v15  ;;  %v4381_v9 = vmax.f32 %v12062_v51, %v4309_v37 }
 0x31a   : > { %v4670_v10 = vrot.slane %v4376_v53, %v13111_v63  ;;  %v4781_v8 = vsel %vm4743_vm8, %v4662_v43, %v4780_v14  ;;  %v3005_v58 = vadd.f32 %v10726_v20, %v2968_v21  ;;  %v2419_v57 = vmul.f32 %v10602_v30, %v2382_v11 }
 0x31b   : > { %v4782_v40 = vsel %vm4745_vm9, %v4666_v59, %v4781_v8  ;;  %v4312_v13 = vmax.f32 %v3620_v55, %v8416_v35  ;;  %v4382_v18 = vmax.f32 %v12066_v60, %v4310_v27  ;;  %v4383_v44 = vmax.f32 %v12068_v36, %v4311_v34  ;;  %v2902_v16 = vpop.permute.xlu1 %2901  ;;  %v4815_v59 = vld [vmem:[#allocation3] sm:$0xff] }
 0x31c   : > { %v4783_v51 = vsel %vm4747_vm10, %v4670_v10, %v4782_v40  ;;  %v4690_v29 = vrot.slane %v4381_v9, %v13111_v63  ;;  %v3037_v24 = vmax.f32 %v3005_v58, 0.0  ;;  %v2677_v36 = vmul.f32 %v10653_v31, %v2632_v39  ;;  %v12117_v21 = vpop.permute.xlu0 %8985  ;;  %v4816_v9 = vld [vmem:[#allocation3 + $0x10] sm:$0xff] }
 0x31d   : > { %4812 = vst.msk [vmem:[#allocation3 + $0x61] sm:$0xff] %vm4393_vm2, %v4783_v51  ;;  %v4384_v38 = vmax.f32 %v12072_v32, %v4312_v13  ;;  %v4694_v28 = vrot.slane %v4382_v18, %v13111_v63  ;;  %v4698_v60 = vrot.slane %v4383_v44, %v13111_v63  ;;  %v2938_v47 = vmul.f32 %v11888_v17, %v2897_v54 }
 0x31e   : > { %v4787_v46 = vsel %vm4741_vm7, %v4690_v29, %v12037_v61  ;;  %v3073_v6 = vmul.f32 %v10784_v41, %v3037_v24  ;;  %v2937_v42 = vmul.f32 %v11888_v17, %v2892_v25  ;;  %v2709_v32 = vadd.f32 %v2677_v36, %v2449_v45 }
 0x31f   : > { %v4702_v30 = vrot.slane %v4384_v38, %v13111_v63  ;;  %v4788_v11 = vsel %vm4743_vm8, %v4694_v28, %v4787_v46  ;;  %v2679_v2 = vmul.f32 %v10653_v31, %v2642_v48  ;;  %v2970_v5 = vadd.f32 %v2938_v47, %v2710_v23  ;;  %v8981_v33 = vpop.permute.xlu1 %8980 }
 0x320   : > { %v4789_v12 = vsel %vm4745_vm9, %v4698_v60, %v4788_v11  ;;  %v3109_v39 = vadd.f32 %v10803_v3, %v3073_v6  ;;  %v2451_v19 = vadd.f32 %v2419_v57, %v12074_v4  ;;  %v2969_v54 = vadd.f32 %v2937_v42, %v2709_v32  ;;  %v12134_v40 = vpop.permute.xlu0 %8995 }
 0x321   : > { %v4790_v61 = vsel %vm4747_vm10, %v4702_v30, %v4789_v12  ;;  %v8978_v62 = vunpack.i.h.bf16 %v12094_v56  ;;  %v3007_v25 = vadd.f32 %v10726_v20, %v2970_v5  ;;  %v2939_v22 = vmul.f32 %v11888_v17, %v2902_v16 }
 0x322   : > { %4813 = vst.msk [vmem:[#allocation3 + $0x71] sm:$0xff] %vm4393_vm2, %v4790_v61  ;;  %v3621_v45 = vcombine.high %v3109_v39, %v3109_v39  ;;  %v3628_v31 = vrot.slane %v3109_v39, %v10827_v7  ;;  %v3006_v49 = vadd.f32 %v10726_v20, %v2969_v54  ;;  %v2711_v52 = vadd.f32 %v2679_v2, %v2451_v19  ;;  %v4847_v19 = vld [vmem:[#allocation3 + $0x11] sm:$0xff] }
 0x323   : > { %v8977_v0 = vunpack.i.l.bf16 %v12094_v56  ;;  %v8983_v4 = vunpack.i.h.bf16 %v8981_v33  ;;  %v3039_v37 = vmax.f32 %v3007_v25, 0.0  ;;  %v8988_v43 = vunpack.i.h.bf16 %v12117_v21 }
 0x324   : > { %v3635_v55 = vrot.slane %v3621_v45, %v10827_v7  ;;  %v3636_v1 = vcombine.high %v3628_v31, %v3628_v31  ;;  %v8417_v15 = vrot.slane %v3628_v31, 9  ;;  %v3038_v48 = vmax.f32 %v3006_v49, 0.0  ;;  %v12136_v13 = vld [vmem:[#allocation3 + $0x62] sm:$0xff] }
 0x325   : > { %v2971_v53 = vadd.f32 %v2939_v22, %v2711_v52  ;;  %v8982_v14 = vunpack.i.l.bf16 %v8981_v33  ;;  %v8987_v34 = vunpack.i.l.bf16 %v12117_v21  ;;  %v3075_v10 = vmul.f32 %v10784_v41, %v3039_v37  ;;  %v12145_v28 = vld [vmem:[#allocation3 + $0x60] sm:$0xff] }
 0x326   : > { %v3637_v35 = vcombine.high %v3635_v55, %v3635_v55  ;;  %v8418_v27 = vrot.slane %v3636_v1, 9  ;;  %v8419_v17 = vrot.slane %v3635_v55, 9  ;;  %v3074_v8 = vmul.f32 %v10784_v41, %v3038_v48 }
 0x327   : > { %v3008_v23 = vadd.f32 %v10726_v20, %v2971_v53  ;;  %v12132_v58 = vsel %vm4393_vm2, %v4816_v9, %v8983_v4  ;;  %v4313_v44 = vmax.f32 %v3628_v31, %v8417_v15  ;;  %v12139_v51 = vsel %vm4393_vm2, %v4815_v59, %v8982_v14  ;;  %v12143_v20 = vpop.permute.xlu1 %8990 }
 0x328   : > { %v8420_v18 = vrot.slane %v3637_v35, 9  ;;  %v4314_v16 = vmax.f32 %v3636_v1, %v8418_v27  ;;  %v4315_v29 = vmax.f32 %v3635_v55, %v8419_v17  ;;  %v3111_v24 = vadd.f32 %v10803_v3, %v3075_v10  ;;  %v4848_v10 = vld [vmem:[#allocation3 + $0x21] sm:$0xff] }
 0x329   : > { %v3110_v57 = vadd.f32 %v10803_v3, %v3074_v8  ;;  %v3040_v38 = vmax.f32 %v3008_v23, 0.0  ;;  %v8998_v36 = vunpack.i.h.bf16 %v12134_v40  ;;  %v8997_v46 = vunpack.i.l.bf16 %v12134_v40 }
 0x32a   : > { %v4316_v60 = vmax.f32 %v3637_v35, %v8420_v18  ;;  %v9034_v6 = vpack.i.bf16 %v12136_v13, %v11881_v26  ;;  %v3655_v47 = vcombine.high %v3111_v24, %v3111_v24  ;;  %v3662_v42 = vrot.slane %v3111_v24, %v10827_v7 }
 0x32b   : > { %v3638_v30 = vcombine.high %v3110_v57, %v3110_v57  ;;  %v3645_v11 = vrot.slane %v3110_v57, %v10827_v7  ;;  %v3076_v32 = vmul.f32 %v10784_v41, %v3040_v38  ;;  %v8993_v2 = vunpack.i.h.bf16 %v12143_v20 }
 0x32c   : > { %v8992_v12 = vunpack.i.l.bf16 %v12143_v20  ;;  %9035 = vrot.lane.b32.xlu0 %v9034_v6, %s9560_s26  ;;  %v9059_v39 = vpack.i.bf16 %v12145_v28, %v11883_v50  ;;  %v3669_v26 = vrot.slane %v3655_v47, %v10827_v7  ;;  %v3670_v5 = vcombine.high %v3662_v42, %v3662_v42 }
 0x32d   : > { %v8425_v33 = vrot.slane %v3662_v42, 9  ;;  %v3652_v61 = vrot.slane %v3638_v30, %v10827_v7  ;;  %v3653_v54 = vcombine.high %v3645_v11, %v3645_v11  ;;  %v8421_v45 = vrot.slane %v3645_v11, 9  ;;  %v9001_v30 = vpop.permute.xlu1 %9000 }
 0x32e   : > { %v3112_v41 = vadd.f32 %v10803_v3, %v3076_v32  ;;  %9060 = vrot.lane.b32.xlu1 %v9059_v39, %s9562_s25  ;;  %v5106_v31 = vsel %vm4393_vm2, %v4847_v19, %v8977_v0  ;;  %v3671_v25 = vcombine.high %v3669_v26, %v3669_v26  ;;  %v8426_v22 = vrot.slane %v3670_v5, 9 }
 0x32f   : > { %v8427_v49 = vrot.slane %v3669_v26, 9  ;;  %v4321_v50 = vmax.f32 %v3662_v42, %v8425_v33  ;;  %v3654_v52 = vcombine.high %v3652_v61, %v3652_v61  ;;  %v8422_v4 = vrot.slane %v3653_v54, 9  ;;  %v12184_v33 = vld [vmem:[#allocation3 + $0x70] sm:$0xff] }
 0x330   : > { %v8423_v55 = vrot.slane %v3652_v61, 9  ;;  %v4317_v1 = vmax.f32 %v3645_v11, %v8421_v45  ;;  %v8428_v15 = vrot.slane %v3671_v25, 9  ;;  %v4322_v37 = vmax.f32 %v3670_v5, %v8426_v22  ;;  %v12182_v5 = vld [vmem:[#allocation3 + $0x72] sm:$0xff] }
 0x331   : > { %v4323_v48 = vmax.f32 %v3669_v26, %v8427_v49  ;;  %v4385_v53 = vmax.f32 %v4313_v44, %v4321_v50  ;;  %v8424_v59 = vrot.slane %v3654_v52, 9  ;;  %v4318_v14 = vmax.f32 %v3653_v54, %v8422_v4 }
 0x332   : > { %v4319_v35 = vmax.f32 %v3652_v61, %v8423_v55  ;;  %v3672_v3 = vcombine.high %v3112_v41, %v3112_v41  ;;  %v4324_v27 = vmax.f32 %v3671_v25, %v8428_v15  ;;  %v4386_v17 = vmax.f32 %v4314_v16, %v4322_v37 }
 0x333   : > { %v4387_v9 = vmax.f32 %v4315_v29, %v4323_v48  ;;  %v4706_v0 = vrot.slane %v4385_v53, %v13111_v63  ;;  %v4320_v8 = vmax.f32 %v3654_v52, %v8424_v59  ;;  %v3679_v23 = vrot.slane %v3112_v41, %v10827_v7  ;;  %v12196_v52 = vld [vmem:[#allocation3 + $0x61] sm:$0xff] }
 0x334   : > { %v3686_v18 = vrot.slane %v3672_v3, %v10827_v7  ;;  %v5107_v24 = vsel %vm4393_vm2, %v4848_v10, %v8978_v62  ;;  %v4388_v44 = vmax.f32 %v4316_v60, %v4324_v27  ;;  %v4710_v57 = vrot.slane %v4386_v17, %v13111_v63 }
 0x335   : > { %v4714_v38 = vrot.slane %v4387_v9, %v13111_v63  ;;  %v5114_v16 = vsel %vm5088_vm11, %v5106_v31, %v8987_v34  ;;  %v3687_v29 = vcombine.high %v3679_v23, %v3679_v23  ;;  %v8429_v47 = vrot.slane %v3679_v23, 9 }
 0x336   : > { %v3688_v6 = vcombine.high %v3686_v18, %v3686_v18  ;;  %v8431_v42 = vrot.slane %v3686_v18, 9  ;;  %v4718_v11 = vrot.slane %v4388_v44, %v13111_v63  ;;  %v4791_v56 = vsel %vm4735_vm4, %v4710_v57, %v4706_v0 }
 0x337   : > { %v5115_v62 = vsel %vm5088_vm11, %v5107_v24, %v8988_v43  ;;  %v5122_v60 = vsel %vm5097_vm12, %v5114_v16, %v8997_v46  ;;  %v4792_v32 = vsel %vm4737_vm5, %v4714_v38, %v4791_v56  ;;  %v8430_v39 = vrot.slane %v3687_v29, 9  ;;  %v12190_v43 = vld [vmem:[#allocation3 + $0x71] sm:$0xff] }
 0x338   : > { %v8432_v26 = vrot.slane %v3688_v6, 9  ;;  %v4325_v34 = vmax.f32 %v3679_v23, %v8429_v47  ;;  %v4327_v61 = vmax.f32 %v3686_v18, %v8431_v42  ;;  %v4793_v19 = vsel %vm4739_vm6, %v4718_v11, %v4792_v32 }
 0x339   : > { %v5123_v21 = vsel %vm5097_vm12, %v5115_v62, %v8998_v36  ;;  %v9003_v54 = vunpack.i.h.bf16 %v9001_v30  ;;  %v4326_v46 = vmax.f32 %v3687_v29, %v8430_v39  ;;  %v9002_v22 = vunpack.i.l.bf16 %v9001_v30  ;;  %v4817_v30 = vld [vmem:[#allocation3 + $0x20] sm:$0xff] }
 0x33a   : > { %v4328_v45 = vmax.f32 %v3688_v6, %v8432_v26  ;;  %v4389_v41 = vmax.f32 %v4317_v1, %v4325_v34  ;;  %v5131_v31 = vpack.c.bf16 %v5123_v21, %v5122_v60  ;;  %v4391_v25 = vmax.f32 %v4319_v35, %v4327_v61  ;;  %v9011_v1 = vpop.permute.xlu1 %9010  ;;  %v4871_v26 = vld [vmem:[#allocation3 + $0x90] sm:$0xff] }
 0x33b   : > { %v5138_v49 = vpack.c.bf16 %v12182_v5, %v12136_v13  ;;  %v9044_v50 = vpack.i.bf16 %v12184_v33, %v12145_v28  ;;  %v4390_v40 = vmax.f32 %v4318_v14, %v4326_v46  ;;  %v9069_v55 = vpack.i.bf16 %v12190_v43, %v12196_v52  ;;  %v9006_v9 = vpop.permute.xlu0 %9005  ;;  %v4849_v61 = vld [vmem:[#allocation3 + $0x31] sm:$0xff] }
 0x33c   : > { %v4392_v4 = vmax.f32 %v4320_v8, %v4328_v45  ;;  %v4722_v36 = vrot.slane %v4389_v41, %v13111_v63  ;;  %5335 = vmatprep.mubr.bf16.mxu0 %v5131_v31  ;;  %v4730_v15 = vrot.slane %v4391_v25, %v13111_v63  ;;  %v5089_v37 = vsel %vm5088_vm11, %v12139_v51, %v8992_v12  ;;  %v4818_v8 = vld [vmem:[#allocation3 + $0x30] sm:$0xff] }
 0x33d   : > { %v5090_v48 = vsel %vm5088_vm11, %v12132_v58, %v8993_v2  ;;  %8849 = vmatprep.mubr.msk.bf16.mxu1 %vm4393_vm2, %v5138_v49  ;;  %9045 = vrot.lane.b32.xlu0 %v9044_v50, %s9561_s17  ;;  %v4726_v53 = vrot.slane %v4390_v40, %v13111_v63  ;;  %v5098_v35 = vsel %vm5097_vm12, %v5089_v37, %v9002_v22  ;;  %v9013_v17 = vunpack.i.h.bf16 %v9011_v1  ;;  %v4879_v40 = vld [vmem:[#allocation3 + $0x91] sm:$0xff] }
 0x33e   : > { %v4734_v59 = vrot.slane %v4392_v4, %v13111_v63  ;;  %v4794_v14 = vsel %vm4741_vm7, %v4722_v36, %v4793_v19  ;;  %9070 = vrot.lane.b32.xlu1 %v9069_v55, %s9560_s26  ;;  %v5099_v51 = vsel %vm5097_vm12, %v5090_v48, %v9003_v54  ;;  %v9079_v58 = vpack.i.bf16 %v12182_v5, %v12136_v13  ;;  %v9021_v27 = vpop.permute.xlu1 %9020  ;;  %v4887_v13 = vld [vmem:[#allocation3 + $0x92] sm:$0xff]  ;;  %v4850_v19 = vld [vmem:[#allocation3 + $0x41] sm:$0xff] }
 0x33f   : > { %v4795_v20 = vsel %vm4743_vm8, %v4726_v53, %v4794_v14  ;;  %v5130_v2 = vpack.c.bf16 %v5099_v51, %v5098_v35  ;;  %v9012_v10 = vunpack.i.l.bf16 %v9011_v1  ;;  %v9023_v23 = vunpack.i.h.bf16 %v9021_v27 }
 0x340   : > { %v4796_v12 = vsel %vm4745_vm9, %v4730_v15, %v4795_v20  ;;  %v5083_v18 = vsel %vm4393_vm2, %v4818_v8, %v9013_v17  ;;  %v9022_v24 = vunpack.i.l.bf16 %v9021_v27  ;;  %v9008_v16 = vunpack.i.h.bf16 %v9006_v9 }
 0x341   : > { %9055 = vrot.lane.b32.xlu0 %v9069_v55, %s9562_s25  ;;  %v4797_v3 = vsel %vm4747_vm10, %v4734_v59, %v4796_v12  ;;  %5336 = vmatmul.mubr.bf16.vlgmr.msra.gmra.mrb[0].mxu0 %v5130_v2  ;;  %v9007_v29 = vunpack.i.l.bf16 %v9006_v9  ;;  %v5082_v32 = vsel %vm4393_vm2, %v4817_v30, %v9012_v10  ;;  %v5092_v39 = vsel %vm5088_vm11, %v5083_v18, %v9023_v23  ;;  %v4820_v10 = vld [vmem:[#allocation3 + $0x50] sm:$0xff] }
 0x342   : > { %9080 = vrot.lane.b32.xlu1 %v9079_v58, %s9561_s17  ;;  %4814 = vst.msk [vmem:[#allocation3 + $0x81] sm:$0xff] %vm4393_vm2, %v4797_v3  ;;  %v9031_v0 = vpop.permute.xlu1 %9030  ;;  %v5091_v34 = vsel %vm5088_vm11, %v5082_v32, %v9022_v24  ;;  %v13160_v24 = vmov 0.0  }
 0x343   : > { %v9033_v44 = vunpack.i.h.bf16 %v9031_v0  ;;  %v9032_v38 = vunpack.i.l.bf16 %v9031_v0  ;;  %v5108_v46 = vsel %vm4393_vm2, %v4849_v61, %v9007_v29  ;;  %v4819_v0 = vld [vmem:[#allocation3 + $0x40] sm:$0xff]  ;;  %5787 = vst.msk [vmem:[#allocation4 + $0x8] sm:$0x3f] %vm5785_vm13, %v13160_v24  ;;  %5786 = vst.msk [vmem:[#allocation4] sm:$0x3f] %vm5785_vm13, %v13160_v24  ;;  %v4851_v29 = vld [vmem:[#allocation3 + $0x51] sm:$0xff] }
 0x344   : > { %5788 = vst.msk [vmem:[#allocation4 + $0x10] sm:$0x3f] %vm5785_vm13, %v13160_v24  ;;  %5789 = vst.msk [vmem:[#allocation4 + $0x18] sm:$0x3f] %vm5785_vm13, %v13160_v24 }
 0x345   : > { %v5101_v54 = vsel %vm5097_vm12, %v5092_v39, %v9033_v44  ;;  %v5100_v49 = vsel %vm5097_vm12, %v5091_v34, %v9032_v38  ;;  %5790 = vst.msk [vmem:[#allocation4 + $0x20] sm:$0x3f] %vm5785_vm13, %v13160_v24  ;;  %5791 = vst.msk [vmem:[#allocation4 + $0x28] sm:$0x3f] %vm5785_vm13, %v13160_v24 }
 0x346   : > { %v5133_v1 = vpack.c.bf16 %v5101_v54, %v5100_v49 }
 0x349   : > { %v4886_v6 = vld [vmem:[#allocation3 + $0x82] sm:$0xff] }
 0x34a   : > { %v9016_v57 = vpop.permute.xlu0 %9015  ;;  %v4846_v47 = vld [vmem:[#allocation3 + $0x80] sm:$0xff]  ;;  %v5141_v11 = vpack.c.bf16 %v4887_v13, %v4886_v6  ;;  %v9064_v56 = vpack.i.bf16 %v4886_v6, %v12182_v5  ;;  %v5109_v5 = vsel %vm4393_vm2, %v4850_v19, %v9008_v16 }
 0x34b   : > { %v9018_v42 = vunpack.i.h.bf16 %v9016_v57  ;;  %v9089_v62 = vpack.i.bf16 %v4846_v47, %v12184_v33  ;;  %v9017_v60 = vunpack.i.l.bf16 %v9016_v57  ;;  %v9074_v31 = vpack.i.bf16 %v4871_v26, %v4846_v47  ;;  %v12241_v50 = vld [vmem:[#allocation3 + $0x81] sm:$0xff]  ;;  %v9041_v37 = vpop.permute.xlu1 %9040 }
 0x34c   : > { %8850 = vmatmul.mubr.msk.bf16.gmra.mrb[4].mxu1 %vm4393_vm2, %v5141_v11  ;;  %9065 = vrot.lane.b32.xlu0 %v9064_v56, %s9560_s26  ;;  %v9084_v15 = vpack.i.bf16 %v4879_v40, %v12241_v50  ;;  %v9043_v20 = vunpack.i.h.bf16 %v9041_v37  ;;  %v9042_v58 = vunpack.i.l.bf16 %v9041_v37  ;;  %s9492_s26 = scalar_lea.vmem %s9491_s16, 32 }
 0x34d   : > { %9090 = vrot.lane.b32.xlu1 %v9089_v62, %s9562_s25  ;;  %v5116_v25 = vsel %vm5088_vm11, %v5108_v46, %v9017_v60  ;;  %v5117_v22 = vsel %vm5088_vm11, %v5109_v5, %v9018_v42  ;;  %8861 = vmatprep.mubr.msk.bf16.mxu1 %vm9563_vm15, %v13160_v24 }
 0x34e   : > { %v9026_v21 = vpop.permute.xlu0 %9025  ;;  %v5084_v44 = vsel %vm4393_vm2, %v4819_v0, %v9042_v58  ;;  %v5085_v57 = vsel %vm4393_vm2, %v4820_v10, %v9043_v20 }
 0x34f   : > { %v9028_v45 = vunpack.i.h.bf16 %v9026_v21  ;;  %v9027_v41 = vunpack.i.l.bf16 %v9026_v21  ;;  %v9051_v53 = vpop.permute.xlu1 %9050 }
 0x350   : > { %9075 = vrot.lane.b32.xlu0 %v9074_v31, %s9561_s17  ;;  %v9053_v12 = vunpack.i.h.bf16 %v9051_v53  ;;  %v9052_v3 = vunpack.i.l.bf16 %v9051_v53 }
 0x351   : > { %v5124_v4 = vsel %vm5097_vm12, %v5116_v25, %v9027_v41  ;;  %v5125_v36 = vsel %vm5097_vm12, %v5117_v22, %v9028_v45 }
 0x352   : > { %v5134_v55 = vpack.c.bf16 %v5125_v36, %v5124_v4  ;;  %v5093_v38 = vsel %vm5088_vm11, %v5084_v44, %v9052_v3  ;;  %v5094_v16 = vsel %vm5088_vm11, %v5085_v57, %v9053_v12 }
 0x354   : > { %5343 = vmatprep.mubr.bf16.mxu0 %v5134_v55  ;;  %9085 = vrot.lane.b32.xlu0 %v9084_v15, %s9562_s25  ;;  %s500_s25 = sand.u32 1, %s9544_s19  }
 0x355   : > { %5344 = vmatmul.mubr.bf16.gmra.mrb[4].mxu0 %v5133_v1  ;;  %s501_s24 = scalar_lea.vmem [#allocation9], %s500_s25  ;;  %s8217_s30 = scalar_lea.sflag [#allocation8], %s500_s25 }
 0x39e   : > { %v9036_v48 = vpop.permute.xlu0 %9035 }
 0x39f   : > { %v9038_v17 = vunpack.i.h.bf16 %v9036_v48  ;;  %v9037_v9 = vunpack.i.l.bf16 %v9036_v48 }
 0x3a0   : > { %v9061_v2 = vpop.permute.xlu1 %9060 }
 0x3a1   : > { %v9063_v8 = vunpack.i.h.bf16 %v9061_v2  ;;  %v9062_v23 = vunpack.i.l.bf16 %v9061_v2  ;;  %v5111_v47 = vsel %vm4393_vm2, %v12196_v52, %v9038_v17  ;;  %v5110_v42 = vsel %vm4393_vm2, %v4851_v29, %v9037_v9 }
 0x3a3   : > { %v5102_v60 = vsel %vm5097_vm12, %v5093_v38, %v9062_v23  ;;  %v5103_v32 = vsel %vm5097_vm12, %v5094_v16, %v9063_v8  ;;  %v13161_v16 = vld [vmem:[#allocation109_spill] sm:$0xff] }
 0x3a4   : > { %v5136_v19 = vpack.c.bf16 %v5103_v32, %v5102_v60 }
 0x3aa   : > { %v12248_v59 = vpop.f32.mrb[0].mxu1 }
 0x3ab   : > { %v12250_v14 = vpop.f32.mrb[1].mxu1 }
 0x3ac   : > { %v12252_v35 = vpop.f32.mrb[2].mxu1 }
 0x3ad   : > { %v12254_v51 = vpop.f32.mrb[3].mxu1 }
 0x3af   : > { %v9046_v27 = vpop.permute.xlu0 %9045 }
 0x3b0   : > { %v9048_v13 = vunpack.i.h.bf16 %v9046_v27  ;;  %v9047_v18 = vunpack.i.l.bf16 %v9046_v27  ;;  %v9071_v61 = vpop.permute.xlu1 %9070 }
 0x3b1   : > { %v9073_v54 = vunpack.i.h.bf16 %v9071_v61  ;;  %v9072_v5 = vunpack.i.l.bf16 %v9071_v61 }
 0x3b2   : > { %v5118_v56 = vsel %vm5088_vm11, %v5110_v42, %v9047_v18  ;;  %v5119_v62 = vsel %vm5088_vm11, %v5111_v47, %v9048_v13  ;;  %v13162_v42 = vld [vmem:[#allocation111_spill] sm:$0xff] }
 0x3b3   : > { %v9056_v6 = vpop.permute.xlu0 %9055  ;;  %v5086_v55 = vsel %vm4393_vm2, %v12145_v28, %v9072_v5  ;;  %v5087_v1 = vsel %vm4393_vm2, %v12184_v33, %v9073_v54 }
 0x3b4   : > { %v9058_v30 = vunpack.i.h.bf16 %v9056_v6  ;;  %v9057_v11 = vunpack.i.l.bf16 %v9056_v6  ;;  %v9081_v52 = vpop.permute.xlu1 %9080 }
 0x3b5   : > { %v9083_v45 = vunpack.i.h.bf16 %v9081_v52  ;;  %v9082_v41 = vunpack.i.l.bf16 %v9081_v52 }
 0x3b6   : > { %v5126_v39 = vsel %vm5097_vm12, %v5118_v56, %v9057_v11  ;;  %v5127_v26 = vsel %vm5097_vm12, %v5119_v62, %v9058_v30 }
 0x3b7   : > { %v5137_v34 = vpack.c.bf16 %v5127_v26, %v5126_v39  ;;  %v5095_v15 = vsel %vm5088_vm11, %v5086_v55, %v9082_v41  ;;  %v5096_v37 = vsel %vm5088_vm11, %v5087_v1, %v9083_v45 }
 0x3b9   : > { %5351 = vmatprep.mubr.bf16.mxu0 %v5137_v34 }
 0x3ba   : > { %5352 = vmatmul.mubr.bf16.gmra.mrb[8].mxu0 %v5136_v19 }
 0x3be   : > { %v9066_v21 = vpop.permute.xlu0 %9065 }
 0x3bf   : > { %v9091_v46 = vpop.permute.xlu1 %9090  ;;  %v9068_v25 = vunpack.i.h.bf16 %v9066_v21  ;;  %v9067_v22 = vunpack.i.l.bf16 %v9066_v21 }
 0x3c0   : > { %v9093_v49 = vunpack.i.h.bf16 %v9091_v46  ;;  %v9092_v40 = vunpack.i.l.bf16 %v9091_v46 }
 0x3c1   : > { %v5113_v53 = vsel %vm4393_vm2, %v12241_v50, %v9068_v25  ;;  %v5112_v20 = vsel %vm4393_vm2, %v12190_v43, %v9067_v22  ;;  %v5178_v43 = vld [vmem:[%s12719_s4] sm:$0x7] }
 0x3c2   : > { %v9076_v31 = vpop.permute.xlu0 %9075  ;;  %v5104_v3 = vsel %vm5097_vm12, %v5095_v15, %v9092_v40  ;;  %v5105_v33 = vsel %vm5097_vm12, %v5096_v37, %v9093_v49  ;;  %v12295_v10 = vrot.slane %v5178_v43, %v13111_v63  ;;  %v12300_v29 = vrot.slane %v5178_v43, %v13161_v16 }
 0x3c3   : > { %v9078_v4 = vunpack.i.h.bf16 %v9076_v31  ;;  %v9077_v36 = vunpack.i.l.bf16 %v9076_v31  ;;  %v5139_v0 = vpack.c.bf16 %v5105_v33, %v5104_v3  ;;  %v12304_v30 = vrot.slane %v5178_v43, %v13162_v42 }
 0x3c5   : > { %v5120_v12 = vsel %vm5088_vm11, %v5112_v20, %v9077_v36  ;;  %v5121_v28 = vsel %vm5088_vm11, %v5113_v53, %v9078_v4 }
 0x3c6   : > { %v9086_v48 = vpop.permute.xlu0 %9085 }
 0x3c7   : > { %v9088_v58 = vunpack.i.h.bf16 %v9086_v48  ;;  %v9087_v2 = vunpack.i.l.bf16 %v9086_v48 }
 0x3c9   : > { %v5128_v27 = vsel %vm5097_vm12, %v5120_v12, %v9087_v2  ;;  %v5129_v17 = vsel %vm5097_vm12, %v5121_v28, %v9088_v58 }
 0x3ca   : > { %v5140_v9 = vpack.c.bf16 %v5129_v17, %v5128_v27 }
 0x3cc   : > { %5359 = vmatprep.mubr.bf16.mxu0 %v5140_v9 }
 0x3cd   : > { %5360 = vmatmul.mubr.bf16.gmra.mrb[12].mxu0 %v5139_v0 }
 0x414   : > { %v8726_v50 = vpop.f32.mrb[0].mxu0 }
 0x415   : > { %v8727_v8 = vpop.f32.mrb[1].mxu0 }
 0x416   : > { %v8728_v23 = vadd.f32 %v8727_v8, %v8726_v50  ;;  %v8729_v13 = vpop.f32.mrb[2].mxu0 }
 0x417   : > { %v8730_v18 = vpop.f32.mrb[3].mxu0 }
 0x418   : > { %v5338_v44 = vadd.f32 %v8728_v23, %v12295_v10  ;;  %v8731_v57 = vadd.f32 %v8730_v18, %v8729_v13 }
 0x41a   : > { %v5403_v38 = vadd.f32 %v12250_v14, %v5338_v44  ;;  %v5341_v6 = vadd.f32 %v8731_v57, %v12295_v10 }
 0x41c   : > { %v5433_v47 = vmax.f32 %v5403_v38, 0.0  ;;  %v5406_v11 = vadd.f32 %v12254_v51, %v5341_v6 }
 0x41e   : > { %v5445_v56 = vmul.f32 %v12300_v29, %v5433_v47  ;;  %v5434_v62 = vmax.f32 %v5406_v11, 0.0 }
 0x41f   : > { %v12308_v60 = vpop.f32.mrb[4].mxu1 }
 0x420   : > { %v5457_v32 = vadd.f32 %v12304_v30, %v5445_v56  ;;  %v5446_v14 = vmul.f32 %v12300_v29, %v5434_v62  ;;  %v12312_v39 = vpop.f32.mrb[5].mxu1 }
 0x421   : > { %v12314_v26 = vpop.f32.mrb[6].mxu1 }
 0x422   : > { %v5473_v34 = vcombine.high %v5457_v32, %v5457_v32  ;;  %v5480_v61 = vrot.slane %v5457_v32, %v10827_v7  ;;  %v5458_v19 = vadd.f32 %v12304_v30, %v5446_v14  ;;  %v12318_v52 = vpop.f32.mrb[7].mxu1 }
 0x424   : > { %v5487_v51 = vrot.slane %v5473_v34, %v10827_v7  ;;  %v5488_v21 = vcombine.high %v5480_v61, %v5480_v61  ;;  %v8455_v54 = vrot.slane %v5480_v61, 9  ;;  %v5490_v5 = vcombine.high %v5458_v19, %v5458_v19 }
 0x425   : > { %v5497_v46 = vrot.slane %v5458_v19, %v10827_v7 }
 0x426   : > { %v5489_v45 = vcombine.high %v5487_v51, %v5487_v51  ;;  %v8456_v41 = vrot.slane %v5488_v21, 9  ;;  %v8457_v31 = vrot.slane %v5487_v51, 9  ;;  %v5504_v22 = vrot.slane %v5490_v5, %v10827_v7 }
 0x427   : > { %v5505_v49 = vcombine.high %v5497_v46, %v5497_v46  ;;  %v8459_v40 = vrot.slane %v5497_v46, 9  ;;  %v5737_v55 = vmax.f32 %v5480_v61, %v8455_v54 }
 0x428   : > { %v8732_v25 = vpop.f32.mrb[4].mxu0  ;;  %v8458_v36 = vrot.slane %v5489_v45, 9  ;;  %v5506_v37 = vcombine.high %v5504_v22, %v5504_v22  ;;  %v8461_v53 = vrot.slane %v5504_v22, 9  ;;  %v5738_v2 = vmax.f32 %v5488_v21, %v8456_v41 }
 0x429   : > { %v8733_v4 = vpop.f32.mrb[5].mxu0  ;;  %v8460_v48 = vrot.slane %v5505_v49, 9  ;;  %v5741_v20 = vmax.f32 %v5497_v46, %v8459_v40  ;;  %v5739_v12 = vmax.f32 %v5487_v51, %v8457_v31 }
 0x42a   : > { %v8734_v1 = vadd.f32 %v8733_v4, %v8732_v25  ;;  %v8735_v15 = vpop.f32.mrb[6].mxu0  ;;  %v8462_v33 = vrot.slane %v5506_v37, 9  ;;  %v5743_v17 = vmax.f32 %v5504_v22, %v8461_v53  ;;  %v5740_v50 = vmax.f32 %v5489_v45, %v8458_v36 }
 0x42b   : > { %v8736_v58 = vpop.f32.mrb[7].mxu0  ;;  %v5742_v27 = vmax.f32 %v5505_v49, %v8460_v48  ;;  %v5769_v9 = vmax.f32 %v5737_v55, %v5741_v20 }
 0x42c   : > { %v5346_v28 = vadd.f32 %v8734_v1, %v12295_v10  ;;  %v8737_v3 = vadd.f32 %v8736_v58, %v8735_v15  ;;  %v5744_v8 = vmax.f32 %v5506_v37, %v8462_v33  ;;  %v5771_v13 = vmax.f32 %v5739_v12, %v5743_v17  ;;  %v9134_v17 = vld [vmem:[%s12720_s5 + $0x100] sm:$0xff]  }
 0x42d   : > { %v5770_v23 = vmax.f32 %v5738_v2, %v5742_v27  ;;  %v5811_v38 = vrot.slane %v5769_v9, %v13111_v63  ;;  %8854 = vmatpush3.bf16.msra.mxu1 %v9134_v17 }
 0x42e   : > { %v5411_v0 = vadd.f32 %v12248_v59, %v5346_v28  ;;  %v5349_v43 = vadd.f32 %v8737_v3, %v12295_v10  ;;  %v5772_v57 = vmax.f32 %v5740_v50, %v5744_v8  ;;  %v5819_v47 = vrot.slane %v5771_v13, %v13111_v63  ;;  %v9135_v8 = vld [vmem:[%s12720_s5 + $0x108] sm:$0xff]   ;;  %8855 = vmatprep.subr.bf16.mxu1 %v13160_v24 }
 0x42f   : > { %v5815_v6 = vrot.slane %v5770_v23, %v13111_v63 }
 0x430   : > { %v5435_v18 = vmax.f32 %v5411_v0, 0.0  ;;  %v5414_v44 = vadd.f32 %v12252_v35, %v5349_v43  ;;  %v5823_v59 = vrot.slane %v5772_v57, %v13111_v63  ;;  %v9136_v57 = vld [vmem:[%s12720_s5 + $0x110] sm:$0xff]  }
 0x431   : > { %v5872_v62 = vsel %vm4735_vm4, %v5815_v6, %v5811_v38  ;;  %8856 = vmatpush3.bf16.msra.mxu1 %v9135_v8  ;;  %v9137_v38 = vld [vmem:[%s12720_s5 + $0x118] sm:$0xff]  }
 0x432   : > { %v5447_v11 = vmul.f32 %v12300_v29, %v5435_v18  ;;  %v5436_v56 = vmax.f32 %v5414_v44, 0.0  ;;  %v5873_v32 = vsel %vm4737_vm5, %v5819_v47, %v5872_v62  ;;  %8857 = vmatprep.subr.bf16.mxu1 %v13160_v24 }
 0x433   : > { %v5874_v34 = vsel %vm4739_vm6, %v5823_v59, %v5873_v32 }
 0x434   : > { %v5459_v14 = vadd.f32 %v12304_v30, %v5447_v11  ;;  %v5448_v35 = vmul.f32 %v12300_v29, %v5436_v56  ;;  %5890 = vst.msk [vmem:[#allocation4 + $0x9] sm:$0xf] %vm5889_vm14, %v5874_v34 }
 0x435   : > { %8858 = vmatpush3.bf16.msra.mxu1 %v9136_v57 }
 0x436   : > { %v5507_v61 = vcombine.high %v5459_v14, %v5459_v14  ;;  %v5514_v19 = vrot.slane %v5459_v14, %v10827_v7  ;;  %v5460_v51 = vadd.f32 %v12304_v30, %v5448_v35  ;;  %8859 = vmatprep.subr.bf16.mxu1 %v13160_v24 }
 0x438   : > { %v5521_v21 = vrot.slane %v5507_v61, %v10827_v7  ;;  %v5522_v54 = vcombine.high %v5514_v19, %v5514_v19  ;;  %v8463_v5 = vrot.slane %v5514_v19, 9  ;;  %v5524_v46 = vcombine.high %v5460_v51, %v5460_v51 }
 0x439   : > { %v5531_v45 = vrot.slane %v5460_v51, %v10827_v7  ;;  %8860 = vmatpush3.bf16.msra.mxu1 %v9137_v38 }
 0x43a   : > { %v5523_v41 = vcombine.high %v5521_v21, %v5521_v21  ;;  %v8464_v31 = vrot.slane %v5522_v54, 9  ;;  %v8465_v25 = vrot.slane %v5521_v21, 9  ;;  %v5538_v22 = vrot.slane %v5524_v46, %v10827_v7 }
 0x43b   : > { %v5539_v49 = vcombine.high %v5531_v45, %v5531_v45  ;;  %v8467_v40 = vrot.slane %v5531_v45, 9  ;;  %v5745_v36 = vmax.f32 %v5514_v19, %v8463_v5 }
 0x43c   : > { %v8466_v4 = vrot.slane %v5523_v41, 9  ;;  %v5540_v55 = vcombine.high %v5538_v22, %v5538_v22  ;;  %v8469_v15 = vrot.slane %v5538_v22, 9  ;;  %v5746_v48 = vmax.f32 %v5522_v54, %v8464_v31 }
 0x43d   : > { %v8468_v1 = vrot.slane %v5539_v49, 9  ;;  %v5749_v37 = vmax.f32 %v5531_v45, %v8467_v40  ;;  %v5747_v53 = vmax.f32 %v5521_v21, %v8465_v25 }
 0x43e   : > { %v8470_v20 = vrot.slane %v5540_v55, 9  ;;  %v5751_v2 = vmax.f32 %v5538_v22, %v8469_v15  ;;  %v5748_v28 = vmax.f32 %v5523_v41, %v8466_v4 }
 0x43f   : > { %v5750_v58 = vmax.f32 %v5539_v49, %v8468_v1  ;;  %v5773_v12 = vmax.f32 %v5745_v36, %v5749_v37 }
 0x440   : > { %v5752_v3 = vmax.f32 %v5540_v55, %v8470_v20  ;;  %v5775_v27 = vmax.f32 %v5747_v53, %v5751_v2 }
 0x441   : > { %v5774_v33 = vmax.f32 %v5746_v48, %v5750_v58  ;;  %v5827_v0 = vrot.slane %v5773_v12, %v13111_v63 }
 0x442   : > { %v5776_v9 = vmax.f32 %v5748_v28, %v5752_v3  ;;  %v5835_v50 = vrot.slane %v5775_v27, %v13111_v63 }
 0x443   : > { %v5831_v43 = vrot.slane %v5774_v33, %v13111_v63 }
 0x444   : > { %v5839_v23 = vrot.slane %v5776_v9, %v13111_v63 }
 0x445   : > { %v5875_v13 = vsel %vm4735_vm4, %v5831_v43, %v5827_v0 }
 0x446   : > { %v5876_v18 = vsel %vm4737_vm5, %v5835_v50, %v5875_v13 }
 0x447   : > { %v5877_v44 = vsel %vm4739_vm6, %v5839_v23, %v5876_v18 }
 0x448   : > { %5891 = vst.msk [vmem:[#allocation4 + $0x11] sm:$0xf] %vm5889_vm14, %v5877_v44 }
 0x48d   : > { %v8738_v6 = vpop.f32.mrb[8].mxu0 }
 0x48e   : > { %v8739_v47 = vpop.f32.mrb[9].mxu0 }
 0x48f   : > { %v8740_v11 = vadd.f32 %v8739_v47, %v8738_v6  ;;  %v8741_v56 = vpop.f32.mrb[10].mxu0 }
 0x490   : > { %v8742_v59 = vpop.f32.mrb[11].mxu0 }
 0x491   : > { %v5354_v62 = vadd.f32 %v8740_v11, %v12295_v10  ;;  %v8743_v32 = vadd.f32 %v8742_v59, %v8741_v56 }
 0x493   : > { %v5419_v14 = vadd.f32 %v12312_v39, %v5354_v62  ;;  %v5357_v35 = vadd.f32 %v8743_v32, %v12295_v10 }
 0x495   : > { %v5437_v34 = vmax.f32 %v5419_v14, 0.0  ;;  %v5422_v61 = vadd.f32 %v12318_v52, %v5357_v35 }
 0x497   : > { %v5449_v19 = vmul.f32 %v12300_v29, %v5437_v34  ;;  %v5438_v51 = vmax.f32 %v5422_v61, 0.0 }
 0x499   : > { %v5461_v21 = vadd.f32 %v12304_v30, %v5449_v19  ;;  %v5450_v54 = vmul.f32 %v12300_v29, %v5438_v51 }
 0x49b   : > { %v5541_v5 = vcombine.high %v5461_v21, %v5461_v21  ;;  %v5548_v46 = vrot.slane %v5461_v21, %v10827_v7  ;;  %v5462_v45 = vadd.f32 %v12304_v30, %v5450_v54 }
 0x49d   : > { %v5555_v41 = vrot.slane %v5541_v5, %v10827_v7  ;;  %v5556_v39 = vcombine.high %v5548_v46, %v5548_v46  ;;  %v8471_v31 = vrot.slane %v5548_v46, 9  ;;  %v5558_v25 = vcombine.high %v5462_v45, %v5462_v45  ;;  %v9149_v5 = vld [vmem:[%s12720_s5] sm:$0xff]  }
 0x49e   : > { %v5565_v22 = vrot.slane %v5462_v45, %v10827_v7 }
 0x49f   : > { %v5557_v52 = vcombine.high %v5555_v41, %v5555_v41  ;;  %v8472_v49 = vrot.slane %v5556_v39, 9  ;;  %v8473_v40 = vrot.slane %v5555_v41, 9  ;;  %v5572_v4 = vrot.slane %v5558_v25, %v10827_v7  ;;  %v9152_v25 = vld [vmem:[%s12720_s5 + $0x50] sm:$0xff]  }
 0x4a0   : > { %v5573_v36 = vcombine.high %v5565_v22, %v5565_v22  ;;  %v8475_v55 = vrot.slane %v5565_v22, 9  ;;  %v5753_v15 = vmax.f32 %v5548_v46, %v8471_v31  ;;  %v8744_v37 = vpop.f32.mrb[12].mxu0  ;;  %v9150_v46 = vld [vmem:[%s12720_s5 + $0x48] sm:$0xff]  }
 0x4a1   : > { %v8474_v1 = vrot.slane %v5557_v52, 9  ;;  %v5574_v48 = vcombine.high %v5572_v4, %v5572_v4  ;;  %v8477_v20 = vrot.slane %v5572_v4, 9  ;;  %v8745_v2 = vpop.f32.mrb[13].mxu0  ;;  %v5754_v12 = vmax.f32 %v5556_v39, %v8472_v49  ;;  %v9151_v31 = vld [vmem:[%s12720_s5 + $0x8] sm:$0xff]  }
 0x4a2   : > { %v8476_v53 = vrot.slane %v5573_v36, 9  ;;  %v5757_v58 = vmax.f32 %v5565_v22, %v8475_v55  ;;  %v5755_v28 = vmax.f32 %v5555_v41, %v8473_v40  ;;  %v8746_v3 = vadd.f32 %v8745_v2, %v8744_v37  ;;  %v8747_v33 = vpop.f32.mrb[14].mxu0  ;;  %v9132_v40 = vld [vmem:[#allocation4 + $0x1] ss:$8 sps:$4 sm:$0xff]  }
 0x4a3   : > { %v8478_v27 = vrot.slane %v5574_v48, 9  ;;  %v5759_v9 = vmax.f32 %v5572_v4, %v8477_v20  ;;  %v8748_v43 = vpop.f32.mrb[15].mxu0  ;;  %v5756_v23 = vmax.f32 %v5557_v52, %v8474_v1 }
 0x4a4   : > { %v5758_v17 = vmax.f32 %v5573_v36, %v8476_v53  ;;  %v5777_v0 = vmax.f32 %v5753_v15, %v5757_v58  ;;  %v5362_v50 = vadd.f32 %v8746_v3, %v12295_v10  ;;  %v8749_v8 = vadd.f32 %v8748_v43, %v8747_v33  ;;  %v9154_v53 = vld [vmem:[%s12720_s5 + $0x58] sm:$0xff]  }
 0x4a5   : > { %v5760_v13 = vmax.f32 %v5574_v48, %v8478_v27  ;;  %v5779_v44 = vmax.f32 %v5755_v28, %v5759_v9  ;;  %v9153_v48 = vld [vmem:[%s12720_s5 + $0x10] sm:$0xff]   ;;  %v9155_v43 = vld [vmem:[%s12720_s5 + $0x18] sm:$0xff]  }
 0x4a6   : > { %v5778_v18 = vmax.f32 %v5754_v12, %v5758_v17  ;;  %v5427_v57 = vadd.f32 %v12308_v60, %v5362_v50  ;;  %v5365_v38 = vadd.f32 %v8749_v8, %v12295_v10  ;;  %v5843_v47 = vrot.slane %v5777_v0, %v13111_v63 }
 0x4a7   : > { %v5780_v6 = vmax.f32 %v5756_v23, %v5760_v13  ;;  %v5851_v56 = vrot.slane %v5779_v44, %v13111_v63 }
 0x4a8   : > { %v5847_v11 = vrot.slane %v5778_v18, %v13111_v63  ;;  %v5439_v59 = vmax.f32 %v5427_v57, 0.0  ;;  %v5430_v62 = vadd.f32 %v12314_v26, %v5365_v38  ;;  %v9148_v26 = vld [vmem:[%s12720_s5 + $0x40] sm:$0xff]  }
 0x4a9   : > { %v5855_v32 = vrot.slane %v5780_v6, %v13111_v63  ;;  %8756 = vmatprep.subr.bf16.mxu0 %v9148_v26  ;;  %v9156_v18 = vld [vmem:[%s12720_s5 + $0x60] sm:$0xff]  }
 0x4aa   : > { %v5878_v14 = vsel %vm4735_vm4, %v5847_v11, %v5843_v47  ;;  %v5451_v60 = vmul.f32 %v12300_v29, %v5439_v59  ;;  %v5440_v34 = vmax.f32 %v5430_v62, 0.0  ;;  %8757 = vmatpush3.bf16.msra.mxu0 %v9149_v5  ;;  %v9157_v47 = vld [vmem:[%s12720_s5 + $0x20] sm:$0xff]   ;;  %v9158_v59 = vld [vmem:[%s12720_s5 + $0x68] sm:$0xff]   ;;  %v9165_v5 = vld [vmem:[%s12720_s5 + $0x38] sm:$0xff]  }
 0x4ab   : > { %v5879_v35 = vsel %vm4737_vm5, %v5851_v56, %v5878_v14  ;;  %8758 = vmatprep.subr.bf16.mxu0 %v9150_v46  ;;  %v9159_v14 = vld [vmem:[%s12720_s5 + $0x28] sm:$0xff]  }
 0x4ac   : > { %v5880_v10 = vsel %vm4739_vm6, %v5855_v32, %v5879_v35  ;;  %v5463_v61 = vadd.f32 %v12304_v30, %v5451_v60  ;;  %v5452_v19 = vmul.f32 %v12300_v29, %v5440_v34  ;;  %v9160_v35 = vld [vmem:[%s12720_s5 + $0x70] sm:$0xff]   ;;  %v9164_v34 = vld [vmem:[%s12720_s5 + $0x78] sm:$0xff]  }
 0x4ad   : > { %5892 = vst.msk [vmem:[#allocation4 + $0x19] sm:$0xf] %vm5889_vm14, %v5880_v10  ;;  %v9161_v60 = vld [vmem:[%s12720_s5 + $0x30] sm:$0xff]  }
 0x4ae   : > { %v5575_v51 = vcombine.high %v5463_v61, %v5463_v61  ;;  %v5582_v21 = vrot.slane %v5463_v61, %v10827_v7  ;;  %v5464_v54 = vadd.f32 %v12304_v30, %v5452_v19  ;;  %8759 = vmatpush3.bf16.msra.mxu0 %v9151_v31  ;;  %v9140_v61 = vld [vmem:[#allocation4 + $0x8] ss:$8 sps:$4 sm:$0xff]  }
 0x4af   : > { %8760 = vmatprep.subr.bf16.mxu0 %v9152_v25  ;;  %v9142_v19 = vld [vmem:[#allocation4 + $0xa] ss:$8 sps:$4 sm:$0xff]  }
 0x4b0   : > { %v5589_v29 = vrot.slane %v5575_v51, %v10827_v7  ;;  %v5590_v45 = vcombine.high %v5582_v21, %v5582_v21  ;;  %v8479_v41 = vrot.slane %v5582_v21, 9  ;;  %v5592_v39 = vcombine.high %v5464_v54, %v5464_v54 }
 0x4b1   : > { %v5599_v30 = vrot.slane %v5464_v54, %v10827_v7 }
 0x4b2   : > { %v5591_v22 = vcombine.high %v5589_v29, %v5589_v29  ;;  %v8480_v52 = vrot.slane %v5590_v45, 9  ;;  %v8481_v49 = vrot.slane %v5589_v29, 9  ;;  %v5606_v4 = vrot.slane %v5592_v39, %v10827_v7  ;;  %8761 = vmatpush3.bf16.msra.mxu0 %v9153_v48 }
 0x4b3   : > { %v5607_v36 = vcombine.high %v5599_v30, %v5599_v30  ;;  %v8483_v55 = vrot.slane %v5599_v30, 9  ;;  %v5761_v37 = vmax.f32 %v5582_v21, %v8479_v41  ;;  %8762 = vmatprep.subr.bf16.mxu0 %v9154_v53  ;;  %v9168_v41 = vld [vmem:[%s12720_s5 + $0xc0] sm:$0xff]  }
 0x4b4   : > { %v9133_v1 = vld [vmem:[#allocation4 + $0x11] ss:$8 sps:$4 sm:$0xff]   ;;  %v8482_v15 = vrot.slane %v5591_v22, 9  ;;  %v5608_v20 = vcombine.high %v5606_v4, %v5606_v4  ;;  %v8485_v2 = vrot.slane %v5606_v4, 9  ;;  %v5762_v28 = vmax.f32 %v5590_v45, %v8480_v52 }
 0x4b5   : > { %v8484_v58 = vrot.slane %v5607_v36, 9  ;;  %v5765_v12 = vmax.f32 %v5599_v30, %v8483_v55  ;;  %v5763_v3 = vmax.f32 %v5589_v29, %v8481_v49  ;;  %v9099_v33 = vpack.i.bf16 %v9133_v1, %v9132_v40  ;;  %v9138_v10 = vld [vmem:[#allocation4 + $0x12] ss:$8 sps:$4 sm:$0xff]   ;;  %v9147_v49 = vld [vmem:[#allocation4] ss:$8 sps:$4 sm:$0xff]  }
 0x4b6   : > { %v8486_v27 = vrot.slane %v5608_v20, 9  ;;  %v5767_v9 = vmax.f32 %v5606_v4, %v8485_v2  ;;  %v5764_v50 = vmax.f32 %v5591_v22, %v8482_v15  ;;  %8763 = vmatpush3.bf16.msra.mxu0 %v9155_v43  ;;  %v9144_v39 = vld [vmem:[#allocation4 + $0x11] ss:$8 sps:$4 sm:$0xff]   ;;  %v9166_v55 = vld [vmem:[#allocation4 + $0x2] ss:$8 sps:$4 sm:$0xff]  }
 0x4b7   : > { %v5766_v17 = vmax.f32 %v5607_v36, %v8484_v58  ;;  %v5781_v0 = vmax.f32 %v5761_v37, %v5765_v12  ;;  %9100 = vrot.lane.b32.xlu1 %v9099_v33, %s9561_s17  ;;  %8764 = vmatprep.subr.bf16.mxu0 %v9156_v18  ;;  %v9146_v52 = vld [vmem:[#allocation4 + $0x10] ss:$8 sps:$4 sm:$0xff]   ;;  %v9177_v18 = vld [vmem:[%s12720_s5 + $0x98] sm:$0xff]  }
 0x4b8   : > { %v5768_v8 = vmax.f32 %v5608_v20, %v8486_v27  ;;  %v5783_v13 = vmax.f32 %v5763_v3, %v5767_v9  ;;  %v9167_v1 = vld [vmem:[#allocation4 + $0x12] ss:$8 sps:$4 sm:$0xff]  }
 0x4b9   : > { %v5782_v23 = vmax.f32 %v5762_v28, %v5766_v17  ;;  %v5859_v57 = vrot.slane %v5781_v0, %v13111_v63  ;;  %v9169_v2 = vld [vmem:[%s12720_s5 + $0x80] sm:$0xff]   ;;  %v9170_v33 = vld [vmem:[%s12720_s5 + $0xc8] sm:$0xff]  }
 0x4ba   : > { %v5784_v44 = vmax.f32 %v5764_v50, %v5768_v8  ;;  %v5867_v6 = vrot.slane %v5783_v13, %v13111_v63  ;;  %8765 = vmatpush3.bf16.msra.mxu0 %v9157_v47  ;;  %v9171_v27 = vld [vmem:[#allocation4 + $0x10] ss:$8 sps:$4 sm:$0xff]   ;;  %v9174_v8 = vld [vmem:[%s12720_s5 + $0xd0] sm:$0xff]   ;;  %v9176_v13 = vld [vmem:[%s12720_s5 + $0xd8] sm:$0xff]  }
 0x4bb   : > { %v5863_v38 = vrot.slane %v5782_v23, %v13111_v63  ;;  %8766 = vmatprep.subr.bf16.mxu0 %v9158_v59  ;;  %v9173_v50 = vld [vmem:[%s12720_s5 + $0x88] sm:$0xff]   ;;  %v9175_v23 = vld [vmem:[%s12720_s5 + $0x90] sm:$0xff]   ;;  %v9184_v59 = vld [vmem:[%s12720_s5 + $0xf8] sm:$0xff]  }
 0x4bc   : > { %v5871_v11 = vrot.slane %v5784_v44, %v13111_v63  ;;  %v9178_v44 = vld [vmem:[%s12720_s5 + $0xe0] sm:$0xff]   ;;  %v9182_v47 = vld [vmem:[%s12720_s5 + $0xf0] sm:$0xff]  }
 0x4bd   : > { %v5881_v56 = vsel %vm4735_vm4, %v5863_v38, %v5859_v57  ;;  %v9179_v57 = vld [vmem:[%s12720_s5 + $0xa0] sm:$0xff]   ;;  %v9180_v38 = vld [vmem:[%s12720_s5 + $0xe8] sm:$0xff]  }
 0x4be   : > { %v5882_v62 = vsel %vm4737_vm5, %v5867_v6, %v5881_v56  ;;  %8767 = vmatpush3.bf16.msra.mxu0 %v9159_v14  ;;  %v9181_v6 = vld [vmem:[%s12720_s5 + $0xa8] sm:$0xff]   ;;  %v9183_v56 = vld [vmem:[%s12720_s5 + $0xb0] sm:$0xff]   ;;  %v9162_v14 = vld [vmem:[#allocation4 + $0x9] ss:$8 sps:$4 sm:$0xff]  }
 0x4bf   : > { %v5883_v32 = vsel %vm4739_vm6, %v5871_v11, %v5882_v62  ;;  %8768 = vmatprep.subr.bf16.mxu0 %v9160_v35 }
 0x4c0   : > { %5893 = vst.msk [vmem:[#allocation4 + $0x21] sm:$0xf] %vm5889_vm14, %v5883_v32 }
 0x4c2   : > { %8769 = vmatpush3.bf16.msra.mxu0 %v9161_v60  ;;  %v9185_v60 = vld [vmem:[%s12720_s5 + $0xb8] sm:$0xff]  }
 0x4c3   : > { %8770 = vmatprep.subr.bf16.mxu0 %v9164_v34 }
 0x4c6   : > { %8771 = vmatpush3.bf16.msra.mxu0 %v9165_v5  ;;  %v9191_v5 = vld [vmem:[#allocation6 + $0x104] ss:$8 sps:$4 sm:$0xff]  }
 0x4c7   : > { %v9139_v26 = vld [vmem:[#allocation4 + $0x22] ss:$8 sps:$4 sm:$0xff]   ;;  %8778 = vmatprep.subr.bf16.mxu0 %v9168_v41  ;;  %7628 = vmatprep.subr.bf16.mxu1 %v9191_v5  ;;  %v9192_v41 = vld [vmem:[#allocation6 + $0x10] ss:$8 sps:$4 sm:$0xff]  }
 0x4c8   : > { %v9141_v51 = vld [vmem:[#allocation4 + $0x18] ss:$8 sps:$4 sm:$0xff]   ;;  %v6031_v54 = vpack.c.bf16 %v9139_v26, %v9138_v10 }
 0x4c9   : > { %v9143_v21 = vld [vmem:[#allocation4 + $0x1a] ss:$8 sps:$4 sm:$0xff]   ;;  %v9094_v46 = vpack.i.bf16 %v9141_v51, %v9140_v61 }
 0x4ca   : > { %v9109_v29 = vpack.i.bf16 %v9143_v21, %v9142_v19  ;;  %v9145_v45 = vld [vmem:[#allocation4 + $0x21] ss:$8 sps:$4 sm:$0xff]   ;;  %8862 = vmatmul.mubr.msk.bf16.vlgmr.msra.gmra.mrb[8].mxu1 %vm5088_vm11, %v6031_v54 }
 0x4cb   : > { %9095 = vrot.lane.b32.xlu0 %v9094_v46, %s9561_s17  ;;  %v9104_v31 = vpack.i.bf16 %v9145_v45, %v9144_v39  ;;  %v9172_v17 = vld [vmem:[#allocation4 + $0x20] ss:$8 sps:$4 sm:$0xff]   ;;  %v9188_v51 = vld [vmem:[#allocation6 + $0x4] ss:$8 sps:$4 sm:$0xff]   ;;  %v9197_v39 = vld [vmem:[#allocation6 + $0x114] ss:$8 sps:$4 sm:$0xff]  }
 0x4cc   : > { %9110 = vrot.lane.b32.xlu1 %v9109_v29, %s9561_s17  ;;  %v9163_v35 = vld [vmem:[#allocation4 + $0x19] ss:$8 sps:$4 sm:$0xff]  }
 0x4cd   : > { %v9186_v26 = vld [vmem:[#allocation6] ss:$8 sps:$4 sm:$0xff]   ;;  %v9194_v29 = vld [vmem:[#allocation6 + $0x14] ss:$8 sps:$4 sm:$0xff]  }
 0x4ce   : > { %v9189_v54 = vld [vmem:[#allocation6 + $0x100] ss:$8 sps:$4 sm:$0xff]  }
 0x4cf   : > { %9105 = vrot.lane.b32.xlu0 %v9104_v31, %s9561_s17  ;;  %7629 = vmatpush1.bf16.msra.mxu1 %v9189_v54  ;;  %v9195_v31 = vld [vmem:[#allocation6 + $0x110] ss:$8 sps:$4 sm:$0xff]   ;;  %v9270_v54 = vld [vmem:[#allocation6 + $0xe0] ss:$8 sps:$4 sm:$0xff]   ;;  %s8229_s17 = sshll.u32 %s501_s24, 4  ;;  %s12675_s17 = int_to_ptr.vmem [resolvable:$true] %s8229_s17 }
 0x4d0   : > { %7630 = vmatprep.subr.bf16.mxu1 %v9197_v39  ;;  %v9273_v5 = vld [vmem:[#allocation6 + $0x1e0] ss:$8 sps:$4 sm:$0xff]   ;;  %v9279_v39 = vld [vmem:[#allocation6 + $0x1f0] ss:$8 sps:$4 sm:$0xff]   ;;  %s9486_s23 = scalar_lea.vmem %s12675_s17, 16  ;;  %p9493_p2 = scmp.lt.s32.totalorder %s12675_s17, %s9491_s16 }
 0x4d1   : > { %p9487_p6 = scmp.ne.s32.totalorder %s12675_s17, %s9486_s23  ;;  %p9494_p3 = scmp.lt.s32.totalorder %s9492_s26, %s9486_s23 }
 0x4d3   : > { %7631 = vmatpush1.bf16.msra.mxu1 %v9195_v31  ;;  %v9287_v31 = vld [vmem:[#allocation6 + $0x204] ss:$8 sps:$4 sm:$0xff]   ;;  %p9488_p10 = pnand %p9487_p6, %p13168_p9  ;;  %p9495_p4 = por %p9494_p3, %p9493_p2 }
 0x4d5   : > { %p9489_p12 = pneg %p9488_p10 }
 0x4d7   : > { %p9496_p7 = pnand %p9495_p4, %p9489_p12 }
 0x529   : > { %v9101_v30 = vpop.permute.xlu1 %9100 }
 0x52a   : > { %v9103_v25 = vunpack.i.h.bf16 %v9101_v30  ;;  %v9102_v22 = vunpack.i.l.bf16 %v9101_v30  ;;  %v9200_v30 = vld [vmem:[#allocation6 + $0x24] ss:$8 sps:$4 sm:$0xff]  }
 0x52c   : > { %v6020_v15 = vsel %vm5088_vm11, %v9146_v52, %v9103_v25  ;;  %v6019_v37 = vsel %vm5088_vm11, %v9147_v49, %v9102_v22  ;;  %v9203_v25 = vld [vmem:[#allocation6 + $0x124] ss:$8 sps:$4 sm:$0xff]   ;;  %v9198_v22 = vld [vmem:[#allocation6 + $0x20] ss:$8 sps:$4 sm:$0xff]   ;;  %v9206_v49 = vld [vmem:[#allocation6 + $0x34] ss:$8 sps:$4 sm:$0xff]  }
 0x52d   : > { %v6027_v12 = vpack.c.bf16 %v6020_v15, %v6019_v37  ;;  %v9201_v52 = vld [vmem:[#allocation6 + $0x120] ss:$8 sps:$4 sm:$0xff]   ;;  %7632 = vmatprep.subr.bf16.mxu1 %v9203_v25 }
 0x52e   : > { %7633 = vmatpush1.bf16.msra.mxu1 %v9201_v52  ;;  %v9210_v15 = vld [vmem:[#allocation6 + $0x40] ss:$8 sps:$4 sm:$0xff]  }
 0x52f   : > { %v9213_v37 = vld [vmem:[#allocation6 + $0x140] ss:$8 sps:$4 sm:$0xff]  }
 0x53d   : > { %v9096_v40 = vpop.permute.xlu0 %9095 }
 0x53e   : > { %v9098_v4 = vunpack.i.h.bf16 %v9096_v40  ;;  %v9097_v36 = vunpack.i.l.bf16 %v9096_v40  ;;  %v9111_v11 = vpop.permute.xlu1 %9110  ;;  %v9209_v40 = vld [vmem:[#allocation6 + $0x134] ss:$8 sps:$4 sm:$0xff]  }
 0x53f   : > { %v9113_v62 = vunpack.i.h.bf16 %v9111_v11  ;;  %v9112_v32 = vunpack.i.l.bf16 %v9111_v11  ;;  %7634 = vmatprep.subr.bf16.mxu1 %v9209_v40  ;;  %v9252_v11 = vld [vmem:[#allocation6 + $0xb0] ss:$8 sps:$4 sm:$0xff]  }
 0x540   : > { %v6021_v48 = vsel %vm5088_vm11, %v9166_v55, %v9097_v36  ;;  %v6022_v53 = vsel %vm5088_vm11, %v9167_v1, %v9098_v4  ;;  %v9204_v4 = vld [vmem:[#allocation6 + $0x30] ss:$8 sps:$4 sm:$0xff]   ;;  %v9212_v55 = vld [vmem:[#allocation6 + $0x44] ss:$8 sps:$4 sm:$0xff]  }
 0x541   : > { %v9106_v20 = vpop.permute.xlu0 %9105  ;;  %v6028_v58 = vpack.c.bf16 %v6022_v53, %v6021_v48  ;;  %v6024_v34 = vsel %vm5088_vm11, %v9163_v35, %v9113_v62  ;;  %v6023_v10 = vsel %vm5088_vm11, %v9162_v14, %v9112_v32  ;;  %v9207_v36 = vld [vmem:[#allocation6 + $0x130] ss:$8 sps:$4 sm:$0xff]   ;;  %v9215_v1 = vld [vmem:[#allocation6 + $0x144] ss:$8 sps:$4 sm:$0xff]   ;;  %v9218_v53 = vld [vmem:[#allocation6 + $0x54] ss:$8 sps:$4 sm:$0xff]  }
 0x542   : > { %v9108_v28 = vunpack.i.h.bf16 %v9106_v20  ;;  %v9107_v3 = vunpack.i.l.bf16 %v9106_v20  ;;  %v6029_v61 = vpack.c.bf16 %v6024_v34, %v6023_v10  ;;  %7635 = vmatpush1.bf16.msra.mxu1 %v9207_v36  ;;  %v9216_v48 = vld [vmem:[#allocation6 + $0x50] ss:$8 sps:$4 sm:$0xff]   ;;  %v9221_v20 = vld [vmem:[#allocation6 + $0x154] ss:$8 sps:$4 sm:$0xff]   ;;  %v9260_v32 = vld [vmem:[#allocation6 + $0xc4] ss:$8 sps:$4 sm:$0xff]  }
 0x543   : > { %6360 = vmatprep.mubr.bf16.mxu0 %v6028_v58  ;;  %7636 = vmatprep.subr.bf16.mxu1 %v9215_v1  ;;  %v9219_v58 = vld [vmem:[#allocation6 + $0x150] ss:$8 sps:$4 sm:$0xff]   ;;  %v9257_v62 = vld [vmem:[#allocation6 + $0x1b4] ss:$8 sps:$4 sm:$0xff]   ;;  %v9263_v14 = vld [vmem:[#allocation6 + $0x1c4] ss:$8 sps:$4 sm:$0xff]  }
 0x544   : > { %6361 = vmatmul.mubr.bf16.vlgmr.msra.gmra.mrb[16].mxu0 %v6027_v12  ;;  %v6025_v9 = vsel %vm5088_vm11, %v9171_v27, %v9107_v3  ;;  %v6026_v0 = vsel %vm5088_vm11, %v9172_v17, %v9108_v28  ;;  %v9222_v12 = vld [vmem:[#allocation6 + $0x60] ss:$8 sps:$4 sm:$0xff]   ;;  %v9227_v28 = vld [vmem:[#allocation6 + $0x164] ss:$8 sps:$4 sm:$0xff]   ;;  %v9228_v27 = vld [vmem:[#allocation6 + $0x70] ss:$8 sps:$4 sm:$0xff]  }
 0x545   : > { %8779 = vmatpush3.bf16.msra.mxu0 %v9169_v2  ;;  %v6030_v43 = vpack.c.bf16 %v6026_v0, %v6025_v9  ;;  %v9224_v2 = vld [vmem:[#allocation6 + $0x64] ss:$8 sps:$4 sm:$0xff]   ;;  %v9225_v3 = vld [vmem:[#allocation6 + $0x160] ss:$8 sps:$4 sm:$0xff]   ;;  %v9233_v17 = vld [vmem:[#allocation6 + $0x174] ss:$8 sps:$4 sm:$0xff]  }
 0x546   : > { %8780 = vmatprep.subr.bf16.mxu0 %v9170_v33  ;;  %7637 = vmatpush1.bf16.msra.mxu1 %v9213_v37  ;;  %v9230_v33 = vld [vmem:[#allocation6 + $0x74] ss:$8 sps:$4 sm:$0xff]   ;;  %v9231_v9 = vld [vmem:[#allocation6 + $0x170] ss:$8 sps:$4 sm:$0xff]   ;;  %v9236_v0 = vld [vmem:[#allocation6 + $0x84] ss:$8 sps:$4 sm:$0xff]  }
 0x547   : > { %6401 = vmatprep.mubr.bf16.mxu0 %v6030_v43  ;;  %7638 = vmatprep.subr.bf16.mxu1 %v9221_v20  ;;  %v9234_v43 = vld [vmem:[#allocation6 + $0x80] ss:$8 sps:$4 sm:$0xff]   ;;  %v9266_v34 = vld [vmem:[#allocation6 + $0xd4] ss:$8 sps:$4 sm:$0xff]  }
 0x548   : > { %v9258_v35 = vld [vmem:[#allocation6 + $0xc0] ss:$8 sps:$4 sm:$0xff]   ;;  %v9269_v10 = vld [vmem:[#allocation6 + $0x1d4] ss:$8 sps:$4 sm:$0xff]  }
 0x549   : > { %8781 = vmatpush3.bf16.msra.mxu0 %v9173_v50  ;;  %v9239_v50 = vld [vmem:[#allocation6 + $0x184] ss:$8 sps:$4 sm:$0xff]  }
 0x54a   : > { %8782 = vmatprep.subr.bf16.mxu0 %v9174_v8  ;;  %7639 = vmatpush1.bf16.msra.mxu1 %v9219_v58  ;;  %v9237_v8 = vld [vmem:[#allocation6 + $0x180] ss:$8 sps:$4 sm:$0xff]  }
 0x54b   : > { %7640 = vmatprep.subr.bf16.mxu1 %v9227_v28 }
 0x54d   : > { %8783 = vmatpush3.bf16.msra.mxu0 %v9175_v23  ;;  %v9242_v23 = vld [vmem:[#allocation6 + $0x94] ss:$8 sps:$4 sm:$0xff]  }
 0x54e   : > { %8784 = vmatprep.subr.bf16.mxu0 %v9176_v13  ;;  %7641 = vmatpush1.bf16.msra.mxu1 %v9225_v3  ;;  %v9240_v13 = vld [vmem:[#allocation6 + $0x90] ss:$8 sps:$4 sm:$0xff]  }
 0x54f   : > { %7642 = vmatprep.subr.bf16.mxu1 %v9233_v17 }
 0x551   : > { %8785 = vmatpush3.bf16.msra.mxu0 %v9177_v18  ;;  %v9245_v18 = vld [vmem:[#allocation6 + $0x194] ss:$8 sps:$4 sm:$0xff]  }
 0x552   : > { %8786 = vmatprep.subr.bf16.mxu0 %v9178_v44  ;;  %7643 = vmatpush1.bf16.msra.mxu1 %v9231_v9  ;;  %v9243_v44 = vld [vmem:[#allocation6 + $0x190] ss:$8 sps:$4 sm:$0xff]  }
 0x553   : > { %7644 = vmatprep.subr.bf16.mxu1 %v9239_v50 }
 0x555   : > { %8787 = vmatpush3.bf16.msra.mxu0 %v9179_v57  ;;  %v9248_v57 = vld [vmem:[#allocation6 + $0xa4] ss:$8 sps:$4 sm:$0xff]  }
 0x556   : > { %8788 = vmatprep.subr.bf16.mxu0 %v9180_v38  ;;  %7645 = vmatpush1.bf16.msra.mxu1 %v9237_v8  ;;  %v9246_v38 = vld [vmem:[#allocation6 + $0xa0] ss:$8 sps:$4 sm:$0xff]  }
 0x557   : > { %7646 = vmatprep.subr.bf16.mxu1 %v9245_v18 }
 0x559   : > { %8789 = vmatpush3.bf16.msra.mxu0 %v9181_v6  ;;  %v9251_v6 = vld [vmem:[#allocation6 + $0x1a4] ss:$8 sps:$4 sm:$0xff]  }
 0x55a   : > { %8790 = vmatprep.subr.bf16.mxu0 %v9182_v47  ;;  %7647 = vmatpush1.bf16.msra.mxu1 %v9243_v44  ;;  %v9249_v47 = vld [vmem:[#allocation6 + $0x1a0] ss:$8 sps:$4 sm:$0xff]  }
 0x55b   : > { %7648 = vmatprep.subr.bf16.mxu1 %v9251_v6 }
 0x55d   : > { %8791 = vmatpush3.bf16.msra.mxu0 %v9183_v56  ;;  %v9254_v56 = vld [vmem:[#allocation6 + $0xb4] ss:$8 sps:$4 sm:$0xff]  }
 0x55e   : > { %8792 = vmatprep.subr.bf16.mxu0 %v9184_v59  ;;  %7649 = vmatpush1.bf16.msra.mxu1 %v9249_v47  ;;  %v9255_v59 = vld [vmem:[#allocation6 + $0x1b0] ss:$8 sps:$4 sm:$0xff]  }
 0x55f   : > { %7650 = vmatprep.subr.bf16.mxu1 %v9257_v62 }
 0x561   : > { %8793 = vmatpush3.bf16.msra.mxu0 %v9185_v60  ;;  %v9261_v60 = vld [vmem:[#allocation6 + $0x1c0] ss:$8 sps:$4 sm:$0xff]  }
 0x562   : > { %7587 = vmatprep.subr.bf16.mxu0 %v9188_v51  ;;  %7651 = vmatpush1.bf16.msra.mxu1 %v9255_v59  ;;  %v9272_v51 = vld [vmem:[#allocation6 + $0xe4] ss:$8 sps:$4 sm:$0xff]  }
 0x563   : > { %7652 = vmatprep.subr.bf16.mxu1 %v9263_v14 }
 0x564   : > { %6402 = vmatmul.mubr.bf16.vlgmr.msra.gmra.mrb[20].mxu0 %v6029_v61  ;;  %v9264_v61 = vld [vmem:[#allocation6 + $0xd0] ss:$8 sps:$4 sm:$0xff]  }
 0x565   : > { %7588 = vmatpush1.bf16.msra.mxu0 %v9186_v26  ;;  %v9267_v26 = vld [vmem:[#allocation6 + $0x1d0] ss:$8 sps:$4 sm:$0xff]  }
 0x566   : > { %7589 = vmatprep.subr.bf16.mxu0 %v9194_v29  ;;  %7653 = vmatpush1.bf16.msra.mxu1 %v9261_v60  ;;  %v9278_v29 = vld [vmem:[#allocation6 + $0xf4] ss:$8 sps:$4 sm:$0xff]  }
 0x567   : > { %7654 = vmatprep.subr.bf16.mxu1 %v9269_v10 }
 0x569   : > { %7590 = vmatpush1.bf16.msra.mxu0 %v9192_v41  ;;  %v9276_v41 = vld [vmem:[#allocation6 + $0xf0] ss:$8 sps:$4 sm:$0xff]  }
 0x56a   : > { %7591 = vmatprep.subr.bf16.mxu0 %v9200_v30  ;;  %7655 = vmatpush1.bf16.msra.mxu1 %v9267_v26 }
 0x56d   : > { %7592 = vmatpush1.bf16.msra.mxu0 %v9198_v22 }
 0x56e   : > { %7593 = vmatprep.subr.bf16.mxu0 %v9206_v49 }
 0x571   : > { %7594 = vmatpush1.bf16.msra.mxu0 %v9204_v4  ;;  %v6104_v4 = vld [vmem:[%s12721_s6] sm:$0x7] }
 0x572   : > { %7595 = vmatprep.subr.bf16.mxu0 %v9212_v55  ;;  %v6108_v36 = vrot.slane %v6104_v4, %v13111_v63  ;;  %v6456_v28 = vrot.slane %v6104_v4, %v13161_v16 }
 0x575   : > { %7596 = vmatpush1.bf16.msra.mxu0 %v9210_v15 }
 0x576   : > { %7597 = vmatprep.subr.bf16.mxu0 %v9218_v53 }
 0x579   : > { %7598 = vmatpush1.bf16.msra.mxu0 %v9216_v48 }
 0x57a   : > { %7599 = vmatprep.subr.bf16.mxu0 %v9224_v2 }
 0x57d   : > { %7600 = vmatpush1.bf16.msra.mxu0 %v9222_v12 }
 0x57e   : > { %7601 = vmatprep.subr.bf16.mxu0 %v9230_v33  ;;  %v6462_v33 = vrot.slane %v6104_v4, %v13162_v42 }
 0x581   : > { %7602 = vmatpush1.bf16.msra.mxu0 %v9228_v27 }
 0x582   : > { %7603 = vmatprep.subr.bf16.mxu0 %v9236_v0 }
 0x585   : > { %7604 = vmatpush1.bf16.msra.mxu0 %v9234_v43 }
 0x586   : > { %7605 = vmatprep.subr.bf16.mxu0 %v9242_v23 }
 0x589   : > { %7606 = vmatpush1.bf16.msra.mxu0 %v9240_v13 }
 0x58a   : > { %7607 = vmatprep.subr.bf16.mxu0 %v9248_v57 }
 0x58d   : > { %7608 = vmatpush1.bf16.msra.mxu0 %v9246_v38 }
 0x58e   : > { %7609 = vmatprep.subr.bf16.mxu0 %v9254_v56 }
 0x591   : > { %7610 = vmatpush1.bf16.msra.mxu0 %v9252_v11 }
 0x592   : > { %7611 = vmatprep.subr.bf16.mxu0 %v9260_v32 }
 0x595   : > { %7612 = vmatpush1.bf16.msra.mxu0 %v9258_v35 }
 0x596   : > { %7613 = vmatprep.subr.bf16.mxu0 %v9266_v34 }
 0x599   : > { %7614 = vmatpush1.bf16.msra.mxu0 %v9264_v61 }
 0x59a   : > { %7615 = vmatprep.subr.bf16.mxu0 %v9272_v51 }
 0x59d   : > { %v12517_v19 = vpop.f32.mrb[8].mxu1  ;;  %7616 = vmatpush1.bf16.msra.mxu0 %v9270_v54 }
 0x59e   : > { %v8863_v21 = vpop.f32.mrb[9].mxu1  ;;  %7617 = vmatprep.subr.bf16.mxu0 %v9278_v29 }
 0x59f   : > { %v12519_v46 = vpop.f32.mrb[10].mxu1  ;;  %v9275_v21 = vld [vmem:[#allocation6 + $0x1e4] ss:$8 sps:$4 sm:$0xff]  }
 0x5a0   : > { %v8864_v45 = vpop.f32.mrb[11].mxu1  ;;  %7656 = vmatprep.subr.bf16.mxu1 %v9275_v21 }
 0x5a1   : > { %v9281_v45 = vld [vmem:[#allocation6 + $0x1f4] ss:$8 sps:$4 sm:$0xff]   ;;  %7657 = vmatpush1.bf16.msra.mxu1 %v9273_v5  ;;  %7618 = vmatpush1.bf16.msra.mxu0 %v9276_v41 }
 0x5a2   : > { %7658 = vmatprep.subr.bf16.mxu1 %v9281_v45 }
 0x5a5   : > { %7659 = vmatpush1.bf16.msra.mxu1 %v9279_v39 }
 0x5a6   : > { %7669 = vmatprep.subr.bf16.mxu1 %v9287_v31 }
 0x617   : > { %v8772_v30 = vpop.f32.mrb[16].mxu0 }
 0x618   : > { %v8773_v25 = vpop.f32.mrb[17].mxu0 }
 0x619   : > { %v8774_v22 = vadd.f32 %v8773_v25, %v8772_v30  ;;  %v8775_v52 = vpop.f32.mrb[18].mxu0 }
 0x61a   : > { %v8776_v49 = vpop.f32.mrb[19].mxu0 }
 0x61b   : > { %v8777_v40 = vadd.f32 %v8776_v49, %v8775_v52  ;;  %v6363_v15 = vadd.f32 %v8774_v22, %v6108_v36 }
 0x61d   : > { %v6366_v20 = vadd.f32 %v8777_v40, %v6108_v36 }
 0x637   : > { %v8794_v55 = vpop.f32.mrb[20].mxu0 }
 0x638   : > { %v8795_v1 = vpop.f32.mrb[21].mxu0 }
 0x639   : > { %v8796_v37 = vadd.f32 %v8795_v1, %v8794_v55  ;;  %v8797_v48 = vpop.f32.mrb[22].mxu0 }
 0x63a   : > { %v8798_v53 = vpop.f32.mrb[23].mxu0 }
 0x63b   : > { %v6404_v58 = vadd.f32 %v8796_v37, %v6363_v15  ;;  %v8799_v2 = vadd.f32 %v8798_v53, %v8797_v48  ;;  %v9285_v48 = vld [vmem:[#allocation6 + $0x200] ss:$8 sps:$4 sm:$0xff]  }
 0x63d   : > { %v6445_v12 = vadd.f32 %v12517_v19, %v6404_v58  ;;  %v6407_v3 = vadd.f32 %v8799_v2, %v6366_v20  ;;  %v9292_v20 = vld [vmem:[#allocation6 + $0x214] ss:$8 sps:$4 sm:$0xff]   ;;  %v9290_v2 = vld [vmem:[#allocation6 + $0x210] ss:$8 sps:$4 sm:$0xff]  }
 0x63f   : > { %v6451_v27 = vmax.f32 %v6445_v12, 0.0  ;;  %v6448_v17 = vadd.f32 %v12519_v46, %v6407_v3  ;;  %v9295_v12 = vld [vmem:[#allocation6 + $0x224] ss:$8 sps:$4 sm:$0xff]   ;;  %v9298_v3 = vld [vmem:[#allocation6 + $0x234] ss:$8 sps:$4 sm:$0xff]  }
 0x641   : > { %v6457_v9 = vmul.f32 %v6456_v28, %v6451_v27  ;;  %v6452_v0 = vmax.f32 %v6448_v17, 0.0  ;;  %v9301_v27 = vld [vmem:[#allocation6 + $0x244] ss:$8 sps:$4 sm:$0xff]   ;;  %v9299_v17 = vld [vmem:[#allocation6 + $0x240] ss:$8 sps:$4 sm:$0xff]  }
 0x643   : > { %v6463_v43 = vadd.f32 %v6462_v33, %v6457_v9  ;;  %v6458_v50 = vmul.f32 %v6456_v28, %v6452_v0  ;;  %v9293_v28 = vld [vmem:[#allocation6 + $0x220] ss:$8 sps:$4 sm:$0xff]   ;;  %v9304_v9 = vld [vmem:[#allocation6 + $0x254] ss:$8 sps:$4 sm:$0xff]   ;;  %v9302_v0 = vld [vmem:[#allocation6 + $0x250] ss:$8 sps:$4 sm:$0xff]  }
 0x645   : > { %v6467_v8 = vcombine.high %v6463_v43, %v6463_v43  ;;  %v6474_v23 = vrot.slane %v6463_v43, %v10827_v7  ;;  %v6464_v13 = vadd.f32 %v6462_v33, %v6458_v50  ;;  %v9296_v33 = vld [vmem:[#allocation6 + $0x230] ss:$8 sps:$4 sm:$0xff]   ;;  %v9307_v43 = vld [vmem:[#allocation6 + $0x264] ss:$8 sps:$4 sm:$0xff]   ;;  %v9305_v50 = vld [vmem:[#allocation6 + $0x260] ss:$8 sps:$4 sm:$0xff]  }
 0x647   : > { %v6481_v18 = vrot.slane %v6467_v8, %v10827_v7  ;;  %v6482_v44 = vcombine.high %v6474_v23, %v6474_v23  ;;  %v8524_v19 = vrot.slane %v6474_v23, 9  ;;  %v6484_v57 = vcombine.high %v6464_v13, %v6464_v13  ;;  %v9310_v8 = vld [vmem:[#allocation6 + $0x274] ss:$8 sps:$4 sm:$0xff]  }
 0x648   : > { %v6491_v38 = vrot.slane %v6464_v13, %v10827_v7  ;;  %v9313_v13 = vld [vmem:[#allocation6 + $0x284] ss:$8 sps:$4 sm:$0xff]  }
 0x649   : > { %v6483_v6 = vcombine.high %v6481_v18, %v6481_v18  ;;  %v8525_v47 = vrot.slane %v6482_v44, 9  ;;  %v8526_v11 = vrot.slane %v6481_v18, 9  ;;  %v6498_v46 = vrot.slane %v6484_v57, %v10827_v7  ;;  %v9319_v57 = vld [vmem:[#allocation6 + $0x2a4] ss:$8 sps:$4 sm:$0xff]  }
 0x64a   : > { %v6499_v56 = vcombine.high %v6491_v38, %v6491_v38  ;;  %v8528_v59 = vrot.slane %v6491_v38, 9  ;;  %v6533_v32 = vmax.f32 %v6474_v23, %v8524_v19  ;;  %v9308_v23 = vld [vmem:[#allocation6 + $0x270] ss:$8 sps:$4 sm:$0xff]  }
 0x64b   : > { %v8527_v62 = vrot.slane %v6483_v6, 9  ;;  %v6535_v14 = vmax.f32 %v6481_v18, %v8526_v11  ;;  %v6500_v35 = vcombine.high %v6498_v46, %v6498_v46  ;;  %v8530_v34 = vrot.slane %v6498_v46, 9  ;;  %v9311_v18 = vld [vmem:[#allocation6 + $0x280] ss:$8 sps:$4 sm:$0xff]   ;;  %v9314_v19 = vld [vmem:[#allocation6 + $0x290] ss:$8 sps:$4 sm:$0xff]  }
 0x64c   : > { %v8529_v60 = vrot.slane %v6499_v56, 9  ;;  %v6534_v10 = vmax.f32 %v6482_v44, %v8525_v47  ;;  %v6537_v21 = vmax.f32 %v6491_v38, %v8528_v59  ;;  %v9316_v44 = vld [vmem:[#allocation6 + $0x294] ss:$8 sps:$4 sm:$0xff]   ;;  %v9317_v38 = vld [vmem:[#allocation6 + $0x2a0] ss:$8 sps:$4 sm:$0xff]  }
 0x64d   : > { %v6536_v61 = vmax.f32 %v6483_v6, %v8527_v62  ;;  %v6541_v26 = vmax.f32 %v6533_v32, %v6535_v14  ;;  %v8531_v51 = vrot.slane %v6500_v35, 9  ;;  %v6539_v54 = vmax.f32 %v6498_v46, %v8530_v34  ;;  %v9322_v6 = vld [vmem:[#allocation6 + $0x2b4] ss:$8 sps:$4 sm:$0xff]   ;;  %v9320_v47 = vld [vmem:[#allocation6 + $0x2b0] ss:$8 sps:$4 sm:$0xff]  }
 0x64e   : > { %v6538_v29 = vmax.f32 %v6499_v56, %v8529_v60  ;;  %v9325_v11 = vld [vmem:[#allocation6 + $0x2c4] ss:$8 sps:$4 sm:$0xff]   ;;  %v9323_v46 = vld [vmem:[#allocation6 + $0x2c0] ss:$8 sps:$4 sm:$0xff]   ;;  %v9328_v56 = vld [vmem:[#allocation6 + $0x2d4] ss:$8 sps:$4 sm:$0xff]  }
 0x64f   : > { %v6542_v5 = vmax.f32 %v6534_v10, %v6536_v61  ;;  %v6540_v45 = vmax.f32 %v6500_v35, %v8531_v51  ;;  %v6543_v41 = vmax.f32 %v6537_v21, %v6539_v54  ;;  %v6556_v7 = vrot.slane %v6541_v26, %v13111_v63  ;;  %v9326_v59 = vld [vmem:[#allocation6 + $0x2d0] ss:$8 sps:$4 sm:$0xff]   ;;  %v9331_v62 = vld [vmem:[#allocation6 + $0x2e4] ss:$8 sps:$4 sm:$0xff]   ;;  %v9329_v32 = vld [vmem:[#allocation6 + $0x2e0] ss:$8 sps:$4 sm:$0xff]  }
 0x650   : > { %v9334_v14 = vld [vmem:[#allocation6 + $0x2f4] ss:$8 sps:$4 sm:$0xff]   ;;  %v9332_v34 = vld [vmem:[#allocation6 + $0x2f0] ss:$8 sps:$4 sm:$0xff]   ;;  %v9338_v10 = vld [vmem:[#allocation6 + $0x304] ss:$8 sps:$4 sm:$0xff]  }
 0x651   : > { %v6560_v39 = vrot.slane %v6542_v5, %v13111_v63  ;;  %v6544_v31 = vmax.f32 %v6538_v29, %v6540_v45  ;;  %v6564_v25 = vrot.slane %v6543_v41, %v13111_v63  ;;  %v9336_v61 = vld [vmem:[#allocation6 + $0x300] ss:$8 sps:$4 sm:$0xff]   ;;  %v9342_v51 = vld [vmem:[#allocation6 + $0x314] ss:$8 sps:$4 sm:$0xff]   ;;  %v9340_v54 = vld [vmem:[#allocation6 + $0x310] ss:$8 sps:$4 sm:$0xff]  }
 0x652   : > { %v9345_v5 = vld [vmem:[#allocation6 + $0x324] ss:$8 sps:$4 sm:$0xff]   ;;  %v9343_v29 = vld [vmem:[#allocation6 + $0x320] ss:$8 sps:$4 sm:$0xff]   ;;  %v9348_v45 = vld [vmem:[#allocation6 + $0x334] ss:$8 sps:$4 sm:$0xff]  }
 0x653   : > { %v6569_v30 = vsel %vm4735_vm4, %v6560_v39, %v6556_v7  ;;  %v6568_v22 = vrot.slane %v6544_v31, %v13111_v63  ;;  %v9346_v41 = vld [vmem:[#allocation6 + $0x330] ss:$8 sps:$4 sm:$0xff]   ;;  %v9351_v7 = vld [vmem:[#allocation6 + $0x344] ss:$8 sps:$4 sm:$0xff]   ;;  %v9349_v39 = vld [vmem:[#allocation6 + $0x340] ss:$8 sps:$4 sm:$0xff]  }
 0x654   : > { %6574 = vst [vmem:[#allocation5 + $0x5] sm:$0x3] %v6569_v30  ;;  %v9354_v31 = vld [vmem:[#allocation6 + $0x354] ss:$8 sps:$4 sm:$0xff]   ;;  %v9352_v30 = vld [vmem:[#allocation6 + $0x350] ss:$8 sps:$4 sm:$0xff]  }
 0x655   : > { %v6570_v52 = vsel %vm4735_vm4, %v6568_v22, %v6564_v25  ;;  %v9357_v25 = vld [vmem:[#allocation6 + $0x364] ss:$8 sps:$4 sm:$0xff]   ;;  %v9411_v22 = vld [vmem:[%s12724_s9 + $0x40] sm:$0xff]  }
 0x656   : > { %6575 = vst [vmem:[#allocation5 + $0x9] sm:$0x3] %v6570_v52  ;;  %v9412_v52 = vld [vmem:[%s12724_s9] sm:$0xff]   ;;  %8805 = vmatprep.subr.bf16.mxu0 %v9411_v22 }
 0x657   : > { %v6847_v22 = vld [vmem:[%s12723_s8] sm:$0x77] }
 0x65b   : > { %v9449_v49 = vld.sshfl [vmem:[#allocation5 + $0x1] sm:$0xf pattern:$0x76325410] }
 0x65c   : > { %v9450_v40 = vld.sshfl [vmem:[#allocation5] sm:$0xf pattern:$0x76325410]  ;;  %v6695_v55 = vpack.c.bf16 %v9449_v49, %v9449_v49  ;;  %v9355_v49 = vld [vmem:[#allocation6 + $0x360] ss:$8 sps:$4 sm:$0xff]  }
 0x65d   : > { %v9451_v4 = vld.sshfl [vmem:[#allocation5 + $0x2] sm:$0xf pattern:$0x76325410]  ;;  %v6694_v15 = vpack.c.bf16 %v9450_v40, %v9450_v40 }
 0x65e   : > { %v9452_v36 = vld.sshfl [vmem:[#allocation5 + $0x4] sm:$0xf pattern:$0x76325410]  ;;  %7619 = vmatprep.mubr.bf16.mxu0 %v6695_v55  ;;  %v6696_v53 = vpack.c.bf16 %v9451_v4, %v9451_v4  ;;  %v9361_v55 = vld [vmem:[#allocation6 + $0x380] ss:$8 sps:$4 sm:$0xff]  }
 0x65f   : > { %v9453_v1 = vld.sshfl [vmem:[#allocation5 + $0x6] sm:$0xf pattern:$0x76325410]  ;;  %7620 = vmatmul.mubr.bf16.vlgmr.msra.gmra.mrb[24].mxu0 %v6694_v15  ;;  %v6697_v37 = vpack.c.bf16 %v9452_v36, %v9452_v36  ;;  %v9363_v36 = vld [vmem:[#allocation6 + $0x384] ss:$8 sps:$4 sm:$0xff]  }
 0x660   : > { %v6699_v58 = vpack.c.bf16 %v9453_v1, %v9453_v1  ;;  %v9454_v35 = vld.sshfl [vmem:[#allocation5 + $0x5] sm:$0xf pattern:$0x76325410]  ;;  %8806 = vmatpush3.bf16.msra.mxu0 %v9412_v52  ;;  %v6852_v52 = vrot.slane %v6847_v22, %v13111_v63 }
 0x661   : > { %7660 = vmatprep.mubr.bf16.mxu1 %v6697_v37  ;;  %v9455_v60 = vld.sshfl [vmem:[#allocation5 + $0x9] sm:$0xf pattern:$0x76325410]  ;;  %v6698_v26 = vpack.c.bf16 %v9454_v35, %v9454_v35  ;;  %v9369_v37 = vld [vmem:[#allocation6 + $0x3a4] ss:$8 sps:$4 sm:$0xff]  }
 0x662   : > { %7661 = vmatmul.mubr.bf16.vlgmr.msra.gmra.mrb[12].mxu1 %v6696_v53  ;;  %v6701_v21 = vpack.c.bf16 %v9455_v60, %v9455_v60  ;;  %v9360_v40 = vld [vmem:[#allocation6 + $0x374] ss:$8 sps:$4 sm:$0xff]   ;;  %v9358_v4 = vld [vmem:[#allocation6 + $0x370] ss:$8 sps:$4 sm:$0xff]  }
 0x663   : > { %7670 = vmatpush1.bf16.msra.mxu1 %v9285_v48  ;;  %7701 = vmatprep.mubr.bf16.mxu1 %v6699_v58  ;;  %v9366_v1 = vld [vmem:[#allocation6 + $0x394] ss:$8 sps:$4 sm:$0xff]   ;;  %v9364_v15 = vld [vmem:[#allocation6 + $0x390] ss:$8 sps:$4 sm:$0xff]   ;;  %v9367_v48 = vld [vmem:[#allocation6 + $0x3a0] ss:$8 sps:$4 sm:$0xff]  }
 0x664   : > { %7671 = vmatprep.subr.bf16.mxu1 %v9292_v20  ;;  %v9372_v53 = vld [vmem:[#allocation6 + $0x3b4] ss:$8 sps:$4 sm:$0xff]   ;;  %v9370_v20 = vld [vmem:[#allocation6 + $0x3b0] ss:$8 sps:$4 sm:$0xff]   ;;  %v9375_v58 = vld [vmem:[#allocation6 + $0x3c4] ss:$8 sps:$4 sm:$0xff]  }
 0x667   : > { %7672 = vmatpush1.bf16.msra.mxu1 %v9290_v2  ;;  %v9373_v2 = vld [vmem:[#allocation6 + $0x3c0] ss:$8 sps:$4 sm:$0xff]  }
 0x668   : > { %7673 = vmatprep.subr.bf16.mxu1 %v9295_v12  ;;  %v9378_v12 = vld [vmem:[#allocation6 + $0x3d4] ss:$8 sps:$4 sm:$0xff]  }
 0x66b   : > { %7674 = vmatpush1.bf16.msra.mxu1 %v9293_v28  ;;  %v9376_v28 = vld [vmem:[#allocation6 + $0x3d0] ss:$8 sps:$4 sm:$0xff]  }
 0x66c   : > { %7675 = vmatprep.subr.bf16.mxu1 %v9298_v3  ;;  %v9381_v3 = vld [vmem:[#allocation6 + $0x3e4] ss:$8 sps:$4 sm:$0xff]  }
 0x66f   : > { %7676 = vmatpush1.bf16.msra.mxu1 %v9296_v33  ;;  %v9379_v33 = vld [vmem:[#allocation6 + $0x3e0] ss:$8 sps:$4 sm:$0xff]  }
 0x670   : > { %7677 = vmatprep.subr.bf16.mxu1 %v9301_v27  ;;  %v9384_v27 = vld [vmem:[#allocation6 + $0x3f4] ss:$8 sps:$4 sm:$0xff]  }
 0x673   : > { %7678 = vmatpush1.bf16.msra.mxu1 %v9299_v17  ;;  %v9456_v17 = vld.sshfl [vmem:[#allocation5 + $0x8] sm:$0xf pattern:$0x76325410] }
 0x674   : > { %7679 = vmatprep.subr.bf16.mxu1 %v9304_v9  ;;  %v9382_v9 = vld [vmem:[#allocation6 + $0x3f0] ss:$8 sps:$4 sm:$0xff]  }
 0x677   : > { %7680 = vmatpush1.bf16.msra.mxu1 %v9302_v0  ;;  %v9388_v0 = vld [vmem:[#allocation6 + $0x404] ss:$8 sps:$4 sm:$0xff]  }
 0x678   : > { %7681 = vmatprep.subr.bf16.mxu1 %v9307_v43  ;;  %v9386_v43 = vld [vmem:[#allocation6 + $0x400] ss:$8 sps:$4 sm:$0xff]  }
 0x67b   : > { %7682 = vmatpush1.bf16.msra.mxu1 %v9305_v50  ;;  %v6700_v50 = vpack.c.bf16 %v9456_v17, %v9456_v17 }
 0x67c   : > { %7683 = vmatprep.subr.bf16.mxu1 %v9310_v8  ;;  %v9391_v8 = vld [vmem:[#allocation6 + $0x414] ss:$8 sps:$4 sm:$0xff]  }
 0x67f   : > { %7684 = vmatpush1.bf16.msra.mxu1 %v9308_v23  ;;  %v9389_v23 = vld [vmem:[#allocation6 + $0x410] ss:$8 sps:$4 sm:$0xff]  }
 0x680   : > { %7685 = vmatprep.subr.bf16.mxu1 %v9313_v13  ;;  %v13163_v13 = vmov 0  }
 0x683   : > { %7686 = vmatpush1.bf16.msra.mxu1 %v9311_v18  ;;  %v9394_v18 = vld [vmem:[#allocation6 + $0x424] ss:$8 sps:$4 sm:$0xff]  }
 0x684   : > { %7687 = vmatprep.subr.bf16.mxu1 %v9316_v44  ;;  %v9392_v44 = vld [vmem:[#allocation6 + $0x420] ss:$8 sps:$4 sm:$0xff]  }
 0x687   : > { %7688 = vmatpush1.bf16.msra.mxu1 %v9314_v19  ;;  %v9397_v19 = vld [vmem:[#allocation6 + $0x434] ss:$8 sps:$4 sm:$0xff]  }
 0x688   : > { %7689 = vmatprep.subr.bf16.mxu1 %v9319_v57  ;;  %v9395_v57 = vld [vmem:[#allocation6 + $0x430] ss:$8 sps:$4 sm:$0xff]  }
 0x68b   : > { %7690 = vmatpush1.bf16.msra.mxu1 %v9317_v38  ;;  %v9400_v38 = vld [vmem:[#allocation6 + $0x444] ss:$8 sps:$4 sm:$0xff]  }
 0x68c   : > { %7691 = vmatprep.subr.bf16.mxu1 %v9322_v6  ;;  %v9398_v6 = vld [vmem:[#allocation6 + $0x440] ss:$8 sps:$4 sm:$0xff]  }
 0x68f   : > { %7692 = vmatpush1.bf16.msra.mxu1 %v9320_v47  ;;  %v9403_v47 = vld [vmem:[#allocation6 + $0x454] ss:$8 sps:$4 sm:$0xff]  }
 0x690   : > { %7693 = vmatprep.subr.bf16.mxu1 %v9325_v11  ;;  %v9401_v11 = vld [vmem:[#allocation6 + $0x450] ss:$8 sps:$4 sm:$0xff]  }
 0x693   : > { %7694 = vmatpush1.bf16.msra.mxu1 %v9323_v46  ;;  %v9406_v46 = vld [vmem:[#allocation6 + $0x464] ss:$8 sps:$4 sm:$0xff]  }
 0x694   : > { %7695 = vmatprep.subr.bf16.mxu1 %v9328_v56  ;;  %v9404_v56 = vld [vmem:[#allocation6 + $0x460] ss:$8 sps:$4 sm:$0xff]  }
 0x697   : > { %7696 = vmatpush1.bf16.msra.mxu1 %v9326_v59  ;;  %v9409_v59 = vld [vmem:[#allocation6 + $0x474] ss:$8 sps:$4 sm:$0xff]  }
 0x698   : > { %7697 = vmatprep.subr.bf16.mxu1 %v9331_v62  ;;  %v9457_v62 = vld.sshfl [vmem:[#allocation5 + $0xa] sm:$0xf pattern:$0x76325410] }
 0x69b   : > { %7698 = vmatpush1.bf16.msra.mxu1 %v9329_v32  ;;  %v9407_v32 = vld [vmem:[#allocation6 + $0x470] ss:$8 sps:$4 sm:$0xff]  }
 0x69c   : > { %7699 = vmatprep.subr.bf16.mxu1 %v9334_v14  ;;  %v6702_v14 = vpack.c.bf16 %v9457_v62, %v9457_v62 }
 0x69f   : > { %7700 = vmatpush1.bf16.msra.mxu1 %v9332_v34 }
 0x6a0   : > { %7710 = vmatprep.subr.bf16.mxu1 %v9338_v10 }
 0x6a2   : > { %7702 = vmatmul.mubr.bf16.vlgmr.msra.gmra.mrb[12].mxu1 %v6698_v26  ;;  %v9414_v26 = vld [vmem:[%s12724_s9 + $0x8] sm:$0xff]  }
 0x6a3   : > { %7711 = vmatpush1.bf16.msra.mxu1 %v9336_v61  ;;  %7742 = vmatprep.mubr.bf16.mxu1 %v6701_v21  ;;  %v9413_v61 = vld [vmem:[%s12724_s9 + $0x48] sm:$0xff]   ;;  %v9416_v21 = vld [vmem:[%s12724_s9 + $0x10] sm:$0xff]  }
 0x6a4   : > { %7712 = vmatprep.subr.bf16.mxu1 %v9342_v51  ;;  %8807 = vmatprep.subr.bf16.mxu0 %v9413_v61  ;;  %v9415_v51 = vld [vmem:[%s12724_s9 + $0x50] sm:$0xff]  }
 0x6a5   : > { %8808 = vmatpush3.bf16.msra.mxu0 %v9414_v26  ;;  %v9428_v26 = vld [vmem:[%s12726_s11 + $0x8] sm:$0xff]  }
 0x6a6   : > { %8809 = vmatprep.subr.bf16.mxu0 %v9415_v51  ;;  %v9429_v51 = vld [vmem:[%s12726_s11 + $0x10] sm:$0xff]  }
 0x6a7   : > { %7713 = vmatpush1.bf16.msra.mxu1 %v9340_v54  ;;  %v9417_v54 = vld [vmem:[%s12724_s9 + $0x58] sm:$0xff]  }
 0x6a8   : > { %7714 = vmatprep.subr.bf16.mxu1 %v9345_v5  ;;  %v9418_v5 = vld [vmem:[%s12724_s9 + $0x18] sm:$0xff]  }
 0x6a9   : > { %8810 = vmatpush3.bf16.msra.mxu0 %v9416_v21  ;;  %v9430_v21 = vld [vmem:[%s12726_s11 + $0x18] sm:$0xff]  }
 0x6aa   : > { %8811 = vmatprep.subr.bf16.mxu0 %v9417_v54  ;;  %v9431_v54 = vld [vmem:[%s12726_s11 + $0x20] sm:$0xff]  }
 0x6ab   : > { %7715 = vmatpush1.bf16.msra.mxu1 %v9343_v29  ;;  %v9419_v29 = vld [vmem:[%s12724_s9 + $0x60] sm:$0xff]  }
 0x6ac   : > { %7716 = vmatprep.subr.bf16.mxu1 %v9348_v45  ;;  %v9420_v45 = vld [vmem:[%s12724_s9 + $0x20] sm:$0xff]  }
 0x6ad   : > { %8812 = vmatpush3.bf16.msra.mxu0 %v9418_v5  ;;  %v9432_v5 = vld [vmem:[%s12726_s11 + $0x28] sm:$0xff]  }
 0x6ae   : > { %8813 = vmatprep.subr.bf16.mxu0 %v9419_v29  ;;  %v9433_v29 = vld [vmem:[%s12726_s11 + $0x30] sm:$0xff]  }
 0x6af   : > { %7717 = vmatpush1.bf16.msra.mxu1 %v9346_v41  ;;  %v9421_v41 = vld [vmem:[%s12724_s9 + $0x68] sm:$0xff]  }
 0x6b0   : > { %7718 = vmatprep.subr.bf16.mxu1 %v9351_v7  ;;  %v9422_v7 = vld [vmem:[%s12724_s9 + $0x28] sm:$0xff]  }
 0x6b1   : > { %8814 = vmatpush3.bf16.msra.mxu0 %v9420_v45  ;;  %v9434_v45 = vld [vmem:[%s12726_s11 + $0x38] sm:$0xff]  }
 0x6b2   : > { %8815 = vmatprep.subr.bf16.mxu0 %v9421_v41 }
 0x6b3   : > { %7719 = vmatpush1.bf16.msra.mxu1 %v9349_v39  ;;  %v9423_v39 = vld [vmem:[%s12724_s9 + $0x70] sm:$0xff]  }
 0x6b4   : > { %7720 = vmatprep.subr.bf16.mxu1 %v9354_v31  ;;  %v9424_v31 = vld [vmem:[%s12724_s9 + $0x30] sm:$0xff]  }
 0x6b5   : > { %8816 = vmatpush3.bf16.msra.mxu0 %v9422_v7  ;;  %v7886_v7 = vld [vmem:[%s12725_s10] sm:$0x1] }
 0x6b6   : > { %8817 = vmatprep.subr.bf16.mxu0 %v9423_v39 }
 0x6b7   : > { %7721 = vmatpush1.bf16.msra.mxu1 %v9352_v30  ;;  %v9425_v30 = vld [vmem:[%s12724_s9 + $0x78] sm:$0xff]  }
 0x6b8   : > { %7722 = vmatprep.subr.bf16.mxu1 %v9357_v25  ;;  %v9426_v25 = vld [vmem:[%s12724_s9 + $0x38] sm:$0xff]  }
 0x6b9   : > { %8818 = vmatpush3.bf16.msra.mxu0 %v9424_v31 }
 0x6ba   : > { %8819 = vmatprep.subr.bf16.mxu0 %v9425_v30 }
 0x6bb   : > { %7723 = vmatpush1.bf16.msra.mxu1 %v9355_v49  ;;  %v13164_v49 = vld [vmem:[#allocation104_spill] sm:$0xff] }
 0x6bc   : > { %7724 = vmatprep.subr.bf16.mxu1 %v9360_v40  ;;  %v13165_v40 = vsub.s32 4, %v13164_v49 }
 0x6bd   : > { %8820 = vmatpush3.bf16.msra.mxu0 %v9426_v25 }
 0x6be   : > { %8865 = vmatprep.subr.bf16.mxu0 %v13160_v24 }
 0x6bf   : > { %7725 = vmatpush1.bf16.msra.mxu1 %v9358_v4  ;;  %v6856_v4 = vrot.slane %v6847_v22, %v13165_v40 }
 0x6c0   : > { %7726 = vmatprep.subr.bf16.mxu1 %v9363_v36  ;;  %v6862_v36 = vrot.slane %v6852_v52, %v13111_v63 }
 0x6c3   : > { %7727 = vmatpush1.bf16.msra.mxu1 %v9361_v55  ;;  %v6866_v55 = vrot.slane %v6856_v4, %v13111_v63  ;;  %v9436_v4 = vld [vmem:[%s12728_s13 + $0x8] sm:$0xff]  }
 0x6c4   : > { %7728 = vmatprep.subr.bf16.mxu1 %v9366_v1  ;;  %v7797_v1 = vrot.slane %v6847_v22, %v13161_v16 }
 0x6c7   : > { %7729 = vmatpush1.bf16.msra.mxu1 %v9364_v15  ;;  %v13166_v15 = vsub.s32 5, %v13164_v49 }
 0x6c8   : > { %7730 = vmatprep.subr.bf16.mxu1 %v9369_v37 }
 0x6c9   : > { %v7801_v37 = vrot.slane %v6847_v22, %v13166_v15 }
 0x6cb   : > { %7731 = vmatpush1.bf16.msra.mxu1 %v9367_v48  ;;  %v7811_v63 = vrot.slane %v7801_v37, %v13161_v16 }
 0x6cc   : > { %7732 = vmatprep.subr.bf16.mxu1 %v9372_v53  ;;  %v7817_v53 = vrot.slane %v6847_v22, %v13162_v42 }
 0x6cf   : > { %7733 = vmatpush1.bf16.msra.mxu1 %v9370_v20 }
 0x6d0   : > { %7734 = vmatprep.subr.bf16.mxu1 %v9375_v58 }
 0x6d3   : > { %7735 = vmatpush1.bf16.msra.mxu1 %v9373_v2  ;;  %v13167_v2 = vsub.s32 6, %v13164_v49  ;;  %v9435_v49 = vld [vmem:[%s12728_s13] sm:$0xff]  }
 0x6d4   : > { %7736 = vmatprep.subr.bf16.mxu1 %v9378_v12 }
 0x6d5   : > { %v7821_v12 = vrot.slane %v6847_v22, %v13167_v2 }
 0x6d7   : > { %7737 = vmatpush1.bf16.msra.mxu1 %v9376_v28 }
 0x6d8   : > { %7738 = vmatprep.subr.bf16.mxu1 %v9381_v3  ;;  %v7807_v3 = vrot.slane %v7797_v1, %v13161_v16  ;;  %v8041_v1 = vld [vmem:[%s12727_s12] sm:$0x1] }
 0x6db   : > { %7739 = vmatpush1.bf16.msra.mxu1 %v9379_v33 }
 0x6dc   : > { %7740 = vmatprep.subr.bf16.mxu1 %v9384_v27 }
 0x6df   : > { %7741 = vmatpush1.bf16.msra.mxu1 %v9382_v9 }
 0x6e0   : > { %7751 = vmatprep.subr.bf16.mxu1 %v9388_v0  ;;  %v7827_v0 = vrot.slane %v7817_v53, %v13162_v42 }
 0x6e2   : > { %7743 = vmatmul.mubr.bf16.vlgmr.msra.gmra.mrb[12].mxu1 %v6700_v50 }
 0x6e3   : > { %7752 = vmatpush1.bf16.msra.mxu1 %v9386_v43  ;;  %7783 = vmatprep.mubr.bf16.mxu1 %v13163_v13 }
 0x6e4   : > { %7753 = vmatprep.subr.bf16.mxu1 %v9391_v8  ;;  %v7831_v8 = vrot.slane %v7821_v12, %v13162_v42 }
 0x6e7   : > { %7754 = vmatpush1.bf16.msra.mxu1 %v9389_v23 }
 0x6e8   : > { %7755 = vmatprep.subr.bf16.mxu1 %v9394_v18 }
 0x6eb   : > { %7756 = vmatpush1.bf16.msra.mxu1 %v9392_v44 }
 0x6ec   : > { %7757 = vmatprep.subr.bf16.mxu1 %v9397_v19 }
 0x6ef   : > { %7758 = vmatpush1.bf16.msra.mxu1 %v9395_v57 }
 0x6f0   : > { %7759 = vmatprep.subr.bf16.mxu1 %v9400_v38 }
 0x6f3   : > { %7760 = vmatpush1.bf16.msra.mxu1 %v9398_v6 }
 0x6f4   : > { %7761 = vmatprep.subr.bf16.mxu1 %v9403_v47 }
 0x6f7   : > { %7762 = vmatpush1.bf16.msra.mxu1 %v9401_v11 }
 0x6f8   : > { %7763 = vmatprep.subr.bf16.mxu1 %v9406_v46 }
 0x6fb   : > { %7764 = vmatpush1.bf16.msra.mxu1 %v9404_v56 }
 0x6fc   : > { %7765 = vmatprep.subr.bf16.mxu1 %v9409_v59 }
 0x6ff   : > { %7766 = vmatpush1.bf16.msra.mxu1 %v9407_v32 }
 0x702   : > { %7784 = vmatmul.mubr.bf16.vlgmr.msra.gmra.mrb[12].mxu1 %v6702_v14 }
 0x732   : > { %v7621_v35 = vpop.f32.mrb[24].mxu0 }
 0x733   : > { %v7623_v60 = vpop.f32.mrb[25].mxu0  ;;  %v7622_v48 = vadd.f32 %v7621_v35, %v6862_v36  ;;  %v9437_v36 = vld [vmem:[%s12728_s13 + $0x10] sm:$0xff]  }
 0x734   : > { %v7625_v34 = vpop.f32.mrb[26].mxu0  ;;  %v7624_v20 = vadd.f32 %v7623_v60, %v6866_v55  ;;  %v9438_v55 = vld [vmem:[%s12728_s13 + $0x18] sm:$0xff]  }
 0x735   : > { %v7626_v10 = vpop.f32.mrb[27].mxu0 }
 0x736   : > { %v9427_v10 = vld [vmem:[%s12726_s11] sm:$0xff]  }
 0x7d5   : > { %v7785_v58 = vpop.f32.mrb[12].mxu1 }
 0x7d6   : > { %v8898_v28 = vadd.f32 %v7785_v58, %v7622_v48  ;;  %v7787_v33 = vpop.f32.mrb[13].mxu1 }
 0x7d7   : > { %v8900_v27 = vadd.f32 %v7787_v33, %v7624_v20  ;;  %v7789_v17 = vpop.f32.mrb[14].mxu1 }
 0x7d8   : > { %v7792_v9 = vmax.f32 %v8898_v28, 0.0  ;;  %v7790_v43 = vpop.f32.mrb[15].mxu1 }
 0x7d9   : > { %v7793_v50 = vmax.f32 %v8900_v27, 0.0 }
 0x7da   : > { %v7812_v23 = vmul.f32 %v7807_v3, %v7792_v9 }
 0x7db   : > { %v7813_v13 = vmul.f32 %v7811_v63, %v7793_v50 }
 0x7dc   : > { %v7832_v18 = vadd.f32 %v7827_v0, %v7812_v23 }
 0x7dd   : > { %v7833_v44 = vadd.f32 %v7831_v8, %v7813_v13 }
 0x7de   : > { %v7835_v19 = vsel %vm7834_vm0, %v7832_v18, 0.0 }
 0x7df   : > { %v7836_v57 = vrot.slane %v7835_v19, 4  ;;  %v7842_v38 = vsel %vm7834_vm0, %v7833_v44, 0.0 }
 0x7e0   : > { %v7843_v6 = vrot.slane %v7842_v38, 4 }
 0x7e1   : > { %v7837_v47 = vadd.f32 %v7836_v57, %v7835_v19 }
 0x7e2   : > { %v7844_v11 = vadd.f32 %v7843_v6, %v7842_v38 }
 0x7e3   : > { %v7838_v16 = vrot.slane %v7837_v47, 2 }
 0x7e4   : > { %v7845_v46 = vrot.slane %v7844_v11, 2 }
 0x7e5   : > { %v7839_v56 = vadd.f32 %v7838_v16, %v7837_v47 }
 0x7e6   : > { %v7846_v59 = vadd.f32 %v7845_v46, %v7844_v11 }
 0x7e7   : > { %v7840_v62 = vrot.slane %v7839_v56, 1 }
 0x7e8   : > { %v7847_v32 = vrot.slane %v7846_v59, 1 }
 0x7e9   : > { %v7841_v14 = vadd.f32 %v7840_v62, %v7839_v56 }
 0x7ea   : > { %v7848_v35 = vadd.f32 %v7847_v32, %v7846_v59 }
 0x7eb   : > { %v7850_v42 = vmul.f32 0.25, %v7841_v14 }
 0x7ec   : > { %v7851_v60 = vmul.f32 0.25, %v7848_v35 }
 0x7ed   : > { %v7852_v61 = vpack.c.bf16 %v7850_v42, %v7850_v42 }
 0x7ee   : > { %v7853_v34 = vpack.c.bf16 %v7851_v60, %v7851_v60 }
 0x7f0   : > { %8015 = vmatprep.mubr.bf16.mxu0 %v7853_v34 }
 0x7f1   : > { %8016 = vmatmul.mubr.bf16.vlgmr.msra.gmra.mrb[28].mxu0 %v7852_v61 }
 0x7f2   : > { %8866 = vmatpush3.bf16.msra.mxu0 %v9427_v10  ;;  %8881 = vmatprep.mubr.msk.bf16.mxu0 %vm9563_vm15, %v13160_v24 }
 0x7f3   : > { %8867 = vmatprep.subr.bf16.mxu0 %v13160_v24 }
 0x7f6   : > { %8868 = vmatpush3.bf16.msra.mxu0 %v9428_v26 }
 0x7f7   : > { %8869 = vmatprep.subr.bf16.mxu0 %v13160_v24 }
 0x7fa   : > { %8870 = vmatpush3.bf16.msra.mxu0 %v9429_v51 }
 0x7fb   : > { %8871 = vmatprep.subr.bf16.mxu0 %v13160_v24 }
 0x7fe   : > { %8872 = vmatpush3.bf16.msra.mxu0 %v9430_v21 }
 0x7ff   : > { %8873 = vmatprep.subr.bf16.mxu0 %v13160_v24 }
 0x802   : > { %8874 = vmatpush3.bf16.msra.mxu0 %v9431_v54 }
 0x803   : > { %8875 = vmatprep.subr.bf16.mxu0 %v13160_v24 }
 0x806   : > { %8876 = vmatpush3.bf16.msra.mxu0 %v9432_v5 }
 0x807   : > { %8877 = vmatprep.subr.bf16.mxu0 %v13160_v24 }
 0x80a   : > { %8878 = vmatpush3.bf16.msra.mxu0 %v9433_v29 }
 0x80b   : > { %8879 = vmatprep.subr.bf16.mxu0 %v13160_v24 }
 0x80e   : > { %8880 = vmatpush3.bf16.msra.mxu0 %v9434_v45 }
 0x80f   : > { %8885 = vmatprep.subr.bf16.mxu0 %v13160_v24 }
 0x8c4   : > { %v8821_v41 = vpop.f32.mrb[28].mxu0 }
 0x8c5   : > { %v8822_v39 = vpop.f32.mrb[29].mxu0 }
 0x8c6   : > { %v8823_v31 = vadd.f32 %v8822_v39, %v8821_v41  ;;  %v8824_v30 = vpop.f32.mrb[30].mxu0 }
 0x8c7   : > { %v8825_v25 = vpop.f32.mrb[31].mxu0 }
 0x8c8   : > { %v8018_v22 = vadd.f32 %v8823_v31, %v7886_v7 }
 0x8ca   : > { %v8023_v52 = vmax.f32 %v8018_v22, 0.0 }
 0x8cc   : > { %v8024_v40 = vpack.c.bf16 %v8023_v52, %v8023_v52 }
 0x8ce   : > { %8882 = vmatmul.mubr.bf16.vlgmr.msra.gmra.mrb[32].mxu0 %v8024_v40 }
 0x8cf   : > { %8886 = vmatpush3.bf16.msra.mxu0 %v9435_v49  ;;  %8893 = vmatprep.mubr.msk.bf16.mxu0 %vm9563_vm15, %v13160_v24 }
 0x8d0   : > { %8887 = vmatprep.subr.bf16.mxu0 %v13160_v24 }
 0x8d3   : > { %8888 = vmatpush3.bf16.msra.mxu0 %v9436_v4 }
 0x8d4   : > { %8889 = vmatprep.subr.bf16.mxu0 %v13160_v24 }
 0x8d7   : > { %8890 = vmatpush3.bf16.msra.mxu0 %v9437_v36 }
 0x8d8   : > { %8891 = vmatprep.subr.bf16.mxu0 %v13160_v24  ;;  %v8140_v24 = vld [vmem:[%s12729_s14] sm:$0x1] }
 0x8db   : > { %8892 = vmatpush3.bf16.msra.mxu0 %v9438_v55 }
 0x9a1   : > { %v8124_v15 = vpop.f32.mrb[32].mxu0 }
 0x9a2   : > { %v8125_v37 = vadd.f32 %v8124_v15, %v8041_v1  ;;  %v8883_v48 = vpop.f32.mrb[33].mxu0 }
 0x9a3   : > { %v8127_v53 = vpop.f32.mrb[34].mxu0 }
 0x9a4   : > { %v8130_v20 = vmax.f32 %v8125_v37, 0.0  ;;  %v8884_v58 = vpop.f32.mrb[35].mxu0 }
 0x9a6   : > { %v8131_v2 = vpack.c.bf16 %v8130_v20, %v8130_v20 }
 0x9a8   : > { %8894 = vmatmul.mubr.msk.bf16.vlgmr.msra.gmra.mrb[36].mxu0 %vm5088_vm11, %v8131_v2 }
 0xa7b   : > { %v8202_v12 = vpop.f32.mrb[36].mxu0 }
 0xa7c   : > { %v8203_v28 = vadd.f32 %v8202_v12, %v8140_v24  ;;  %v8895_v3 = vpop.f32.mrb[37].mxu0 }
 0xa7d   : > { %v8205_v33 = vpop.f32.mrb[38].mxu0 }
 0xa7e   : > { %v8705_v27 = vmul.f32 -1.442695, %v8203_v28  ;;  %v8896_v63 = vpop.f32.mrb[39].mxu0 }
 0xa80   : > { %9439 = vpow2.f32 %v8705_v27 }
 0xa8a   : > { %v9440_v17 = vpop.eup %9439 }
 0xa8b   : > { %v8211_v9 = vadd.f32 1.0, %v9440_v17 }
 0xa8d   : > { %9441 = vrcp.f32 %v8211_v9 }
 0xa97   : > { %v9442_v0 = vpop.eup %9441 }
 0xa98   : > { %8215 = vst.msk [vmem:[%s501_s24] sm:$0x1] %vm8214_vm1, %v9442_v0 }
 0xa99   : > { %9499 = shalt.err (!%p9496_p7)
}
 0xa9a   : > { %s9500_s25 = scalar_lea.hbm %s12673_s29, 16  ;;  %s9504_s18 = scalar_lea.hbm %s12730_s15, 32 }
 0xa9b   : > { %p9501_p8 = scmp.ne.s32.totalorder %s12673_s29, %s9500_s25  ;;  %p9505_p1 = scmp.lt.u32.totalorder %s12673_s29, %s12730_s15 }
 0xa9c   : > { %p9506_p0 = scmp.lt.u32.totalorder %s9504_s18, %s9500_s25  ;;  %p9508_p6 = scmp.lt.u32.totalorder %s9500_s25, %s12673_s29 }
 0xa9d   : > { %p9502_p11 = pnand %p9501_p8, %p13168_p9 }
 0xa9e   : > { %p9507_p5 = por %p9506_p0, %p9505_p1 }
 0xa9f   : > { %p9503_p13 = pneg %p9502_p11 }
 0xaa0   : > { %p9509_p10 = por %p9508_p6, %p9507_p5 }
 0xaa2   : > { %p9510_p12 = pnand %p9509_p10, %p9503_p13 }
 0xaa4   : > { %9513 = shalt.err (!%p9510_p12)
}
 0xaa5   : > { %8917 = dma.vmem_to_hbm [thread:$0]  (%p13168_p9), %s12675_s17, 16, %s12673_s29, %s8217_s30  }
 0xaa6 PF: > { %s13169_s23 = sld [smem:[#allocation12_spill]]  ;;  %s13170_s16 = sld [smem:[#allocation16_spill]] }
 0xaa7   : > { %p8929_p2 = scmp.ge.s32.totalorder %s9552_s21, 2 }
 0xaac   : > { %s8241_s26 = sand.u32 1, %s13169_s23   ;;  %p13171_p3 = scmp.ne.s32.totalorder %s13170_s16, 0 }
 0xaad   : > { %s8242_s20 = scalar_lea.sflag [#allocation8], %s8241_s26 }
 0xaae   : > { %p8924_p4 = pnand %p8929_p2, %p13171_p3 }
 0xab0   : > { %9535 = dma.done.wait (!%p8924_p4), %s8242_s20, 16  }
 0xab1   : > { %9537 = vsyncadd (!%p8924_p4), %s8242_s20, 4294967280  ;;  %s13172_s21 = sld [smem:[#allocation14_spill]]  ;;  %s13173_s25 = sld [smem:[#allocation13_spill]] }
 0xab2   : > { %s13174_s20 = sld [smem:[#allocation15_spill]]  ;;  %s13175_s18 = smov %s9544_s19 }
 0xab7   : > { %p26_p7 = scmp.ge.s32.totalorder %s13172_s21, 4   ;;  %s13176_s19 = smov %s13173_s25 }
 0xab9   :  { %28 = sbr.rel (!%p26_p7) target bundleno = 4 (0x4), region = 128 }
 0xac0   :  { %8246 = vsyncpa [#allocation7], 1 }
 0xac1   :  { %8248 = vsyncpa [#allocation7 + $0x1], 1 }
 0xac2   :  { %8249 = vsyncpa [#allocation8], 1 }
 0xac3   :  { %8251 = vsyncpa [#allocation8 + $0x1], 1 }

</bundles_post_ra>
